<compile_context>
chip_gen: v7x
topology: tpu7x:2x2x1
jax: 0.10.0
libtpu: 0.0.40
codegen_flags: <defaults>
</compile_context>

<pallas_src>
import jax
import jax.numpy as jnp
from jax.experimental import pallas as pl
from jax.experimental.pallas import tpu as pltpu

_BN_EPS = 1e-5


# ----------------------------------------------------------------- Pallas kernel

def _conv_block_kernel(x_ref, t_ref,
                       mw1_ref, mb1_ref, mw2_ref, mb2_ref,
                       w1_ref, g1_ref, be1_ref,
                       w2_ref, g2_ref, be2_ref,
                       o_ref,
                       xpad_ref, hpad_ref, p2_ref):
    N, H, W, Cin = x_ref.shape
    Cout = o_ref.shape[-1]
    rows = N * H * W

    # ---- time-embedding MLP: Linear -> ReLU -> Linear (tiny; stays f32) ----
    h = jnp.dot(t_ref[...], mw1_ref[...],
                preferred_element_type=jnp.float32) + mb1_ref[...]
    h = jnp.maximum(h, 0.0)
    tvec = jnp.dot(h, mw2_ref[...],
                   preferred_element_type=jnp.float32) + mb2_ref[...]        # (N, Cin)

    def zero_halo(pad_ref, c):
        # Zero only the 1-pixel halo (top/bottom rows, left/right columns);
        # the interior is overwritten below.  Corners are written twice (harmless).
        pad_ref[:, 0:1, :, :] = jnp.zeros((N, 1, W + 2, c), jnp.float32)
        pad_ref[:, H + 1:H + 2, :, :] = jnp.zeros((N, 1, W + 2, c), jnp.float32)
        pad_ref[:, :, 0:1, :] = jnp.zeros((N, H + 2, 1, c), jnp.float32)
        pad_ref[:, :, W + 1:W + 2, :] = jnp.zeros((N, H + 2, 1, c), jnp.float32)

    def bn_relu(acc, g_ref, b_ref):
        # Training-mode BatchNorm over (N, H, W): single-pass batch stats,
        # biased variance, eps=1e-5.  acc is the f32 MXU accumulator.
        inv_n = 1.0 / rows
        mean = jnp.sum(acc, axis=0, keepdims=True) * inv_n
        ex2 = jnp.sum(acc * acc, axis=0, keepdims=True) * inv_n
        var = ex2 - mean * mean
        y = (acc - mean) * jax.lax.rsqrt(var + _BN_EPS) * g_ref[...] + b_ref[...]
        return jnp.maximum(y, 0.0)                                            # (rows, C) f32

    # ---- conv1 input: zero halo, interior = (x + t) ----
    zero_halo(xpad_ref, Cin)
    xpad_ref[:, 1:H + 1, 1:W + 1, :] = x_ref[...] + tvec.reshape(N, 1, 1, Cin)

    # ---- conv1 as ONE im2col matmul: (rows, 9*Cin) @ (9*Cin, Cout) ----
    taps1 = [xpad_ref[:, kh:kh + H, kw:kw + W, :]
             for kh in range(3) for kw in range(3)]                           # 9 x (N,H,W,Cin)
    patches1 = jnp.concatenate(taps1, axis=-1).reshape(rows, 9 * Cin)
    acc1 = jnp.dot(patches1.astype(jnp.bfloat16), w1_ref[...],
                   preferred_element_type=jnp.float32)                        # (rows, Cout)

    h1 = bn_relu(acc1, g1_ref, be1_ref)

    # ---- conv2 input stays on-chip: zero halo, interior = h1 ----
    zero_halo(hpad_ref, Cout)
    hpad_ref[:, 1:H + 1, 1:W + 1, :] = h1.reshape(N, H, W, Cout)

    # ---- conv2 as ONE im2col matmul: (rows, 9*Cout) @ (9*Cout, Cout) ----
    # Each tap is stored into a lane-tile-aligned 128-wide column block of the
    # bf16 patch slab, then a single long-K (K=1152) matmul accumulates on the MXU.
    for k in range(9):
        kh, kw = divmod(k, 3)
        p2_ref[:, k * Cout:(k + 1) * Cout] = (
            hpad_ref[:, kh:kh + H, kw:kw + W, :]
            .reshape(rows, Cout).astype(jnp.bfloat16))
    acc2 = jnp.dot(p2_ref[...], w2_ref[...],
                   preferred_element_type=jnp.float32)                        # (rows, Cout)

    o_ref[...] = bn_relu(acc2, g2_ref, be2_ref).reshape(N, H, W, Cout)


# ----------------------------------------------------------------- pallas_call glue

def _full_spec(shape):
    nd = len(shape)
    return pl.BlockSpec(shape, lambda i, _nd=nd: (0,) * _nd)


def conv_block_forward_nhwc(params, x_nhwc, t):
    """Hot path: x_nhwc (N, H, W, Cin) f32, t (N, temb) f32 -> (N, H, W, Cout) f32.
    No layout transposes; the channel axis stays on the 128-lane dim."""
    N, H, W, Cin = x_nhwc.shape
    Cout = params['g1'].shape[0]
    rows = N * H * W

    # Pre-reshape conv weights to im2col form (folded by jit; bf16 MXU operands).
    w1 = params['cw1'].reshape(9 * Cin, Cout)      # (36, Cout)   bf16
    w2 = params['cw2'].reshape(9 * Cout, Cout)     # (1152, Cout) bf16

    inputs = (
        x_nhwc, t,
        params['mw1'], params['mb1'].reshape(1, -1),
        params['mw2'], params['mb2'].reshape(1, -1),
        w1, params['g1'].reshape(1, -1), params['be1'].reshape(1, -1),
        w2, params['g2'].reshape(1, -1), params['be2'].reshape(1, -1),
    )

    # Single VMEM-resident invocation: the whole N*H*W row extent lives in one
    # block so BN batch stats are global.  If N*H*W ever grows, tile the row
    # axis with a real "parallel" grid dimension (second v7x TensorCore) and
    # switch BN to a two-pass partial-sum/finalize scheme.
    return pl.pallas_call(
        _conv_block_kernel,
        out_shape=jax.ShapeDtypeStruct((N, H, W, Cout), jnp.float32),
        grid=(1,),
        in_specs=[_full_spec(a.shape) for a in inputs],
        out_specs=_full_spec((N, H, W, Cout)),
        scratch_shapes=[
            pltpu.VMEM((N, H + 2, W + 2, Cin), jnp.float32),    # padded (x + t)
            pltpu.VMEM((N, H + 2, W + 2, Cout), jnp.float32),   # padded conv1 output
            pltpu.VMEM((rows, 9 * Cout), jnp.bfloat16),         # conv2 im2col slab
        ],
        compiler_params=pltpu.CompilerParams(
            dimension_semantics=("arbitrary",)),
    )(*inputs)


def conv_block_forward(params, x_nchw, t):
    """NCHW drop-in adapter (matches the PyTorch module signature).  Prefer
    keeping the surrounding model NHWC and calling conv_block_forward_nhwc:
    these transposes move more HBM bytes than the kernel itself."""
    x = jnp.transpose(x_nchw, (0, 2, 3, 1))
    out = conv_block_forward_nhwc(params, x, t)
    return jnp.transpose(out, (0, 3, 1, 2))


# ----------------------------------------------------------------- parameters

def init_conv_block_params(key, cin, cout, temb=100):
    ks = jax.random.split(key, 12)
    s = 0.05
    f32, bf16 = jnp.float32, jnp.bfloat16
    return dict(
        # conv weights stored (9, cin, cout) in bf16 (MXU operands), taps ordered (kh, kw)
        cw1=(jax.random.normal(ks[0], (9, cin, cout), f32) * s).astype(bf16),
        cb1=jax.random.normal(ks[1], (cout,), f32) * 0.1,    # used only by the f32 reference
        g1=1.0 + 0.1 * jax.random.normal(ks[2], (cout,), f32),
        be1=0.1 * jax.random.normal(ks[3], (cout,), f32),
        cw2=(jax.random.normal(ks[4], (9, cout, cout), f32) * s).astype(bf16),
        cb2=jax.random.normal(ks[5], (cout,), f32) * 0.1,    # used only by the f32 reference
        g2=1.0 + 0.1 * jax.random.normal(ks[6], (cout,), f32),
        be2=0.1 * jax.random.normal(ks[7], (cout,), f32),
        mw1=jax.random.normal(ks[8], (temb, cin), f32) * s,
        mb1=jax.random.normal(ks[9], (cin,), f32) * 0.1,
        mw2=jax.random.normal(ks[10], (cin, cin), f32) * s,
        mb2=jax.random.normal(ks[11], (cin,), f32) * 0.1,
    )


# ----------------------------------------------------------------- f32 reference

def _reference_forward_nhwc(params, x, t):
    """Pure-JAX f32 reference matching the PyTorch conv_block forward
    (includes the conv biases and two-pass BN stats)."""
    x = x.astype(jnp.float32)
    h = jnp.maximum(t @ params['mw1'] + params['mb1'], 0.0)
    tvec = h @ params['mw2'] + params['mb2']
    x = x + tvec[:, None, None, :]

    def conv_bn_relu(x, w, b, g, beta):
        N, H, W, C = x.shape
        cout = w.shape[-1]
        xp = jnp.pad(x, ((0, 0), (1, 1), (1, 1), (0, 0)))
        cols = [xp[:, kh:kh + H, kw:kw + W, :] for kh in range(3) for kw in range(3)]
        patches = jnp.concatenate(cols, axis=-1).reshape(N * H * W, 9 * C)
        y = patches @ w.reshape(9 * C, cout).astype(jnp.float32) + b
        mean = y.mean(axis=0, keepdims=True)
        var = ((y - mean) ** 2).mean(axis=0, keepdims=True)
        y = (y - mean) * jax.lax.rsqrt(var + _BN_EPS) * g + beta
        return jnp.maximum(y, 0.0).reshape(N, H, W, cout)

    x = conv_bn_relu(x, params['cw1'], params['cb1'], params['g1'], params['be1'])
    x = conv_bn_relu(x, params['cw2'], params['cb2'], params['g2'], params['be2'])
    return x


# ----------------------------------------------------------------- main

if __name__ == "__main__":
    key = jax.random.PRNGKey(0)
    kp, kx, kt = jax.random.split(key, 3)

    N, Cin, H, W = 2, 4, 16, 16
    Cout, TEMB = 128, 100          # Cout=128 keeps the output store lane-dense

    params = init_conv_block_params(kp, Cin, Cout, TEMB)
    x_nchw = jax.random.normal(kx, (N, Cin, H, W), jnp.float32)   # module-spec layout
    t = jax.random.normal(kt, (N, TEMB), jnp.float32)

    # One-time layout conversion at the model boundary; the hot path (the jitted
    # NHWC forward below) contains no transposes.
    x_nhwc = jnp.transpose(x_nchw, (0, 2, 3, 1))

    fwd = jax.jit(conv_block_forward_nhwc)
    out = fwd(params, x_nhwc, t)
    jax.block_until_ready(out)

    assert out.shape == (N, H, W, Cout)
    assert bool(jnp.isfinite(out).all())

    # Loose tolerance: the kernel uses bf16 MXU operands (f32 accumulation) and
    # omits the conv biases (exactly cancelled by training-mode BN); the
    # reference is full f32 and includes the biases.
    ref = _reference_forward_nhwc(params, x_nhwc, t)
    max_err = float(jnp.max(jnp.abs(out - ref)))
    assert max_err < 0.2, f"max abs error vs f32 reference: {max_err}"
    print("KERNEL_OK")
</pallas_src>

<mosaic_0001>
module attributes {stable_mosaic.version = 11 : i64} {
  func.func @_conv_block_kernel(%arg0: i32, %arg1: memref<2x16x16x4xf32, #tpu.memory_space<vmem>>, %arg2: memref<2x100xf32, #tpu.memory_space<vmem>>, %arg3: memref<100x4xf32, #tpu.memory_space<vmem>>, %arg4: memref<1x4xf32, #tpu.memory_space<vmem>>, %arg5: memref<4x4xf32, #tpu.memory_space<vmem>>, %arg6: memref<1x4xf32, #tpu.memory_space<vmem>>, %arg7: memref<36x128xbf16, #tpu.memory_space<vmem>>, %arg8: memref<1x128xf32, #tpu.memory_space<vmem>>, %arg9: memref<1x128xf32, #tpu.memory_space<vmem>>, %arg10: memref<1152x128xbf16, #tpu.memory_space<vmem>>, %arg11: memref<1x128xf32, #tpu.memory_space<vmem>>, %arg12: memref<1x128xf32, #tpu.memory_space<vmem>>, %arg13: memref<2x16x16x128xf32, #tpu.memory_space<vmem>>, %arg14: memref<2x18x18x4xf32, #tpu.memory_space<vmem>>, %arg15: memref<2x18x18x128xf32, #tpu.memory_space<vmem>>, %arg16: memref<512x1152xbf16, #tpu.memory_space<vmem>>) attributes {dimension_semantics = [#tpu.dimension_semantics<arbitrary>], iteration_bounds = array<i64: 1>, scalar_prefetch = 0 : i64, scratch_operands = 3 : i64, tpu.core_type = #tpu.core_type<tc>, window_params = [{pipeline_mode = #tpu.pipeline_mode<synchronous>, transform_indices = @transform_0, window_bounds = array<i64: 2, 16, 16, 4>}, {pipeline_mode = #tpu.pipeline_mode<synchronous>, transform_indices = @transform_1, window_bounds = array<i64: 2, 100>}, {pipeline_mode = #tpu.pipeline_mode<synchronous>, transform_indices = @transform_2, window_bounds = array<i64: 100, 4>}, {pipeline_mode = #tpu.pipeline_mode<synchronous>, transform_indices = @transform_3, window_bounds = array<i64: 1, 4>}, {pipeline_mode = #tpu.pipeline_mode<synchronous>, transform_indices = @transform_4, window_bounds = array<i64: 4, 4>}, {pipeline_mode = #tpu.pipeline_mode<synchronous>, transform_indices = @transform_5, window_bounds = array<i64: 1, 4>}, {pipeline_mode = #tpu.pipeline_mode<synchronous>, transform_indices = @transform_6, window_bounds = array<i64: 36, 128>}, {pipeline_mode = #tpu.pipeline_mode<synchronous>, transform_indices = @transform_7, window_bounds = array<i64: 1, 128>}, {pipeline_mode = #tpu.pipeline_mode<synchronous>, transform_indices = @transform_8, window_bounds = array<i64: 1, 128>}, {pipeline_mode = #tpu.pipeline_mode<synchronous>, transform_indices = @transform_9, window_bounds = array<i64: 1152, 128>}, {pipeline_mode = #tpu.pipeline_mode<synchronous>, transform_indices = @transform_10, window_bounds = array<i64: 1, 128>}, {pipeline_mode = #tpu.pipeline_mode<synchronous>, transform_indices = @transform_11, window_bounds = array<i64: 1, 128>}, {pipeline_mode = #tpu.pipeline_mode<synchronous>, transform_indices = @transform_12, window_bounds = array<i64: 2, 16, 16, 128>}]} {
    %c0 = arith.constant 0 : index
    %c0_0 = arith.constant 0 : index
    %0 = vector.load %arg2[%c0, %c0_0] : memref<2x100xf32, #tpu.memory_space<vmem>>, vector<2x100xf32>
    %c0_1 = arith.constant 0 : index
    %c0_2 = arith.constant 0 : index
    %1 = vector.load %arg3[%c0_1, %c0_2] : memref<100x4xf32, #tpu.memory_space<vmem>>, vector<100x4xf32>
    %cst = arith.constant dense<0.000000e+00> : vector<2x4xf32>
    %2 = tpu.matmul %0, %1, %cst {dimension_numbers = #tpu.dot_dimension_numbers<[1], [0], [0], [1], [0, 0, 1, 1], [], []>} : vector<2x100xf32>, vector<100x4xf32>, vector<2x4xf32> -> vector<2x4xf32>
    %c0_3 = arith.constant 0 : index
    %c0_4 = arith.constant 0 : index
    %3 = vector.load %arg4[%c0_3, %c0_4] : memref<1x4xf32, #tpu.memory_space<vmem>>, vector<1x4xf32>
    %4 = vector.broadcast %3 : vector<1x4xf32> to vector<2x4xf32>
    %5 = arith.addf %2, %4 : vector<2x4xf32>
    %cst_5 = arith.constant 0.000000e+00 : f32
    %6 = vector.broadcast %cst_5 : f32 to vector<2x4xf32>
    %7 = arith.maximumf %5, %6 : vector<2x4xf32>
    %c0_6 = arith.constant 0 : index
    %c0_7 = arith.constant 0 : index
    %8 = vector.load %arg5[%c0_6, %c0_7] : memref<4x4xf32, #tpu.memory_space<vmem>>, vector<4x4xf32>
    %cst_8 = arith.constant dense<0.000000e+00> : vector<2x4xf32>
    %9 = tpu.matmul %7, %8, %cst_8 {dimension_numbers = #tpu.dot_dimension_numbers<[1], [0], [0], [1], [0, 0, 1, 1], [], []>} : vector<2x4xf32>, vector<4x4xf32>, vector<2x4xf32> -> vector<2x4xf32>
    %c0_9 = arith.constant 0 : index
    %c0_10 = arith.constant 0 : index
    %10 = vector.load %arg6[%c0_9, %c0_10] : memref<1x4xf32, #tpu.memory_space<vmem>>, vector<1x4xf32>
    %11 = vector.broadcast %10 : vector<1x4xf32> to vector<2x4xf32>
    %12 = arith.addf %9, %11 : vector<2x4xf32>
    %cst_11 = arith.constant 0.000000e+00 : f32
    %13 = vector.broadcast %cst_11 : f32 to vector<2x1x18x4xf32>
    %c0_12 = arith.constant 0 : index
    %c0_13 = arith.constant 0 : index
    %c0_14 = arith.constant 0 : index
    %c0_15 = arith.constant 0 : index
    %14 = vector.load %arg14[%c0_12, %c0_13, %c0_14, %c0_15] : memref<2x18x18x4xf32, #tpu.memory_space<vmem>>, vector<2x1x18x4xf32>
    tpu.vector_store %arg14[%c0_12, %c0_13, %c0_14, %c0_15], %13 {strides = array<i32>} : memref<2x18x18x4xf32, #tpu.memory_space<vmem>>, vector<2x1x18x4xf32>,
    %cst_16 = arith.constant 0.000000e+00 : f32
    %15 = vector.broadcast %cst_16 : f32 to vector<2x1x18x4xf32>
    %c0_17 = arith.constant 0 : index
    %c17 = arith.constant 17 : index
    %c0_18 = arith.constant 0 : index
    %c0_19 = arith.constant 0 : index
    %16 = vector.load %arg14[%c0_17, %c17, %c0_18, %c0_19] : memref<2x18x18x4xf32, #tpu.memory_space<vmem>>, vector<2x1x18x4xf32>
    tpu.vector_store %arg14[%c0_17, %c17, %c0_18, %c0_19], %15 {strides = array<i32>} : memref<2x18x18x4xf32, #tpu.memory_space<vmem>>, vector<2x1x18x4xf32>,
    %cst_20 = arith.constant 0.000000e+00 : f32
    %17 = vector.broadcast %cst_20 : f32 to vector<2x18x1x4xf32>
    %c0_21 = arith.constant 0 : index
    %c0_22 = arith.constant 0 : index
    %c0_23 = arith.constant 0 : index
    %c0_24 = arith.constant 0 : index
    %18 = vector.load %arg14[%c0_21, %c0_22, %c0_23, %c0_24] : memref<2x18x18x4xf32, #tpu.memory_space<vmem>>, vector<2x18x1x4xf32>
    tpu.vector_store %arg14[%c0_21, %c0_22, %c0_23, %c0_24], %17 {strides = array<i32>} : memref<2x18x18x4xf32, #tpu.memory_space<vmem>>, vector<2x18x1x4xf32>,
    %cst_25 = arith.constant 0.000000e+00 : f32
    %19 = vector.broadcast %cst_25 : f32 to vector<2x18x1x4xf32>
    %c0_26 = arith.constant 0 : index
    %c0_27 = arith.constant 0 : index
    %c17_28 = arith.constant 17 : index
    %c0_29 = arith.constant 0 : index
    %20 = vector.load %arg14[%c0_26, %c0_27, %c17_28, %c0_29] : memref<2x18x18x4xf32, #tpu.memory_space<vmem>>, vector<2x18x1x4xf32>
    tpu.vector_store %arg14[%c0_26, %c0_27, %c17_28, %c0_29], %19 {strides = array<i32>} : memref<2x18x18x4xf32, #tpu.memory_space<vmem>>, vector<2x18x1x4xf32>,
    %c0_30 = arith.constant 0 : index
    %c0_31 = arith.constant 0 : index
    %c0_32 = arith.constant 0 : index
    %c0_33 = arith.constant 0 : index
    %21 = vector.load %arg1[%c0_30, %c0_31, %c0_32, %c0_33] : memref<2x16x16x4xf32, #tpu.memory_space<vmem>>, vector<2x16x16x4xf32>
    %22 = vector.shape_cast %12 : vector<2x4xf32> to vector<2x1x1x4xf32>
    %23 = vector.broadcast %22 : vector<2x1x1x4xf32> to vector<2x16x16x4xf32>
    %24 = arith.addf %21, %23 : vector<2x16x16x4xf32>
    %c0_34 = arith.constant 0 : index
    %c1 = arith.constant 1 : index
    %c1_35 = arith.constant 1 : index
    %c0_36 = arith.constant 0 : index
    %25 = vector.load %arg14[%c0_34, %c1, %c1_35, %c0_36] : memref<2x18x18x4xf32, #tpu.memory_space<vmem>>, vector<2x16x16x4xf32>
    tpu.vector_store %arg14[%c0_34, %c1, %c1_35, %c0_36], %24 {strides = array<i32>} : memref<2x18x18x4xf32, #tpu.memory_space<vmem>>, vector<2x16x16x4xf32>,
    %c0_37 = arith.constant 0 : index
    %c0_38 = arith.constant 0 : index
    %c0_39 = arith.constant 0 : index
    %c0_40 = arith.constant 0 : index
    %26 = vector.load %arg14[%c0_37, %c0_38, %c0_39, %c0_40] : memref<2x18x18x4xf32, #tpu.memory_space<vmem>>, vector<2x16x16x4xf32>
    %c0_41 = arith.constant 0 : index
    %c0_42 = arith.constant 0 : index
    %c1_43 = arith.constant 1 : index
    %c0_44 = arith.constant 0 : index
    %27 = vector.load %arg14[%c0_41, %c0_42, %c1_43, %c0_44] : memref<2x18x18x4xf32, #tpu.memory_space<vmem>>, vector<2x16x16x4xf32>
    %c0_45 = arith.constant 0 : index
    %c0_46 = arith.constant 0 : index
    %c2 = arith.constant 2 : index
    %c0_47 = arith.constant 0 : index
    %28 = vector.load %arg14[%c0_45, %c0_46, %c2, %c0_47] : memref<2x18x18x4xf32, #tpu.memory_space<vmem>>, vector<2x16x16x4xf32>
    %c0_48 = arith.constant 0 : index
    %c1_49 = arith.constant 1 : index
    %c0_50 = arith.constant 0 : index
    %c0_51 = arith.constant 0 : index
    %29 = vector.load %arg14[%c0_48, %c1_49, %c0_50, %c0_51] : memref<2x18x18x4xf32, #tpu.memory_space<vmem>>, vector<2x16x16x4xf32>
    %c0_52 = arith.constant 0 : index
    %c1_53 = arith.constant 1 : index
    %c1_54 = arith.constant 1 : index
    %c0_55 = arith.constant 0 : index
    %30 = vector.load %arg14[%c0_52, %c1_53, %c1_54, %c0_55] : memref<2x18x18x4xf32, #tpu.memory_space<vmem>>, vector<2x16x16x4xf32>
    %c0_56 = arith.constant 0 : index
    %c1_57 = arith.constant 1 : index
    %c2_58 = arith.constant 2 : index
    %c0_59 = arith.constant 0 : index
    %31 = vector.load %arg14[%c0_56, %c1_57, %c2_58, %c0_59] : memref<2x18x18x4xf32, #tpu.memory_space<vmem>>, vector<2x16x16x4xf32>
    %c0_60 = arith.constant 0 : index
    %c2_61 = arith.constant 2 : index
    %c0_62 = arith.constant 0 : index
    %c0_63 = arith.constant 0 : index
    %32 = vector.load %arg14[%c0_60, %c2_61, %c0_62, %c0_63] : memref<2x18x18x4xf32, #tpu.memory_space<vmem>>, vector<2x16x16x4xf32>
    %c0_64 = arith.constant 0 : index
    %c2_65 = arith.constant 2 : index
    %c1_66 = arith.constant 1 : index
    %c0_67 = arith.constant 0 : index
    %33 = vector.load %arg14[%c0_64, %c2_65, %c1_66, %c0_67] : memref<2x18x18x4xf32, #tpu.memory_space<vmem>>, vector<2x16x16x4xf32>
    %c0_68 = arith.constant 0 : index
    %c2_69 = arith.constant 2 : index
    %c2_70 = arith.constant 2 : index
    %c0_71 = arith.constant 0 : index
    %34 = vector.load %arg14[%c0_68, %c2_69, %c2_70, %c0_71] : memref<2x18x18x4xf32, #tpu.memory_space<vmem>>, vector<2x16x16x4xf32>
    %35 = tpu.concatenate %26, %27, %28, %29, %30, %31, %32, %33, %34 in 3 : vector<2x16x16x4xf32>, vector<2x16x16x4xf32>, vector<2x16x16x4xf32>, vector<2x16x16x4xf32>, vector<2x16x16x4xf32>, vector<2x16x16x4xf32>, vector<2x16x16x4xf32>, vector<2x16x16x4xf32>, vector<2x16x16x4xf32> -> vector<2x16x16x36xf32>
    %36 = vector.shape_cast %35 : vector<2x16x16x36xf32> to vector<512x36xf32>
    %37 = arith.truncf %36 : vector<512x36xf32> to vector<512x36xbf16>
    %c0_72 = arith.constant 0 : index
    %c0_73 = arith.constant 0 : index
    %38 = vector.load %arg7[%c0_72, %c0_73] : memref<36x128xbf16, #tpu.memory_space<vmem>>, vector<36x128xbf16>
    %cst_74 = arith.constant dense<0.000000e+00> : vector<512x128xf32>
    %39 = tpu.matmul %37, %38, %cst_74 {dimension_numbers = #tpu.dot_dimension_numbers<[1], [0], [0], [1], [0, 0, 1, 1], [], []>} : vector<512x36xbf16>, vector<36x128xbf16>, vector<512x128xf32> -> vector<512x128xf32>
    %cst_75 = arith.constant dense<0.000000e+00> : vector<128xf32>
    %40 = vector.multi_reduction <add>, %39, %cst_75 [0] : vector<512x128xf32> to vector<128xf32>
    %41 = vector.shape_cast %40 : vector<128xf32> to vector<1x128xf32>
    %cst_76 = arith.constant 0.001953125 : f32
    %42 = vector.broadcast %cst_76 : f32 to vector<1x128xf32>
    %43 = arith.mulf %41, %42 : vector<1x128xf32>
    %44 = arith.mulf %39, %39 : vector<512x128xf32>
    %cst_77 = arith.constant dense<0.000000e+00> : vector<128xf32>
    %45 = vector.multi_reduction <add>, %44, %cst_77 [0] : vector<512x128xf32> to vector<128xf32>
    %46 = vector.shape_cast %45 : vector<128xf32> to vector<1x128xf32>
    %cst_78 = arith.constant 0.001953125 : f32
    %47 = vector.broadcast %cst_78 : f32 to vector<1x128xf32>
    %48 = arith.mulf %46, %47 : vector<1x128xf32>
    %49 = arith.mulf %43, %43 : vector<1x128xf32>
    %50 = arith.subf %48, %49 : vector<1x128xf32>
    %51 = vector.broadcast %43 : vector<1x128xf32> to vector<512x128xf32>
    %52 = arith.subf %39, %51 : vector<512x128xf32>
    %cst_79 = arith.constant 9.99999974E-6 : f32
    %53 = vector.broadcast %cst_79 : f32 to vector<1x128xf32>
    %54 = arith.addf %50, %53 : vector<1x128xf32>
    %55 = math.rsqrt %54 : vector<1x128xf32>
    %56 = vector.broadcast %55 : vector<1x128xf32> to vector<512x128xf32>
    %57 = arith.mulf %52, %56 : vector<512x128xf32>
    %c0_80 = arith.constant 0 : index
    %c0_81 = arith.constant 0 : index
    %58 = vector.load %arg8[%c0_80, %c0_81] : memref<1x128xf32, #tpu.memory_space<vmem>>, vector<1x128xf32>
    %59 = vector.broadcast %58 : vector<1x128xf32> to vector<512x128xf32>
    %60 = arith.mulf %57, %59 : vector<512x128xf32>
    %c0_82 = arith.constant 0 : index
    %c0_83 = arith.constant 0 : index
    %61 = vector.load %arg9[%c0_82, %c0_83] : memref<1x128xf32, #tpu.memory_space<vmem>>, vector<1x128xf32>
    %62 = vector.broadcast %61 : vector<1x128xf32> to vector<512x128xf32>
    %63 = arith.addf %60, %62 : vector<512x128xf32>
    %cst_84 = arith.constant 0.000000e+00 : f32
    %64 = vector.broadcast %cst_84 : f32 to vector<512x128xf32>
    %65 = arith.maximumf %63, %64 : vector<512x128xf32>
    %cst_85 = arith.constant 0.000000e+00 : f32
    %66 = vector.broadcast %cst_85 : f32 to vector<2x1x18x128xf32>
    %c0_86 = arith.constant 0 : index
    %c0_87 = arith.constant 0 : index
    %c0_88 = arith.constant 0 : index
    %c0_89 = arith.constant 0 : index
    %67 = vector.load %arg15[%c0_86, %c0_87, %c0_88, %c0_89] : memref<2x18x18x128xf32, #tpu.memory_space<vmem>>, vector<2x1x18x128xf32>
    tpu.vector_store %arg15[%c0_86, %c0_87, %c0_88, %c0_89], %66 {strides = array<i32>} : memref<2x18x18x128xf32, #tpu.memory_space<vmem>>, vector<2x1x18x128xf32>,
    %cst_90 = arith.constant 0.000000e+00 : f32
    %68 = vector.broadcast %cst_90 : f32 to vector<2x1x18x128xf32>
    %c0_91 = arith.constant 0 : index
    %c17_92 = arith.constant 17 : index
    %c0_93 = arith.constant 0 : index
    %c0_94 = arith.constant 0 : index
    %69 = vector.load %arg15[%c0_91, %c17_92, %c0_93, %c0_94] : memref<2x18x18x128xf32, #tpu.memory_space<vmem>>, vector<2x1x18x128xf32>
    tpu.vector_store %arg15[%c0_91, %c17_92, %c0_93, %c0_94], %68 {strides = array<i32>} : memref<2x18x18x128xf32, #tpu.memory_space<vmem>>, vector<2x1x18x128xf32>,
    %cst_95 = arith.constant 0.000000e+00 : f32
    %70 = vector.broadcast %cst_95 : f32 to vector<2x18x1x128xf32>
    %c0_96 = arith.constant 0 : index
    %c0_97 = arith.constant 0 : index
    %c0_98 = arith.constant 0 : index
    %c0_99 = arith.constant 0 : index
    %71 = vector.load %arg15[%c0_96, %c0_97, %c0_98, %c0_99] : memref<2x18x18x128xf32, #tpu.memory_space<vmem>>, vector<2x18x1x128xf32>
    tpu.vector_store %arg15[%c0_96, %c0_97, %c0_98, %c0_99], %70 {strides = array<i32>} : memref<2x18x18x128xf32, #tpu.memory_space<vmem>>, vector<2x18x1x128xf32>,
    %cst_100 = arith.constant 0.000000e+00 : f32
    %72 = vector.broadcast %cst_100 : f32 to vector<2x18x1x128xf32>
    %c0_101 = arith.constant 0 : index
    %c0_102 = arith.constant 0 : index
    %c17_103 = arith.constant 17 : index
    %c0_104 = arith.constant 0 : index
    %73 = vector.load %arg15[%c0_101, %c0_102, %c17_103, %c0_104] : memref<2x18x18x128xf32, #tpu.memory_space<vmem>>, vector<2x18x1x128xf32>
    tpu.vector_store %arg15[%c0_101, %c0_102, %c17_103, %c0_104], %72 {strides = array<i32>} : memref<2x18x18x128xf32, #tpu.memory_space<vmem>>, vector<2x18x1x128xf32>,
    %74 = vector.shape_cast %65 : vector<512x128xf32> to vector<2x16x16x128xf32>
    %c0_105 = arith.constant 0 : index
    %c1_106 = arith.constant 1 : index
    %c1_107 = arith.constant 1 : index
    %c0_108 = arith.constant 0 : index
    %75 = vector.load %arg15[%c0_105, %c1_106, %c1_107, %c0_108] : memref<2x18x18x128xf32, #tpu.memory_space<vmem>>, vector<2x16x16x128xf32>
    tpu.vector_store %arg15[%c0_105, %c1_106, %c1_107, %c0_108], %74 {strides = array<i32>} : memref<2x18x18x128xf32, #tpu.memory_space<vmem>>, vector<2x16x16x128xf32>,
    %c0_109 = arith.constant 0 : index
    %c0_110 = arith.constant 0 : index
    %c0_111 = arith.constant 0 : index
    %c0_112 = arith.constant 0 : index
    %76 = vector.load %arg15[%c0_109, %c0_110, %c0_111, %c0_112] : memref<2x18x18x128xf32, #tpu.memory_space<vmem>>, vector<2x16x16x128xf32>
    %77 = vector.shape_cast %76 : vector<2x16x16x128xf32> to vector<512x128xf32>
    %78 = arith.truncf %77 : vector<512x128xf32> to vector<512x128xbf16>
    %c0_113 = arith.constant 0 : index
    %c0_114 = arith.constant 0 : index
    %79 = vector.load %arg16[%c0_113, %c0_114] : memref<512x1152xbf16, #tpu.memory_space<vmem>>, vector<512x128xbf16>
    tpu.vector_store %arg16[%c0_113, %c0_114], %78 {strides = array<i32>} : memref<512x1152xbf16, #tpu.memory_space<vmem>>, vector<512x128xbf16>,
    %c0_115 = arith.constant 0 : index
    %c0_116 = arith.constant 0 : index
    %c1_117 = arith.constant 1 : index
    %c0_118 = arith.constant 0 : index
    %80 = vector.load %arg15[%c0_115, %c0_116, %c1_117, %c0_118] : memref<2x18x18x128xf32, #tpu.memory_space<vmem>>, vector<2x16x16x128xf32>
    %81 = vector.shape_cast %80 : vector<2x16x16x128xf32> to vector<512x128xf32>
    %82 = arith.truncf %81 : vector<512x128xf32> to vector<512x128xbf16>
    %c0_119 = arith.constant 0 : index
    %c128 = arith.constant 128 : index
    %83 = vector.load %arg16[%c0_119, %c128] : memref<512x1152xbf16, #tpu.memory_space<vmem>>, vector<512x128xbf16>
    tpu.vector_store %arg16[%c0_119, %c128], %82 {strides = array<i32>} : memref<512x1152xbf16, #tpu.memory_space<vmem>>, vector<512x128xbf16>,
    %c0_120 = arith.constant 0 : index
    %c0_121 = arith.constant 0 : index
    %c2_122 = arith.constant 2 : index
    %c0_123 = arith.constant 0 : index
    %84 = vector.load %arg15[%c0_120, %c0_121, %c2_122, %c0_123] : memref<2x18x18x128xf32, #tpu.memory_space<vmem>>, vector<2x16x16x128xf32>
    %85 = vector.shape_cast %84 : vector<2x16x16x128xf32> to vector<512x128xf32>
    %86 = arith.truncf %85 : vector<512x128xf32> to vector<512x128xbf16>
    %c0_124 = arith.constant 0 : index
    %c256 = arith.constant 256 : index
    %87 = vector.load %arg16[%c0_124, %c256] : memref<512x1152xbf16, #tpu.memory_space<vmem>>, vector<512x128xbf16>
    tpu.vector_store %arg16[%c0_124, %c256], %86 {strides = array<i32>} : memref<512x1152xbf16, #tpu.memory_space<vmem>>, vector<512x128xbf16>,
    %c0_125 = arith.constant 0 : index
    %c1_126 = arith.constant 1 : index
    %c0_127 = arith.constant 0 : index
    %c0_128 = arith.constant 0 : index
    %88 = vector.load %arg15[%c0_125, %c1_126, %c0_127, %c0_128] : memref<2x18x18x128xf32, #tpu.memory_space<vmem>>, vector<2x16x16x128xf32>
    %89 = vector.shape_cast %88 : vector<2x16x16x128xf32> to vector<512x128xf32>
    %90 = arith.truncf %89 : vector<512x128xf32> to vector<512x128xbf16>
    %c0_129 = arith.constant 0 : index
    %c384 = arith.constant 384 : index
    %91 = vector.load %arg16[%c0_129, %c384] : memref<512x1152xbf16, #tpu.memory_space<vmem>>, vector<512x128xbf16>
    tpu.vector_store %arg16[%c0_129, %c384], %90 {strides = array<i32>} : memref<512x1152xbf16, #tpu.memory_space<vmem>>, vector<512x128xbf16>,
    %c0_130 = arith.constant 0 : index
    %c1_131 = arith.constant 1 : index
    %c1_132 = arith.constant 1 : index
    %c0_133 = arith.constant 0 : index
    %92 = vector.load %arg15[%c0_130, %c1_131, %c1_132, %c0_133] : memref<2x18x18x128xf32, #tpu.memory_space<vmem>>, vector<2x16x16x128xf32>
    %93 = vector.shape_cast %92 : vector<2x16x16x128xf32> to vector<512x128xf32>
    %94 = arith.truncf %93 : vector<512x128xf32> to vector<512x128xbf16>
    %c0_134 = arith.constant 0 : index
    %c512 = arith.constant 512 : index
    %95 = vector.load %arg16[%c0_134, %c512] : memref<512x1152xbf16, #tpu.memory_space<vmem>>, vector<512x128xbf16>
    tpu.vector_store %arg16[%c0_134, %c512], %94 {strides = array<i32>} : memref<512x1152xbf16, #tpu.memory_space<vmem>>, vector<512x128xbf16>,
    %c0_135 = arith.constant 0 : index
    %c1_136 = arith.constant 1 : index
    %c2_137 = arith.constant 2 : index
    %c0_138 = arith.constant 0 : index
    %96 = vector.load %arg15[%c0_135, %c1_136, %c2_137, %c0_138] : memref<2x18x18x128xf32, #tpu.memory_space<vmem>>, vector<2x16x16x128xf32>
    %97 = vector.shape_cast %96 : vector<2x16x16x128xf32> to vector<512x128xf32>
    %98 = arith.truncf %97 : vector<512x128xf32> to vector<512x128xbf16>
    %c0_139 = arith.constant 0 : index
    %c640 = arith.constant 640 : index
    %99 = vector.load %arg16[%c0_139, %c640] : memref<512x1152xbf16, #tpu.memory_space<vmem>>, vector<512x128xbf16>
    tpu.vector_store %arg16[%c0_139, %c640], %98 {strides = array<i32>} : memref<512x1152xbf16, #tpu.memory_space<vmem>>, vector<512x128xbf16>,
    %c0_140 = arith.constant 0 : index
    %c2_141 = arith.constant 2 : index
    %c0_142 = arith.constant 0 : index
    %c0_143 = arith.constant 0 : index
    %100 = vector.load %arg15[%c0_140, %c2_141, %c0_142, %c0_143] : memref<2x18x18x128xf32, #tpu.memory_space<vmem>>, vector<2x16x16x128xf32>
    %101 = vector.shape_cast %100 : vector<2x16x16x128xf32> to vector<512x128xf32>
    %102 = arith.truncf %101 : vector<512x128xf32> to vector<512x128xbf16>
    %c0_144 = arith.constant 0 : index
    %c768 = arith.constant 768 : index
    %103 = vector.load %arg16[%c0_144, %c768] : memref<512x1152xbf16, #tpu.memory_space<vmem>>, vector<512x128xbf16>
    tpu.vector_store %arg16[%c0_144, %c768], %102 {strides = array<i32>} : memref<512x1152xbf16, #tpu.memory_space<vmem>>, vector<512x128xbf16>,
    %c0_145 = arith.constant 0 : index
    %c2_146 = arith.constant 2 : index
    %c1_147 = arith.constant 1 : index
    %c0_148 = arith.constant 0 : index
    %104 = vector.load %arg15[%c0_145, %c2_146, %c1_147, %c0_148] : memref<2x18x18x128xf32, #tpu.memory_space<vmem>>, vector<2x16x16x128xf32>
    %105 = vector.shape_cast %104 : vector<2x16x16x128xf32> to vector<512x128xf32>
    %106 = arith.truncf %105 : vector<512x128xf32> to vector<512x128xbf16>
    %c0_149 = arith.constant 0 : index
    %c896 = arith.constant 896 : index
    %107 = vector.load %arg16[%c0_149, %c896] : memref<512x1152xbf16, #tpu.memory_space<vmem>>, vector<512x128xbf16>
    tpu.vector_store %arg16[%c0_149, %c896], %106 {strides = array<i32>} : memref<512x1152xbf16, #tpu.memory_space<vmem>>, vector<512x128xbf16>,
    %c0_150 = arith.constant 0 : index
    %c2_151 = arith.constant 2 : index
    %c2_152 = arith.constant 2 : index
    %c0_153 = arith.constant 0 : index
    %108 = vector.load %arg15[%c0_150, %c2_151, %c2_152, %c0_153] : memref<2x18x18x128xf32, #tpu.memory_space<vmem>>, vector<2x16x16x128xf32>
    %109 = vector.shape_cast %108 : vector<2x16x16x128xf32> to vector<512x128xf32>
    %110 = arith.truncf %109 : vector<512x128xf32> to vector<512x128xbf16>
    %c0_154 = arith.constant 0 : index
    %c1024 = arith.constant 1024 : index
    %111 = vector.load %arg16[%c0_154, %c1024] : memref<512x1152xbf16, #tpu.memory_space<vmem>>, vector<512x128xbf16>
    tpu.vector_store %arg16[%c0_154, %c1024], %110 {strides = array<i32>} : memref<512x1152xbf16, #tpu.memory_space<vmem>>, vector<512x128xbf16>,
    %c0_155 = arith.constant 0 : index
    %c0_156 = arith.constant 0 : index
    %112 = vector.load %arg16[%c0_155, %c0_156] : memref<512x1152xbf16, #tpu.memory_space<vmem>>, vector<512x1152xbf16>
    %c0_157 = arith.constant 0 : index
    %c0_158 = arith.constant 0 : index
    %113 = vector.load %arg10[%c0_157, %c0_158] : memref<1152x128xbf16, #tpu.memory_space<vmem>>, vector<1152x128xbf16>
    %cst_159 = arith.constant dense<0.000000e+00> : vector<512x128xf32>
    %114 = tpu.matmul %112, %113, %cst_159 {dimension_numbers = #tpu.dot_dimension_numbers<[1], [0], [0], [1], [0, 0, 1, 1], [], []>} : vector<512x1152xbf16>, vector<1152x128xbf16>, vector<512x128xf32> -> vector<512x128xf32>
    %cst_160 = arith.constant dense<0.000000e+00> : vector<128xf32>
    %115 = vector.multi_reduction <add>, %114, %cst_160 [0] : vector<512x128xf32> to vector<128xf32>
    %116 = vector.shape_cast %115 : vector<128xf32> to vector<1x128xf32>
    %cst_161 = arith.constant 0.001953125 : f32
    %117 = vector.broadcast %cst_161 : f32 to vector<1x128xf32>
    %118 = arith.mulf %116, %117 : vector<1x128xf32>
    %119 = arith.mulf %114, %114 : vector<512x128xf32>
    %cst_162 = arith.constant dense<0.000000e+00> : vector<128xf32>
    %120 = vector.multi_reduction <add>, %119, %cst_162 [0] : vector<512x128xf32> to vector<128xf32>
    %121 = vector.shape_cast %120 : vector<128xf32> to vector<1x128xf32>
    %cst_163 = arith.constant 0.001953125 : f32
    %122 = vector.broadcast %cst_163 : f32 to vector<1x128xf32>
    %123 = arith.mulf %121, %122 : vector<1x128xf32>
    %124 = arith.mulf %118, %118 : vector<1x128xf32>
    %125 = arith.subf %123, %124 : vector<1x128xf32>
    %126 = vector.broadcast %118 : vector<1x128xf32> to vector<512x128xf32>
    %127 = arith.subf %114, %126 : vector<512x128xf32>
    %cst_164 = arith.constant 9.99999974E-6 : f32
    %128 = vector.broadcast %cst_164 : f32 to vector<1x128xf32>
    %129 = arith.addf %125, %128 : vector<1x128xf32>
    %130 = math.rsqrt %129 : vector<1x128xf32>
    %131 = vector.broadcast %130 : vector<1x128xf32> to vector<512x128xf32>
    %132 = arith.mulf %127, %131 : vector<512x128xf32>
    %c0_165 = arith.constant 0 : index
    %c0_166 = arith.constant 0 : index
    %133 = vector.load %arg11[%c0_165, %c0_166] : memref<1x128xf32, #tpu.memory_space<vmem>>, vector<1x128xf32>
    %134 = vector.broadcast %133 : vector<1x128xf32> to vector<512x128xf32>
    %135 = arith.mulf %132, %134 : vector<512x128xf32>
    %c0_167 = arith.constant 0 : index
    %c0_168 = arith.constant 0 : index
    %136 = vector.load %arg12[%c0_167, %c0_168] : memref<1x128xf32, #tpu.memory_space<vmem>>, vector<1x128xf32>
    %137 = vector.broadcast %136 : vector<1x128xf32> to vector<512x128xf32>
    %138 = arith.addf %135, %137 : vector<512x128xf32>
    %cst_169 = arith.constant 0.000000e+00 : f32
    %139 = vector.broadcast %cst_169 : f32 to vector<512x128xf32>
    %140 = arith.maximumf %138, %139 : vector<512x128xf32>
    %141 = vector.shape_cast %140 : vector<512x128xf32> to vector<2x16x16x128xf32>
    %c0_170 = arith.constant 0 : index
    %c0_171 = arith.constant 0 : index
    %c0_172 = arith.constant 0 : index
    %c0_173 = arith.constant 0 : index
    %142 = vector.load %arg13[%c0_170, %c0_171, %c0_172, %c0_173] : memref<2x16x16x128xf32, #tpu.memory_space<vmem>>, vector<2x16x16x128xf32>
    tpu.vector_store %arg13[%c0_170, %c0_171, %c0_172, %c0_173], %141 {strides = array<i32>} : memref<2x16x16x128xf32, #tpu.memory_space<vmem>>, vector<2x16x16x128xf32>,
    return
  }
  func.func @transform_0(%arg0: i32) -> (i32, i32, i32, i32) {
    %c0_i32 = arith.constant 0 : i32
    %c0_i32_0 = arith.constant 0 : i32
    %c0_i32_1 = arith.constant 0 : i32
    %c0_i32_2 = arith.constant 0 : i32
    %c0_i32_3 = arith.constant 0 : i32
    return %c0_i32, %c0_i32_0, %c0_i32_1, %c0_i32_2 : i32, i32, i32, i32
  }
  func.func @transform_1(%arg0: i32) -> (i32, i32) {
    %c0_i32 = arith.constant 0 : i32
    %c0_i32_0 = arith.constant 0 : i32
    %c0_i32_1 = arith.constant 0 : i32
    return %c0_i32, %c0_i32_0 : i32, i32
  }
  func.func @transform_2(%arg0: i32) -> (i32, i32) {
    %c0_i32 = arith.constant 0 : i32
    %c0_i32_0 = arith.constant 0 : i32
    %c0_i32_1 = arith.constant 0 : i32
    return %c0_i32, %c0_i32_0 : i32, i32
  }
  func.func @transform_3(%arg0: i32) -> (i32, i32) {
    %c0_i32 = arith.constant 0 : i32
    %c0_i32_0 = arith.constant 0 : i32
    %c0_i32_1 = arith.constant 0 : i32
    return %c0_i32, %c0_i32_0 : i32, i32
  }
  func.func @transform_4(%arg0: i32) -> (i32, i32) {
    %c0_i32 = arith.constant 0 : i32
    %c0_i32_0 = arith.constant 0 : i32
    %c0_i32_1 = arith.constant 0 : i32
    return %c0_i32, %c0_i32_0 : i32, i32
  }
  func.func @transform_5(%arg0: i32) -> (i32, i32) {
    %c0_i32 = arith.constant 0 : i32
    %c0_i32_0 = arith.constant 0 : i32
    %c0_i32_1 = arith.constant 0 : i32
    return %c0_i32, %c0_i32_0 : i32, i32
  }
  func.func @transform_6(%arg0: i32) -> (i32, i32) {
    %c0_i32 = arith.constant 0 : i32
    %c0_i32_0 = arith.constant 0 : i32
    %c0_i32_1 = arith.constant 0 : i32
    return %c0_i32, %c0_i32_0 : i32, i32
  }
  func.func @transform_7(%arg0: i32) -> (i32, i32) {
    %c0_i32 = arith.constant 0 : i32
    %c0_i32_0 = arith.constant 0 : i32
    %c0_i32_1 = arith.constant 0 : i32
    return %c0_i32, %c0_i32_0 : i32, i32
  }
  func.func @transform_8(%arg0: i32) -> (i32, i32) {
    %c0_i32 = arith.constant 0 : i32
    %c0_i32_0 = arith.constant 0 : i32
    %c0_i32_1 = arith.constant 0 : i32
    return %c0_i32, %c0_i32_0 : i32, i32
  }
  func.func @transform_9(%arg0: i32) -> (i32, i32) {
    %c0_i32 = arith.constant 0 : i32
    %c0_i32_0 = arith.constant 0 : i32
    %c0_i32_1 = arith.constant 0 : i32
    return %c0_i32, %c0_i32_0 : i32, i32
  }
  func.func @transform_10(%arg0: i32) -> (i32, i32) {
    %c0_i32 = arith.constant 0 : i32
    %c0_i32_0 = arith.constant 0 : i32
    %c0_i32_1 = arith.constant 0 : i32
    return %c0_i32, %c0_i32_0 : i32, i32
  }
  func.func @transform_11(%arg0: i32) -> (i32, i32) {
    %c0_i32 = arith.constant 0 : i32
    %c0_i32_0 = arith.constant 0 : i32
    %c0_i32_1 = arith.constant 0 : i32
    return %c0_i32, %c0_i32_0 : i32, i32
  }
  func.func @transform_12(%arg0: i32) -> (i32, i32, i32, i32) {
    %c0_i32 = arith.constant 0 : i32
    %c0_i32_0 = arith.constant 0 : i32
    %c0_i32_1 = arith.constant 0 : i32
    %c0_i32_2 = arith.constant 0 : i32
    %c0_i32_3 = arith.constant 0 : i32
    return %c0_i32, %c0_i32_0, %c0_i32_1, %c0_i32_2 : i32, i32, i32, i32
  }
}

</mosaic_0001>

<bundles_post_ra>
// kernel: conv_block_forward_nhwc.1
= control target key start
LH: loop header
LB: loop body
LE: loop exit
PB: predicated region body
PF: predicated region fallthrough
CT: control target
= control target key end

     0   :  { %v11069_v3 = vmov 0.0|0.0   ;;  %v11070_v6 = vmov 0.0   ;;  %vm11071_vm0 = vmmov 0   ;;  %vm68_vm1 = vcmask 1043456   ;;  %s17537_s0 = inlined_call_operand.vmem [shape: f32[2,16,16,4], index: 0, kind: input, shape index: {}]   ;;  %s17538_s1 = inlined_call_operand.vmem [shape: f32[2,100], index: 1, kind: input, shape index: {}]   ;;  %s17539_s2 = inlined_call_operand.vmem [shape: f32[100,4], index: 2, kind: input, shape index: {}]   ;;  %s17540_s3 = inlined_call_operand.vmem [shape: f32[1,4], index: 3, kind: input, shape index: {}]   ;;  %s17541_s4 = inlined_call_operand.vmem [shape: f32[4,4], index: 4, kind: input, shape index: {}]   ;;  %s17542_s5 = inlined_call_operand.vmem [shape: f32[1,4], index: 5, kind: input, shape index: {}]   ;;  %s17543_s6 = inlined_call_operand.vmem [shape: bf16[36,128], index: 6, kind: input, shape index: {}]   ;;  %s17544_s7 = inlined_call_operand.vmem [shape: f32[1,128], index: 7, kind: input, shape index: {}]   ;;  %s17545_s8 = inlined_call_operand.vmem [shape: f32[1,128], index: 8, kind: input, shape index: {}]   ;;  %s17546_s9 = inlined_call_operand.vmem [shape: bf16[1152,128], index: 9, kind: input, shape index: {}]   ;;  %s17547_s10 = inlined_call_operand.vmem [shape: f32[1,128], index: 10, kind: input, shape index: {}]   ;;  %s17548_s11 = inlined_call_operand.vmem [shape: f32[1,128], index: 11, kind: input, shape index: {}]   ;;  %s17549_s12 = inlined_call_operand.hbm [shape: f32[2,16,16,128], index: 12, kind: output, shape index: {}]  }
   0x1   :  { %v11152_v0 = vld [vmem:[%s17539_s2] sm:$0xff]  ;;  %v11157_v1 = vld [vmem:[%s17539_s2 + $0x8] sm:$0xff]  ;;  %v11162_v2 = vld [vmem:[%s17539_s2 + $0x10] sm:$0xff]  ;;  %9295 = vmatprep.subr.bf16.mxu0 %v11069_v3  ;;  %4669 = vst [vmem:[#allocation3] sm:$0xff] %v11070_v6  ;;  %9140 = vmatprep.subr.mxu1 %v11070_v6  ;;  %vm64_vm2 = vcmask 818176  }
   0x2   :  { %v9296_v4 = vpack.c.bf16 %v11157_v1, %v11152_v0  ;;  %v11170_v5 = vld [vmem:[%s17539_s2 + $0x18] sm:$0xff]  ;;  %4670 = vst [vmem:[#allocation3 + $0x8] sm:$0xff] %v11070_v6  ;;  %4671 = vst [vmem:[#allocation3 + $0x10] sm:$0x3] %v11070_v6  ;;  %9137 = vmatprep.mubr.msk.f32.mxu0 %vm11071_vm0, %v11070_v6  ;;  %9142 = vmatprep.mubr.msk.f32.mxu1 %vm11071_vm0, %v11070_v6  ;;  %v48_v8 = vld [vmem:[%s17539_s2 + $0x20] sm:$0xff] }
   0x3   :  { %4672 = vst [vmem:[#allocation3 + $0x1b0] sm:$0xff] %v11070_v6  ;;  %4673 = vst [vmem:[#allocation3 + $0x1b8] sm:$0xff] %v11070_v6  ;;  %v9299_v7 = vpack.c.bf16 %v11170_v5, %v11162_v2  ;;  %v49_v9 = vld [vmem:[%s17539_s2 + $0x28] sm:$0xff]  ;;  %v50_v10 = vld [vmem:[%s17539_s2 + $0x30] sm:$0xff] }
   0x4   :  { %4674 = vst [vmem:[#allocation3 + $0x1c0] sm:$0x3] %v11070_v6  ;;  %4676 = vst [vmem:[#allocation3 + $0x198] sm:$0xff] %v11070_v6  ;;  %9297 = vmatpush3.bf16.msra.mxu0 %v9296_v4  ;;  %v51_v11 = vld [vmem:[%s17539_s2 + $0x38] sm:$0xff]  ;;  %v9302_v12 = vpack.c.bf16 %v49_v9, %v48_v8  ;;  %v52_v13 = vld [vmem:[%s17539_s2 + $0x40] sm:$0xff] }
   0x5   :  { %4677 = vst [vmem:[#allocation3 + $0x1a0] sm:$0xff] %v11070_v6  ;;  %4678 = vst [vmem:[#allocation3 + $0x1a8] sm:$0x3] %v11070_v6  ;;  %9298 = vmatprep.subr.bf16.mxu0 %v11069_v3  ;;  %v53_v14 = vld [vmem:[%s17539_s2 + $0x48] sm:$0xff]  ;;  %v9305_v15 = vpack.c.bf16 %v51_v11, %v50_v10  ;;  %v54_v16 = vld [vmem:[%s17539_s2 + $0x50] sm:$0xff] }
   0x6   :  { %4679 = vst [vmem:[#allocation3 + $0x348] sm:$0xff] %v11070_v6  ;;  %4680 = vst [vmem:[#allocation3 + $0x350] sm:$0xff] %v11070_v6  ;;  %v55_v17 = vld [vmem:[%s17539_s2 + $0x58] sm:$0xff]  ;;  %v9308_v18 = vpack.c.bf16 %v53_v14, %v52_v13  ;;  %v56_v20 = vld [vmem:[%s17539_s2 + $0x60] sm:$0xf] }
   0x7   :  { %4681 = vst [vmem:[#allocation3 + $0x358] sm:$0x3] %v11070_v6  ;;  %4683 = vst [vmem:[#allocation3 + $0x18] sm:$0x1] %v11070_v6  ;;  %v9311_v19 = vpack.c.bf16 %v55_v17, %v54_v16  ;;  %v43_v21 = vld [vmem:[%s17538_s1] sm:$0x3] }
   0x8   :  { %4684 = vst [vmem:[#allocation3 + $0x30] sm:$0x1] %v11070_v6  ;;  %4685 = vst [vmem:[#allocation3 + $0x48] sm:$0x1] %v11070_v6  ;;  %9300 = vmatpush3.bf16.msra.mxu0 %v9299_v7 }
   0x9   :  { %4686 = vst [vmem:[#allocation3 + $0x60] sm:$0x1] %v11070_v6  ;;  %4687 = vst [vmem:[#allocation3 + $0x78] sm:$0x1] %v11070_v6  ;;  %9301 = vmatprep.subr.bf16.mxu0 %v11069_v3 }
   0xa   :  { %4688 = vst [vmem:[#allocation3 + $0x90] sm:$0x1] %v11070_v6  ;;  %4689 = vst [vmem:[#allocation3 + $0xa8] sm:$0x1] %v11070_v6 }
   0xb   :  { %4690 = vst [vmem:[#allocation3 + $0xc0] sm:$0x1] %v11070_v6  ;;  %4691 = vst [vmem:[#allocation3 + $0xd8] sm:$0x1] %v11070_v6 }
   0xc   :  { %4692 = vst [vmem:[#allocation3 + $0xf0] sm:$0x1] %v11070_v6  ;;  %4693 = vst [vmem:[#allocation3 + $0x108] sm:$0x1] %v11070_v6  ;;  %9303 = vmatpush3.bf16.msra.mxu0 %v9302_v12 }
   0xd   :  { %4694 = vst [vmem:[#allocation3 + $0x120] sm:$0x1] %v11070_v6  ;;  %4695 = vst [vmem:[#allocation3 + $0x138] sm:$0x1] %v11070_v6  ;;  %9304 = vmatprep.subr.bf16.mxu0 %v11069_v3 }
   0xe   :  { %4696 = vst [vmem:[#allocation3 + $0x150] sm:$0x1] %v11070_v6  ;;  %4697 = vst [vmem:[#allocation3 + $0x168] sm:$0x1] %v11070_v6 }
   0xf   :  { %4698 = vst [vmem:[#allocation3 + $0x180] sm:$0x1] %v11070_v6  ;;  %4701 = vst [vmem:[#allocation3 + $0x1c8] sm:$0x1] %v11070_v6 }
  0x10   :  { %4702 = vst [vmem:[#allocation3 + $0x1e0] sm:$0x1] %v11070_v6  ;;  %4703 = vst [vmem:[#allocation3 + $0x1f8] sm:$0x1] %v11070_v6  ;;  %9306 = vmatpush3.bf16.msra.mxu0 %v9305_v15 }
  0x11   :  { %4704 = vst [vmem:[#allocation3 + $0x210] sm:$0x1] %v11070_v6  ;;  %4705 = vst [vmem:[#allocation3 + $0x228] sm:$0x1] %v11070_v6  ;;  %9307 = vmatprep.subr.bf16.mxu0 %v11069_v3 }
  0x12   :  { %4706 = vst [vmem:[#allocation3 + $0x240] sm:$0x1] %v11070_v6  ;;  %4707 = vst [vmem:[#allocation3 + $0x258] sm:$0x1] %v11070_v6 }
  0x13   :  { %4708 = vst [vmem:[#allocation3 + $0x270] sm:$0x1] %v11070_v6  ;;  %4709 = vst [vmem:[#allocation3 + $0x288] sm:$0x1] %v11070_v6 }
  0x14   :  { %4710 = vst [vmem:[#allocation3 + $0x2a0] sm:$0x1] %v11070_v6  ;;  %4711 = vst [vmem:[#allocation3 + $0x2b8] sm:$0x1] %v11070_v6  ;;  %9309 = vmatpush3.bf16.msra.mxu0 %v9308_v18 }
  0x15   :  { %4712 = vst [vmem:[#allocation3 + $0x2d0] sm:$0x1] %v11070_v6  ;;  %4713 = vst [vmem:[#allocation3 + $0x2e8] sm:$0x1] %v11070_v6  ;;  %9310 = vmatprep.subr.bf16.mxu0 %v11069_v3 }
  0x16   :  { %4714 = vst [vmem:[#allocation3 + $0x300] sm:$0x1] %v11070_v6  ;;  %4715 = vst [vmem:[#allocation3 + $0x318] sm:$0x1] %v11070_v6 }
  0x17   :  { %4716 = vst [vmem:[#allocation3 + $0x330] sm:$0x1] %v11070_v6  ;;  %4719 = vst [vmem:[#allocation3 + $0x29] sm:$0x1] %v11070_v6 }
  0x18   :  { %4720 = vst [vmem:[#allocation3 + $0x41] sm:$0x1] %v11070_v6  ;;  %4721 = vst [vmem:[#allocation3 + $0x59] sm:$0x1] %v11070_v6  ;;  %9312 = vmatpush3.bf16.msra.mxu0 %v9311_v19 }
  0x19   :  { %4722 = vst [vmem:[#allocation3 + $0x71] sm:$0x1] %v11070_v6  ;;  %4723 = vst [vmem:[#allocation3 + $0x89] sm:$0x1] %v11070_v6  ;;  %9135 = vmatprep.subr.mxu0 %v11070_v6 }
  0x1a   :  { %4724 = vst [vmem:[#allocation3 + $0xa1] sm:$0x1] %v11070_v6  ;;  %4725 = vst [vmem:[#allocation3 + $0xb9] sm:$0x1] %v11070_v6 }
  0x1b   :  { %4726 = vst [vmem:[#allocation3 + $0xd1] sm:$0x1] %v11070_v6  ;;  %4727 = vst [vmem:[#allocation3 + $0xe9] sm:$0x1] %v11070_v6 }
  0x1c   :  { %4728 = vst [vmem:[#allocation3 + $0x101] sm:$0x1] %v11070_v6  ;;  %4729 = vst [vmem:[#allocation3 + $0x119] sm:$0x1] %v11070_v6  ;;  %9136 = vmatpush3.msk.msra.mxu0 %vm68_vm1, %v56_v20 }
  0x1d   :  { %4730 = vst [vmem:[#allocation3 + $0x131] sm:$0x1] %v11070_v6  ;;  %4731 = vst [vmem:[#allocation3 + $0x149] sm:$0x1] %v11070_v6  ;;  %9138 = vmatmul.mubr.msk.f32.vlgmr.msra.gmra.mrb[0].mxu0 %vm64_vm2, %v43_v21 }
  0x1e   :  { %4732 = vst [vmem:[#allocation3 + $0x161] sm:$0x1] %v11070_v6  ;;  %4733 = vst [vmem:[#allocation3 + $0x179] sm:$0x1] %v11070_v6 }
  0x1f   :  { %4734 = vst [vmem:[#allocation3 + $0x191] sm:$0x1] %v11070_v6  ;;  %4737 = vst [vmem:[#allocation3 + $0x1d9] sm:$0x1] %v11070_v6 }
  0x20   :  { %4738 = vst [vmem:[#allocation3 + $0x1f1] sm:$0x1] %v11070_v6  ;;  %4739 = vst [vmem:[#allocation3 + $0x209] sm:$0x1] %v11070_v6 }
  0x21   :  { %4740 = vst [vmem:[#allocation3 + $0x221] sm:$0x1] %v11070_v6  ;;  %4741 = vst [vmem:[#allocation3 + $0x239] sm:$0x1] %v11070_v6 }
  0x22   :  { %4742 = vst [vmem:[#allocation3 + $0x251] sm:$0x1] %v11070_v6  ;;  %4743 = vst [vmem:[#allocation3 + $0x269] sm:$0x1] %v11070_v6 }
  0x23   :  { %4744 = vst [vmem:[#allocation3 + $0x281] sm:$0x1] %v11070_v6  ;;  %4745 = vst [vmem:[#allocation3 + $0x299] sm:$0x1] %v11070_v6 }
  0x24   :  { %4746 = vst [vmem:[#allocation3 + $0x2b1] sm:$0x1] %v11070_v6  ;;  %4747 = vst [vmem:[#allocation3 + $0x2c9] sm:$0x1] %v11070_v6 }
  0x25   :  { %4748 = vst [vmem:[#allocation3 + $0x2e1] sm:$0x1] %v11070_v6  ;;  %4749 = vst [vmem:[#allocation3 + $0x2f9] sm:$0x1] %v11070_v6 }
  0x26   :  { %4750 = vst [vmem:[#allocation3 + $0x311] sm:$0x1] %v11070_v6  ;;  %4751 = vst [vmem:[#allocation3 + $0x329] sm:$0x1] %v11070_v6 }
  0x27   :  { %4752 = vst [vmem:[#allocation3 + $0x341] sm:$0x1] %v11070_v6  ;;  %4682 = vst [vmem:[#allocation3] sm:$0x1] %v11070_v6 }
  0x28   :  { %4699 = vst [vmem:[#allocation3 + $0x198] sm:$0x1] %v11070_v6  ;;  %4700 = vst [vmem:[#allocation3 + $0x1b0] sm:$0x1] %v11070_v6 }
  0x29   :  { %4717 = vst [vmem:[#allocation3 + $0x348] sm:$0x1] %v11070_v6  ;;  %4718 = vst [vmem:[#allocation3 + $0x11] sm:$0x1] %v11070_v6 }
  0x2a   :  { %4735 = vst [vmem:[#allocation3 + $0x1a9] sm:$0x1] %v11070_v6  ;;  %4736 = vst [vmem:[#allocation3 + $0x1c1] sm:$0x1] %v11070_v6 }
  0x2b   :  { %4753 = vst [vmem:[#allocation3 + $0x359] sm:$0x1] %v11070_v6 }
  0x2c   :  { %17 = vsyncpa [#allocation6], 0  ;;  %v143_v22 = vld [vmem:[%s17541_s4] sm:$0xf]  ;;  %vm151_vm3 = vcmask 31744   ;;  %vm230_vm4 = vcmask 25600   ;;  %v383_v51 = vlaneseq }
  0x2d   :  { %9141 = vmatpush3.msk.msra.mxu1 %vm68_vm1, %v143_v22  ;;  %228 = vst.msk [vmem:[#allocation2] sm:$0xff] %vm151_vm3, %v11070_v6  ;;  %229 = vst.msk [vmem:[#allocation2 + $0x8] sm:$0xff] %vm151_vm3, %v11070_v6  ;;  %v8903_v23 = vld [vmem:[%s17540_s3] ss:$0 sm:$0xff]  ;;  %vm242_vm5 = vcmask 24576   ;;  %s11072_s3 = smov 28  }
  0x2e   :  { %232 = vst.msk [vmem:[#allocation2 + $0x1b0] sm:$0xff] %vm151_vm3, %v11070_v6  ;;  %233 = vst.msk [vmem:[#allocation2 + $0x1b8] sm:$0xff] %vm151_vm3, %v11070_v6  ;;  %s11073_s4 = smov 8   ;;  %s11074_s15 = smov 4   ;;  %v11077_v49 = vmov 1966171168  }
  0x2f   :  { %236 = vst.msk [vmem:[#allocation2 + $0x198] sm:$0xff] %vm151_vm3, %v11070_v6  ;;  %237 = vst.msk [vmem:[#allocation2 + $0x1a0] sm:$0xff] %vm151_vm3, %v11070_v6  ;;  %s11075_s16 = smov 24   ;;  %s11076_s17 = smov 32   ;;  %v381_v50 = vunpack.c.l.s4 %v11077_v49  ;;  %v11478_v53 = vshrl.u32 %v383_v51, 7  ;;  %v315_v61 = vld [vmem:[%s17537_s0] sm:$0xff] }
  0x30   :  { %239 = vst.msk [vmem:[#allocation2 + $0x348] sm:$0xff] %vm151_vm3, %v11070_v6  ;;  %240 = vst.msk [vmem:[#allocation2 + $0x350] sm:$0xff] %vm151_vm3, %v11070_v6  ;;  %v8906_v54 = vld [vmem:[%s17542_s5] ss:$0 sm:$0xff]  ;;  %v316_v62 = vld [vmem:[%s17537_s0 + $0x8] sm:$0xff]  ;;  %s11078_s22 = smov 12  }
  0x31   :  { %238 = vst.msk [vmem:[#allocation2 + $0x1a8] sm:$0x3] %vm230_vm4, %v11070_v6  ;;  %231 = vst.msk [vmem:[#allocation2 + $0x10] sm:$0x3] %vm230_vm4, %v11070_v6  ;;  %v382_v52 = vunpack.c.0.s8 %v381_v50  ;;  %v404_v60 = vsub.s32 0, %v11478_v53  ;;  %v317_v63 = vld [vmem:[%s17537_s0 + $0x10] sm:$0xff] }
  0x32   :  { %234 = vst.msk [vmem:[#allocation2 + $0x1c0] sm:$0x3] %vm230_vm4, %v11070_v6  ;;  %241 = vst.msk [vmem:[#allocation2 + $0x358] sm:$0x3] %vm230_vm4, %v11070_v6  ;;  %v318_v2 = vld [vmem:[%s17537_s0 + $0x18] sm:$0xff]  ;;  %v319_v3 = vld [vmem:[%s17537_s0 + $0x20] sm:$0xff] }
  0x33   :  { %296 = vst.msk [vmem:[#allocation2 + $0x1a9] sm:$0x1] %vm242_vm5, %v11070_v6  ;;  %243 = vst.msk [vmem:[#allocation2] sm:$0x1] %vm242_vm5, %v11070_v6  ;;  %v385_v55 = vsub.s32 %v382_v52, %v11478_v53  ;;  %v320_v4 = vld [vmem:[%s17537_s0 + $0x28] sm:$0xff]  ;;  %v321_v5 = vld [vmem:[%s17537_s0 + $0x30] sm:$0xff] }
  0x34   :  { %244 = vst.msk [vmem:[#allocation2 + $0x18] sm:$0x1] %vm242_vm5, %v11070_v6  ;;  %245 = vst.msk [vmem:[#allocation2 + $0x30] sm:$0x1] %vm242_vm5, %v11070_v6  ;;  %v669_v31 = vld [vmem:[#allocation2 + $0x2] sm:$0xff]  ;;  %v325_v9 = vld [vmem:[%s17537_s0 + $0x50] sm:$0xff] }
  0x35   :  { %246 = vst.msk [vmem:[#allocation2 + $0x48] sm:$0x1] %vm242_vm5, %v11070_v6  ;;  %247 = vst.msk [vmem:[#allocation2 + $0x60] sm:$0x1] %vm242_vm5, %v11070_v6  ;;  %v605_v34 = vld [vmem:[#allocation2 + $0x1] sm:$0xff]  ;;  %v637_v42 = vld [vmem:[#allocation2 + $0x1b1] sm:$0xff] }
  0x36   :  { %248 = vst.msk [vmem:[#allocation2 + $0x78] sm:$0x1] %vm242_vm5, %v11070_v6  ;;  %249 = vst.msk [vmem:[#allocation2 + $0x90] sm:$0x1] %vm242_vm5, %v11070_v6  ;;  %v1020_v28 = vld [vmem:[#allocation2 + $0x199] sm:$0xff]  ;;  %v324_v8 = vld [vmem:[%s17537_s0 + $0x48] sm:$0xff] }
  0x37   :  { %250 = vst.msk [vmem:[#allocation2 + $0xa8] sm:$0x1] %vm242_vm5, %v11070_v6  ;;  %251 = vst.msk [vmem:[#allocation2 + $0xc0] sm:$0x1] %vm242_vm5, %v11070_v6  ;;  %v957_v38 = vld [vmem:[#allocation2 + $0x1a0] sm:$0xff]  ;;  %v701_v45 = vld [vmem:[#allocation2 + $0x1b2] sm:$0xff] }
  0x38   :  { %252 = vst.msk [vmem:[#allocation2 + $0xd8] sm:$0x1] %vm242_vm5, %v11070_v6  ;;  %253 = vst.msk [vmem:[#allocation2 + $0xf0] sm:$0x1] %vm242_vm5, %v11070_v6  ;;  %v1021_v29 = vld [vmem:[#allocation2 + $0x1a1] sm:$0xff]  ;;  %v606_v35 = vld [vmem:[#allocation2 + $0x9] sm:$0xff] }
  0x39   :  { %254 = vst.msk [vmem:[#allocation2 + $0x108] sm:$0x1] %vm242_vm5, %v11070_v6  ;;  %255 = vst.msk [vmem:[#allocation2 + $0x120] sm:$0x1] %vm242_vm5, %v11070_v6  ;;  %v9686_v30 = vpack.i.bf16 %v1021_v29, %v1020_v28  ;;  %v9681_v36 = vpack.i.bf16 %v606_v35, %v605_v34  ;;  %v1084_v39 = vld [vmem:[#allocation2 + $0x19a] sm:$0xff]  ;;  %v328_v13 = vld [vmem:[%s17537_s0 + $0x68] sm:$0xff] }
  0x3a   :  { %256 = vst.msk [vmem:[#allocation2 + $0x138] sm:$0x1] %vm242_vm5, %v11070_v6  ;;  %257 = vst.msk [vmem:[#allocation2 + $0x150] sm:$0x1] %vm242_vm5, %v11070_v6  ;;  %v1085_v41 = vld [vmem:[#allocation2 + $0x1a2] sm:$0xff]  ;;  %v638_v43 = vld [vmem:[#allocation2 + $0x1b9] sm:$0xff] }
  0x3b   :  { %258 = vst.msk [vmem:[#allocation2 + $0x168] sm:$0x1] %vm242_vm5, %v11070_v6  ;;  %259 = vst.msk [vmem:[#allocation2 + $0x180] sm:$0x1] %vm242_vm5, %v11070_v6  ;;  %9687 = vrot.lane.b32.xlu1 %v9686_v30, %s11072_s3  ;;  %9682 = vrot.lane.b32.xlu0 %v9681_v36, %s11074_s15  ;;  %v9706_v44 = vpack.i.bf16 %v1085_v41, %v1084_v39  ;;  %v9701_v47 = vpack.i.bf16 %v638_v43, %v637_v42  ;;  %v323_v7 = vld [vmem:[%s17537_s0 + $0x40] sm:$0xff]  ;;  %v326_v11 = vld [vmem:[%s17537_s0 + $0x58] sm:$0xff] }
  0x3c   :  { %260 = vst.msk [vmem:[#allocation2 + $0x198] sm:$0x1] %vm242_vm5, %v11070_v6  ;;  %261 = vst.msk [vmem:[#allocation2 + $0x1b0] sm:$0x1] %vm242_vm5, %v11070_v6  ;;  %v327_v12 = vld [vmem:[%s17537_s0 + $0x60] sm:$0xff]  ;;  %v329_v14 = vld [vmem:[%s17537_s0 + $0x70] sm:$0xff] }
  0x3d   :  { %262 = vst.msk [vmem:[#allocation2 + $0x1c8] sm:$0x1] %vm242_vm5, %v11070_v6  ;;  %263 = vst.msk [vmem:[#allocation2 + $0x1e0] sm:$0x1] %vm242_vm5, %v11070_v6  ;;  %v330_v15 = vld [vmem:[%s17537_s0 + $0x78] sm:$0xff]  ;;  %v331_v16 = vld [vmem:[%s17537_s0 + $0x80] sm:$0xff] }
  0x3e   :  { %264 = vst.msk [vmem:[#allocation2 + $0x1f8] sm:$0x1] %vm242_vm5, %v11070_v6  ;;  %265 = vst.msk [vmem:[#allocation2 + $0x210] sm:$0x1] %vm242_vm5, %v11070_v6  ;;  %v332_v21 = vld [vmem:[%s17537_s0 + $0x88] sm:$0xff]  ;;  %v333_v22 = vld [vmem:[%s17537_s0 + $0x90] sm:$0xff] }
  0x3f   :  { %266 = vst.msk [vmem:[#allocation2 + $0x228] sm:$0x1] %vm242_vm5, %v11070_v6  ;;  %267 = vst.msk [vmem:[#allocation2 + $0x240] sm:$0x1] %vm242_vm5, %v11070_v6  ;;  %9707 = vrot.lane.b32.xlu0 %v9706_v44, %s11076_s17  ;;  %v335_v28 = vld [vmem:[%s17537_s0 + $0xa0] sm:$0xff]  ;;  %v336_v29 = vld [vmem:[%s17537_s0 + $0xa8] sm:$0xff] }
  0x40   :  { %268 = vst.msk [vmem:[#allocation2 + $0x258] sm:$0x1] %vm242_vm5, %v11070_v6  ;;  %269 = vst.msk [vmem:[#allocation2 + $0x270] sm:$0x1] %vm242_vm5, %v11070_v6  ;;  %v337_v30 = vld [vmem:[%s17537_s0 + $0xb0] sm:$0xff]  ;;  %v338_v35 = vld [vmem:[%s17537_s0 + $0xb8] sm:$0xff] }
  0x41   :  { %270 = vst.msk [vmem:[#allocation2 + $0x288] sm:$0x1] %vm242_vm5, %v11070_v6  ;;  %271 = vst.msk [vmem:[#allocation2 + $0x2a0] sm:$0x1] %vm242_vm5, %v11070_v6  ;;  %v339_v36 = vld [vmem:[%s17537_s0 + $0xc0] sm:$0xff]  ;;  %v341_v42 = vld [vmem:[%s17537_s0 + $0xd0] sm:$0xff] }
  0x42   :  { %272 = vst.msk [vmem:[#allocation2 + $0x2b8] sm:$0x1] %vm242_vm5, %v11070_v6  ;;  %273 = vst.msk [vmem:[#allocation2 + $0x2d0] sm:$0x1] %vm242_vm5, %v11070_v6  ;;  %v342_v43 = vld [vmem:[%s17537_s0 + $0xd8] sm:$0xff]  ;;  %v343_v44 = vld [vmem:[%s17537_s0 + $0xe0] sm:$0xff] }
  0x43   :  { %274 = vst.msk [vmem:[#allocation2 + $0x2e8] sm:$0x1] %vm242_vm5, %v11070_v6  ;;  %275 = vst.msk [vmem:[#allocation2 + $0x300] sm:$0x1] %vm242_vm5, %v11070_v6  ;;  %v956_v37 = vld [vmem:[#allocation2 + $0x198] sm:$0xff]  ;;  %v345_v49 = vld [vmem:[%s17537_s0 + $0xf0] sm:$0xff] }
  0x44   :  { %276 = vst.msk [vmem:[#allocation2 + $0x318] sm:$0x1] %vm242_vm5, %v11070_v6  ;;  %277 = vst.msk [vmem:[#allocation2 + $0x330] sm:$0x1] %vm242_vm5, %v11070_v6  ;;  %v9696_v40 = vpack.i.bf16 %v957_v38, %v956_v37  ;;  %v340_v37 = vld [vmem:[%s17537_s0 + $0xc8] sm:$0xff]  ;;  %v346_v50 = vld [vmem:[%s17537_s0 + $0xf8] sm:$0xff] }
  0x45   :  { %278 = vst.msk [vmem:[#allocation2 + $0x348] sm:$0x1] %vm242_vm5, %v11070_v6  ;;  %280 = vst.msk [vmem:[#allocation2 + $0x29] sm:$0x1] %vm242_vm5, %v11070_v6  ;;  %v348_v53 = vld [vmem:[%s17537_s0 + $0x108] sm:$0xff]  ;;  %s11079_s24 = smov 16  }
  0x46   :  { %281 = vst.msk [vmem:[#allocation2 + $0x41] sm:$0x1] %vm242_vm5, %v11070_v6  ;;  %282 = vst.msk [vmem:[#allocation2 + $0x59] sm:$0x1] %vm242_vm5, %v11070_v6  ;;  %vm3834_vm6 = vcmask 1041408   ;;  %vm3230_vm7 = vcmask 64512  }
  0x47   :  { %283 = vst.msk [vmem:[#allocation2 + $0x71] sm:$0x1] %vm242_vm5, %v11070_v6  ;;  %284 = vst.msk [vmem:[#allocation2 + $0x89] sm:$0x1] %vm242_vm5, %v11070_v6  ;;  %vm3295_vm8 = vcmask 97280   ;;  %vm3360_vm9 = vcmask 130048  }
  0x48   :  { %285 = vst.msk [vmem:[#allocation2 + $0xa1] sm:$0x1] %vm242_vm5, %v11070_v6  ;;  %286 = vst.msk [vmem:[#allocation2 + $0xb9] sm:$0x1] %vm242_vm5, %v11070_v6  ;;  %vm3425_vm10 = vcmask 162816   ;;  %vm3490_vm11 = vcmask 195584  }
  0x49   :  { %287 = vst.msk [vmem:[#allocation2 + $0xd1] sm:$0x1] %vm242_vm5, %v11070_v6  ;;  %288 = vst.msk [vmem:[#allocation2 + $0xe9] sm:$0x1] %vm242_vm5, %v11070_v6  ;;  %vm3555_vm12 = vcmask 228352   ;;  %vm3620_vm13 = vcmask 261120  }
  0x4a   :  { %289 = vst.msk [vmem:[#allocation2 + $0x101] sm:$0x1] %vm242_vm5, %v11070_v6  ;;  %290 = vst.msk [vmem:[#allocation2 + $0x119] sm:$0x1] %vm242_vm5, %v11070_v6  ;;  %vm3737_vm14 = vcmask 293888  }
  0x4b   :  { %291 = vst.msk [vmem:[#allocation2 + $0x131] sm:$0x1] %vm242_vm5, %v11070_v6  ;;  %292 = vst.msk [vmem:[#allocation2 + $0x149] sm:$0x1] %vm242_vm5, %v11070_v6 }
  0x4c   :  { %293 = vst.msk [vmem:[#allocation2 + $0x161] sm:$0x1] %vm242_vm5, %v11070_v6  ;;  %294 = vst.msk [vmem:[#allocation2 + $0x179] sm:$0x1] %vm242_vm5, %v11070_v6 }
  0x4d   :  { %295 = vst.msk [vmem:[#allocation2 + $0x191] sm:$0x1] %vm242_vm5, %v11070_v6  ;;  %298 = vst.msk [vmem:[#allocation2 + $0x1d9] sm:$0x1] %vm242_vm5, %v11070_v6 }
  0x4e   :  { %299 = vst.msk [vmem:[#allocation2 + $0x1f1] sm:$0x1] %vm242_vm5, %v11070_v6  ;;  %300 = vst.msk [vmem:[#allocation2 + $0x209] sm:$0x1] %vm242_vm5, %v11070_v6 }
  0x4f   :  { %301 = vst.msk [vmem:[#allocation2 + $0x221] sm:$0x1] %vm242_vm5, %v11070_v6  ;;  %302 = vst.msk [vmem:[#allocation2 + $0x239] sm:$0x1] %vm242_vm5, %v11070_v6 }
  0x50   :  { %303 = vst.msk [vmem:[#allocation2 + $0x251] sm:$0x1] %vm242_vm5, %v11070_v6  ;;  %304 = vst.msk [vmem:[#allocation2 + $0x269] sm:$0x1] %vm242_vm5, %v11070_v6 }
  0x51   :  { %305 = vst.msk [vmem:[#allocation2 + $0x281] sm:$0x1] %vm242_vm5, %v11070_v6  ;;  %306 = vst.msk [vmem:[#allocation2 + $0x299] sm:$0x1] %vm242_vm5, %v11070_v6 }
  0x52   :  { %307 = vst.msk [vmem:[#allocation2 + $0x2b1] sm:$0x1] %vm242_vm5, %v11070_v6  ;;  %308 = vst.msk [vmem:[#allocation2 + $0x2c9] sm:$0x1] %vm242_vm5, %v11070_v6 }
  0x53   :  { %309 = vst.msk [vmem:[#allocation2 + $0x2e1] sm:$0x1] %vm242_vm5, %v11070_v6  ;;  %310 = vst.msk [vmem:[#allocation2 + $0x2f9] sm:$0x1] %vm242_vm5, %v11070_v6 }
  0x54   :  { %311 = vst.msk [vmem:[#allocation2 + $0x311] sm:$0x1] %vm242_vm5, %v11070_v6  ;;  %312 = vst.msk [vmem:[#allocation2 + $0x329] sm:$0x1] %vm242_vm5, %v11070_v6 }
  0x55   :  { %313 = vst.msk [vmem:[#allocation2 + $0x341] sm:$0x1] %vm242_vm5, %v11070_v6  ;;  %279 = vst.msk [vmem:[#allocation2 + $0x11] sm:$0x1] %vm242_vm5, %v11070_v6 }
  0x56   :  { %297 = vst.msk [vmem:[#allocation2 + $0x1c1] sm:$0x1] %vm242_vm5, %v11070_v6  ;;  %314 = vst.msk [vmem:[#allocation2 + $0x359] sm:$0x1] %vm242_vm5, %v11070_v6  ;;  %v322_v6 = vld [vmem:[%s17537_s0 + $0x38] sm:$0xff] }
  0x5c   :  { %v670_v32 = vld [vmem:[#allocation2 + $0xa] sm:$0xff] }
  0x5d   :  { %v9691_v33 = vpack.i.bf16 %v670_v32, %v669_v31  ;;  %v702_v46 = vld [vmem:[#allocation2 + $0x1ba] sm:$0xff] }
  0x5e   :  { %v9711_v48 = vpack.i.bf16 %v702_v46, %v701_v45 }
  0x5f   :  { %9692 = vrot.lane.b32.xlu1 %v9691_v33, %s11073_s4 }
  0x60   :  { %9712 = vrot.lane.b32.xlu0 %v9711_v48, %s11073_s4  ;;  %v344_v48 = vld [vmem:[%s17537_s0 + $0xe8] sm:$0xff] }
  0x63   :  { %9697 = vrot.lane.b32.xlu1 %v9696_v40, %s11075_s16 }
  0x67   :  { %9702 = vrot.lane.b32.xlu1 %v9701_v47, %s11074_s15 }
  0xf0   :  { %v138_v24 = vpop.f32.mrb[0].mxu0 }
  0xf1   :  { %v139_v25 = vadd.f32 %v8903_v23, %v138_v24  ;;  %v9139_v26 = vpop.f32.mrb[1].mxu0  ;;  %v334_v23 = vld [vmem:[%s17537_s0 + $0x98] sm:$0xff] }
  0xf3   :  { %v142_v27 = vmax.f32 %v139_v25, 0.0 }
  0xf5   :  { %9143 = vmatmul.mubr.msk.f32.vlgmr.msra.gmra.mrb[0].mxu1 %vm151_vm3, %v142_v27 }
 0x1c8   :  { %v224_v56 = vpop.f32.mrb[0].mxu1 }
 0x1c9   :  { %v225_v57 = vadd.f32 %v8906_v54, %v224_v56  ;;  %v9144_v58 = vpop.f32.mrb[1].mxu1  ;;  %v349_v56 = vld [vmem:[%s17537_s0 + $0x110] sm:$0xff] }
 0x1cb   :  { %v386_v59 = vrot.slane %v225_v57, %v385_v55 }
 0x1cd   :  { %v387_v0 = vcombine.high %v386_v59, %v386_v59  ;;  %v394_v1 = vrot.slane %v386_v59, %v385_v55 }
 0x1cf   :  { %v11520_v10 = vrot.slane %v394_v1, %v404_v60  ;;  %v401_v17 = vrot.slane %v387_v0, %v385_v55  ;;  %v347_v55 = vld [vmem:[%s17537_s0 + $0x100] sm:$0xff] }
 0x1d1   :  { %v412_v18 = vadd.f32 %v11520_v10, %v315_v61  ;;  %v413_v19 = vadd.f32 %v11520_v10, %v316_v62  ;;  %v414_v20 = vadd.f32 %v11520_v10, %v317_v63  ;;  %v415_v24 = vadd.f32 %v11520_v10, %v318_v2  ;;  %v351_v61 = vld [vmem:[%s17537_s0 + $0x120] sm:$0xff]  ;;  %v352_v62 = vld [vmem:[%s17537_s0 + $0x128] sm:$0xff] }
 0x1d2   :  { %v416_v25 = vadd.f32 %v11520_v10, %v319_v3  ;;  %v417_v26 = vadd.f32 %v11520_v10, %v320_v4  ;;  %v418_v27 = vadd.f32 %v11520_v10, %v321_v5  ;;  %v419_v31 = vadd.f32 %v11520_v10, %v322_v6  ;;  %v353_v3 = vld [vmem:[%s17537_s0 + $0x130] sm:$0xff]  ;;  %v354_v4 = vld [vmem:[%s17537_s0 + $0x138] sm:$0xff]  ;;  %v355_v5 = vld [vmem:[%s17537_s0 + $0x140] sm:$0xff] }
 0x1d3   :  { %477 = vst.msk [vmem:[#allocation2 + $0x19] sm:$0xff] %vm151_vm3, %v412_v18  ;;  %478 = vst.msk [vmem:[#allocation2 + $0x21] sm:$0xff] %vm151_vm3, %v413_v19  ;;  %v420_v32 = vadd.f32 %v11520_v10, %v323_v7  ;;  %v421_v33 = vadd.f32 %v11520_v10, %v324_v8  ;;  %v422_v34 = vadd.f32 %v11520_v10, %v325_v9 }
 0x1d4   :  { %479 = vst.msk [vmem:[#allocation2 + $0x31] sm:$0xff] %vm151_vm3, %v414_v20  ;;  %480 = vst.msk [vmem:[#allocation2 + $0x39] sm:$0xff] %vm151_vm3, %v415_v24  ;;  %v423_v38 = vadd.f32 %v11520_v10, %v326_v11  ;;  %v424_v39 = vadd.f32 %v11520_v10, %v327_v12  ;;  %v425_v40 = vadd.f32 %v11520_v10, %v328_v13  ;;  %v356_v11 = vld [vmem:[%s17537_s0 + $0x148] sm:$0xff]  ;;  %v357_v12 = vld [vmem:[%s17537_s0 + $0x150] sm:$0xff] }
 0x1d5   :  { %481 = vst.msk [vmem:[#allocation2 + $0x49] sm:$0xff] %vm151_vm3, %v416_v25  ;;  %482 = vst.msk [vmem:[#allocation2 + $0x51] sm:$0xff] %vm151_vm3, %v417_v26  ;;  %v426_v41 = vadd.f32 %v11520_v10, %v329_v14  ;;  %v427_v45 = vadd.f32 %v11520_v10, %v330_v15  ;;  %v428_v46 = vadd.f32 %v11520_v10, %v331_v16  ;;  %v358_v13 = vld [vmem:[%s17537_s0 + $0x158] sm:$0xff]  ;;  %v359_v24 = vld [vmem:[%s17537_s0 + $0x160] sm:$0xff] }
 0x1d6   :  { %483 = vst.msk [vmem:[#allocation2 + $0x61] sm:$0xff] %vm151_vm3, %v418_v27  ;;  %484 = vst.msk [vmem:[#allocation2 + $0x69] sm:$0xff] %vm151_vm3, %v419_v31  ;;  %v429_v47 = vadd.f32 %v11520_v10, %v332_v21  ;;  %v11616_v51 = vrot.slane %v401_v17, %v404_v60  ;;  %v430_v52 = vadd.f32 %v11520_v10, %v333_v22  ;;  %v350_v60 = vld [vmem:[%s17537_s0 + $0x118] sm:$0xff]  ;;  %v360_v25 = vld [vmem:[%s17537_s0 + $0x168] sm:$0xff] }
 0x1d7   :  { %485 = vst.msk [vmem:[#allocation2 + $0x79] sm:$0xff] %vm151_vm3, %v420_v32  ;;  %486 = vst.msk [vmem:[#allocation2 + $0x81] sm:$0xff] %vm151_vm3, %v421_v33  ;;  %v431_v54 = vadd.f32 %v11520_v10, %v334_v23  ;;  %v432_v57 = vadd.f32 %v11520_v10, %v335_v28  ;;  %v433_v58 = vadd.f32 %v11520_v10, %v336_v29  ;;  %v361_v31 = vld [vmem:[%s17537_s0 + $0x170] sm:$0xff] }
 0x1d8   :  { %487 = vst.msk [vmem:[#allocation2 + $0x91] sm:$0xff] %vm151_vm3, %v422_v34  ;;  %488 = vst.msk [vmem:[#allocation2 + $0x99] sm:$0xff] %vm151_vm3, %v423_v38  ;;  %v434_v59 = vadd.f32 %v11520_v10, %v337_v30  ;;  %v435_v63 = vadd.f32 %v11520_v10, %v338_v35  ;;  %v436_v0 = vadd.f32 %v11520_v10, %v339_v36 }
 0x1d9   :  { %489 = vst.msk [vmem:[#allocation2 + $0xa9] sm:$0xff] %vm151_vm3, %v424_v39  ;;  %490 = vst.msk [vmem:[#allocation2 + $0xb1] sm:$0xff] %vm151_vm3, %v425_v40  ;;  %v437_v1 = vadd.f32 %v11520_v10, %v340_v37  ;;  %v438_v2 = vadd.f32 %v11520_v10, %v341_v42  ;;  %v439_v6 = vadd.f32 %v11520_v10, %v342_v43  ;;  %v362_v37 = vld [vmem:[%s17537_s0 + $0x178] sm:$0xff]  ;;  %v363_v40 = vld [vmem:[%s17537_s0 + $0x180] sm:$0xff] }
 0x1da   :  { %491 = vst.msk [vmem:[#allocation2 + $0xc1] sm:$0xff] %vm151_vm3, %v426_v41  ;;  %492 = vst.msk [vmem:[#allocation2 + $0xc9] sm:$0xff] %vm151_vm3, %v427_v45  ;;  %v440_v7 = vadd.f32 %v11520_v10, %v343_v44  ;;  %v441_v8 = vadd.f32 %v11520_v10, %v344_v48  ;;  %v442_v9 = vadd.f32 %v11520_v10, %v345_v49  ;;  %v671_v14 = vld [vmem:[#allocation2 + $0x1a] sm:$0xff]  ;;  %v672_v15 = vld [vmem:[#allocation2 + $0x22] sm:$0xff] }
 0x1db   :  { %493 = vst.msk [vmem:[#allocation2 + $0xd9] sm:$0xff] %vm151_vm3, %v428_v46  ;;  %494 = vst.msk [vmem:[#allocation2 + $0xe1] sm:$0xff] %vm151_vm3, %v429_v47  ;;  %v607_v16 = vld [vmem:[#allocation2 + $0x19] sm:$0xff]  ;;  %v443_v17 = vadd.f32 %v11520_v10, %v346_v50  ;;  %v444_v18 = vadd.f32 %v11616_v51, %v347_v55  ;;  %v445_v19 = vadd.f32 %v11616_v51, %v348_v53  ;;  %v608_v22 = vld [vmem:[#allocation2 + $0x21] sm:$0xff] }
 0x1dc   :  { %495 = vst.msk [vmem:[#allocation2 + $0xf1] sm:$0xff] %vm151_vm3, %v430_v52  ;;  %496 = vst.msk [vmem:[#allocation2 + $0xf9] sm:$0xff] %vm151_vm3, %v431_v54  ;;  %v446_v20 = vadd.f32 %v11616_v51, %v349_v56  ;;  %v11687_v21 = vpack.i.bf16 %v672_v15, %v671_v14  ;;  %v447_v23 = vadd.f32 %v11616_v51, %v350_v60  ;;  %v11703_v27 = vld [vmem:[#allocation2 + $0x30] sm:$0xff]  ;;  %v11705_v28 = vld [vmem:[#allocation2 + $0x38] sm:$0xff] }
 0x1dd   :  { %497 = vst.msk [vmem:[#allocation2 + $0x109] sm:$0xff] %vm151_vm3, %v432_v57  ;;  %498 = vst.msk [vmem:[#allocation2 + $0x111] sm:$0xff] %vm151_vm3, %v433_v58  ;;  %v448_v10 = vadd.f32 %v11616_v51, %v351_v61  ;;  %v11701_v26 = vpack.i.bf16 %v608_v22, %v607_v16  ;;  %v449_v29 = vadd.f32 %v11616_v51, %v352_v62  ;;  %v11718_v32 = vld [vmem:[#allocation2 + $0x18] sm:$0xff]  ;;  %v11720_v33 = vld [vmem:[#allocation2 + $0x20] sm:$0xff] }
 0x1de   :  { %499 = vst.msk [vmem:[#allocation2 + $0x121] sm:$0xff] %vm151_vm3, %v434_v59  ;;  %500 = vst.msk [vmem:[#allocation2 + $0x129] sm:$0xff] %vm151_vm3, %v435_v63  ;;  %v450_v30 = vadd.f32 %v11616_v51, %v353_v3  ;;  %9722 = vrot.lane.b32.xlu1 %v11687_v21, %s11073_s4  ;;  %v451_v34 = vadd.f32 %v11616_v51, %v354_v4  ;;  %v452_v35 = vadd.f32 %v11616_v51, %v355_v5  ;;  %v364_v41 = vld [vmem:[%s17537_s0 + $0x188] sm:$0xff]  ;;  %v365_v42 = vld [vmem:[%s17537_s0 + $0x190] sm:$0xff] }
 0x1df   :  { %501 = vst.msk [vmem:[#allocation2 + $0x139] sm:$0xff] %vm151_vm3, %v436_v0  ;;  %502 = vst.msk [vmem:[#allocation2 + $0x141] sm:$0xff] %vm151_vm3, %v437_v1  ;;  %v453_v36 = vadd.f32 %v11616_v51, %v356_v11  ;;  %9717 = vrot.lane.b32.xlu0 %v11701_v26, %s11074_s15  ;;  %v454_v38 = vadd.f32 %v11616_v51, %v357_v12  ;;  %v455_v39 = vadd.f32 %v11616_v51, %v358_v13  ;;  %v366_v46 = vld [vmem:[%s17537_s0 + $0x198] sm:$0xff]  ;;  %v367_v47 = vld [vmem:[%s17537_s0 + $0x1a0] sm:$0xff] }
 0x1e0   :  { %503 = vst.msk [vmem:[#allocation2 + $0x151] sm:$0xff] %vm151_vm3, %v438_v2  ;;  %504 = vst.msk [vmem:[#allocation2 + $0x159] sm:$0xff] %vm151_vm3, %v439_v6  ;;  %v11747_v43 = vpack.i.bf16 %v11705_v28, %v11703_v27  ;;  %v456_v44 = vadd.f32 %v11616_v51, %v359_v24  ;;  %v457_v45 = vadd.f32 %v11616_v51, %v360_v25  ;;  %v368_v48 = vld [vmem:[%s17537_s0 + $0x1a8] sm:$0xff]  ;;  %v799_v50 = vld [vmem:[#allocation2 + $0x31] sm:$0xff] }
 0x1e1   :  { %505 = vst.msk [vmem:[#allocation2 + $0x169] sm:$0xff] %vm151_vm3, %v440_v7  ;;  %506 = vst.msk [vmem:[#allocation2 + $0x171] sm:$0xff] %vm151_vm3, %v441_v8  ;;  %v9726_v49 = vpack.i.bf16 %v11720_v33, %v11718_v32  ;;  %v800_v52 = vld [vmem:[#allocation2 + $0x39] sm:$0xff]  ;;  %v458_v54 = vadd.f32 %v11616_v51, %v361_v31  ;;  %v459_v55 = vadd.f32 %v11616_v51, %v362_v37  ;;  %v369_v53 = vld [vmem:[%s17537_s0 + $0x1b0] sm:$0xff] }
 0x1e2   :  { %507 = vst.msk [vmem:[#allocation2 + $0x181] sm:$0xff] %vm151_vm3, %v442_v9  ;;  %508 = vst.msk [vmem:[#allocation2 + $0x189] sm:$0xff] %vm151_vm3, %v443_v17  ;;  %9732 = vrot.lane.b32.xlu1 %v11747_v43, %s11078_s22  ;;  %v460_v56 = vadd.f32 %v11616_v51, %v363_v40  ;;  %v461_v57 = vadd.f32 %v11616_v51, %v364_v41  ;;  %v462_v58 = vadd.f32 %v11616_v51, %v365_v42  ;;  %v370_v59 = vld [vmem:[%s17537_s0 + $0x1b8] sm:$0xff]  ;;  %v371_v60 = vld [vmem:[%s17537_s0 + $0x1c0] sm:$0xff] }
 0x1e3   :  { %509 = vst.msk [vmem:[#allocation2 + $0x1c9] sm:$0xff] %vm151_vm3, %v444_v18  ;;  %510 = vst.msk [vmem:[#allocation2 + $0x1d1] sm:$0xff] %vm151_vm3, %v445_v19  ;;  %9727 = vrot.lane.b32.xlu0 %v9726_v49, %s11078_s22  ;;  %v463_v61 = vadd.f32 %v11616_v51, %v366_v46  ;;  %v464_v62 = vadd.f32 %v11616_v51, %v367_v47  ;;  %v372_v63 = vld [vmem:[%s17537_s0 + $0x1c8] sm:$0xff]  ;;  %v373_v0 = vld [vmem:[%s17537_s0 + $0x1d0] sm:$0xff]  ;;  %v9741_v2 = vpack.i.bf16 %v800_v52, %v799_v50 }
 0x1e4   :  { %511 = vst.msk [vmem:[#allocation2 + $0x1e1] sm:$0xff] %vm151_vm3, %v446_v20  ;;  %512 = vst.msk [vmem:[#allocation2 + $0x1e9] sm:$0xff] %vm151_vm3, %v447_v23  ;;  %v374_v1 = vld [vmem:[%s17537_s0 + $0x1d8] sm:$0xff]  ;;  %v465_v3 = vadd.f32 %v11616_v51, %v368_v48  ;;  %v466_v4 = vadd.f32 %v11616_v51, %v369_v53  ;;  %v375_v5 = vld [vmem:[%s17537_s0 + $0x1e0] sm:$0xff]  ;;  %v467_v11 = vadd.f32 %v11616_v51, %v370_v59 }
 0x1e5   :  { %513 = vst.msk [vmem:[#allocation2 + $0x1f9] sm:$0xff] %vm151_vm3, %v448_v10  ;;  %514 = vst.msk [vmem:[#allocation2 + $0x201] sm:$0xff] %vm151_vm3, %v449_v29  ;;  %v376_v6 = vld [vmem:[%s17537_s0 + $0x1e8] sm:$0xff]  ;;  %v377_v7 = vld [vmem:[%s17537_s0 + $0x1f0] sm:$0xff]  ;;  %v468_v12 = vadd.f32 %v11616_v51, %v371_v60  ;;  %v469_v14 = vadd.f32 %v11616_v51, %v372_v63  ;;  %v470_v15 = vadd.f32 %v11616_v51, %v373_v0 }
 0x1e6   :  { %515 = vst.msk [vmem:[#allocation2 + $0x211] sm:$0xff] %vm151_vm3, %v450_v30  ;;  %516 = vst.msk [vmem:[#allocation2 + $0x219] sm:$0xff] %vm151_vm3, %v451_v34  ;;  %v863_v8 = vld [vmem:[#allocation2 + $0x32] sm:$0xff]  ;;  %v864_v9 = vld [vmem:[#allocation2 + $0x3a] sm:$0xff]  ;;  %9742 = vrot.lane.b32.xlu1 %v9741_v2, %s11079_s24  ;;  %v471_v16 = vadd.f32 %v11616_v51, %v374_v1  ;;  %v472_v17 = vadd.f32 %v11616_v51, %v375_v5  ;;  %v473_v18 = vadd.f32 %v11616_v51, %v376_v6 }
 0x1e7   :  { %517 = vst.msk [vmem:[#allocation2 + $0x229] sm:$0xff] %vm151_vm3, %v452_v35  ;;  %518 = vst.msk [vmem:[#allocation2 + $0x231] sm:$0xff] %vm151_vm3, %v453_v36  ;;  %v378_v13 = vld [vmem:[%s17537_s0 + $0x1f8] sm:$0xff]  ;;  %9737 = vrot.lane.b32.xlu0 %v11701_v26, %s11079_s24  ;;  %v9751_v19 = vpack.i.bf16 %v864_v9, %v863_v8  ;;  %v474_v20 = vadd.f32 %v11616_v51, %v377_v7  ;;  %v11837_v23 = vld [vmem:[#allocation2 + $0x48] sm:$0xff]  ;;  %s11080_s0 = smov 20   ;;  %v11898_v9 = vpop.permute.xlu1 %9687 }
 0x1e8   :  { %519 = vst.msk [vmem:[#allocation2 + $0x241] sm:$0xff] %vm151_vm3, %v454_v38  ;;  %520 = vst.msk [vmem:[#allocation2 + $0x249] sm:$0xff] %vm151_vm3, %v455_v39  ;;  %v475_v22 = vadd.f32 %v11616_v51, %v378_v13  ;;  %v11839_v10 = vld [vmem:[#allocation2 + $0x50] sm:$0xff]  ;;  %v10961_v26 = vld [vmem:[%s17543_s6] sm:$0xff]  }
 0x1e9   :  { %521 = vst.msk [vmem:[#allocation2 + $0x259] sm:$0xff] %vm151_vm3, %v456_v44  ;;  %522 = vst.msk [vmem:[#allocation2 + $0x261] sm:$0xff] %vm151_vm3, %v457_v45  ;;  %v9761_v51 = vpack.i.bf16 %v11839_v10, %v11837_v23  ;;  %v992_v24 = vld [vmem:[#allocation2 + $0x49] sm:$0xff]  ;;  %v993_v25 = vld [vmem:[#allocation2 + $0x51] sm:$0xff]  ;;  %9145 = vmatprep.subr.bf16.mxu1 %v10961_v26 }
 0x1ea   :  { %523 = vst.msk [vmem:[#allocation2 + $0x271] sm:$0xff] %vm151_vm3, %v458_v54  ;;  %524 = vst.msk [vmem:[#allocation2 + $0x279] sm:$0xff] %vm151_vm3, %v459_v55  ;;  %9752 = vrot.lane.b32.xlu1 %v9751_v19, %s11080_s0  ;;  %v10962_v29 = vld [vmem:[%s17543_s6 + $0x8] sm:$0xff]   ;;  %9146 = vmatpush3.bf16.msra.mxu1 %v10961_v26  ;;  %v10963_v30 = vld [vmem:[%s17543_s6 + $0x10] ss:$0 sps:$4 sm:$0x33]  }
 0x1eb   :  { %525 = vst.msk [vmem:[#allocation2 + $0x289] sm:$0xff] %vm151_vm3, %v460_v56  ;;  %526 = vst.msk [vmem:[#allocation2 + $0x291] sm:$0xff] %vm151_vm3, %v461_v57  ;;  %9747 = vrot.lane.b32.xlu0 %v11687_v21, %s11080_s0  ;;  %v9771_v21 = vpack.i.bf16 %v993_v25, %v992_v24  ;;  %9147 = vmatprep.subr.bf16.mxu1 %v10962_v29  ;;  %v3836_v31 = vsel %vm3834_vm6, %v10963_v30, 0  ;;  %v1056_v34 = vld [vmem:[#allocation2 + $0x4a] sm:$0xff]  ;;  %v1057_v35 = vld [vmem:[#allocation2 + $0x52] sm:$0xff] }
 0x1ec   :  { %527 = vst.msk [vmem:[#allocation2 + $0x2a1] sm:$0xff] %vm151_vm3, %v462_v58  ;;  %528 = vst.msk [vmem:[#allocation2 + $0x2a9] sm:$0xff] %vm151_vm3, %v463_v61  ;;  %v9786_v36 = vpack.i.bf16 %v1057_v35, %v1056_v34  ;;  %v739_v37 = vld [vmem:[#allocation2 + $0x60] sm:$0xff]  ;;  %v740_v38 = vld [vmem:[#allocation2 + $0x68] sm:$0xff] }
 0x1ed   :  { %529 = vst.msk [vmem:[#allocation2 + $0x2b9] sm:$0xff] %vm151_vm3, %v464_v62  ;;  %530 = vst.msk [vmem:[#allocation2 + $0x2c1] sm:$0xff] %vm151_vm3, %v465_v3  ;;  %v9811_v39 = vpack.i.bf16 %v740_v38, %v739_v37  ;;  %v803_v40 = vld [vmem:[#allocation2 + $0x61] sm:$0xff]  ;;  %v804_v41 = vld [vmem:[#allocation2 + $0x69] sm:$0xff] }
 0x1ee   :  { %531 = vst.msk [vmem:[#allocation2 + $0x2d1] sm:$0xff] %vm151_vm3, %v466_v4  ;;  %532 = vst.msk [vmem:[#allocation2 + $0x2d9] sm:$0xff] %vm151_vm3, %v467_v11  ;;  %9762 = vrot.lane.b32.xlu1 %v9761_v51, %s11075_s16  ;;  %9148 = vmatpush3.bf16.msra.mxu1 %v10962_v29  ;;  %v9821_v42 = vpack.i.bf16 %v804_v41, %v803_v40  ;;  %v868_v44 = vld [vmem:[#allocation2 + $0x6a] sm:$0xff]  ;;  %v932_v46 = vld [vmem:[#allocation2 + $0x78] sm:$0xff] }
 0x1ef   :  { %533 = vst.msk [vmem:[#allocation2 + $0x2e9] sm:$0xff] %vm151_vm3, %v468_v12  ;;  %534 = vst.msk [vmem:[#allocation2 + $0x2f1] sm:$0xff] %vm151_vm3, %v469_v14  ;;  %9757 = vrot.lane.b32.xlu0 %v11747_v43, %s11075_s16  ;;  %9665 = vmatprep.subr.msk.bf16.mxu1 %vm3834_vm6, %v10963_v30  ;;  %v867_v43 = vld [vmem:[#allocation2 + $0x62] sm:$0xff]  ;;  %v996_v49 = vld [vmem:[#allocation2 + $0x79] sm:$0xff]  ;;  %v11903_v14 = vpop.permute.xlu1 %9692 }
 0x1f0   :  { %535 = vst.msk [vmem:[#allocation2 + $0x301] sm:$0xff] %vm151_vm3, %v470_v15  ;;  %536 = vst.msk [vmem:[#allocation2 + $0x309] sm:$0xff] %vm151_vm3, %v471_v16  ;;  %v9831_v45 = vpack.i.bf16 %v868_v44, %v867_v43  ;;  %v933_v47 = vld [vmem:[#allocation2 + $0x80] sm:$0xff]  ;;  %v743_v56 = vld [vmem:[#allocation2 + $0x90] sm:$0xff]  ;;  %v9683_v15 = vpop.permute.xlu0 %9682 }
 0x1f1   :  { %537 = vst.msk [vmem:[#allocation2 + $0x319] sm:$0xff] %vm151_vm3, %v472_v17  ;;  %538 = vst.msk [vmem:[#allocation2 + $0x321] sm:$0xff] %vm151_vm3, %v473_v18  ;;  %v9841_v48 = vpack.i.bf16 %v933_v47, %v932_v46  ;;  %v997_v50 = vld [vmem:[#allocation2 + $0x81] sm:$0xff]  ;;  %v744_v57 = vld [vmem:[#allocation2 + $0x98] sm:$0xff]  ;;  %v9685_v43 = vunpack.i.h.bf16 %v9683_v15  ;;  %v9684_v44 = vunpack.i.l.bf16 %v9683_v15 }
 0x1f2   :  { %539 = vst.msk [vmem:[#allocation2 + $0x331] sm:$0xff] %vm151_vm3, %v474_v20  ;;  %540 = vst.msk [vmem:[#allocation2 + $0x339] sm:$0xff] %vm151_vm3, %v475_v22  ;;  %9772 = vrot.lane.b32.xlu1 %v9771_v21, %s11072_s3  ;;  %9150 = vmatpush3.bf16.msra.mxu1 %v3836_v31  ;;  %v9851_v52 = vpack.i.bf16 %v997_v50, %v996_v49  ;;  %v1060_v54 = vld [vmem:[#allocation2 + $0x7a] sm:$0xff]  ;;  %v1061_v55 = vld [vmem:[#allocation2 + $0x82] sm:$0xff]  ;;  %v9891_v58 = vpack.i.bf16 %v744_v57, %v743_v56  ;;  %v9695_v50 = vunpack.i.h.bf16 %v11903_v14 }
 0x1f3   :  { %9767 = vrot.lane.b32.xlu0 %v9741_v2, %s11072_s3  ;;  %v9866_v53 = vpack.i.bf16 %v1061_v55, %v1060_v54  ;;  %v807_v59 = vld [vmem:[#allocation2 + $0x91] sm:$0xff]  ;;  %v808_v60 = vld [vmem:[#allocation2 + $0x99] sm:$0xff]  ;;  %v936_v1 = vld [vmem:[#allocation2 + $0xa8] sm:$0xff]  ;;  %v11908_v20 = vpop.permute.xlu1 %9697 }
 0x1f4   :  { %v9901_v61 = vpack.i.bf16 %v808_v60, %v807_v59  ;;  %v871_v62 = vld [vmem:[#allocation2 + $0x92] sm:$0xff]  ;;  %v872_v63 = vld [vmem:[#allocation2 + $0x9a] sm:$0xff]  ;;  %v1000_v4 = vld [vmem:[#allocation2 + $0xa9] sm:$0xff]  ;;  %v11910_v22 = vpop.permute.xlu0 %9707 }
 0x1f5   :  { %v9911_v0 = vpack.i.bf16 %v872_v63, %v871_v62  ;;  %v1001_v5 = vld [vmem:[#allocation2 + $0xb1] sm:$0xff]  ;;  %v747_v12 = vld [vmem:[#allocation2 + $0xc0] sm:$0xff]  ;;  %v748_v13 = vld [vmem:[#allocation2 + $0xc8] sm:$0xff] }
 0x1f6   :  { %9782 = vrot.lane.b32.xlu1 %v9741_v2, %s11074_s15  ;;  %v937_v2 = vld [vmem:[#allocation2 + $0xb0] sm:$0xff]  ;;  %v9931_v6 = vpack.i.bf16 %v1001_v5, %v1000_v4  ;;  %v9971_v16 = vpack.i.bf16 %v748_v13, %v747_v12  ;;  %v811_v17 = vld [vmem:[#allocation2 + $0xc1] sm:$0xff]  ;;  %v940_v26 = vld [vmem:[#allocation2 + $0xd8] sm:$0xff] }
 0x1f7   :  { %9777 = vrot.lane.b32.xlu0 %v9751_v19, %s11076_s17  ;;  %v9921_v3 = vpack.i.bf16 %v937_v2, %v936_v1  ;;  %v1064_v7 = vld [vmem:[#allocation2 + $0xaa] sm:$0xff]  ;;  %v1065_v8 = vld [vmem:[#allocation2 + $0xb2] sm:$0xff]  ;;  %v941_v29 = vld [vmem:[#allocation2 + $0xe0] sm:$0xff] }
 0x1f8   :  { %v9946_v11 = vpack.i.bf16 %v1065_v8, %v1064_v7  ;;  %v812_v18 = vld [vmem:[#allocation2 + $0xc9] sm:$0xff]  ;;  %v11918_v30 = vpop.permute.xlu0 %9712  ;;  %v10001_v31 = vpack.i.bf16 %v941_v29, %v940_v26  ;;  %v1004_v34 = vld [vmem:[#allocation2 + $0xd9] sm:$0xff]  ;;  %v1005_v35 = vld [vmem:[#allocation2 + $0xe1] sm:$0xff] }
 0x1f9   :  { %v876_v24 = vld [vmem:[#allocation2 + $0xca] sm:$0xff]  ;;  %v11924_v37 = vpack.i.bf16 %v1005_v35, %v1004_v34  ;;  %v1068_v41 = vld [vmem:[#allocation2 + $0xda] sm:$0xff]  ;;  %v879_v1 = vld [vmem:[#allocation2 + $0xf2] sm:$0xff] }
 0x1fa   :  { %9792 = vrot.lane.b32.xlu1 %v9771_v21, %s11074_s15  ;;  %v542_v46 = vld [vmem:[#allocation2 + $0x8] sm:$0xff]  ;;  %v541_v47 = vld [vmem:[#allocation2] sm:$0xff]  ;;  %v751_v59 = vld [vmem:[#allocation2 + $0xf0] sm:$0xff] }
 0x1fb   :  { %9787 = vrot.lane.b32.xlu0 %v9786_v36, %s11076_s17  ;;  %v3167_v54 = vsel %vm151_vm3, %v542_v46, %v9685_v43  ;;  %v3166_v55 = vsel %vm151_vm3, %v541_v47, %v9684_v44  ;;  %v752_v60 = vld [vmem:[#allocation2 + $0xf8] sm:$0xff]  ;;  %v944_v7 = vld [vmem:[#allocation2 + $0x108] sm:$0xff]  ;;  %v945_v8 = vld [vmem:[#allocation2 + $0x110] sm:$0xff] }
 0x1fc   :  { %v3232_v62 = vsel %vm3230_vm7, %v3167_v54, %v9695_v50  ;;  %v815_v63 = vld [vmem:[#allocation2 + $0xf1] sm:$0xff]  ;;  %v11962_v5 = vpack.i.bf16 %v752_v60, %v751_v59 }
 0x1fe   :  { %9802 = vrot.lane.b32.xlu1 %v9786_v36, %s11073_s4 }
 0x1ff   :  { %9797 = vrot.lane.b32.xlu0 %v9751_v19, %s11073_s4  ;;  %v9981_v19 = vpack.i.bf16 %v812_v18, %v811_v17  ;;  %v11979_v18 = vpack.i.bf16 %v945_v8, %v944_v7 }
 0x202   :  { %9812 = vrot.lane.b32.xlu1 %v9811_v39, %s11078_s22 }
 0x203   :  { %9807 = vrot.lane.b32.xlu0 %v9761_v51, %s11078_s22  ;;  %v875_v51 = vld [vmem:[#allocation2 + $0xc2] sm:$0xff] }
 0x204   :  { %v9991_v25 = vpack.i.bf16 %v876_v24, %v875_v51 }
 0x206   :  { %9822 = vrot.lane.b32.xlu1 %v9821_v42, %s11079_s24 }
 0x207   :  { %9817 = vrot.lane.b32.xlu0 %v9771_v21, %s11079_s24  ;;  %v11915_v21 = vpop.permute.xlu1 %9702 }
 0x20a   :  { %9832 = vrot.lane.b32.xlu1 %v9831_v45, %s11080_s0 }
 0x20b   :  { %9827 = vrot.lane.b32.xlu0 %v9786_v36, %s11080_s0 }
 0x20e   :  { %9842 = vrot.lane.b32.xlu1 %v9841_v48, %s11075_s16 }
 0x20f   :  { %9837 = vrot.lane.b32.xlu0 %v9811_v39, %s11075_s16 }
 0x212   :  { %9852 = vrot.lane.b32.xlu1 %v9851_v52, %s11072_s3 }
 0x213   :  { %9847 = vrot.lane.b32.xlu0 %v9821_v42, %s11072_s3 }
 0x216   :  { %9862 = vrot.lane.b32.xlu1 %v9821_v42, %s11074_s15  ;;  %v1069_v42 = vld [vmem:[#allocation2 + $0xe2] sm:$0xff] }
 0x217   :  { %9857 = vrot.lane.b32.xlu0 %v9831_v45, %s11076_s17  ;;  %v11939_v49 = vpack.i.bf16 %v1069_v42, %v1068_v41 }
 0x21a   :  { %9872 = vrot.lane.b32.xlu1 %v9851_v52, %s11074_s15 }
 0x21b   :  { %9867 = vrot.lane.b32.xlu0 %v9866_v53, %s11076_s17 }
 0x21e   :  { %9882 = vrot.lane.b32.xlu1 %v9866_v53, %s11073_s4 }
 0x21f   :  { %9877 = vrot.lane.b32.xlu0 %v9831_v45, %s11073_s4 }
 0x222   :  { %9892 = vrot.lane.b32.xlu1 %v9891_v58, %s11078_s22 }
 0x223   :  { %9887 = vrot.lane.b32.xlu0 %v9841_v48, %s11078_s22 }
 0x226   :  { %9902 = vrot.lane.b32.xlu1 %v9901_v61, %s11079_s24 }
 0x227   :  { %9897 = vrot.lane.b32.xlu0 %v9851_v52, %s11079_s24  ;;  %v9694_v52 = vunpack.i.l.bf16 %v11903_v14 }
 0x22a   :  { %9912 = vrot.lane.b32.xlu1 %v9911_v0, %s11080_s0 }
 0x22b   :  { %9907 = vrot.lane.b32.xlu0 %v9866_v53, %s11080_s0 }
 0x22e   :  { %9922 = vrot.lane.b32.xlu1 %v9921_v3, %s11075_s16 }
 0x22f   :  { %9917 = vrot.lane.b32.xlu0 %v9891_v58, %s11075_s16 }
 0x232   :  { %9932 = vrot.lane.b32.xlu1 %v9931_v6, %s11072_s3 }
 0x233   :  { %9927 = vrot.lane.b32.xlu0 %v9901_v61, %s11072_s3 }
 0x236   :  { %9942 = vrot.lane.b32.xlu1 %v9901_v61, %s11074_s15  ;;  %v3231_v61 = vsel %vm3230_vm7, %v3166_v55, %v9694_v52 }
 0x237   :  { %9937 = vrot.lane.b32.xlu0 %v9911_v0, %s11076_s17 }
 0x23a   :  { %9952 = vrot.lane.b32.xlu1 %v9931_v6, %s11074_s15 }
 0x23b   :  { %9947 = vrot.lane.b32.xlu0 %v9946_v11, %s11076_s17 }
 0x23e   :  { %9962 = vrot.lane.b32.xlu1 %v9946_v11, %s11073_s4 }
 0x23f   :  { %9957 = vrot.lane.b32.xlu0 %v9911_v0, %s11073_s4  ;;  %v816_v0 = vld [vmem:[#allocation2 + $0xf9] sm:$0xff] }
 0x242   :  { %9972 = vrot.lane.b32.xlu1 %v9971_v16, %s11078_s22 }
 0x243   :  { %9967 = vrot.lane.b32.xlu0 %v9921_v3, %s11078_s22 }
 0x246   :  { %9982 = vrot.lane.b32.xlu1 %v9981_v19, %s11079_s24 }
 0x247   :  { %9977 = vrot.lane.b32.xlu0 %v9931_v6, %s11079_s24  ;;  %v880_v6 = vld [vmem:[#allocation2 + $0xfa] sm:$0xff] }
 0x24a   :  { %9992 = vrot.lane.b32.xlu1 %v9991_v25, %s11080_s0 }
 0x24b   :  { %9987 = vrot.lane.b32.xlu0 %v9946_v11, %s11080_s0 }
 0x24e   :  { %10002 = vrot.lane.b32.xlu1 %v10001_v31, %s11075_s16 }
 0x24f   :  { %9997 = vrot.lane.b32.xlu0 %v9971_v16, %s11075_s16 }
 0x250   :  { %v11922_v36 = vpop.permute.xlu1 %9722 }
 0x251   :  { %v9718_v38 = vpop.permute.xlu0 %9717  ;;  %v9725_v2 = vunpack.i.h.bf16 %v11922_v36  ;;  %v9724_v3 = vunpack.i.l.bf16 %v11922_v36 }
 0x252   :  { %10012 = vrot.lane.b32.xlu1 %v11924_v37, %s11072_s3  ;;  %v9720_v56 = vunpack.i.h.bf16 %v9718_v38  ;;  %v9719_v57 = vunpack.i.l.bf16 %v9718_v38 }
 0x253   :  { %10007 = vrot.lane.b32.xlu0 %v9981_v19, %s11072_s3 }
 0x254   :  { %v11929_v39 = vpop.permute.xlu1 %9732  ;;  %v3168_v11 = vsel %vm151_vm3, %v11718_v32, %v9719_v57  ;;  %v3169_v12 = vsel %vm151_vm3, %v11720_v33, %v9720_v56  ;;  %v11975_v32 = vpack.i.bf16 %v816_v0, %v815_v63  ;;  %v11977_v33 = vpack.i.bf16 %v880_v6, %v879_v1 }
 0x255   :  { %v11931_v40 = vpop.permute.xlu0 %9727  ;;  %v9735_v13 = vunpack.i.h.bf16 %v11929_v39  ;;  %v9734_v14 = vunpack.i.l.bf16 %v11929_v39  ;;  %v3234_v51 = vsel %vm3230_vm7, %v3169_v12, %v9725_v2 }
 0x256   :  { %10022 = vrot.lane.b32.xlu1 %v9981_v19, %s11074_s15  ;;  %v9730_v16 = vunpack.i.h.bf16 %v11931_v40  ;;  %v9729_v17 = vunpack.i.l.bf16 %v11931_v40  ;;  %v3233_v19 = vsel %vm3230_vm7, %v3168_v11, %v9724_v3 }
 0x257   :  { %10017 = vrot.lane.b32.xlu0 %v9991_v25, %s11076_s17  ;;  %v3298_v29 = vsel %vm3295_vm8, %v3233_v19, %v9734_v14  ;;  %v1009_v14 = vld [vmem:[#allocation2 + $0x111] sm:$0xff] }
 0x258   :  { %v11935_v45 = vpop.permute.xlu1 %9742  ;;  %v3297_v38 = vsel %vm3295_vm8, %v3232_v62, %v9730_v16  ;;  %v3296_v39 = vsel %vm3295_vm8, %v3231_v61, %v9729_v17 }
 0x259   :  { %v11937_v48 = vpop.permute.xlu0 %9737  ;;  %v9745_v42 = vunpack.i.h.bf16 %v11935_v45  ;;  %v9744_v43 = vunpack.i.l.bf16 %v11935_v45 }
 0x25a   :  { %10032 = vrot.lane.b32.xlu1 %v11924_v37, %s11074_s15  ;;  %v9740_v24 = vunpack.i.h.bf16 %v11937_v48 }
 0x25b   :  { %10027 = vrot.lane.b32.xlu0 %v11939_v49, %s11076_s17  ;;  %v3363_v1 = vsel %vm3360_vm9, %v3298_v29, %v9744_v43  ;;  %v756_v43 = vld [vmem:[#allocation2 + $0x128] sm:$0xff] }
 0x25c   :  { %v11949_v53 = vpop.permute.xlu1 %9752 }
 0x25d   :  { %v11951_v58 = vpop.permute.xlu0 %9747  ;;  %v9755_v50 = vunpack.i.h.bf16 %v11949_v53  ;;  %v9754_v52 = vunpack.i.l.bf16 %v11949_v53 }
 0x25e   :  { %10042 = vrot.lane.b32.xlu1 %v11939_v49, %s11073_s4  ;;  %v9750_v34 = vunpack.i.h.bf16 %v11951_v58  ;;  %v9749_v35 = vunpack.i.l.bf16 %v11951_v58 }
 0x25f   :  { %10037 = vrot.lane.b32.xlu0 %v9991_v25, %s11073_s4  ;;  %v9739_v25 = vunpack.i.l.bf16 %v11937_v48  ;;  %v3362_v48 = vsel %vm3360_vm9, %v3297_v38, %v9740_v24  ;;  %v3428_v7 = vsel %vm3425_vm10, %v3363_v1, %v9754_v52  ;;  %v1073_v38 = vld [vmem:[#allocation2 + $0x112] sm:$0xff] }
 0x260   :  { %v11960_v4 = vpop.permute.xlu1 %9762  ;;  %v3427_v56 = vsel %vm3425_vm10, %v3362_v48, %v9750_v34  ;;  %v883_v48 = vld [vmem:[#allocation2 + $0x122] sm:$0xff] }
 0x261   :  { %v9758_v15 = vpop.permute.xlu0 %9757  ;;  %v3361_v47 = vsel %vm3360_vm9, %v3296_v39, %v9739_v25  ;;  %v9765_v45 = vunpack.i.h.bf16 %v11960_v4  ;;  %v9764_v57 = vunpack.i.l.bf16 %v11960_v4 }
 0x262   :  { %10052 = vrot.lane.b32.xlu1 %v11962_v5, %s11078_s22  ;;  %v9760_v40 = vunpack.i.h.bf16 %v9758_v15  ;;  %v9759_v41 = vunpack.i.l.bf16 %v9758_v15  ;;  %v3426_v55 = vsel %vm3425_vm10, %v3361_v47, %v9749_v35  ;;  %v820_v47 = vld [vmem:[#allocation2 + $0x129] sm:$0xff] }
 0x263   :  { %10047 = vrot.lane.b32.xlu0 %v10001_v31, %s11078_s22  ;;  %v3299_v31 = vsel %vm3295_vm8, %v3234_v51, %v9735_v13  ;;  %v1008_v13 = vld [vmem:[#allocation2 + $0x109] sm:$0xff] }
 0x264   :  { %v9773_v26 = vpop.permute.xlu1 %9772  ;;  %v3492_v59 = vsel %vm3490_vm11, %v3427_v56, %v9760_v40  ;;  %v3364_v2 = vsel %vm3360_vm9, %v3299_v31, %v9745_v42  ;;  %v12034_v29 = vpack.i.bf16 %v1009_v14, %v1008_v13  ;;  %v948_v56 = vld [vmem:[#allocation2 + $0x138] sm:$0xff] }
 0x265   :  { %v9768_v36 = vpop.permute.xlu0 %9767  ;;  %v9775_v53 = vunpack.i.h.bf16 %v9773_v26  ;;  %v9774_v62 = vunpack.i.l.bf16 %v9773_v26  ;;  %v3429_v8 = vsel %vm3425_vm10, %v3364_v2, %v9755_v50 }
 0x266   :  { %10062 = vrot.lane.b32.xlu1 %v11975_v32, %s11079_s24  ;;  %v9770_v44 = vunpack.i.h.bf16 %v9768_v36  ;;  %v9769_v46 = vunpack.i.l.bf16 %v9768_v36  ;;  %v3494_v15 = vsel %vm3490_vm11, %v3429_v8, %v9765_v45  ;;  %v1072_v36 = vld [vmem:[#allocation2 + $0x10a] sm:$0xff]  ;;  %v949_v45 = vld [vmem:[#allocation2 + $0x140] sm:$0xff] }
 0x267   :  { %10057 = vrot.lane.b32.xlu0 %v11924_v37, %s11079_s24  ;;  %v3491_v37 = vsel %vm3490_vm11, %v3426_v55, %v9759_v41  ;;  %v3559_v51 = vsel %vm3555_vm12, %v3494_v15, %v9775_v53  ;;  %v12049_v41 = vpack.i.bf16 %v1073_v38, %v1072_v36  ;;  %v884_v55 = vld [vmem:[#allocation2 + $0x12a] sm:$0xff] }
 0x268   :  { %v12001_v54 = vpop.permute.xlu1 %9782  ;;  %v3556_v63 = vsel %vm3555_vm12, %v3491_v37, %v9769_v46  ;;  %v3557_v0 = vsel %vm3555_vm12, %v3492_v59, %v9770_v44  ;;  %v819_v46 = vld [vmem:[#allocation2 + $0x121] sm:$0xff] }
 0x269   :  { %v9778_v58 = vpop.permute.xlu0 %9777 }
 0x26a   :  { %v9780_v60 = vunpack.i.h.bf16 %v9778_v58  ;;  %v9779_v61 = vunpack.i.l.bf16 %v9778_v58  ;;  %10072 = vrot.lane.b32.xlu1 %v11977_v33, %s11080_s0  ;;  %v9784_v58 = vunpack.i.l.bf16 %v12001_v54 }
 0x26b   :  { %10067 = vrot.lane.b32.xlu0 %v11939_v49, %s11080_s0  ;;  %v3493_v49 = vsel %vm3490_vm11, %v3428_v7, %v9764_v57  ;;  %v9785_v57 = vunpack.i.h.bf16 %v12001_v54 }
 0x26c   :  { %v3621_v3 = vsel %vm3620_vm13, %v3556_v63, %v9779_v61  ;;  %v3622_v4 = vsel %vm3620_vm13, %v3557_v0, %v9780_v60  ;;  %v12019_v6 = vpop.permute.xlu1 %9792  ;;  %v3558_v19 = vsel %vm3555_vm12, %v3493_v49, %v9774_v62  ;;  %v12071_v63 = vpack.i.bf16 %v820_v47, %v819_v46 }
 0x26d   :  { %v9788_v11 = vpop.permute.xlu0 %9787  ;;  %v3685_v12 = vpack.c.bf16 %v3622_v4, %v3621_v3  ;;  %v9795_v50 = vunpack.i.h.bf16 %v12019_v6  ;;  %v9794_v52 = vunpack.i.l.bf16 %v12019_v6  ;;  %v12073_v3 = vpack.i.bf16 %v884_v55, %v883_v48 }
 0x26e   :  { %v9790_v16 = vunpack.i.h.bf16 %v9788_v11  ;;  %v9789_v17 = vunpack.i.l.bf16 %v9788_v11  ;;  %10082 = vrot.lane.b32.xlu1 %v11979_v18, %s11075_s16  ;;  %v12075_v4 = vpack.i.bf16 %v949_v45, %v948_v56  ;;  %v3171_v8 = vsel %vm151_vm3, %v11705_v28, %v9785_v57 }
 0x26f   :  { %10077 = vrot.lane.b32.xlu0 %v11962_v5, %s11075_s16  ;;  %9151 = vmatprep.mubr.msk.bf16.mxu1 %vm3737_vm14, %v3685_v12  ;;  %v3173_v54 = vsel %vm151_vm3, %v11839_v10, %v9795_v50  ;;  %v3170_v11 = vsel %vm151_vm3, %v11703_v27, %v9784_v58 }
 0x270   :  { %v3623_v24 = vsel %vm3620_vm13, %v3558_v19, %v9789_v17  ;;  %v3624_v25 = vsel %vm3620_vm13, %v3559_v51, %v9790_v16  ;;  %v9803_v26 = vpop.permute.xlu1 %9802 }
 0x271   :  { %v3686_v31 = vpack.c.bf16 %v3624_v25, %v3623_v24  ;;  %v9798_v34 = vpop.permute.xlu0 %9797  ;;  %v9805_v37 = vunpack.i.h.bf16 %v9803_v26  ;;  %v9804_v59 = vunpack.i.l.bf16 %v9803_v26 }
 0x272   :  { %10092 = vrot.lane.b32.xlu1 %v12034_v29, %s11072_s3  ;;  %v9800_v60 = vunpack.i.h.bf16 %v9798_v34  ;;  %v9799_v61 = vunpack.i.l.bf16 %v9798_v34 }
 0x273   :  { %10087 = vrot.lane.b32.xlu0 %v11975_v32, %s11072_s3  ;;  %9152 = vmatmul.mubr.msk.bf16.vlgmr.msra.gmra.mrb[4].mxu1 %vm3737_vm14, %v3686_v31  ;;  %v3238_v13 = vsel %vm3230_vm7, %v3173_v54, %v9805_v37  ;;  %v1013_v54 = vld [vmem:[#allocation2 + $0x141] sm:$0xff] }
 0x274   :  { %v9813_v5 = vpop.permute.xlu1 %9812  ;;  %v3235_v10 = vsel %vm3230_vm7, %v3170_v11, %v9799_v61 }
 0x275   :  { %v9808_v35 = vpop.permute.xlu0 %9807  ;;  %v9815_v0 = vunpack.i.h.bf16 %v9813_v5  ;;  %v9814_v1 = vunpack.i.l.bf16 %v9813_v5 }
 0x276   :  { %10102 = vrot.lane.b32.xlu1 %v11975_v32, %s11074_s15  ;;  %v755_v32 = vld [vmem:[#allocation2 + $0x120] sm:$0xff]  ;;  %v9810_v6 = vunpack.i.h.bf16 %v9808_v35  ;;  %v9809_v7 = vunpack.i.l.bf16 %v9808_v35 }
 0x277   :  { %10097 = vrot.lane.b32.xlu0 %v11977_v33, %s11076_s17  ;;  %v12069_v62 = vpack.i.bf16 %v756_v43, %v755_v32  ;;  %v3303_v27 = vsel %vm3295_vm8, %v3238_v13, %v9815_v0 }
 0x278   :  { %v12045_v39 = vpop.permute.xlu1 %9822 }
 0x279   :  { %v12047_v40 = vpop.permute.xlu0 %9817  ;;  %v9825_v26 = vunpack.i.h.bf16 %v12045_v39  ;;  %v9824_v31 = vunpack.i.l.bf16 %v12045_v39 }
 0x27a   :  { %10112 = vrot.lane.b32.xlu1 %v12034_v29, %s11074_s15  ;;  %v9820_v14 = vunpack.i.h.bf16 %v12047_v40  ;;  %v9819_v49 = vunpack.i.l.bf16 %v12047_v40 }
 0x27b   :  { %10107 = vrot.lane.b32.xlu0 %v12049_v41, %s11076_s17  ;;  %v3368_v58 = vsel %vm3360_vm9, %v3303_v27, %v9825_v26  ;;  %v1077_v27 = vld [vmem:[#allocation2 + $0x142] sm:$0xff]  ;;  %v824_v26 = vld [vmem:[#allocation2 + $0x159] sm:$0xff] }
 0x27c   :  { %v12055_v42 = vpop.permute.xlu1 %9832 }
 0x27d   :  { %v12057_v44 = vpop.permute.xlu0 %9827  ;;  %v9835_v38 = vunpack.i.h.bf16 %v12055_v42  ;;  %v9834_v40 = vunpack.i.l.bf16 %v12055_v42 }
 0x27e   :  { %10122 = vrot.lane.b32.xlu1 %v12049_v41, %s11073_s4  ;;  %v9830_v16 = vunpack.i.h.bf16 %v12057_v44  ;;  %v9829_v17 = vunpack.i.l.bf16 %v12057_v44 }
 0x27f   :  { %10117 = vrot.lane.b32.xlu0 %v11977_v33, %s11073_s4  ;;  %v3172_v33 = vsel %vm151_vm3, %v11837_v23, %v9794_v52  ;;  %v3236_v23 = vsel %vm3230_vm7, %v3171_v8, %v9800_v60 }
 0x280   :  { %v12067_v53 = vpop.permute.xlu1 %9842  ;;  %v3237_v12 = vsel %vm3230_vm7, %v3172_v33, %v9804_v59  ;;  %v3301_v51 = vsel %vm3295_vm8, %v3236_v23, %v9810_v6 }
 0x281   :  { %v9838_v2 = vpop.permute.xlu0 %9837  ;;  %v3302_v28 = vsel %vm3295_vm8, %v3237_v12, %v9814_v1  ;;  %v3366_v36 = vsel %vm3360_vm9, %v3301_v51, %v9820_v14  ;;  %v9845_v39 = vunpack.i.h.bf16 %v12067_v53  ;;  %v9844_v46 = vunpack.i.l.bf16 %v12067_v53  ;;  %v760_v51 = vld [vmem:[#allocation2 + $0x158] sm:$0xff] }
 0x282   :  { %10132 = vrot.lane.b32.xlu1 %v12069_v62, %s11078_s22  ;;  %v9840_v24 = vunpack.i.h.bf16 %v9838_v2  ;;  %v9839_v25 = vunpack.i.l.bf16 %v9838_v2  ;;  %v3431_v44 = vsel %vm3425_vm10, %v3366_v36, %v9830_v16  ;;  %v3367_v57 = vsel %vm3360_vm9, %v3302_v28, %v9824_v31  ;;  %v1012_v2 = vld [vmem:[#allocation2 + $0x139] sm:$0xff]  ;;  %v952_v36 = vld [vmem:[#allocation2 + $0x168] sm:$0xff] }
 0x283   :  { %10127 = vrot.lane.b32.xlu0 %v11979_v18, %s11078_s22  ;;  %v3300_v18 = vsel %vm3295_vm8, %v3235_v10, %v9809_v7  ;;  %v3432_v61 = vsel %vm3425_vm10, %v3367_v57, %v9834_v40  ;;  %v3433_v53 = vsel %vm3425_vm10, %v3368_v58, %v9835_v38  ;;  %v12144_v10 = vpack.i.bf16 %v1013_v54, %v1012_v2  ;;  %v1076_v28 = vld [vmem:[#allocation2 + $0x13a] sm:$0xff]  ;;  %v887_v31 = vld [vmem:[#allocation2 + $0x152] sm:$0xff] }
 0x284   :  { %v9853_v15 = vpop.permute.xlu1 %9852  ;;  %v3365_v35 = vsel %vm3360_vm9, %v3300_v18, %v9819_v49  ;;  %v3496_v48 = vsel %vm3490_vm11, %v3431_v44, %v9840_v24  ;;  %v3498_v33 = vsel %vm3490_vm11, %v3433_v53, %v9845_v39  ;;  %v953_v38 = vld [vmem:[#allocation2 + $0x170] sm:$0xff]  ;;  %v549_v58 = vld [vmem:[#allocation2 + $0x60] sm:$0xff] }
 0x285   :  { %v9848_v19 = vpop.permute.xlu0 %9847  ;;  %v3430_v43 = vsel %vm3425_vm10, %v3365_v35, %v9829_v17  ;;  %v9855_v42 = vunpack.i.h.bf16 %v9853_v15  ;;  %v9854_v55 = vunpack.i.l.bf16 %v9853_v15  ;;  %v888_v35 = vld [vmem:[#allocation2 + $0x15a] sm:$0xff] }
 0x286   :  { %10142 = vrot.lane.b32.xlu1 %v12071_v63, %s11079_s24  ;;  %v9850_v34 = vunpack.i.h.bf16 %v9848_v19  ;;  %v9849_v5 = vunpack.i.l.bf16 %v9848_v19  ;;  %v12161_v19 = vpack.i.bf16 %v1077_v27, %v1076_v28  ;;  %v12185_v57 = vpack.i.bf16 %v888_v35, %v887_v31 }
 0x287   :  { %10137 = vrot.lane.b32.xlu0 %v12034_v29, %s11079_s24  ;;  %v3495_v29 = vsel %vm3490_vm11, %v3430_v43, %v9839_v25  ;;  %v3563_v11 = vsel %vm3555_vm12, %v3498_v33, %v9855_v42  ;;  %v823_v25 = vld [vmem:[#allocation2 + $0x151] sm:$0xff]  ;;  %v552_v42 = vld [vmem:[#allocation2 + $0x80] sm:$0xff] }
 0x288   :  { %v12111_v32 = vpop.permute.xlu1 %9862  ;;  %v3560_v56 = vsel %vm3555_vm12, %v3495_v29, %v9849_v5  ;;  %v3561_v45 = vsel %vm3555_vm12, %v3496_v48, %v9850_v34 }
 0x289   :  { %v9858_v47 = vpop.permute.xlu0 %9857  ;;  %v9865_v40 = vunpack.i.h.bf16 %v12111_v32  ;;  %v9864_v43 = vunpack.i.l.bf16 %v12111_v32  ;;  %v12187_v32 = vpack.i.bf16 %v953_v38, %v952_v36 }
 0x28a   :  { %v9860_v50 = vunpack.i.h.bf16 %v9858_v47  ;;  %v9859_v52 = vunpack.i.l.bf16 %v9858_v47  ;;  %10152 = vrot.lane.b32.xlu1 %v12073_v3, %s11080_s0 }
 0x28b   :  { %10147 = vrot.lane.b32.xlu0 %v12049_v41, %s11080_s0  ;;  %v3497_v41 = vsel %vm3490_vm11, %v3432_v61, %v9844_v46 }
 0x28c   :  { %v3625_v37 = vsel %vm3620_vm13, %v3560_v56, %v9859_v52  ;;  %v3626_v59 = vsel %vm3620_vm13, %v3561_v45, %v9860_v50  ;;  %v12129_v60 = vpop.permute.xlu1 %9872  ;;  %v3562_v8 = vsel %vm3555_vm12, %v3497_v41, %v9854_v55  ;;  %v12183_v50 = vpack.i.bf16 %v824_v26, %v823_v25  ;;  %v551_v52 = vld [vmem:[#allocation2 + $0x78] sm:$0xff] }
 0x28d   :  { %v9868_v0 = vpop.permute.xlu0 %9867  ;;  %v3687_v1 = vpack.c.bf16 %v3626_v59, %v3625_v37  ;;  %v9875_v34 = vunpack.i.h.bf16 %v12129_v60  ;;  %v9874_v5 = vunpack.i.l.bf16 %v12129_v60  ;;  %v550_v37 = vld [vmem:[#allocation2 + $0x68] sm:$0xff] }
 0x28e   :  { %v9870_v6 = vunpack.i.h.bf16 %v9868_v0  ;;  %v9869_v7 = vunpack.i.l.bf16 %v9868_v0  ;;  %10162 = vrot.lane.b32.xlu1 %v12075_v4, %s11075_s16  ;;  %v3175_v53 = vsel %vm151_vm3, %v550_v37, %v9865_v40  ;;  %v3174_v0 = vsel %vm151_vm3, %v549_v58, %v9864_v43  ;;  %v1016_v37 = vld [vmem:[#allocation2 + $0x169] sm:$0xff] }
 0x28f   :  { %10157 = vrot.lane.b32.xlu0 %v12069_v62, %s11075_s16  ;;  %9155 = vmatprep.mubr.msk.bf16.mxu1 %vm3737_vm14, %v3687_v1  ;;  %v3176_v59 = vsel %vm151_vm3, %v551_v52, %v9874_v5 }
 0x290   :  { %v3628_v12 = vsel %vm3620_vm13, %v3563_v11, %v9870_v6  ;;  %v3627_v13 = vsel %vm3620_vm13, %v3562_v8, %v9869_v7  ;;  %v9883_v23 = vpop.permute.xlu1 %9882 }
 0x291   :  { %v9878_v14 = vpop.permute.xlu0 %9877  ;;  %v3688_v49 = vpack.c.bf16 %v3628_v12, %v3627_v13  ;;  %v9885_v44 = vunpack.i.h.bf16 %v9883_v23  ;;  %v9884_v39 = vunpack.i.l.bf16 %v9883_v23 }
 0x292   :  { %10172 = vrot.lane.b32.xlu1 %v12144_v10, %s11072_s3  ;;  %v9880_v46 = vunpack.i.h.bf16 %v9878_v14  ;;  %v9879_v47 = vunpack.i.l.bf16 %v9878_v14 }
 0x293   :  { %10167 = vrot.lane.b32.xlu0 %v12071_v63, %s11072_s3  ;;  %9156 = vmatmul.mubr.msk.bf16.gmra.mrb[8].mxu1 %vm3737_vm14, %v3688_v49  ;;  %v3241_v1 = vsel %vm3230_vm7, %v3176_v59, %v9884_v39 }
 0x294   :  { %v9893_v62 = vpop.permute.xlu1 %9892  ;;  %v3240_v54 = vsel %vm3230_vm7, %v3175_v53, %v9880_v46  ;;  %v3239_v41 = vsel %vm3230_vm7, %v3174_v0, %v9879_v47 }
 0x295   :  { %v12151_v15 = vpop.permute.xlu0 %9887  ;;  %v9895_v55 = vunpack.i.h.bf16 %v9893_v62  ;;  %v9894_v56 = vunpack.i.l.bf16 %v9893_v62 }
 0x296   :  { %10182 = vrot.lane.b32.xlu1 %v12071_v63, %s11074_s15  ;;  %v759_v63 = vld [vmem:[#allocation2 + $0x150] sm:$0xff]  ;;  %v9890_v60 = vunpack.i.h.bf16 %v12151_v15  ;;  %v9889_v61 = vunpack.i.l.bf16 %v12151_v15 }
 0x297   :  { %10177 = vrot.lane.b32.xlu0 %v12073_v3, %s11076_s17  ;;  %v12181_v48 = vpack.i.bf16 %v760_v51, %v759_v63  ;;  %v3306_v8 = vsel %vm3295_vm8, %v3241_v1, %v9894_v56 }
 0x298   :  { %v12157_v16 = vpop.permute.xlu1 %9902  ;;  %v3305_v14 = vsel %vm3295_vm8, %v3240_v54, %v9890_v60 }
 0x299   :  { %v12159_v17 = vpop.permute.xlu0 %9897  ;;  %v9905_v15 = vunpack.i.h.bf16 %v12157_v16  ;;  %v9904_v28 = vunpack.i.l.bf16 %v12157_v16 }
 0x29a   :  { %10192 = vrot.lane.b32.xlu1 %v12144_v10, %s11074_s15  ;;  %v9900_v33 = vunpack.i.h.bf16 %v12159_v17  ;;  %v9899_v6 = vunpack.i.l.bf16 %v12159_v17 }
 0x29b   :  { %10187 = vrot.lane.b32.xlu0 %v12161_v19, %s11076_s17  ;;  %v3371_v46 = vsel %vm3360_vm9, %v3306_v8, %v9904_v28  ;;  %v1080_v8 = vld [vmem:[#allocation2 + $0x16a] sm:$0xff]  ;;  %v891_v28 = vld [vmem:[#allocation2 + $0x182] sm:$0xff] }
 0x29c   :  { %v12167_v18 = vpop.permute.xlu1 %9912  ;;  %v3370_v51 = vsel %vm3360_vm9, %v3305_v14, %v9900_v33  ;;  %v764_v14 = vld [vmem:[#allocation2 + $0x188] sm:$0xff] }
 0x29d   :  { %v12169_v24 = vpop.permute.xlu0 %9907  ;;  %v9914_v25 = vunpack.i.l.bf16 %v12167_v18 }
 0x29e   :  { %10202 = vrot.lane.b32.xlu1 %v12161_v19, %s11073_s4  ;;  %v9910_v12 = vunpack.i.h.bf16 %v12169_v24  ;;  %v9909_v13 = vunpack.i.l.bf16 %v12169_v24  ;;  %v9915_v24 = vunpack.i.h.bf16 %v12167_v18 }
 0x29f   :  { %10197 = vrot.lane.b32.xlu0 %v12073_v3, %s11073_s4  ;;  %v3177_v3 = vsel %vm151_vm3, %v552_v42, %v9875_v34 }
 0x2a0   :  { %v12179_v29 = vpop.permute.xlu1 %9922  ;;  %v3242_v2 = vsel %vm3230_vm7, %v3177_v3, %v9885_v44  ;;  %v3435_v34 = vsel %vm3425_vm10, %v3370_v51, %v9910_v12  ;;  %v1017_v3 = vld [vmem:[#allocation2 + $0x171] sm:$0xff]  ;;  %v639_v51 = vld [vmem:[#allocation2 + $0x1c9] sm:$0xff] }
 0x2a1   :  { %v9918_v45 = vpop.permute.xlu0 %9917  ;;  %v3307_v11 = vsel %vm3295_vm8, %v3242_v2, %v9895_v55  ;;  %v9925_v16 = vunpack.i.h.bf16 %v12179_v29  ;;  %v9924_v5 = vunpack.i.l.bf16 %v12179_v29  ;;  %v3436_v55 = vsel %vm3425_vm10, %v3371_v46, %v9914_v25 }
 0x2a2   :  { %10212 = vrot.lane.b32.xlu1 %v12181_v48, %s11078_s22  ;;  %v9920_v49 = vunpack.i.h.bf16 %v9918_v45  ;;  %v9919_v62 = vunpack.i.l.bf16 %v9918_v45  ;;  %v3372_v47 = vsel %vm3360_vm9, %v3307_v11, %v9905_v15  ;;  %v1081_v11 = vld [vmem:[#allocation2 + $0x172] sm:$0xff]  ;;  %v828_v15 = vld [vmem:[#allocation2 + $0x189] sm:$0xff] }
 0x2a3   :  { %10207 = vrot.lane.b32.xlu0 %v12075_v4, %s11078_s22  ;;  %v3304_v4 = vsel %vm3295_vm8, %v3239_v41, %v9889_v61  ;;  %v3437_v56 = vsel %vm3425_vm10, %v3372_v47, %v9915_v24  ;;  %v12254_v41 = vpack.i.bf16 %v1017_v3, %v1016_v37  ;;  %v640_v24 = vld [vmem:[#allocation2 + $0x1d1] sm:$0xff] }
 0x2a4   :  { %v9933_v7 = vpop.permute.xlu1 %9932  ;;  %v3369_v63 = vsel %vm3360_vm9, %v3304_v4, %v9899_v6  ;;  %v3500_v36 = vsel %vm3490_vm11, %v3435_v34, %v9920_v49  ;;  %v3502_v59 = vsel %vm3490_vm11, %v3437_v56, %v9925_v16  ;;  %v553_v47 = vld [vmem:[#allocation2 + $0x90] sm:$0xff] }
 0x2a5   :  { %v9928_v23 = vpop.permute.xlu0 %9927  ;;  %v3434_v31 = vsel %vm3425_vm10, %v3369_v63, %v9909_v13  ;;  %v9935_v18 = vunpack.i.h.bf16 %v9933_v7  ;;  %v9934_v43 = vunpack.i.l.bf16 %v9933_v7  ;;  %v892_v63 = vld [vmem:[#allocation2 + $0x18a] sm:$0xff] }
 0x2a6   :  { %10222 = vrot.lane.b32.xlu1 %v12183_v50, %s11079_s24  ;;  %v9930_v27 = vunpack.i.h.bf16 %v9928_v23  ;;  %v9929_v17 = vunpack.i.l.bf16 %v9928_v23  ;;  %v12271_v23 = vpack.i.bf16 %v1081_v11, %v1080_v8  ;;  %v12295_v46 = vpack.i.bf16 %v892_v63, %v891_v28 }
 0x2a7   :  { %10217 = vrot.lane.b32.xlu0 %v12144_v10, %s11079_s24  ;;  %v3499_v10 = vsel %vm3490_vm11, %v3434_v31, %v9919_v62  ;;  %v3567_v0 = vsel %vm3555_vm12, %v3502_v59, %v9935_v18  ;;  %v827_v62 = vld [vmem:[#allocation2 + $0x181] sm:$0xff]  ;;  %v556_v18 = vld [vmem:[#allocation2 + $0xb0] sm:$0xff] }
 0x2a8   :  { %v12221_v26 = vpop.permute.xlu1 %9942  ;;  %v3564_v44 = vsel %vm3555_vm12, %v3499_v10, %v9929_v17  ;;  %v3565_v39 = vsel %vm3555_vm12, %v3500_v36, %v9930_v27 }
 0x2a9   :  { %v9938_v35 = vpop.permute.xlu0 %9937  ;;  %v9945_v25 = vunpack.i.h.bf16 %v12221_v26  ;;  %v9944_v31 = vunpack.i.l.bf16 %v12221_v26  ;;  %v12297_v26 = vpack.i.bf16 %v640_v24, %v639_v51 }
 0x2aa   :  { %v9940_v38 = vunpack.i.h.bf16 %v9938_v35  ;;  %v9939_v40 = vunpack.i.l.bf16 %v9938_v35  ;;  %10232 = vrot.lane.b32.xlu1 %v12185_v57, %s11080_s0 }
 0x2ab   :  { %10227 = vrot.lane.b32.xlu0 %v12161_v19, %s11080_s0  ;;  %v3501_v19 = vsel %vm3490_vm11, %v3436_v55, %v9924_v5 }
 0x2ac   :  { %v3629_v29 = vsel %vm3620_vm13, %v3564_v44, %v9939_v40  ;;  %v3630_v52 = vsel %vm3620_vm13, %v3565_v39, %v9940_v38  ;;  %v12239_v42 = vpop.permute.xlu1 %9952  ;;  %v3566_v53 = vsel %vm3555_vm12, %v3501_v19, %v9934_v43  ;;  %v12293_v38 = vpack.i.bf16 %v828_v15, %v827_v62  ;;  %v555_v40 = vld [vmem:[#allocation2 + $0xa8] sm:$0xff] }
 0x2ad   :  { %v9948_v45 = vpop.permute.xlu0 %9947  ;;  %v3689_v58 = vpack.c.bf16 %v3630_v52, %v3629_v29  ;;  %v9955_v27 = vunpack.i.h.bf16 %v12239_v42  ;;  %v9954_v17 = vunpack.i.l.bf16 %v12239_v42  ;;  %v554_v29 = vld [vmem:[#allocation2 + $0x98] sm:$0xff] }
 0x2ae   :  { %v9950_v60 = vunpack.i.h.bf16 %v9948_v45  ;;  %v9949_v61 = vunpack.i.l.bf16 %v9948_v45  ;;  %10242 = vrot.lane.b32.xlu1 %v12187_v32, %s11075_s16  ;;  %v3179_v56 = vsel %vm151_vm3, %v554_v29, %v9945_v25  ;;  %v3178_v45 = vsel %vm151_vm3, %v553_v47, %v9944_v31  ;;  %v703_v29 = vld [vmem:[#allocation2 + $0x1ca] sm:$0xff] }
 0x2af   :  { %10237 = vrot.lane.b32.xlu0 %v12181_v48, %s11075_s16  ;;  %9159 = vmatprep.mubr.msk.bf16.mxu1 %vm3737_vm14, %v3689_v58  ;;  %v3180_v52 = vsel %vm151_vm3, %v555_v40, %v9954_v17 }
 0x2b0   :  { %v3632_v1 = vsel %vm3620_vm13, %v3567_v0, %v9950_v60  ;;  %v3631_v2 = vsel %vm3620_vm13, %v3566_v53, %v9949_v61  ;;  %v9963_v54 = vpop.permute.xlu1 %9962 }
 0x2b1   :  { %v9958_v33 = vpop.permute.xlu0 %9957  ;;  %v3690_v6 = vpack.c.bf16 %v3632_v1, %v3631_v2  ;;  %v9965_v34 = vunpack.i.h.bf16 %v9963_v54  ;;  %v9964_v16 = vunpack.i.l.bf16 %v9963_v54 }
 0x2b2   :  { %10252 = vrot.lane.b32.xlu1 %v12254_v41, %s11072_s3  ;;  %v9960_v5 = vunpack.i.h.bf16 %v9958_v33  ;;  %v9959_v35 = vunpack.i.l.bf16 %v9958_v33 }
 0x2b3   :  { %10247 = vrot.lane.b32.xlu0 %v12183_v50, %s11072_s3  ;;  %9160 = vmatmul.mubr.msk.bf16.gmra.mrb[12].mxu1 %vm3737_vm14, %v3690_v6  ;;  %v3245_v58 = vsel %vm3230_vm7, %v3180_v52, %v9964_v16 }
 0x2b4   :  { %v9973_v48 = vpop.permute.xlu1 %9972  ;;  %v3244_v3 = vsel %vm3230_vm7, %v3179_v56, %v9960_v5  ;;  %v3243_v19 = vsel %vm3230_vm7, %v3178_v45, %v9959_v35 }
 0x2b5   :  { %v12261_v7 = vpop.permute.xlu0 %9967  ;;  %v9975_v43 = vunpack.i.h.bf16 %v9973_v48  ;;  %v9974_v44 = vunpack.i.l.bf16 %v9973_v48 }
 0x2b6   :  { %10262 = vrot.lane.b32.xlu1 %v12183_v50, %s11074_s15  ;;  %v763_v50 = vld [vmem:[#allocation2 + $0x180] sm:$0xff]  ;;  %v9970_v42 = vunpack.i.h.bf16 %v12261_v7  ;;  %v9969_v55 = vunpack.i.l.bf16 %v12261_v7 }
 0x2b7   :  { %10257 = vrot.lane.b32.xlu0 %v12185_v57, %s11076_s17  ;;  %v12291_v36 = vpack.i.bf16 %v764_v14, %v763_v50  ;;  %v3310_v53 = vsel %vm3295_vm8, %v3245_v58, %v9974_v44 }
 0x2b8   :  { %v12267_v12 = vpop.permute.xlu1 %9982  ;;  %v3309_v33 = vsel %vm3295_vm8, %v3244_v3, %v9970_v42 }
 0x2b9   :  { %v12269_v13 = vpop.permute.xlu0 %9977  ;;  %v9985_v7 = vunpack.i.h.bf16 %v12267_v12  ;;  %v9984_v8 = vunpack.i.l.bf16 %v12267_v12 }
 0x2ba   :  { %10272 = vrot.lane.b32.xlu1 %v12254_v41, %s11074_s15  ;;  %v9980_v59 = vunpack.i.h.bf16 %v12269_v13  ;;  %v9979_v60 = vunpack.i.l.bf16 %v12269_v13 }
 0x2bb   :  { %10267 = vrot.lane.b32.xlu0 %v12271_v23, %s11076_s17  ;;  %v3375_v5 = vsel %vm3360_vm9, %v3310_v53, %v9984_v8  ;;  %v768_v53 = vld [vmem:[#allocation2 + $0x1e8] sm:$0xff] }
 0x2bc   :  { %v12277_v4 = vpop.permute.xlu1 %9992  ;;  %v3374_v14 = vsel %vm3360_vm9, %v3309_v33, %v9980_v59  ;;  %v766_v33 = vld [vmem:[#allocation2 + $0x1d0] sm:$0xff]  ;;  %v895_v8 = vld [vmem:[#allocation2 + $0x1e2] sm:$0xff] }
 0x2bd   :  { %v12279_v49 = vpop.permute.xlu0 %9987  ;;  %v9994_v62 = vunpack.i.l.bf16 %v12277_v4 }
 0x2be   :  { %10282 = vrot.lane.b32.xlu1 %v12271_v23, %s11073_s4  ;;  %v9990_v1 = vunpack.i.h.bf16 %v12279_v49  ;;  %v9989_v2 = vunpack.i.l.bf16 %v12279_v49  ;;  %v9995_v49 = vunpack.i.h.bf16 %v12277_v4 }
 0x2bf   :  { %10277 = vrot.lane.b32.xlu0 %v12185_v57, %s11073_s4  ;;  %v3181_v57 = vsel %vm151_vm3, %v556_v18, %v9955_v27 }
 0x2c0   :  { %v12289_v10 = vpop.permute.xlu1 %10002  ;;  %v3246_v37 = vsel %vm3230_vm7, %v3181_v57, %v9965_v34  ;;  %v3439_v27 = vsel %vm3425_vm10, %v3374_v14, %v9990_v1  ;;  %v704_v57 = vld [vmem:[#allocation2 + $0x1d2] sm:$0xff] }
 0x2c1   :  { %v9998_v39 = vpop.permute.xlu0 %9997  ;;  %v3311_v0 = vsel %vm3295_vm8, %v3246_v37, %v9975_v43  ;;  %v10005_v12 = vunpack.i.h.bf16 %v12289_v10  ;;  %v10004_v17 = vunpack.i.l.bf16 %v12289_v10  ;;  %v3440_v43 = vsel %vm3425_vm10, %v3375_v5, %v9994_v62 }
 0x2c2   :  { %10292 = vrot.lane.b32.xlu1 %v12291_v36, %s11078_s22  ;;  %v10000_v6 = vunpack.i.h.bf16 %v9998_v39  ;;  %v9999_v48 = vunpack.i.l.bf16 %v9998_v39  ;;  %v3376_v35 = vsel %vm3360_vm9, %v3311_v0, %v9985_v7 }
 0x2c3   :  { %10287 = vrot.lane.b32.xlu0 %v12187_v32, %s11078_s22  ;;  %v3308_v32 = vsel %vm3295_vm8, %v3243_v19, %v9969_v55  ;;  %v3441_v44 = vsel %vm3425_vm10, %v3376_v35, %v9995_v49  ;;  %v10336_v19 = vpack.i.bf16 %v704_v57, %v703_v29  ;;  %v961_v49 = vld [vmem:[#allocation2 + $0x200] sm:$0xff] }
 0x2c4   :  { %v10013_v61 = vpop.permute.xlu1 %10012  ;;  %v3373_v50 = vsel %vm3360_vm9, %v3308_v32, %v9979_v60  ;;  %v3504_v51 = vsel %vm3490_vm11, %v3439_v27, %v10000_v6  ;;  %v3506_v52 = vsel %vm3490_vm11, %v3441_v44, %v10005_v12  ;;  %v765_v32 = vld [vmem:[#allocation2 + $0x1c8] sm:$0xff]  ;;  %v1024_v27 = vld [vmem:[#allocation2 + $0x1f9] sm:$0xff] }
 0x2c5   :  { %v10008_v54 = vpop.permute.xlu0 %10007  ;;  %v3438_v28 = vsel %vm3425_vm10, %v3373_v50, %v9989_v2  ;;  %v10015_v4 = vunpack.i.h.bf16 %v10013_v61  ;;  %v10014_v31 = vunpack.i.l.bf16 %v10013_v61  ;;  %v767_v61 = vld [vmem:[#allocation2 + $0x1e0] sm:$0xff]  ;;  %v10341_v7 = vpack.i.bf16 %v766_v33, %v765_v32 }
 0x2c6   :  { %10302 = vrot.lane.b32.xlu1 %v12293_v38, %s11079_s24  ;;  %v10010_v11 = vunpack.i.h.bf16 %v10008_v54  ;;  %v10009_v13 = vunpack.i.l.bf16 %v10008_v54  ;;  %v12372_v0 = vpack.i.bf16 %v768_v53, %v767_v61  ;;  %v831_v2 = vld [vmem:[#allocation2 + $0x1e1] sm:$0xff]  ;;  %v832_v54 = vld [vmem:[#allocation2 + $0x1e9] sm:$0xff] }
 0x2c7   :  { %10297 = vrot.lane.b32.xlu0 %v12254_v41, %s11079_s24  ;;  %v3503_v41 = vsel %vm3490_vm11, %v3438_v28, %v9999_v48  ;;  %v3571_v45 = vsel %vm3555_vm12, %v3506_v52, %v10015_v4  ;;  %v1025_v12 = vld [vmem:[#allocation2 + $0x201] sm:$0xff] }
 0x2c8   :  { %v12331_v15 = vpop.permute.xlu1 %10022  ;;  %v3568_v34 = vsel %vm3555_vm12, %v3503_v41, %v10009_v13  ;;  %v3569_v16 = vsel %vm3555_vm12, %v3504_v51, %v10010_v11  ;;  %v896_v11 = vld [vmem:[#allocation2 + $0x1ea] sm:$0xff] }
 0x2c9   :  { %v10018_v63 = vpop.permute.xlu0 %10017  ;;  %v12391_v50 = vpack.i.bf16 %v896_v11, %v895_v8 }
 0x2ca   :  { %v10020_v24 = vunpack.i.h.bf16 %v10018_v63  ;;  %v10019_v25 = vunpack.i.l.bf16 %v10018_v63  ;;  %10312 = vrot.lane.b32.xlu1 %v12295_v46, %s11080_s0  ;;  %v10024_v63 = vunpack.i.l.bf16 %v12331_v15 }
 0x2cb   :  { %10307 = vrot.lane.b32.xlu0 %v12271_v23, %s11080_s0  ;;  %v3505_v23 = vsel %vm3490_vm11, %v3440_v43, %v10004_v17  ;;  %v10025_v17 = vunpack.i.h.bf16 %v12331_v15 }
 0x2cc   :  { %v3633_v10 = vsel %vm3620_vm13, %v3568_v34, %v10019_v25  ;;  %v3634_v40 = vsel %vm3620_vm13, %v3569_v16, %v10020_v24  ;;  %v12349_v18 = vpop.permute.xlu1 %10032  ;;  %v3570_v56 = vsel %vm3555_vm12, %v3505_v23, %v10014_v31  ;;  %v559_v34 = vld [vmem:[#allocation2 + $0xd8] sm:$0xff]  ;;  %v560_v16 = vld [vmem:[#allocation2 + $0xe0] sm:$0xff] }
 0x2cd   :  { %v10028_v39 = vpop.permute.xlu0 %10027  ;;  %v3691_v47 = vpack.c.bf16 %v3634_v40, %v3633_v10  ;;  %v10035_v62 = vunpack.i.h.bf16 %v12349_v18  ;;  %v10034_v28 = vunpack.i.l.bf16 %v12349_v18  ;;  %v12411_v10 = vpack.i.bf16 %v1025_v12, %v1024_v27  ;;  %v557_v40 = vld [vmem:[#allocation2 + $0xc0] sm:$0xff]  ;;  %v558_v18 = vld [vmem:[#allocation2 + $0xc8] sm:$0xff] }
 0x2ce   :  { %v10030_v42 = vunpack.i.h.bf16 %v10028_v39  ;;  %v10029_v55 = vunpack.i.l.bf16 %v10028_v39  ;;  %10332 = vrot.lane.b32.xlu1 %v12297_v26, %s11074_s15  ;;  %v3182_v29 = vsel %vm151_vm3, %v557_v40, %v10024_v63  ;;  %v1088_v40 = vld [vmem:[#allocation2 + $0x1fa] sm:$0xff] }
 0x2cf   :  { %10317 = vrot.lane.b32.xlu0 %v12291_v36, %s11075_s16  ;;  %9163 = vmatprep.mubr.msk.bf16.mxu1 %vm3737_vm14, %v3691_v47  ;;  %v3185_v43 = vsel %vm151_vm3, %v560_v16, %v10035_v62  ;;  %v3183_v47 = vsel %vm151_vm3, %v558_v18, %v10025_v17  ;;  %v1089_v18 = vld [vmem:[#allocation2 + $0x202] sm:$0xff] }
 0x2d0   :  { %v3636_v58 = vsel %vm3620_vm13, %v3571_v45, %v10030_v42  ;;  %v3635_v37 = vsel %vm3620_vm13, %v3570_v56, %v10029_v55  ;;  %v12364_v3 = vpop.permute.xlu1 %10042 }
 0x2d1   :  { %v12366_v59 = vpop.permute.xlu0 %10037  ;;  %v3692_v60 = vpack.c.bf16 %v3636_v58, %v3635_v37  ;;  %v10045_v41 = vunpack.i.h.bf16 %v12364_v3  ;;  %v10044_v51 = vunpack.i.l.bf16 %v12364_v3 }
 0x2d2   :  { %10337 = vrot.lane.b32.xlu1 %v10336_v19, %s11073_s4  ;;  %v10040_v24 = vunpack.i.h.bf16 %v12366_v59  ;;  %v10039_v25 = vunpack.i.l.bf16 %v12366_v59 }
 0x2d3   :  { %10322 = vrot.lane.b32.xlu0 %v12293_v38, %s11072_s3  ;;  %9164 = vmatmul.mubr.msk.bf16.gmra.mrb[16].mxu1 %vm3737_vm14, %v3692_v60  ;;  %v12382_v38 = vpack.i.bf16 %v832_v54, %v831_v2  ;;  %v3250_v23 = vsel %vm3230_vm7, %v3185_v43, %v10045_v41 }
 0x2d4   :  { %v10053_v36 = vpop.permute.xlu1 %10052  ;;  %v3248_v52 = vsel %vm3230_vm7, %v3183_v47, %v10040_v24  ;;  %v3247_v42 = vsel %vm3230_vm7, %v3182_v29, %v10039_v25 }
 0x2d5   :  { %v12374_v1 = vpop.permute.xlu0 %10047  ;;  %v10055_v5 = vunpack.i.h.bf16 %v10053_v36  ;;  %v10054_v35 = vunpack.i.l.bf16 %v10053_v36 }
 0x2d6   :  { %10347 = vrot.lane.b32.xlu1 %v12372_v0, %s11078_s22  ;;  %v10050_v44 = vunpack.i.h.bf16 %v12374_v1  ;;  %v10049_v39 = vunpack.i.l.bf16 %v12374_v1 }
 0x2d7   :  { %10327 = vrot.lane.b32.xlu0 %v12295_v46, %s11076_s17  ;;  %v960_v46 = vld [vmem:[#allocation2 + $0x1f8] sm:$0xff]  ;;  %v3315_v37 = vsel %vm3295_vm8, %v3250_v23, %v10055_v5 }
 0x2d8   :  { %v12380_v6 = vpop.permute.xlu1 %10062  ;;  %v12409_v31 = vpack.i.bf16 %v961_v49, %v960_v46  ;;  %v3313_v61 = vsel %vm3295_vm8, %v3248_v52, %v10050_v44  ;;  %v10401_v52 = vpack.i.bf16 %v1089_v18, %v1088_v40 }
 0x2d9   :  { %v12384_v48 = vpop.permute.xlu0 %10057  ;;  %v10065_v1 = vunpack.i.h.bf16 %v12380_v6  ;;  %v10064_v2 = vunpack.i.l.bf16 %v12380_v6 }
 0x2da   :  { %10357 = vrot.lane.b32.xlu1 %v12382_v38, %s11079_s24  ;;  %v10060_v55 = vunpack.i.h.bf16 %v12384_v48  ;;  %v10059_v56 = vunpack.i.l.bf16 %v12384_v48 }
 0x2db   :  { %10342 = vrot.lane.b32.xlu0 %v10341_v7, %s11078_s22  ;;  %v3380_v24 = vsel %vm3360_vm9, %v3315_v37, %v10065_v1  ;;  %v900_v1 = vld [vmem:[#allocation2 + $0x21a] sm:$0xff] }
 0x2dc   :  { %v12389_v13 = vpop.permute.xlu1 %10072  ;;  %v3378_v48 = vsel %vm3360_vm9, %v3313_v61, %v10060_v55 }
 0x2dd   :  { %v12393_v14 = vpop.permute.xlu0 %10067  ;;  %v10075_v7 = vunpack.i.h.bf16 %v12389_v13  ;;  %v10074_v8 = vunpack.i.l.bf16 %v12389_v13 }
 0x2de   :  { %10367 = vrot.lane.b32.xlu1 %v12391_v50, %s11080_s0  ;;  %v10070_v3 = vunpack.i.h.bf16 %v12393_v14  ;;  %v10069_v59 = vunpack.i.l.bf16 %v12393_v14 }
 0x2df   :  { %10352 = vrot.lane.b32.xlu0 %v12297_v26, %s11079_s24  ;;  %v3184_v26 = vsel %vm151_vm3, %v559_v34, %v10034_v28  ;;  %v3445_v5 = vsel %vm3425_vm10, %v3380_v24, %v10075_v7  ;;  %v561_v24 = vld [vmem:[#allocation2 + $0xf0] sm:$0xff] }
 0x2e0   :  { %v12407_v4 = vpop.permute.xlu1 %10082  ;;  %v3249_v57 = vsel %vm3230_vm7, %v3184_v26, %v10044_v51  ;;  %v3443_v46 = vsel %vm3425_vm10, %v3378_v48, %v10070_v3 }
 0x2e1   :  { %v10078_v15 = vpop.permute.xlu0 %10077  ;;  %v3314_v58 = vsel %vm3295_vm8, %v3249_v57, %v10054_v35  ;;  %v10085_v6 = vunpack.i.h.bf16 %v12407_v4  ;;  %v10084_v49 = vunpack.i.l.bf16 %v12407_v4 }
 0x2e2   :  { %10377 = vrot.lane.b32.xlu1 %v12409_v31, %s11075_s16  ;;  %v10080_v53 = vunpack.i.h.bf16 %v10078_v15  ;;  %v10079_v36 = vunpack.i.l.bf16 %v10078_v15  ;;  %v3379_v51 = vsel %vm3360_vm9, %v3314_v58, %v10064_v2 }
 0x2e3   :  { %10362 = vrot.lane.b32.xlu0 %v10336_v19, %s11080_s0  ;;  %v3312_v19 = vsel %vm3295_vm8, %v3247_v42, %v10049_v39  ;;  %v3444_v16 = vsel %vm3425_vm10, %v3379_v51, %v10074_v8  ;;  %v3510_v43 = vsel %vm3490_vm11, %v3445_v5, %v10085_v6  ;;  %v1028_v8 = vld [vmem:[#allocation2 + $0x229] sm:$0xff] }
 0x2e4   :  { %v10093_v45 = vpop.permute.xlu1 %10092  ;;  %v3377_v33 = vsel %vm3360_vm9, %v3312_v19, %v10059_v56  ;;  %v3508_v28 = vsel %vm3490_vm11, %v3443_v46, %v10080_v53  ;;  %v771_v56 = vld [vmem:[#allocation2 + $0x210] sm:$0xff] }
 0x2e5   :  { %v10088_v60 = vpop.permute.xlu0 %10087  ;;  %v3442_v14 = vsel %vm3425_vm10, %v3377_v33, %v10069_v59  ;;  %v10095_v13 = vunpack.i.h.bf16 %v10093_v45  ;;  %v10094_v17 = vunpack.i.l.bf16 %v10093_v45  ;;  %v772_v45 = vld [vmem:[#allocation2 + $0x218] sm:$0xff]  ;;  %v965_v33 = vld [vmem:[#allocation2 + $0x230] sm:$0xff] }
 0x2e6   :  { %10387 = vrot.lane.b32.xlu1 %v12411_v10, %s11072_s3  ;;  %v10090_v54 = vunpack.i.h.bf16 %v10088_v60  ;;  %v10089_v32 = vunpack.i.l.bf16 %v10088_v60  ;;  %v12480_v37 = vpack.i.bf16 %v772_v45, %v771_v56  ;;  %v835_v59 = vld [vmem:[#allocation2 + $0x211] sm:$0xff]  ;;  %v836_v60 = vld [vmem:[#allocation2 + $0x219] sm:$0xff] }
 0x2e7   :  { %10372 = vrot.lane.b32.xlu0 %v12372_v0, %s11075_s16  ;;  %v3507_v0 = vsel %vm3490_vm11, %v3442_v14, %v10079_v36  ;;  %v3575_v47 = vsel %vm3555_vm12, %v3510_v43, %v10095_v13  ;;  %v12488_v61 = vpack.i.bf16 %v836_v60, %v835_v59  ;;  %v899_v36 = vld [vmem:[#allocation2 + $0x212] sm:$0xff] }
 0x2e8   :  { %v12444_v11 = vpop.permute.xlu1 %10102  ;;  %v3572_v63 = vsel %vm3555_vm12, %v3507_v0, %v10089_v32  ;;  %v3573_v41 = vsel %vm3555_vm12, %v3508_v28, %v10090_v54  ;;  %v12498_v54 = vpack.i.bf16 %v900_v1, %v899_v36  ;;  %v1029_v14 = vld [vmem:[#allocation2 + $0x231] sm:$0xff] }
 0x2e9   :  { %v10098_v62 = vpop.permute.xlu0 %10097  ;;  %v10105_v46 = vunpack.i.h.bf16 %v12444_v11  ;;  %v564_v13 = vld [vmem:[#allocation2 + $0x110] sm:$0xff]  ;;  %v12514_v51 = vpack.i.bf16 %v1029_v14, %v1028_v8 }
 0x2ea   :  { %v10100_v27 = vunpack.i.h.bf16 %v10098_v62  ;;  %v10099_v12 = vunpack.i.l.bf16 %v10098_v62  ;;  %10397 = vrot.lane.b32.xlu1 %v12382_v38, %s11074_s15 }
 0x2eb   :  { %10382 = vrot.lane.b32.xlu0 %v12382_v38, %s11072_s3  ;;  %v3509_v38 = vsel %vm3490_vm11, %v3444_v16, %v10084_v49 }
 0x2ec   :  { %v3637_v25 = vsel %vm3620_vm13, %v3572_v63, %v10099_v12  ;;  %v3638_v4 = vsel %vm3620_vm13, %v3573_v41, %v10100_v27  ;;  %v12462_v34 = vpop.permute.xlu1 %10112  ;;  %v3574_v39 = vsel %vm3555_vm12, %v3509_v38, %v10094_v17  ;;  %v563_v12 = vld [vmem:[#allocation2 + $0x108] sm:$0xff] }
 0x2ed   :  { %v10108_v35 = vpop.permute.xlu0 %10107  ;;  %v3693_v15 = vpack.c.bf16 %v3638_v4, %v3637_v25  ;;  %v10115_v48 = vunpack.i.h.bf16 %v12462_v34  ;;  %v10114_v7 = vunpack.i.l.bf16 %v12462_v34 }
 0x2ee   :  { %v10110_v26 = vunpack.i.h.bf16 %v10108_v35  ;;  %v10109_v44 = vunpack.i.l.bf16 %v10108_v35  ;;  %10407 = vrot.lane.b32.xlu1 %v12411_v10, %s11074_s15 }
 0x2ef   :  { %9167 = vmatprep.mubr.msk.bf16.mxu1 %vm3737_vm14, %v3693_v15  ;;  %10392 = vrot.lane.b32.xlu0 %v12391_v50, %s11076_s17  ;;  %v3189_v25 = vsel %vm151_vm3, %v564_v13, %v10115_v48  ;;  %v3188_v4 = vsel %vm151_vm3, %v563_v12, %v10114_v7 }
 0x2f0   :  { %v3640_v29 = vsel %vm3620_vm13, %v3575_v47, %v10110_v26  ;;  %v3639_v57 = vsel %vm3620_vm13, %v3574_v39, %v10109_v44  ;;  %v10123_v23 = vpop.permute.xlu1 %10122 }
 0x2f1   :  { %v10118_v42 = vpop.permute.xlu0 %10117  ;;  %v3694_v55 = vpack.c.bf16 %v3640_v29, %v3639_v57  ;;  %v10125_v6 = vunpack.i.h.bf16 %v10123_v23  ;;  %v10124_v49 = vunpack.i.l.bf16 %v10123_v23 }
 0x2f2   :  { %10417 = vrot.lane.b32.xlu1 %v10401_v52, %s11073_s4  ;;  %v10120_v62 = vunpack.i.h.bf16 %v10118_v42  ;;  %v10119_v0 = vunpack.i.l.bf16 %v10118_v42 }
 0x2f3   :  { %9168 = vmatmul.mubr.msk.bf16.gmra.mrb[20].mxu1 %vm3737_vm14, %v3694_v55  ;;  %10402 = vrot.lane.b32.xlu0 %v10401_v52, %s11076_s17  ;;  %v3253_v35 = vsel %vm3230_vm7, %v3188_v4, %v10124_v49  ;;  %v3254_v15 = vsel %vm3230_vm7, %v3189_v25, %v10125_v6 }
 0x2f4   :  { %v10133_v58 = vpop.permute.xlu1 %10132 }
 0x2f5   :  { %v10128_v3 = vpop.permute.xlu0 %10127  ;;  %v10135_v17 = vunpack.i.h.bf16 %v10133_v58  ;;  %v10134_v63 = vunpack.i.l.bf16 %v10133_v58 }
 0x2f6   :  { %10427 = vrot.lane.b32.xlu1 %v12480_v37, %s11078_s22  ;;  %v10129_v34 = vunpack.i.l.bf16 %v10128_v3 }
 0x2f7   :  { %10412 = vrot.lane.b32.xlu0 %v12391_v50, %s11073_s4  ;;  %v964_v50 = vld [vmem:[#allocation2 + $0x228] sm:$0xff]  ;;  %v3318_v44 = vsel %vm3295_vm8, %v3253_v35, %v10134_v63  ;;  %v3319_v39 = vsel %vm3295_vm8, %v3254_v15, %v10135_v17 }
 0x2f8   :  { %v12486_v19 = vpop.permute.xlu1 %10142  ;;  %v12512_v27 = vpack.i.bf16 %v965_v33, %v964_v50 }
 0x2f9   :  { %v12490_v53 = vpop.permute.xlu0 %10137  ;;  %v10145_v56 = vunpack.i.h.bf16 %v12486_v19  ;;  %v10144_v45 = vunpack.i.l.bf16 %v12486_v19 }
 0x2fa   :  { %10437 = vrot.lane.b32.xlu1 %v12488_v61, %s11079_s24  ;;  %v10140_v38 = vunpack.i.h.bf16 %v12490_v53  ;;  %v10139_v43 = vunpack.i.l.bf16 %v12490_v53 }
 0x2fb   :  { %10422 = vrot.lane.b32.xlu0 %v12409_v31, %s11078_s22  ;;  %v10104_v31 = vunpack.i.l.bf16 %v12444_v11  ;;  %v562_v11 = vld [vmem:[#allocation2 + $0xf8] sm:$0xff]  ;;  %v3383_v49 = vsel %vm3360_vm9, %v3318_v44, %v10144_v45 }
 0x2fc   :  { %v12496_v2 = vpop.permute.xlu1 %10152  ;;  %v3187_v16 = vsel %vm151_vm3, %v562_v11, %v10105_v46  ;;  %v1093_v11 = vld [vmem:[#allocation2 + $0x232] sm:$0xff] }
 0x2fd   :  { %v12500_v32 = vpop.permute.xlu0 %10147  ;;  %v3186_v5 = vsel %vm151_vm3, %v561_v24, %v10104_v31  ;;  %v3252_v40 = vsel %vm3230_vm7, %v3187_v16, %v10120_v62  ;;  %v10155_v53 = vunpack.i.h.bf16 %v12496_v2  ;;  %v10154_v36 = vunpack.i.l.bf16 %v12496_v2  ;;  %v1092_v24 = vld [vmem:[#allocation2 + $0x22a] sm:$0xff] }
 0x2fe   :  { %10447 = vrot.lane.b32.xlu1 %v12498_v54, %s11080_s0  ;;  %v3251_v18 = vsel %vm3230_vm7, %v3186_v5, %v10119_v0  ;;  %v10150_v47 = vunpack.i.h.bf16 %v12500_v32  ;;  %v10149_v29 = vunpack.i.l.bf16 %v12500_v32  ;;  %v3384_v62 = vsel %vm3360_vm9, %v3319_v39, %v10145_v56  ;;  %v904_v56 = vld [vmem:[#allocation2 + $0x24a] sm:$0xff] }
 0x2ff   :  { %10432 = vrot.lane.b32.xlu0 %v12411_v10, %s11079_s24  ;;  %v10130_v10 = vunpack.i.h.bf16 %v10128_v3  ;;  %v3316_v23 = vsel %vm3295_vm8, %v3251_v18, %v10129_v34  ;;  %v3448_v13 = vsel %vm3425_vm10, %v3383_v49, %v10154_v36  ;;  %v3449_v17 = vsel %vm3425_vm10, %v3384_v62, %v10155_v53  ;;  %v1032_v36 = vld [vmem:[#allocation2 + $0x259] sm:$0xff] }
 0x300   :  { %v12510_v28 = vpop.permute.xlu1 %10162  ;;  %v3381_v59 = vsel %vm3360_vm9, %v3316_v23, %v10139_v43  ;;  %v775_v43 = vld [vmem:[#allocation2 + $0x240] sm:$0xff] }
 0x301   :  { %v10158_v41 = vpop.permute.xlu0 %10157  ;;  %v3446_v32 = vsel %vm3425_vm10, %v3381_v59, %v10149_v29  ;;  %v10165_v19 = vunpack.i.h.bf16 %v12510_v28  ;;  %v10164_v33 = vunpack.i.l.bf16 %v12510_v28  ;;  %v839_v29 = vld [vmem:[#allocation2 + $0x241] sm:$0xff] }
 0x302   :  { %10457 = vrot.lane.b32.xlu1 %v12512_v27, %s11075_s16  ;;  %v10160_v42 = vunpack.i.h.bf16 %v10158_v41  ;;  %v10159_v55 = vunpack.i.l.bf16 %v10158_v41  ;;  %v969_v59 = vld [vmem:[#allocation2 + $0x260] sm:$0xff] }
 0x303   :  { %10442 = vrot.lane.b32.xlu0 %v10401_v52, %s11080_s0  ;;  %v3317_v52 = vsel %vm3295_vm8, %v3252_v40, %v10130_v10  ;;  %v3514_v25 = vsel %vm3490_vm11, %v3449_v17, %v10165_v19  ;;  %v10481_v40 = vpack.i.bf16 %v1093_v11, %v1092_v24  ;;  %v565_v62 = vld [vmem:[#allocation2 + $0x120] sm:$0xff] }
 0x304   :  { %v10173_v26 = vpop.permute.xlu1 %10172  ;;  %v3382_v60 = vsel %vm3360_vm9, %v3317_v52, %v10140_v38 }
 0x305   :  { %v10168_v57 = vpop.permute.xlu0 %10167  ;;  %v3447_v50 = vsel %vm3425_vm10, %v3382_v60, %v10150_v47  ;;  %v10175_v2 = vunpack.i.h.bf16 %v10173_v26  ;;  %v10174_v46 = vunpack.i.l.bf16 %v10173_v26  ;;  %v776_v26 = vld [vmem:[#allocation2 + $0x248] sm:$0xff] }
 0x306   :  { %10467 = vrot.lane.b32.xlu1 %v12514_v51, %s11072_s3  ;;  %v10170_v58 = vunpack.i.h.bf16 %v10168_v57  ;;  %v10169_v3 = vunpack.i.l.bf16 %v10168_v57  ;;  %v3512_v7 = vsel %vm3490_vm11, %v3447_v50, %v10160_v42  ;;  %v12581_v39 = vpack.i.bf16 %v776_v26, %v775_v43  ;;  %v840_v57 = vld [vmem:[#allocation2 + $0x249] sm:$0xff] }
 0x307   :  { %10452 = vrot.lane.b32.xlu0 %v12480_v37, %s11075_s16  ;;  %v3511_v37 = vsel %vm3490_vm11, %v3446_v32, %v10159_v55  ;;  %v3579_v16 = vsel %vm3555_vm12, %v3514_v25, %v10175_v2  ;;  %v12589_v52 = vpack.i.bf16 %v840_v57, %v839_v29  ;;  %v903_v55 = vld [vmem:[#allocation2 + $0x242] sm:$0xff] }
 0x308   :  { %v12545_v1 = vpop.permute.xlu1 %10182  ;;  %v3576_v31 = vsel %vm3555_vm12, %v3511_v37, %v10169_v3  ;;  %v3577_v6 = vsel %vm3555_vm12, %v3512_v7, %v10170_v58  ;;  %v12599_v58 = vpack.i.bf16 %v904_v56, %v903_v55  ;;  %v1033_v32 = vld [vmem:[#allocation2 + $0x261] sm:$0xff] }
 0x309   :  { %v10178_v48 = vpop.permute.xlu0 %10177  ;;  %v10185_v50 = vunpack.i.h.bf16 %v12545_v1  ;;  %v568_v2 = vld [vmem:[#allocation2 + $0x140] sm:$0xff]  ;;  %v12615_v49 = vpack.i.bf16 %v1033_v32, %v1032_v36 }
 0x30a   :  { %v10180_v8 = vunpack.i.h.bf16 %v10178_v48  ;;  %v10179_v14 = vunpack.i.l.bf16 %v10178_v48  ;;  %10477 = vrot.lane.b32.xlu1 %v12488_v61, %s11074_s15 }
 0x30b   :  { %10462 = vrot.lane.b32.xlu0 %v12488_v61, %s11072_s3  ;;  %v3513_v61 = vsel %vm3490_vm11, %v3448_v13, %v10164_v33 }
 0x30c   :  { %v3641_v0 = vsel %vm3620_vm13, %v3576_v31, %v10179_v14  ;;  %v3642_v28 = vsel %vm3620_vm13, %v3577_v6, %v10180_v8  ;;  %v12563_v12 = vpop.permute.xlu1 %10192  ;;  %v3578_v34 = vsel %vm3555_vm12, %v3513_v61, %v10174_v46  ;;  %v567_v14 = vld [vmem:[#allocation2 + $0x138] sm:$0xff] }
 0x30d   :  { %v10188_v63 = vpop.permute.xlu0 %10187  ;;  %v3695_v41 = vpack.c.bf16 %v3642_v28, %v3641_v0  ;;  %v10195_v60 = vunpack.i.h.bf16 %v12563_v12  ;;  %v10194_v53 = vunpack.i.l.bf16 %v12563_v12 }
 0x30e   :  { %v10190_v4 = vunpack.i.h.bf16 %v10188_v63  ;;  %v10189_v10 = vunpack.i.l.bf16 %v10188_v63  ;;  %10487 = vrot.lane.b32.xlu1 %v12514_v51, %s11074_s15 }
 0x30f   :  { %9171 = vmatprep.mubr.msk.bf16.mxu1 %vm3737_vm14, %v3695_v41  ;;  %10472 = vrot.lane.b32.xlu0 %v12498_v54, %s11076_s17  ;;  %v3193_v0 = vsel %vm151_vm3, %v568_v2, %v10195_v60  ;;  %v3192_v28 = vsel %vm151_vm3, %v567_v14, %v10194_v53 }
 0x310   :  { %v3644_v5 = vsel %vm3620_vm13, %v3579_v16, %v10190_v4  ;;  %v3643_v35 = vsel %vm3620_vm13, %v3578_v34, %v10189_v10  ;;  %v10203_v15 = vpop.permute.xlu1 %10202 }
 0x311   :  { %v10198_v18 = vpop.permute.xlu0 %10197  ;;  %v3696_v38 = vpack.c.bf16 %v3644_v5, %v3643_v35  ;;  %v10205_v19 = vunpack.i.h.bf16 %v10203_v15  ;;  %v10204_v33 = vunpack.i.l.bf16 %v10203_v15 }
 0x312   :  { %10497 = vrot.lane.b32.xlu1 %v10481_v40, %s11073_s4  ;;  %v10200_v48 = vunpack.i.h.bf16 %v10198_v18  ;;  %v10199_v37 = vunpack.i.l.bf16 %v10198_v18 }
 0x313   :  { %9172 = vmatmul.mubr.msk.bf16.gmra.mrb[24].mxu1 %vm3737_vm14, %v3696_v38  ;;  %10482 = vrot.lane.b32.xlu0 %v10481_v40, %s11076_s17  ;;  %v3257_v63 = vsel %vm3230_vm7, %v3192_v28, %v10204_v33  ;;  %v3258_v41 = vsel %vm3230_vm7, %v3193_v0, %v10205_v19 }
 0x314   :  { %v10213_v44 = vpop.permute.xlu1 %10212 }
 0x315   :  { %v10208_v47 = vpop.permute.xlu0 %10207  ;;  %v10215_v46 = vunpack.i.h.bf16 %v10213_v44  ;;  %v10214_v31 = vunpack.i.l.bf16 %v10213_v44 }
 0x316   :  { %10507 = vrot.lane.b32.xlu1 %v12581_v39, %s11078_s22  ;;  %v10209_v12 = vunpack.i.l.bf16 %v10208_v47 }
 0x317   :  { %10492 = vrot.lane.b32.xlu0 %v12498_v54, %s11073_s4  ;;  %v968_v54 = vld [vmem:[#allocation2 + $0x258] sm:$0xff]  ;;  %v3322_v10 = vsel %vm3295_vm8, %v3257_v63, %v10214_v31  ;;  %v3323_v34 = vsel %vm3295_vm8, %v3258_v41, %v10215_v46 }
 0x318   :  { %v12587_v23 = vpop.permute.xlu1 %10222  ;;  %v12613_v8 = vpack.i.bf16 %v969_v59, %v968_v54 }
 0x319   :  { %v12591_v42 = vpop.permute.xlu0 %10217  ;;  %v10225_v43 = vunpack.i.h.bf16 %v12587_v23  ;;  %v10224_v26 = vunpack.i.l.bf16 %v12587_v23 }
 0x31a   :  { %10517 = vrot.lane.b32.xlu1 %v12589_v52, %s11079_s24  ;;  %v10220_v61 = vunpack.i.h.bf16 %v12591_v42  ;;  %v10219_v25 = vunpack.i.l.bf16 %v12591_v42 }
 0x31b   :  { %10502 = vrot.lane.b32.xlu0 %v12512_v27, %s11078_s22  ;;  %v10184_v27 = vunpack.i.l.bf16 %v12545_v1  ;;  %v566_v1 = vld [vmem:[#allocation2 + $0x128] sm:$0xff]  ;;  %v3387_v33 = vsel %vm3360_vm9, %v3322_v10, %v10224_v26  ;;  %v907_v26 = vld [vmem:[#allocation2 + $0x272] sm:$0xff] }
 0x31c   :  { %v12597_v45 = vpop.permute.xlu1 %10232  ;;  %v3191_v13 = vsel %vm151_vm3, %v566_v1, %v10185_v50  ;;  %v1097_v1 = vld [vmem:[#allocation2 + $0x262] sm:$0xff] }
 0x31d   :  { %v12601_v3 = vpop.permute.xlu0 %10227  ;;  %v3190_v17 = vsel %vm151_vm3, %v565_v62, %v10184_v27  ;;  %v3256_v24 = vsel %vm3230_vm7, %v3191_v13, %v10200_v48  ;;  %v10235_v42 = vunpack.i.h.bf16 %v12597_v45  ;;  %v10234_v55 = vunpack.i.l.bf16 %v12597_v45  ;;  %v1096_v62 = vld [vmem:[#allocation2 + $0x25a] sm:$0xff] }
 0x31e   :  { %10527 = vrot.lane.b32.xlu1 %v12599_v58, %s11080_s0  ;;  %v3255_v11 = vsel %vm3230_vm7, %v3190_v17, %v10199_v37  ;;  %v10230_v16 = vunpack.i.h.bf16 %v12601_v3  ;;  %v10229_v5 = vunpack.i.l.bf16 %v12601_v3  ;;  %v3388_v48 = vsel %vm3360_vm9, %v3323_v34, %v10225_v43 }
 0x31f   :  { %10512 = vrot.lane.b32.xlu0 %v12514_v51, %s11079_s24  ;;  %v10210_v51 = vunpack.i.h.bf16 %v10208_v47  ;;  %v3320_v15 = vsel %vm3295_vm8, %v3255_v11, %v10209_v12  ;;  %v3452_v2 = vsel %vm3425_vm10, %v3387_v33, %v10234_v55  ;;  %v3453_v46 = vsel %vm3425_vm10, %v3388_v48, %v10235_v42 }
 0x320   :  { %v12611_v7 = vpop.permute.xlu1 %10242  ;;  %v3385_v29 = vsel %vm3360_vm9, %v3320_v15, %v10219_v25  ;;  %v779_v25 = vld [vmem:[#allocation2 + $0x270] sm:$0xff] }
 0x321   :  { %v10238_v6 = vpop.permute.xlu0 %10237  ;;  %v3450_v3 = vsel %vm3425_vm10, %v3385_v29, %v10229_v5  ;;  %v10245_v23 = vunpack.i.h.bf16 %v12611_v7  ;;  %v10244_v59 = vunpack.i.l.bf16 %v12611_v7  ;;  %v843_v5 = vld [vmem:[#allocation2 + $0x271] sm:$0xff] }
 0x322   :  { %10537 = vrot.lane.b32.xlu1 %v12613_v8, %s11075_s16  ;;  %v10240_v18 = vunpack.i.h.bf16 %v10238_v6  ;;  %v10239_v38 = vunpack.i.l.bf16 %v10238_v6 }
 0x323   :  { %10522 = vrot.lane.b32.xlu0 %v10481_v40, %s11080_s0  ;;  %v3321_v40 = vsel %vm3295_vm8, %v3256_v24, %v10210_v51  ;;  %v3518_v0 = vsel %vm3490_vm11, %v3453_v46, %v10245_v23  ;;  %v12679_v24 = vpack.i.bf16 %v1097_v1, %v1096_v62  ;;  %v1037_v46 = vld [vmem:[#allocation2 + $0x291] sm:$0xff] }
 0x324   :  { %v10253_v4 = vpop.permute.xlu1 %10252  ;;  %v3386_v57 = vsel %vm3360_vm9, %v3321_v40, %v10220_v61 }
 0x325   :  { %v10248_v35 = vpop.permute.xlu0 %10247  ;;  %v3451_v54 = vsel %vm3425_vm10, %v3386_v57, %v10230_v16  ;;  %v10255_v45 = vunpack.i.h.bf16 %v10253_v4  ;;  %v10254_v50 = vunpack.i.l.bf16 %v10253_v4  ;;  %v780_v4 = vld [vmem:[#allocation2 + $0x278] sm:$0xff]  ;;  %v571_v57 = vld [vmem:[#allocation2 + $0x168] sm:$0xff] }
 0x326   :  { %10547 = vrot.lane.b32.xlu1 %v12615_v49, %s11072_s3  ;;  %v10250_v44 = vunpack.i.h.bf16 %v10248_v35  ;;  %v10249_v47 = vunpack.i.l.bf16 %v10248_v35  ;;  %v3516_v53 = vsel %vm3490_vm11, %v3451_v54, %v10240_v18  ;;  %v12688_v34 = vpack.i.bf16 %v780_v4, %v779_v25  ;;  %v844_v35 = vld [vmem:[#allocation2 + $0x279] sm:$0xff] }
 0x327   :  { %10532 = vrot.lane.b32.xlu0 %v12581_v39, %s11075_s16  ;;  %v3515_v39 = vsel %vm3490_vm11, %v3450_v3, %v10239_v38  ;;  %v3583_v13 = vsel %vm3555_vm12, %v3518_v0, %v10255_v45  ;;  %v12697_v18 = vpack.i.bf16 %v844_v35, %v843_v5  ;;  %v9700_v0 = vunpack.i.h.bf16 %v11908_v20 }
 0x328   :  { %v12646_v56 = vpop.permute.xlu1 %10262  ;;  %v3580_v27 = vsel %vm3555_vm12, %v3515_v39, %v10249_v47  ;;  %v3581_v19 = vsel %vm3555_vm12, %v3516_v53, %v10250_v44  ;;  %v908_v44 = vld [vmem:[#allocation2 + $0x27a] sm:$0xff]  ;;  %v9690_v39 = vunpack.i.h.bf16 %v11898_v9  ;;  %v572_v53 = vld [vmem:[#allocation2 + $0x170] sm:$0xff] }
 0x329   :  { %v10258_v60 = vpop.permute.xlu0 %10257  ;;  %v12707_v23 = vpack.i.bf16 %v908_v44, %v907_v26  ;;  %v10265_v48 = vunpack.i.h.bf16 %v12646_v56 }
 0x32a   :  { %v10260_v36 = vunpack.i.h.bf16 %v10258_v60  ;;  %v10259_v32 = vunpack.i.l.bf16 %v10258_v60  ;;  %10557 = vrot.lane.b32.xlu1 %v12589_v52, %s11074_s15  ;;  %v973_v60 = vld [vmem:[#allocation2 + $0x290] sm:$0xff] }
 0x32b   :  { %10542 = vrot.lane.b32.xlu0 %v12589_v52, %s11072_s3  ;;  %v3517_v52 = vsel %vm3490_vm11, %v3452_v2, %v10244_v59  ;;  %v972_v59 = vld [vmem:[#allocation2 + $0x288] sm:$0xff] }
 0x32c   :  { %v3645_v37 = vsel %vm3620_vm13, %v3580_v27, %v10259_v32  ;;  %v3646_v7 = vsel %vm3620_vm13, %v3581_v19, %v10260_v36  ;;  %v12664_v14 = vpop.permute.xlu1 %10272  ;;  %v3582_v12 = vsel %vm3555_vm12, %v3517_v52, %v10254_v50  ;;  %v9689_v27 = vunpack.i.l.bf16 %v11898_v9  ;;  %v1036_v2 = vld [vmem:[#allocation2 + $0x289] sm:$0xff] }
 0x32d   :  { %v10268_v31 = vpop.permute.xlu0 %10267  ;;  %v3697_v6 = vpack.c.bf16 %v3646_v7, %v3645_v37  ;;  %v10274_v15 = vunpack.i.l.bf16 %v12664_v14  ;;  %v10275_v47 = vunpack.i.h.bf16 %v12664_v14  ;;  %v12721_v14 = vpack.i.bf16 %v973_v60, %v972_v59 }
 0x32e   :  { %v10270_v28 = vunpack.i.h.bf16 %v10268_v31  ;;  %v10269_v51 = vunpack.i.l.bf16 %v10268_v31  ;;  %10567 = vrot.lane.b32.xlu1 %v12615_v49, %s11074_s15  ;;  %v10264_v31 = vunpack.i.l.bf16 %v12646_v56  ;;  %v9710_v60 = vunpack.i.h.bf16 %v11910_v22 }
 0x32f   :  { %9175 = vmatprep.mubr.msk.bf16.mxu1 %vm3737_vm14, %v3697_v6  ;;  %10552 = vrot.lane.b32.xlu0 %v12599_v58, %s11076_s17 }
 0x330   :  { %v3648_v17 = vsel %vm3620_vm13, %v3583_v13, %v10270_v28  ;;  %v3647_v63 = vsel %vm3620_vm13, %v3582_v12, %v10269_v51  ;;  %v10283_v41 = vpop.permute.xlu1 %10282  ;;  %v9699_v28 = vunpack.i.l.bf16 %v11908_v20  ;;  %v570_v13 = vld [vmem:[#allocation2 + $0x158] sm:$0xff] }
 0x331   :  { %v12681_v11 = vpop.permute.xlu0 %10277  ;;  %v3698_v61 = vpack.c.bf16 %v3648_v17, %v3647_v63  ;;  %v10284_v38 = vunpack.i.l.bf16 %v10283_v41  ;;  %v10285_v42 = vunpack.i.h.bf16 %v10283_v41  ;;  %v12738_v41 = vpack.i.bf16 %v1037_v46, %v1036_v2 }
 0x332   :  { %10577 = vrot.lane.b32.xlu1 %v12679_v24, %s11073_s4  ;;  %v10280_v6 = vunpack.i.h.bf16 %v12681_v11  ;;  %v3195_v20 = vsel %vm151_vm3, %v570_v13, %v10265_v48  ;;  %v1101_v13 = vld [vmem:[#allocation2 + $0x292] sm:$0xff] }
 0x333   :  { %9176 = vmatmul.mubr.msk.bf16.gmra.mrb[28].mxu1 %vm3737_vm14, %v3698_v61  ;;  %10562 = vrot.lane.b32.xlu0 %v12679_v24, %s11076_s17  ;;  %v569_v61 = vld [vmem:[#allocation2 + $0x150] sm:$0xff] }
 0x334   :  { %v10293_v10 = vpop.permute.xlu1 %10292 }
 0x335   :  { %v12690_v16 = vpop.permute.xlu0 %10287  ;;  %v10294_v29 = vunpack.i.l.bf16 %v10293_v10  ;;  %v10295_v3 = vunpack.i.h.bf16 %v10293_v10  ;;  %v3194_v10 = vsel %vm151_vm3, %v569_v61, %v10264_v31 }
 0x336   :  { %10587 = vrot.lane.b32.xlu1 %v12688_v34, %s11078_s22  ;;  %v10290_v56 = vunpack.i.h.bf16 %v12690_v16  ;;  %v10289_v17 = vunpack.i.l.bf16 %v12690_v16  ;;  %v3260_v16 = vsel %vm3230_vm7, %v3195_v20, %v10280_v6 }
 0x337   :  { %10572 = vrot.lane.b32.xlu0 %v12599_v58, %s11073_s4  ;;  %v3196_v58 = vsel %vm151_vm3, %v571_v57, %v10274_v15 }
 0x338   :  { %v10303_v40 = vpop.permute.xlu1 %10302  ;;  %v3261_v36 = vsel %vm3230_vm7, %v3196_v58, %v10284_v38 }
 0x339   :  { %v12699_v43 = vpop.permute.xlu0 %10297  ;;  %v10304_v55 = vunpack.i.l.bf16 %v10303_v40  ;;  %v10305_v32 = vunpack.i.h.bf16 %v10303_v40  ;;  %v3326_v19 = vsel %vm3295_vm8, %v3261_v36, %v10294_v29 }
 0x33a   :  { %10597 = vrot.lane.b32.xlu1 %v12697_v18, %s11079_s24  ;;  %v10299_v25 = vunpack.i.l.bf16 %v12699_v43 }
 0x33b   :  { %10582 = vrot.lane.b32.xlu0 %v12613_v8, %s11078_s22  ;;  %v3197_v8 = vsel %vm151_vm3, %v572_v53, %v10275_v47  ;;  %v3391_v7 = vsel %vm3360_vm9, %v3326_v19, %v10304_v55  ;;  %v9709_v47 = vunpack.i.l.bf16 %v11910_v22 }
 0x33c   :  { %v10313_v54 = vpop.permute.xlu1 %10312  ;;  %v3262_v37 = vsel %vm3230_vm7, %v3197_v8, %v10285_v42 }
 0x33d   :  { %v10314_v45 = vunpack.i.l.bf16 %v10313_v54  ;;  %v10308_v50 = vpop.permute.xlu0 %10307  ;;  %v10315_v33 = vunpack.i.h.bf16 %v10313_v54  ;;  %v3327_v62 = vsel %vm3295_vm8, %v3262_v37, %v10295_v3 }
 0x33e   :  { %10607 = vrot.lane.b32.xlu1 %v12707_v23, %s11080_s0  ;;  %v3392_v51 = vsel %vm3360_vm9, %v3327_v62, %v10305_v32  ;;  %v10310_v5 = vunpack.i.h.bf16 %v10308_v50  ;;  %v10309_v35 = vunpack.i.l.bf16 %v10308_v50 }
 0x33f   :  { %10592 = vrot.lane.b32.xlu0 %v12615_v49, %s11079_s24  ;;  %v3456_v1 = vsel %vm3425_vm10, %v3391_v7, %v10314_v45  ;;  %v10279_v49 = vunpack.i.l.bf16 %v12681_v11  ;;  %v3457_v63 = vsel %vm3425_vm10, %v3392_v51, %v10315_v33  ;;  %v10300_v11 = vunpack.i.h.bf16 %v12699_v43 }
 0x340   :  { %v12727_v52 = vpop.permute.xlu1 %10332  ;;  %v3521_v4 = vsel %vm3490_vm11, %v3456_v1, %v9699_v28  ;;  %v3522_v38 = vsel %vm3490_vm11, %v3457_v63, %v9700_v0 }
 0x341   :  { %v10318_v12 = vpop.permute.xlu0 %10317  ;;  %v3259_v40 = vsel %vm3230_vm7, %v3194_v10, %v10279_v49  ;;  %v3586_v42 = vsel %vm3555_vm12, %v3521_v4, %v9689_v27  ;;  %v3587_v50 = vsel %vm3555_vm12, %v3522_v38, %v9690_v39  ;;  %v783_v4 = vld [vmem:[#allocation2 + $0x2a0] sm:$0xff]  ;;  %v784_v10 = vld [vmem:[#allocation2 + $0x2a8] sm:$0xff] }
 0x342   :  { %10617 = vrot.lane.b32.xlu1 %v12721_v14, %s11075_s16  ;;  %v10320_v26 = vunpack.i.h.bf16 %v10318_v12  ;;  %v10319_v44 = vunpack.i.l.bf16 %v10318_v12  ;;  %v3324_v29 = vsel %vm3295_vm8, %v3259_v40, %v10289_v17  ;;  %v3651_v33 = vsel %vm3620_vm13, %v3586_v42, %v9709_v47  ;;  %v1100_v12 = vld [vmem:[#allocation2 + $0x28a] sm:$0xff]  ;;  %v847_v47 = vld [vmem:[#allocation2 + $0x2a1] sm:$0xff] }
 0x343   :  { %10602 = vrot.lane.b32.xlu0 %v12679_v24, %s11080_s0  ;;  %v3325_v24 = vsel %vm3295_vm8, %v3260_v16, %v10290_v56  ;;  %v3389_v55 = vsel %vm3360_vm9, %v3324_v29, %v10299_v25  ;;  %v3652_v31 = vsel %vm3620_vm13, %v3587_v50, %v9710_v60  ;;  %v12816_v20 = vpack.i.bf16 %v1101_v13, %v1100_v12  ;;  %v573_v40 = vld [vmem:[#allocation2 + $0x1b0] sm:$0xff]  ;;  %v1041_v50 = vld [vmem:[#allocation2 + $0x2c1] sm:$0xff] }
 0x344   :  { %v12748_v15 = vpop.permute.xlu1 %10337  ;;  %v3390_v58 = vsel %vm3360_vm9, %v3325_v24, %v10300_v11  ;;  %v3454_v53 = vsel %vm3425_vm10, %v3389_v55, %v10309_v35  ;;  %v3700_v17 = vpack.c.bf16 %v3652_v31, %v3651_v33  ;;  %v9705_v16 = vunpack.i.h.bf16 %v11915_v21  ;;  %v848_v29 = vld [vmem:[#allocation2 + $0x2a9] sm:$0xff] }
 0x345   :  { %v10323_v43 = vpop.permute.xlu0 %10322  ;;  %v3455_v36 = vsel %vm3425_vm10, %v3390_v58, %v10310_v5  ;;  %v3519_v27 = vsel %vm3490_vm11, %v3454_v53, %v10319_v44  ;;  %v574_v5 = vld [vmem:[#allocation2 + $0x1b8] sm:$0xff]  ;;  %v9704_v35 = vunpack.i.l.bf16 %v11915_v21  ;;  %v9715_v44 = vunpack.i.h.bf16 %v11918_v30  ;;  %v911_v21 = vld [vmem:[#allocation2 + $0x2a2] sm:$0xff]  ;;  %v912_v55 = vld [vmem:[#allocation2 + $0x2aa] sm:$0xff] }
 0x346   :  { %v12755_v57 = vpop.f32.mrb[4].mxu1  ;;  %10627 = vrot.lane.b32.xlu1 %v12738_v41, %s11072_s3  ;;  %v10325_v3 = vunpack.i.h.bf16 %v10323_v43  ;;  %v10324_v54 = vunpack.i.l.bf16 %v10323_v43  ;;  %v3199_v24 = vsel %vm151_vm3, %v574_v5, %v9705_v16  ;;  %v9714_v42 = vunpack.i.l.bf16 %v11918_v30  ;;  %v976_v58 = vld [vmem:[#allocation2 + $0x2b8] sm:$0xff]  ;;  %v977_v53 = vld [vmem:[#allocation2 + $0x2c0] sm:$0xff] }
 0x347   :  { %10612 = vrot.lane.b32.xlu0 %v12688_v34, %s11075_s16  ;;  %v12764_v59 = vpop.f32.mrb[5].mxu1  ;;  %v3520_v34 = vsel %vm3490_vm11, %v3455_v36, %v10320_v26  ;;  %v4199_v46 = vmul.f32 %v12755_v57, %v12755_v57  ;;  %v12830_v26 = vpack.i.bf16 %v784_v10, %v783_v4  ;;  %v10334_v60 = vunpack.i.l.bf16 %v12727_v52  ;;  %v1040_v36 = vld [vmem:[#allocation2 + $0x2b9] sm:$0xff] }
 0x348   :  { %v12769_v32 = vpop.f32.mrb[6].mxu1  ;;  %v12771_v45 = vpop.permute.xlu1 %10347  ;;  %v4197_v8 = vmul.f32 %v12764_v59, %v12764_v59  ;;  %v3584_v39 = vsel %vm3555_vm12, %v3519_v27, %v10324_v54  ;;  %v3585_v2 = vsel %vm3555_vm12, %v3520_v34, %v10325_v3  ;;  %v3198_v3 = vsel %vm151_vm3, %v573_v40, %v9704_v35 }
 0x349   :  { %v10328_v22 = vpop.permute.xlu0 %10327  ;;  %v12780_v19 = vpop.f32.mrb[7].mxu1  ;;  %v4200_v56 = vmul.f32 %v12769_v32, %v12769_v32  ;;  %v10335_v54 = vunpack.i.h.bf16 %v12727_v52  ;;  %v10340_v30 = vunpack.i.h.bf16 %v12748_v15  ;;  %v10339_v27 = vunpack.i.l.bf16 %v12748_v15 }
 0x34a   :  { %v10330_v48 = vunpack.i.h.bf16 %v10328_v22  ;;  %v10329_v37 = vunpack.i.l.bf16 %v10328_v22  ;;  %v4127_v7 = vadd.f32 %v12780_v19, %v12764_v59  ;;  %v4198_v9 = vmul.f32 %v12780_v19, %v12780_v19  ;;  %10637 = vrot.lane.b32.xlu1 %v12697_v18, %s11074_s15 }
 0x34b   :  { %10622 = vrot.lane.b32.xlu0 %v12697_v18, %s11072_s3  ;;  %v3264_v22 = vsel %vm3230_vm7, %v3199_v24, %v9715_v44  ;;  %v10350_v33 = vunpack.i.h.bf16 %v12771_v45  ;;  %v10349_v52 = vunpack.i.l.bf16 %v12771_v45  ;;  %v12858_v15 = vpack.i.bf16 %v977_v53, %v976_v58 }
 0x34c   :  { %v3649_v6 = vsel %vm3620_vm13, %v3584_v39, %v10329_v37  ;;  %v3650_v62 = vsel %vm3620_vm13, %v3585_v2, %v10330_v48  ;;  %v4128_v1 = vadd.f32 %v12755_v57, %v4127_v7  ;;  %v4261_v0 = vadd.f32 %v4198_v9, %v4197_v8  ;;  %v12799_v28 = vpop.permute.xlu1 %10357  ;;  %v575_v37 = vld [vmem:[#allocation2 + $0x1c8] sm:$0xff]  ;;  %v576_v7 = vld [vmem:[#allocation2 + $0x1d0] sm:$0xff] }
 0x34d   :  { %v12801_v49 = vpop.permute.xlu0 %10342  ;;  %v3699_v51 = vpack.c.bf16 %v3650_v62, %v3649_v6  ;;  %v12848_v8 = vpack.i.bf16 %v848_v29, %v847_v47  ;;  %v12856_v9 = vpack.i.bf16 %v912_v55, %v911_v21  ;;  %v12860_v39 = vpack.i.bf16 %v1041_v50, %v1040_v36 }
 0x34e   :  { %v4262_v18 = vadd.f32 %v4261_v0, %v4199_v46  ;;  %10647 = vrot.lane.b32.xlu1 %v12738_v41, %s11074_s15  ;;  %v12808_v63 = vadd.f32 %v12769_v32, %v4128_v1  ;;  %v3200_v2 = vsel %vm151_vm3, %v575_v37, %v10334_v60  ;;  %v3201_v46 = vsel %vm151_vm3, %v576_v7, %v10335_v54 }
 0x34f   :  { %9179 = vmatprep.mubr.msk.bf16.mxu1 %vm3737_vm14, %v3699_v51  ;;  %10632 = vrot.lane.b32.xlu0 %v12707_v23, %s11076_s17  ;;  %v10345_v45 = vunpack.i.h.bf16 %v12801_v49  ;;  %v10344_v31 = vunpack.i.l.bf16 %v12801_v49  ;;  %v3265_v6 = vsel %vm3230_vm7, %v3200_v2, %v10339_v27  ;;  %v3266_v62 = vsel %vm3230_vm7, %v3201_v46, %v10340_v30 }
 0x350   :  { %9180 = vmatmul.mubr.msk.bf16.gmra.mrb[32].mxu1 %vm3737_vm14, %v3700_v17  ;;  %v12814_v61 = vpop.permute.xlu1 %10367  ;;  %v12818_v11 = vadd.f32 %v4262_v18, %v4200_v56  ;;  %v3330_v12 = vsel %vm3295_vm8, %v3265_v6, %v10349_v52  ;;  %v3331_v13 = vsel %vm3295_vm8, %v3266_v62, %v10350_v33  ;;  %v10359_v17 = vunpack.i.l.bf16 %v12799_v28 }
 0x351   :  { %v12820_v25 = vpop.permute.xlu0 %10352 }
 0x352   :  { %10657 = vrot.lane.b32.xlu1 %v12816_v20, %s11073_s4  ;;  %v10355_v1 = vunpack.i.h.bf16 %v12820_v25  ;;  %v10354_v0 = vunpack.i.l.bf16 %v12820_v25  ;;  %v3329_v25 = vsel %vm3295_vm8, %v3264_v22, %v10345_v45 }
 0x353   :  { %10642 = vrot.lane.b32.xlu0 %v12816_v20, %s11076_s17 }
 0x354   :  { %v12828_v38 = vpop.permute.xlu1 %10377  ;;  %v3394_v44 = vsel %vm3360_vm9, %v3329_v25, %v10355_v1 }
 0x355   :  { %v12833_v43 = vpop.permute.xlu0 %10362  ;;  %v10379_v21 = vunpack.i.l.bf16 %v12828_v38 }
 0x356   :  { %10667 = vrot.lane.b32.xlu1 %v12830_v26, %s11078_s22  ;;  %v10365_v56 = vunpack.i.h.bf16 %v12833_v43  ;;  %v10364_v49 = vunpack.i.l.bf16 %v12833_v43  ;;  %v10369_v43 = vunpack.i.l.bf16 %v12814_v61 }
 0x357   :  { %10652 = vrot.lane.b32.xlu0 %v12707_v23, %s11073_s4  ;;  %v3263_v23 = vsel %vm3230_vm7, %v3198_v3, %v9714_v42  ;;  %v10380_v42 = vunpack.i.h.bf16 %v12828_v38  ;;  %v3395_v38 = vsel %vm3360_vm9, %v3330_v12, %v10359_v17 }
 0x358   :  { %v12846_v34 = vpop.permute.xlu1 %10387  ;;  %v3328_v16 = vsel %vm3295_vm8, %v3263_v23, %v10344_v31  ;;  %v3459_v24 = vsel %vm3425_vm10, %v3394_v44, %v10365_v56  ;;  %v3460_v33 = vsel %vm3425_vm10, %v3395_v38, %v10369_v43 }
 0x359   :  { %v10373_v48 = vpop.permute.xlu0 %10372  ;;  %v3393_v40 = vsel %vm3360_vm9, %v3328_v16, %v10354_v0  ;;  %v10389_v60 = vunpack.i.l.bf16 %v12846_v34  ;;  %v3525_v23 = vsel %vm3490_vm11, %v3460_v33, %v10379_v21  ;;  %v1104_v16 = vld [vmem:[#allocation2 + $0x2ba] sm:$0xff]  ;;  %v1045_v33 = vld [vmem:[#allocation2 + $0x2f1] sm:$0xff] }
 0x35a   :  { %10677 = vrot.lane.b32.xlu1 %v12848_v8, %s11079_s24  ;;  %v10375_v4 = vunpack.i.h.bf16 %v10373_v48  ;;  %v10374_v10 = vunpack.i.l.bf16 %v10373_v48  ;;  %v3458_v29 = vsel %vm3425_vm10, %v3393_v40, %v10364_v49 }
 0x35b   :  { %10662 = vrot.lane.b32.xlu0 %v12721_v14, %s11078_s22  ;;  %v10360_v14 = vunpack.i.h.bf16 %v12799_v28  ;;  %v10370_v28 = vunpack.i.h.bf16 %v12814_v61  ;;  %v10390_v61 = vunpack.i.h.bf16 %v12846_v34  ;;  %v3590_v46 = vsel %vm3555_vm12, %v3525_v23, %v10389_v60  ;;  %v980_v60 = vld [vmem:[#allocation2 + $0x2e8] sm:$0xff] }
 0x35c   :  { %v12872_v51 = vpop.permute.xlu1 %10397  ;;  %v3524_v58 = vsel %vm3490_vm11, %v3459_v24, %v10375_v4  ;;  %v788_v24 = vld [vmem:[#allocation2 + $0x2d8] sm:$0xff] }
 0x35d   :  { %v10383_v18 = vpop.permute.xlu0 %10382  ;;  %v3396_v50 = vsel %vm3360_vm9, %v3331_v13, %v10360_v14 }
 0x35e   :  { %10687 = vrot.lane.b32.xlu1 %v12856_v9, %s11080_s0  ;;  %v10385_v5 = vunpack.i.h.bf16 %v10383_v18  ;;  %v10384_v35 = vunpack.i.l.bf16 %v10383_v18  ;;  %v3461_v34 = vsel %vm3425_vm10, %v3396_v50, %v10370_v28 }
 0x35f   :  { %10672 = vrot.lane.b32.xlu0 %v12738_v41, %s11079_s24  ;;  %v3523_v41 = vsel %vm3490_vm11, %v3458_v29, %v10374_v10  ;;  %v787_v29 = vld [vmem:[#allocation2 + $0x2d0] sm:$0xff] }
 0x360   :  { %v12890_v47 = vpop.permute.xlu1 %10407  ;;  %v3588_v53 = vsel %vm3555_vm12, %v3523_v41, %v10384_v35  ;;  %v3589_v36 = vsel %vm3555_vm12, %v3524_v58, %v10385_v5  ;;  %v1105_v5 = vld [vmem:[#allocation2 + $0x2c2] sm:$0xff]  ;;  %v851_v41 = vld [vmem:[#allocation2 + $0x2d1] sm:$0xff]  ;;  %v852_v58 = vld [vmem:[#allocation2 + $0x2d9] sm:$0xff] }
 0x361   :  { %v10393_v55 = vpop.permute.xlu0 %10392  ;;  %v12968_v28 = vpack.i.bf16 %v1105_v5, %v1104_v16  ;;  %v10410_v38 = vunpack.i.h.bf16 %v12890_v47  ;;  %v10409_v50 = vunpack.i.l.bf16 %v12890_v47  ;;  %v12998_v47 = vpack.i.bf16 %v852_v58, %v851_v41 }
 0x362   :  { %v10395_v3 = vunpack.i.h.bf16 %v10393_v55  ;;  %v10394_v54 = vunpack.i.l.bf16 %v10393_v55  ;;  %10697 = vrot.lane.b32.xlu1 %v12858_v15, %s11075_s16  ;;  %v12980_v55 = vpack.i.bf16 %v788_v24, %v787_v29 }
 0x363   :  { %10682 = vrot.lane.b32.xlu0 %v12816_v20, %s11080_s0  ;;  %v3526_v20 = vsel %vm3490_vm11, %v3461_v34, %v10380_v42 }
 0x364   :  { %v3653_v30 = vsel %vm3620_vm13, %v3588_v53, %v10394_v54  ;;  %v3654_v27 = vsel %vm3620_vm13, %v3589_v36, %v10395_v3  ;;  %v12910_v22 = vpop.permute.xlu1 %10417  ;;  %v3591_v45 = vsel %vm3555_vm12, %v3526_v20, %v10390_v61  ;;  %v915_v54 = vld [vmem:[#allocation2 + $0x2d2] sm:$0xff]  ;;  %v916_v61 = vld [vmem:[#allocation2 + $0x2da] sm:$0xff]  ;;  %v10400_v53 = vunpack.i.h.bf16 %v12872_v51 }
 0x365   :  { %v10403_v52 = vpop.permute.xlu0 %10402  ;;  %v3701_v48 = vpack.c.bf16 %v3654_v27, %v3653_v30  ;;  %v10399_v36 = vunpack.i.l.bf16 %v12872_v51  ;;  %v981_v30 = vld [vmem:[#allocation2 + $0x2f0] sm:$0xff]  ;;  %v10420_v34 = vunpack.i.h.bf16 %v12910_v22 }
 0x366   :  { %v10405_v37 = vunpack.i.h.bf16 %v10403_v52  ;;  %v10404_v7 = vunpack.i.l.bf16 %v10403_v52  ;;  %v12916_v2 = vpop.f32.mrb[8].mxu1  ;;  %10707 = vrot.lane.b32.xlu1 %v12860_v39, %s11072_s3  ;;  %v1044_v27 = vld [vmem:[#allocation2 + $0x2e9] sm:$0xff]  ;;  %v10419_v52 = vunpack.i.l.bf16 %v12910_v22 }
 0x367   :  { %10692 = vrot.lane.b32.xlu0 %v12830_v26, %s11075_s16  ;;  %9183 = vmatprep.mubr.msk.bf16.mxu1 %vm3737_vm14, %v3701_v48  ;;  %v12925_v31 = vpop.f32.mrb[9].mxu1  ;;  %v577_v48 = vld [vmem:[#allocation2 + $0x1e0] sm:$0xff] }
 0x368   :  { %v3655_v6 = vsel %vm3620_vm13, %v3590_v46, %v10404_v7  ;;  %v3656_v62 = vsel %vm3620_vm13, %v3591_v45, %v10405_v37  ;;  %v4130_v1 = vadd.f32 %v12808_v63, %v12925_v31  ;;  %v4201_v0 = vmul.f32 %v12925_v31, %v12925_v31  ;;  %v12933_v12 = vpop.f32.mrb[10].mxu1  ;;  %v12935_v13 = vpop.permute.xlu1 %10427  ;;  %v578_v7 = vld [vmem:[#allocation2 + $0x1e8] sm:$0xff]  ;;  %v579_v46 = vld [vmem:[#allocation2 + $0x1f8] sm:$0xff]  ;;  %v580_v45 = vld [vmem:[#allocation2 + $0x200] sm:$0xff] }
 0x369   :  { %v12937_v56 = vpop.permute.xlu0 %10412  ;;  %v12939_v26 = vpop.f32.mrb[11].mxu1  ;;  %v3702_v49 = vpack.c.bf16 %v3656_v62, %v3655_v6  ;;  %v10430_v51 = vunpack.i.h.bf16 %v12935_v13  ;;  %v10429_v23 = vunpack.i.l.bf16 %v12935_v13  ;;  %v13000_v37 = vpack.i.bf16 %v916_v61, %v915_v54 }
 0x36a   :  { %v4264_v18 = vadd.f32 %v12818_v11, %v4201_v0  ;;  %v4131_v14 = vadd.f32 %v4130_v1, %v12939_v26  ;;  %10717 = vrot.lane.b32.xlu1 %v12848_v8, %s11074_s15  ;;  %v4202_v63 = vmul.f32 %v12939_v26, %v12939_v26  ;;  %v4203_v11 = vmul.f32 %v12916_v2, %v12916_v2 }
 0x36b   :  { %10702 = vrot.lane.b32.xlu0 %v12848_v8, %s11072_s3  ;;  %9184 = vmatmul.mubr.msk.bf16.gmra.mrb[36].mxu1 %vm3737_vm14, %v3702_v49  ;;  %v4204_v8 = vmul.f32 %v12933_v12, %v12933_v12  ;;  %v10415_v6 = vunpack.i.h.bf16 %v12937_v56  ;;  %v10414_v22 = vunpack.i.l.bf16 %v12937_v56  ;;  %v13006_v1 = vpack.i.bf16 %v1045_v33, %v1044_v27 }
 0x36c   :  { %v4132_v17 = vadd.f32 %v12916_v2, %v4131_v14  ;;  %v12951_v4 = vpop.permute.xlu1 %10437  ;;  %v4265_v10 = vadd.f32 %v4264_v18, %v4202_v63  ;;  %v3203_v0 = vsel %vm151_vm3, %v578_v7, %v10400_v53  ;;  %v3202_v13 = vsel %vm151_vm3, %v577_v48, %v10399_v36 }
 0x36d   :  { %v12955_v25 = vpop.permute.xlu0 %10422  ;;  %v3205_v49 = vsel %vm151_vm3, %v580_v45, %v10410_v38  ;;  %v3204_v18 = vsel %vm151_vm3, %v579_v46, %v10409_v50  ;;  %v3268_v29 = vsel %vm3230_vm7, %v3203_v0, %v10415_v6  ;;  %v10439_v58 = vunpack.i.l.bf16 %v12951_v4 }
 0x36e   :  { %10727 = vrot.lane.b32.xlu1 %v12860_v39, %s11074_s15  ;;  %v12960_v35 = vadd.f32 %v12933_v12, %v4132_v17  ;;  %v4266_v40 = vadd.f32 %v4265_v10, %v4203_v11  ;;  %v3269_v14 = vsel %vm3230_vm7, %v3204_v18, %v10419_v52  ;;  %v3270_v56 = vsel %vm3230_vm7, %v3205_v49, %v10420_v34 }
 0x36f   :  { %10712 = vrot.lane.b32.xlu0 %v12856_v9, %s11076_s17  ;;  %v10425_v63 = vunpack.i.h.bf16 %v12955_v25  ;;  %v10424_v17 = vunpack.i.l.bf16 %v12955_v25  ;;  %v3334_v11 = vsel %vm3295_vm8, %v3269_v14, %v10429_v23  ;;  %v3335_v10 = vsel %vm3295_vm8, %v3270_v56, %v10430_v51 }
 0x370   :  { %v12966_v44 = vpop.permute.xlu1 %10447  ;;  %v12972_v42 = vadd.f32 %v4266_v40, %v4204_v8  ;;  %v3267_v40 = vsel %vm3230_vm7, %v3202_v13, %v10414_v22 }
 0x371   :  { %v12970_v43 = vpop.permute.xlu0 %10432  ;;  %v10449_v50 = vunpack.i.l.bf16 %v12966_v44 }
 0x372   :  { %10737 = vrot.lane.b32.xlu1 %v12968_v28, %s11073_s4  ;;  %v10435_v16 = vunpack.i.h.bf16 %v12970_v43  ;;  %v10434_v5 = vunpack.i.l.bf16 %v12970_v43  ;;  %v3332_v43 = vsel %vm3295_vm8, %v3267_v40, %v10424_v17 }
 0x373   :  { %10722 = vrot.lane.b32.xlu0 %v12968_v28, %s11076_s17 }
 0x374   :  { %v12978_v21 = vpop.permute.xlu1 %10457 }
 0x375   :  { %v12982_v3 = vpop.permute.xlu0 %10442  ;;  %v10460_v34 = vunpack.i.h.bf16 %v12978_v21  ;;  %v10459_v52 = vunpack.i.l.bf16 %v12978_v21  ;;  %v3399_v21 = vsel %vm3360_vm9, %v3334_v11, %v10439_v58 }
 0x376   :  { %10747 = vrot.lane.b32.xlu1 %v12980_v55, %s11078_s22  ;;  %v10445_v24 = vunpack.i.h.bf16 %v12982_v3  ;;  %v10444_v25 = vunpack.i.l.bf16 %v12982_v3  ;;  %v3397_v3 = vsel %vm3360_vm9, %v3332_v43, %v10434_v5  ;;  %v3464_v49 = vsel %vm3425_vm10, %v3399_v21, %v10449_v50  ;;  %v920_v21 = vld [vmem:[#allocation2 + $0x30a] sm:$0xff] }
 0x377   :  { %10732 = vrot.lane.b32.xlu0 %v12856_v9, %s11073_s4  ;;  %v13004_v9 = vpack.i.bf16 %v981_v30, %v980_v60  ;;  %v3333_v60 = vsel %vm3295_vm8, %v3268_v29, %v10425_v63  ;;  %v3529_v56 = vsel %vm3490_vm11, %v3464_v49, %v10459_v52 }
 0x378   :  { %v12996_v20 = vpop.permute.xlu1 %10467  ;;  %v3398_v38 = vsel %vm3360_vm9, %v3333_v60, %v10435_v16  ;;  %v3462_v27 = vsel %vm3425_vm10, %v3397_v3, %v10444_v25 }
 0x379   :  { %v10453_v62 = vpop.permute.xlu0 %10452  ;;  %v3463_v33 = vsel %vm3425_vm10, %v3398_v38, %v10445_v24  ;;  %v10469_v46 = vunpack.i.l.bf16 %v12996_v20  ;;  %v1108_v38 = vld [vmem:[#allocation2 + $0x2ea] sm:$0xff] }
 0x37a   :  { %10757 = vrot.lane.b32.xlu1 %v12998_v47, %s11079_s24  ;;  %v10455_v54 = vunpack.i.h.bf16 %v10453_v62  ;;  %v10454_v61 = vunpack.i.l.bf16 %v10453_v62 }
 0x37b   :  { %10742 = vrot.lane.b32.xlu0 %v12858_v15, %s11078_s22  ;;  %v10440_v15 = vunpack.i.h.bf16 %v12951_v4  ;;  %v10450_v4 = vunpack.i.h.bf16 %v12966_v44  ;;  %v10470_v44 = vunpack.i.h.bf16 %v12996_v20 }
 0x37c   :  { %v13024_v8 = vpop.permute.xlu1 %10477  ;;  %v3528_v51 = vsel %vm3490_vm11, %v3463_v33, %v10455_v54 }
 0x37d   :  { %v10463_v41 = vpop.permute.xlu0 %10462  ;;  %v3400_v22 = vsel %vm3360_vm9, %v3335_v10, %v10440_v15  ;;  %v3594_v10 = vsel %vm3555_vm12, %v3529_v56, %v10469_v46  ;;  %v856_v46 = vld [vmem:[#allocation2 + $0x309] sm:$0xff]  ;;  %v1049_v56 = vld [vmem:[#allocation2 + $0x321] sm:$0xff] }
 0x37e   :  { %10767 = vrot.lane.b32.xlu1 %v13000_v37, %s11080_s0  ;;  %v10465_v53 = vunpack.i.h.bf16 %v10463_v41  ;;  %v10464_v36 = vunpack.i.l.bf16 %v10463_v41  ;;  %v3465_v20 = vsel %vm3425_vm10, %v3400_v22, %v10450_v4  ;;  %v1109_v4 = vld [vmem:[#allocation2 + $0x2f2] sm:$0xff] }
 0x37f   :  { %10752 = vrot.lane.b32.xlu0 %v12860_v39, %s11079_s24  ;;  %v3527_v39 = vsel %vm3490_vm11, %v3462_v27, %v10454_v61  ;;  %v984_v22 = vld [vmem:[#allocation2 + $0x318] sm:$0xff] }
 0x380   :  { %v13042_v30 = vpop.permute.xlu1 %10487  ;;  %v3592_v45 = vsel %vm3555_vm12, %v3527_v39, %v10464_v36  ;;  %v3593_v6 = vsel %vm3555_vm12, %v3528_v51, %v10465_v53  ;;  %v792_v39 = vld [vmem:[#allocation2 + $0x308] sm:$0xff] }
 0x381   :  { %v10473_v48 = vpop.permute.xlu0 %10472  ;;  %v10490_v49 = vunpack.i.h.bf16 %v13042_v30 }
 0x382   :  { %v10475_v23 = vunpack.i.h.bf16 %v10473_v48  ;;  %v10474_v7 = vunpack.i.l.bf16 %v10473_v48  ;;  %10777 = vrot.lane.b32.xlu1 %v13004_v9, %s11075_s16  ;;  %v791_v48 = vld [vmem:[#allocation2 + $0x300] sm:$0xff] }
 0x383   :  { %10762 = vrot.lane.b32.xlu0 %v12968_v28, %s11080_s0  ;;  %v3530_v28 = vsel %vm3490_vm11, %v3465_v20, %v10460_v34  ;;  %v13120_v34 = vpack.i.bf16 %v1109_v4, %v1108_v38  ;;  %v10489_v20 = vunpack.i.l.bf16 %v13042_v30 }
 0x384   :  { %v3657_v62 = vsel %vm3620_vm13, %v3592_v45, %v10474_v7  ;;  %v3658_v0 = vsel %vm3620_vm13, %v3593_v6, %v10475_v23  ;;  %v13062_v13 = vpop.permute.xlu1 %10497  ;;  %v3595_v16 = vsel %vm3555_vm12, %v3530_v28, %v10470_v44  ;;  %v13132_v7 = vpack.i.bf16 %v792_v39, %v791_v48  ;;  %v855_v44 = vld [vmem:[#allocation2 + $0x301] sm:$0xff] }
 0x385   :  { %v3703_v18 = vpack.c.bf16 %v3658_v0, %v3657_v62  ;;  %v10483_v14 = vpop.permute.xlu0 %10482  ;;  %v919_v6 = vld [vmem:[#allocation2 + $0x302] sm:$0xff]  ;;  %v10480_v62 = vunpack.i.h.bf16 %v13024_v8  ;;  %v10479_v0 = vunpack.i.l.bf16 %v13024_v8  ;;  %v10500_v28 = vunpack.i.h.bf16 %v13062_v13 }
 0x386   :  { %v10485_v63 = vunpack.i.h.bf16 %v10483_v14  ;;  %v10484_v17 = vunpack.i.l.bf16 %v10483_v14  ;;  %v13068_v11 = vpop.f32.mrb[12].mxu1  ;;  %10787 = vrot.lane.b32.xlu1 %v13006_v1, %s11072_s3  ;;  %v1048_v14 = vld [vmem:[#allocation2 + $0x319] sm:$0xff]  ;;  %v13150_v30 = vpack.i.bf16 %v856_v46, %v855_v44 }
 0x387   :  { %10772 = vrot.lane.b32.xlu0 %v12980_v55, %s11075_s16  ;;  %v13076_v5 = vpop.f32.mrb[13].mxu1  ;;  %9187 = vmatprep.mubr.msk.bf16.mxu1 %vm3737_vm14, %v3703_v18  ;;  %v985_v18 = vld [vmem:[#allocation2 + $0x320] sm:$0xff] }
 0x388   :  { %v3659_v40 = vsel %vm3620_vm13, %v3594_v10, %v10484_v17  ;;  %v3660_v29 = vsel %vm3620_vm13, %v3595_v16, %v10485_v63  ;;  %v4134_v24 = vadd.f32 %v12960_v35, %v13076_v5  ;;  %v4205_v25 = vmul.f32 %v13076_v5, %v13076_v5  ;;  %v13085_v41 = vpop.f32.mrb[14].mxu1  ;;  %v13087_v15 = vpop.permute.xlu1 %10507  ;;  %v581_v17 = vld [vmem:[#allocation2 + $0x210] sm:$0xff] }
 0x389   :  { %v3704_v58 = vpack.c.bf16 %v3660_v29, %v3659_v40  ;;  %v13089_v55 = vpop.permute.xlu0 %10492  ;;  %v13091_v54 = vpop.f32.mrb[15].mxu1  ;;  %v10499_v63 = vunpack.i.l.bf16 %v13062_v13  ;;  %v10510_v8 = vunpack.i.h.bf16 %v13087_v15  ;;  %v10509_v10 = vunpack.i.l.bf16 %v13087_v15  ;;  %v582_v29 = vld [vmem:[#allocation2 + $0x218] sm:$0xff] }
 0x38a   :  { %v4268_v61 = vadd.f32 %v12972_v42, %v4205_v25  ;;  %v4135_v43 = vadd.f32 %v4134_v24, %v13091_v54  ;;  %10797 = vrot.lane.b32.xlu1 %v12998_v47, %s11074_s15  ;;  %v4206_v35 = vmul.f32 %v13091_v54, %v13091_v54  ;;  %v4207_v42 = vmul.f32 %v13068_v11, %v13068_v11  ;;  %v583_v24 = vld [vmem:[#allocation2 + $0x228] sm:$0xff]  ;;  %v584_v25 = vld [vmem:[#allocation2 + $0x230] sm:$0xff] }
 0x38b   :  { %10782 = vrot.lane.b32.xlu0 %v12998_v47, %s11072_s3  ;;  %9188 = vmatmul.mubr.msk.bf16.gmra.mrb[40].mxu1 %vm3737_vm14, %v3704_v58  ;;  %v4208_v47 = vmul.f32 %v13085_v41, %v13085_v41  ;;  %v13152_v40 = vpack.i.bf16 %v920_v21, %v919_v6  ;;  %v10495_v58 = vunpack.i.h.bf16 %v13089_v55  ;;  %v10494_v13 = vunpack.i.l.bf16 %v13089_v55 }
 0x38c   :  { %v4136_v60 = vadd.f32 %v13068_v11, %v4135_v43  ;;  %v13103_v53 = vpop.permute.xlu1 %10517  ;;  %v4269_v36 = vadd.f32 %v4268_v61, %v4206_v35  ;;  %v13158_v43 = vpack.i.bf16 %v1049_v56, %v1048_v14  ;;  %v3207_v15 = vsel %vm151_vm3, %v582_v29, %v10480_v62 }
 0x38d   :  { %v13107_v3 = vpop.permute.xlu0 %10502  ;;  %v3206_v35 = vsel %vm151_vm3, %v581_v17, %v10479_v0  ;;  %v3272_v6 = vsel %vm3230_vm7, %v3207_v15, %v10495_v58  ;;  %v10519_v62 = vunpack.i.l.bf16 %v13103_v53 }
 0x38e   :  { %10807 = vrot.lane.b32.xlu1 %v13006_v1, %s11074_s15  ;;  %v13112_v50 = vadd.f32 %v13085_v41, %v4136_v60  ;;  %v4270_v27 = vadd.f32 %v4269_v36, %v4207_v42  ;;  %v3209_v60 = vsel %vm151_vm3, %v584_v25, %v10490_v49  ;;  %v3208_v42 = vsel %vm151_vm3, %v583_v24, %v10489_v20 }
 0x38f   :  { %10792 = vrot.lane.b32.xlu0 %v13000_v37, %s11076_s17  ;;  %v3273_v36 = vsel %vm3230_vm7, %v3208_v42, %v10499_v63  ;;  %v3274_v55 = vsel %vm3230_vm7, %v3209_v60, %v10500_v28  ;;  %v10505_v38 = vunpack.i.h.bf16 %v13107_v3  ;;  %v10504_v4 = vunpack.i.l.bf16 %v13107_v3 }
 0x390   :  { %v13118_v33 = vpop.permute.xlu1 %10527  ;;  %v13124_v51 = vadd.f32 %v4270_v27, %v4208_v47  ;;  %v3338_v47 = vsel %vm3295_vm8, %v3273_v36, %v10509_v10  ;;  %v3339_v27 = vsel %vm3295_vm8, %v3274_v55, %v10510_v8  ;;  %v3271_v46 = vsel %vm3230_vm7, %v3206_v35, %v10494_v13 }
 0x391   :  { %v13122_v52 = vpop.permute.xlu0 %10512  ;;  %v3337_v20 = vsel %vm3295_vm8, %v3272_v6, %v10505_v38  ;;  %v10529_v28 = vunpack.i.l.bf16 %v13118_v33 }
 0x392   :  { %10817 = vrot.lane.b32.xlu1 %v13120_v34, %s11073_s4  ;;  %v10515_v48 = vunpack.i.h.bf16 %v13122_v52  ;;  %v10514_v39 = vunpack.i.l.bf16 %v13122_v52  ;;  %v3336_v52 = vsel %vm3295_vm8, %v3271_v46, %v10504_v4 }
 0x393   :  { %10802 = vrot.lane.b32.xlu0 %v13120_v34, %s11076_s17 }
 0x394   :  { %v13130_v23 = vpop.permute.xlu1 %10537  ;;  %v3402_v56 = vsel %vm3360_vm9, %v3337_v20, %v10515_v48 }
 0x395   :  { %v13134_v45 = vpop.permute.xlu0 %10522  ;;  %v10540_v10 = vunpack.i.h.bf16 %v13130_v23  ;;  %v10539_v29 = vunpack.i.l.bf16 %v13130_v23  ;;  %v3403_v23 = vsel %vm3360_vm9, %v3338_v47, %v10519_v62 }
 0x396   :  { %10827 = vrot.lane.b32.xlu1 %v13132_v7, %s11078_s22  ;;  %v10525_v21 = vunpack.i.h.bf16 %v13134_v45  ;;  %v10524_v3 = vunpack.i.l.bf16 %v13134_v45  ;;  %v3401_v45 = vsel %vm3360_vm9, %v3336_v52, %v10514_v39  ;;  %v3468_v38 = vsel %vm3425_vm10, %v3403_v23, %v10529_v28  ;;  %v859_v23 = vld [vmem:[#allocation2 + $0x331] sm:$0xff] }
 0x397   :  { %10812 = vrot.lane.b32.xlu0 %v13000_v37, %s11073_s4  ;;  %v13156_v37 = vpack.i.bf16 %v985_v18, %v984_v22  ;;  %v3533_v39 = vsel %vm3490_vm11, %v3468_v38, %v10539_v29  ;;  %v924_v38 = vld [vmem:[#allocation2 + $0x33a] sm:$0xff] }
 0x398   :  { %v13148_v16 = vpop.permute.xlu1 %10547  ;;  %v3466_v17 = vsel %vm3425_vm10, %v3401_v45, %v10524_v3  ;;  %v3467_v8 = vsel %vm3425_vm10, %v3402_v56, %v10525_v21 }
 0x399   :  { %v10533_v61 = vpop.permute.xlu0 %10532 }
 0x39a   :  { %10837 = vrot.lane.b32.xlu1 %v13150_v30, %s11079_s24  ;;  %v10535_v0 = vunpack.i.h.bf16 %v10533_v61  ;;  %v10534_v49 = vunpack.i.l.bf16 %v10533_v61  ;;  %v10549_v61 = vunpack.i.l.bf16 %v13148_v16 }
 0x39b   :  { %10822 = vrot.lane.b32.xlu0 %v13004_v9, %s11078_s22  ;;  %v10520_v9 = vunpack.i.h.bf16 %v13103_v53  ;;  %v10530_v53 = vunpack.i.h.bf16 %v13118_v33  ;;  %v10550_v33 = vunpack.i.h.bf16 %v13148_v16 }
 0x39c   :  { %v13176_v44 = vpop.permute.xlu1 %10557  ;;  %v3532_v25 = vsel %vm3490_vm11, %v3467_v8, %v10535_v0  ;;  %v1112_v8 = vld [vmem:[#allocation2 + $0x31a] sm:$0xff] }
 0x39d   :  { %v10543_v22 = vpop.permute.xlu0 %10542  ;;  %v3404_v60 = vsel %vm3360_vm9, %v3339_v27, %v10520_v9  ;;  %v3598_v27 = vsel %vm3555_vm12, %v3533_v39, %v10549_v61 }
 0x39e   :  { %10847 = vrot.lane.b32.xlu1 %v13152_v40, %s11080_s0  ;;  %v10545_v18 = vunpack.i.h.bf16 %v10543_v22  ;;  %v10544_v14 = vunpack.i.l.bf16 %v10543_v22  ;;  %v3469_v16 = vsel %vm3425_vm10, %v3404_v60, %v10530_v53  ;;  %v860_v60 = vld [vmem:[#allocation2 + $0x339] sm:$0xff] }
 0x39f   :  { %10832 = vrot.lane.b32.xlu0 %v13006_v1, %s11079_s24  ;;  %v3531_v1 = vsel %vm3490_vm11, %v3466_v17, %v10534_v49 }
 0x3a0   :  { %v13194_v63 = vpop.permute.xlu1 %10567  ;;  %v3596_v15 = vsel %vm3555_vm12, %v3531_v1, %v10544_v14  ;;  %v3597_v35 = vsel %vm3555_vm12, %v3532_v25, %v10545_v18 }
 0x3a1   :  { %v10553_v24 = vpop.permute.xlu0 %10552  ;;  %v10570_v39 = vunpack.i.h.bf16 %v13194_v63 }
 0x3a2   :  { %v10555_v58 = vunpack.i.h.bf16 %v10553_v24  ;;  %v10554_v13 = vunpack.i.l.bf16 %v10553_v24  ;;  %10857 = vrot.lane.b32.xlu1 %v13156_v37, %s11075_s16 }
 0x3a3   :  { %10842 = vrot.lane.b32.xlu0 %v13120_v34, %s11080_s0  ;;  %v3534_v34 = vsel %vm3490_vm11, %v3469_v16, %v10540_v10  ;;  %v1113_v10 = vld [vmem:[#allocation2 + $0x322] sm:$0xff] }
 0x3a4   :  { %v3661_v42 = vsel %vm3620_vm13, %v3596_v15, %v10554_v13  ;;  %v3662_v36 = vsel %vm3620_vm13, %v3597_v35, %v10555_v58  ;;  %v13214_v55 = vpop.permute.xlu1 %10577  ;;  %v3599_v21 = vsel %vm3555_vm12, %v3534_v34, %v10550_v33  ;;  %v13272_v25 = vpack.i.bf16 %v1113_v10, %v1112_v8  ;;  %v795_v13 = vld [vmem:[#allocation2 + $0x330] sm:$0xff]  ;;  %v796_v33 = vld [vmem:[#allocation2 + $0x338] sm:$0xff]  ;;  %v13288_v16 = vld [vmem:[#allocation2 + $0x348] sm:$0xff] }
 0x3a5   :  { %v3705_v4 = vpack.c.bf16 %v3662_v36, %v3661_v42  ;;  %v10563_v48 = vpop.permute.xlu0 %10562  ;;  %v13284_v35 = vpack.i.bf16 %v796_v33, %v795_v13  ;;  %v923_v36 = vld [vmem:[#allocation2 + $0x332] sm:$0xff]  ;;  %v10569_v34 = vunpack.i.l.bf16 %v13194_v63 }
 0x3a6   :  { %v10565_v46 = vunpack.i.h.bf16 %v10563_v48  ;;  %v10564_v47 = vunpack.i.l.bf16 %v10563_v48  ;;  %v13220_v6 = vpop.f32.mrb[16].mxu1  ;;  %10867 = vrot.lane.b32.xlu1 %v13158_v43, %s11072_s3  ;;  %v10559_v48 = vunpack.i.l.bf16 %v13176_v44 }
 0x3a7   :  { %10852 = vrot.lane.b32.xlu0 %v13132_v7, %s11075_s16  ;;  %v13228_v3 = vpop.f32.mrb[17].mxu1  ;;  %9191 = vmatprep.mubr.msk.bf16.mxu1 %vm3737_vm14, %v3705_v4  ;;  %v10560_v4 = vunpack.i.h.bf16 %v13176_v44  ;;  %v585_v44 = vld [vmem:[#allocation2 + $0x240] sm:$0xff] }
 0x3a8   :  { %v3663_v22 = vsel %vm3620_vm13, %v3598_v27, %v10564_v47  ;;  %v3664_v9 = vsel %vm3620_vm13, %v3599_v21, %v10565_v46  ;;  %v4138_v62 = vadd.f32 %v13112_v50, %v13228_v3  ;;  %v4209_v0 = vmul.f32 %v13228_v3, %v13228_v3  ;;  %v13237_v49 = vpop.f32.mrb[18].mxu1  ;;  %v13239_v52 = vpop.permute.xlu1 %10587  ;;  %v13296_v46 = vld [vmem:[#allocation2 + $0x350] sm:$0xff] }
 0x3a9   :  { %v3706_v20 = vpack.c.bf16 %v3664_v9, %v3663_v22  ;;  %v13241_v7 = vpop.permute.xlu0 %10572  ;;  %v13243_v18 = vpop.f32.mrb[19].mxu1  ;;  %v13298_v47 = vld [vmem:[#allocation2 + $0x349] sm:$0xff]  ;;  %v13300_v27 = vld [vmem:[#allocation2 + $0x351] sm:$0xff]  ;;  %v10580_v21 = vunpack.i.h.bf16 %v13214_v55  ;;  %v10579_v22 = vunpack.i.l.bf16 %v13214_v55  ;;  %v10590_v9 = vunpack.i.h.bf16 %v13239_v52 }
 0x3aa   :  { %v4272_v14 = vadd.f32 %v13124_v51, %v4209_v0  ;;  %v4139_v45 = vadd.f32 %v4138_v62, %v13243_v18  ;;  %10877 = vrot.lane.b32.xlu1 %v13150_v30, %s11074_s15  ;;  %v4210_v50 = vmul.f32 %v13243_v18, %v13243_v18  ;;  %v4211_v51 = vmul.f32 %v13220_v6, %v13220_v6 }
 0x3ab   :  { %10862 = vrot.lane.b32.xlu0 %v13150_v30, %s11072_s3  ;;  %9192 = vmatmul.mubr.msk.bf16.gmra.mrb[44].mxu1 %vm3737_vm14, %v3706_v20  ;;  %v4212_v30 = vmul.f32 %v13237_v49, %v13237_v49  ;;  %v10589_v63 = vunpack.i.l.bf16 %v13239_v52  ;;  %v13310_v0 = vpack.i.bf16 %v860_v60, %v859_v23  ;;  %v13312_v20 = vpack.i.bf16 %v924_v38, %v923_v36 }
 0x3ac   :  { %v4140_v56 = vadd.f32 %v13220_v6, %v4139_v45  ;;  %v13255_v53 = vpop.permute.xlu1 %10597  ;;  %v4273_v28 = vadd.f32 %v4272_v14, %v4210_v50  ;;  %v586_v14 = vld [vmem:[#allocation2 + $0x248] sm:$0xff]  ;;  %v587_v45 = vld [vmem:[#allocation2 + $0x258] sm:$0xff]  ;;  %v588_v50 = vld [vmem:[#allocation2 + $0x260] sm:$0xff]  ;;  %v10574_v55 = vunpack.i.l.bf16 %v13241_v7  ;;  %v10946_v52 = vpack.i.bf16 %v13300_v27, %v13298_v47 }
 0x3ad   :  { %v13259_v17 = vpop.permute.xlu0 %10582  ;;  %v3210_v8 = vsel %vm151_vm3, %v585_v44, %v10559_v48  ;;  %v3213_v10 = vsel %vm151_vm3, %v588_v50, %v10570_v39 }
 0x3ae   :  { %10887 = vrot.lane.b32.xlu1 %v13158_v43, %s11074_s15  ;;  %v13264_v29 = vadd.f32 %v13237_v49, %v4140_v56  ;;  %v4274_v24 = vadd.f32 %v4273_v28, %v4211_v51  ;;  %v10575_v56 = vunpack.i.h.bf16 %v13241_v7  ;;  %v3211_v28 = vsel %vm151_vm3, %v586_v14, %v10560_v4 }
 0x3af   :  { %10872 = vrot.lane.b32.xlu0 %v13152_v40, %s11076_s17  ;;  %v10585_v13 = vunpack.i.h.bf16 %v13259_v17  ;;  %v10584_v33 = vunpack.i.l.bf16 %v13259_v17  ;;  %v3275_v4 = vsel %vm3230_vm7, %v3210_v8, %v10574_v55 }
 0x3b0   :  { %v13270_v1 = vpop.permute.xlu1 %10607  ;;  %v13276_v61 = vadd.f32 %v4274_v24, %v4212_v30  ;;  %v3212_v30 = vsel %vm151_vm3, %v587_v45, %v10569_v34  ;;  %v3278_v24 = vsel %vm3230_vm7, %v3213_v10, %v10580_v21  ;;  %v3276_v48 = vsel %vm3230_vm7, %v3211_v28, %v10575_v56 }
 0x3b1   :  { %v13274_v58 = vpop.permute.xlu0 %10592  ;;  %v3277_v7 = vsel %vm3230_vm7, %v3212_v30, %v10579_v22  ;;  %v3343_v60 = vsel %vm3295_vm8, %v3278_v24, %v10590_v9  ;;  %v3341_v44 = vsel %vm3295_vm8, %v3276_v48, %v10585_v13  ;;  %v10609_v45 = vunpack.i.l.bf16 %v13270_v1  ;;  %v1117_v24 = vld [vmem:[#allocation2 + $0x352] sm:$0xff] }
 0x3b2   :  { %10897 = vrot.lane.b32.xlu1 %v13272_v25, %s11073_s4  ;;  %v3342_v23 = vsel %vm3295_vm8, %v3277_v7, %v10589_v63  ;;  %v10595_v36 = vunpack.i.h.bf16 %v13274_v58  ;;  %v10594_v38 = vunpack.i.l.bf16 %v13274_v58  ;;  %v3340_v58 = vsel %vm3295_vm8, %v3275_v4, %v10584_v33 }
 0x3b3   :  { %10882 = vrot.lane.b32.xlu0 %v13272_v25, %s11076_s17 }
 0x3b4   :  { %v13282_v15 = vpop.permute.xlu1 %10617  ;;  %v3406_v14 = vsel %vm3360_vm9, %v3341_v44, %v10595_v36 }
 0x3b5   :  { %v13286_v42 = vpop.permute.xlu0 %10602  ;;  %v10619_v28 = vunpack.i.l.bf16 %v13282_v15 }
 0x3b6   :  { %10907 = vrot.lane.b32.xlu1 %v13284_v35, %s11078_s22  ;;  %v10605_v39 = vunpack.i.h.bf16 %v13286_v42  ;;  %v10604_v17 = vunpack.i.l.bf16 %v13286_v42  ;;  %v3405_v42 = vsel %vm3360_vm9, %v3340_v58, %v10594_v38 }
 0x3b7   :  { %10892 = vrot.lane.b32.xlu0 %v13152_v40, %s11073_s4  ;;  %v10936_v40 = vpack.i.bf16 %v13296_v46, %v13288_v16  ;;  %v10599_v46 = vunpack.i.l.bf16 %v13255_v53 }
 0x3b8   :  { %v13308_v62 = vpop.permute.xlu1 %10627  ;;  %v3470_v56 = vsel %vm3425_vm10, %v3405_v42, %v10604_v17  ;;  %v3471_v55 = vsel %vm3425_vm10, %v3406_v14, %v10605_v39 }
 0x3b9   :  { %v10613_v51 = vpop.permute.xlu0 %10612  ;;  %v10630_v13 = vunpack.i.h.bf16 %v13308_v62  ;;  %v10629_v33 = vunpack.i.l.bf16 %v13308_v62 }
 0x3ba   :  { %10917 = vrot.lane.b32.xlu1 %v13310_v0, %s11079_s24  ;;  %v10615_v21 = vunpack.i.h.bf16 %v10613_v51  ;;  %v10614_v22 = vunpack.i.l.bf16 %v10613_v51  ;;  %v10620_v51 = vunpack.i.h.bf16 %v13282_v15  ;;  %v3407_v15 = vsel %vm3360_vm9, %v3342_v23, %v10599_v46 }
 0x3bb   :  { %10902 = vrot.lane.b32.xlu0 %v13156_v37, %s11078_s22  ;;  %v10600_v37 = vunpack.i.h.bf16 %v13255_v53  ;;  %v10610_v53 = vunpack.i.h.bf16 %v13270_v1  ;;  %v1116_v1 = vld [vmem:[#allocation2 + $0x34a] sm:$0xff]  ;;  %v3472_v17 = vsel %vm3425_vm10, %v3407_v15, %v10609_v45 }
 0x3bc   :  { %v13336_v16 = vpop.permute.xlu1 %10637  ;;  %v3536_v10 = vsel %vm3490_vm11, %v3471_v55, %v10615_v21  ;;  %v3537_v58 = vsel %vm3490_vm11, %v3472_v17, %v10619_v28 }
 0x3bd   :  { %v10623_v34 = vpop.permute.xlu0 %10622  ;;  %v3408_v4 = vsel %vm3360_vm9, %v3343_v60, %v10600_v37  ;;  %v3602_v37 = vsel %vm3555_vm12, %v3537_v58, %v10629_v33  ;;  %v592_v58 = vld [vmem:[#allocation2 + $0x290] sm:$0xff] }
 0x3be   :  { %10927 = vrot.lane.b32.xlu1 %v13312_v20, %s11080_s0  ;;  %v10625_v9 = vunpack.i.h.bf16 %v10623_v34  ;;  %v10624_v63 = vunpack.i.l.bf16 %v10623_v34  ;;  %v3473_v62 = vsel %vm3425_vm10, %v3408_v4, %v10610_v53 }
 0x3bf   :  { %10912 = vrot.lane.b32.xlu0 %v13158_v43, %s11079_s24  ;;  %v3535_v43 = vsel %vm3490_vm11, %v3470_v56, %v10614_v22  ;;  %v10956_v22 = vpack.i.bf16 %v1117_v24, %v1116_v1 }
 0x3c0   :  { %v13354_v50 = vpop.permute.xlu1 %10647  ;;  %v3600_v36 = vsel %vm3555_vm12, %v3535_v43, %v10624_v63  ;;  %v3601_v38 = vsel %vm3555_vm12, %v3536_v10, %v10625_v9 }
 0x3c1   :  { %v10633_v8 = vpop.permute.xlu0 %10632  ;;  %v10650_v15 = vunpack.i.h.bf16 %v13354_v50  ;;  %v10649_v4 = vunpack.i.l.bf16 %v13354_v50 }
 0x3c2   :  { %v10635_v30 = vunpack.i.h.bf16 %v10633_v8  ;;  %v10634_v7 = vunpack.i.l.bf16 %v10633_v8  ;;  %10937 = vrot.lane.b32.xlu1 %v10936_v40, %s11075_s16 }
 0x3c3   :  { %10922 = vrot.lane.b32.xlu0 %v13272_v25, %s11080_s0  ;;  %v3538_v25 = vsel %vm3490_vm11, %v3473_v62, %v10620_v51  ;;  %v3217_v50 = vsel %vm151_vm3, %v592_v58, %v10650_v15 }
 0x3c4   :  { %v3665_v48 = vsel %vm3620_vm13, %v3600_v36, %v10634_v7  ;;  %v3666_v40 = vsel %vm3620_vm13, %v3601_v38, %v10635_v30  ;;  %v13373_v39 = vpop.permute.xlu1 %10657  ;;  %v3603_v44 = vsel %vm3555_vm12, %v3538_v25, %v10630_v13  ;;  %v10640_v36 = vunpack.i.h.bf16 %v13336_v16 }
 0x3c5   :  { %v3707_v34 = vpack.c.bf16 %v3666_v40, %v3665_v48  ;;  %v10643_v21 = vpop.permute.xlu0 %10642  ;;  %v10639_v38 = vunpack.i.l.bf16 %v13336_v16  ;;  %v10660_v48 = vunpack.i.h.bf16 %v13373_v39  ;;  %v589_v40 = vld [vmem:[#allocation2 + $0x270] sm:$0xff] }
 0x3c6   :  { %v10645_v23 = vunpack.i.h.bf16 %v10643_v21  ;;  %v10644_v46 = vunpack.i.l.bf16 %v10643_v21  ;;  %v13379_v60 = vpop.f32.mrb[20].mxu1  ;;  %10947 = vrot.lane.b32.xlu1 %v10946_v52, %s11072_s3  ;;  %v590_v21 = vld [vmem:[#allocation2 + $0x278] sm:$0xff] }
 0x3c7   :  { %10932 = vrot.lane.b32.xlu0 %v13284_v35, %s11075_s16  ;;  %v13389_v9 = vpop.f32.mrb[21].mxu1  ;;  %9195 = vmatprep.mubr.msk.bf16.mxu1 %vm3737_vm14, %v3707_v34  ;;  %v4215_v8 = vmul.f32 %v13379_v60, %v13379_v60  ;;  %v3215_v16 = vsel %vm151_vm3, %v590_v21, %v10640_v36 }
 0x3c8   :  { %v3667_v63 = vsel %vm3620_vm13, %v3602_v37, %v10644_v46  ;;  %v3668_v42 = vsel %vm3620_vm13, %v3603_v44, %v10645_v23  ;;  %v4142_v14 = vadd.f32 %v13264_v29, %v13389_v9  ;;  %v4213_v47 = vmul.f32 %v13389_v9, %v13389_v9  ;;  %v13398_v27 = vpop.f32.mrb[22].mxu1  ;;  %v10668_v52 = vpop.permute.xlu1 %10667 }
 0x3c9   :  { %v3708_v53 = vpack.c.bf16 %v3668_v42, %v3667_v63  ;;  %v10653_v45 = vpop.permute.xlu0 %10652  ;;  %v13400_v35 = vpop.f32.mrb[23].mxu1  ;;  %v4216_v30 = vmul.f32 %v13398_v27, %v13398_v27  ;;  %v10670_v17 = vunpack.i.h.bf16 %v10668_v52  ;;  %v10669_v62 = vunpack.i.l.bf16 %v10668_v52 }
 0x3ca   :  { %v4276_v56 = vadd.f32 %v13276_v61, %v4213_v47  ;;  %v4143_v55 = vadd.f32 %v4142_v14, %v13400_v35  ;;  %10957 = vrot.lane.b32.xlu1 %v10956_v22, %s11076_s17  ;;  %v4214_v51 = vmul.f32 %v13400_v35, %v13400_v35  ;;  %v591_v22 = vld [vmem:[#allocation2 + $0x288] sm:$0xff]  ;;  %v10655_v25 = vunpack.i.h.bf16 %v10653_v45 }
 0x3cb   :  { %10942 = vrot.lane.b32.xlu0 %v13310_v0, %s11072_s3  ;;  %9196 = vmatmul.mubr.msk.bf16.gmra.mrb[48].mxu1 %vm3737_vm14, %v3708_v53  ;;  %v10654_v23 = vunpack.i.l.bf16 %v10653_v45  ;;  %v3214_v37 = vsel %vm151_vm3, %v589_v40, %v10639_v38  ;;  %v3216_v44 = vsel %vm151_vm3, %v591_v22, %v10649_v4  ;;  %v3282_v63 = vsel %vm3230_vm7, %v3217_v50, %v10660_v48 }
 0x3cc   :  { %v4144_v29 = vadd.f32 %v13379_v60, %v4143_v55  ;;  %v13411_v28 = vpop.permute.xlu1 %10677  ;;  %v4277_v61 = vadd.f32 %v4276_v56, %v4214_v51  ;;  %v3347_v52 = vsel %vm3295_vm8, %v3282_v63, %v10670_v17  ;;  %v3280_v51 = vsel %vm3230_vm7, %v3215_v16, %v10655_v25 }
 0x3cd   :  { %v10663_v43 = vpop.permute.xlu0 %10662  ;;  %v3279_v55 = vsel %vm3230_vm7, %v3214_v37, %v10654_v23 }
 0x3ce   :  { %v13416_v10 = vadd.f32 %v13398_v27, %v4144_v29  ;;  %v4278_v7 = vadd.f32 %v4277_v61, %v4215_v8  ;;  %v10665_v42 = vunpack.i.h.bf16 %v10663_v43  ;;  %v10664_v14 = vunpack.i.l.bf16 %v10663_v43 }
 0x3cf   :  { %10952 = vrot.lane.b32.xlu0 %v13312_v20, %s11076_s17  ;;  %v10659_v20 = vunpack.i.l.bf16 %v13373_v39 }
 0x3d0   :  { %v13422_v0 = vpop.permute.xlu1 %10687  ;;  %v13424_v24 = vadd.f32 %v4278_v7, %v4216_v30  ;;  %v10680_v30 = vunpack.i.h.bf16 %v13411_v28  ;;  %v10679_v7 = vunpack.i.l.bf16 %v13411_v28  ;;  %v3344_v38 = vsel %vm3295_vm8, %v3279_v55, %v10664_v14 }
 0x3d1   :  { %v10673_v1 = vpop.permute.xlu0 %10672  ;;  %v3281_v39 = vsel %vm3230_vm7, %v3216_v44, %v10659_v20  ;;  %v3345_v15 = vsel %vm3295_vm8, %v3280_v51, %v10665_v42  ;;  %v10690_v40 = vunpack.i.h.bf16 %v13422_v0 }
 0x3d2   :  { %v3346_v47 = vsel %vm3295_vm8, %v3281_v39, %v10669_v62  ;;  %v10675_v53 = vunpack.i.h.bf16 %v10673_v1  ;;  %v10674_v45 = vunpack.i.l.bf16 %v10673_v1  ;;  %v3412_v63 = vsel %vm3360_vm9, %v3347_v52, %v10680_v30 }
 0x3d3   :  { %v3411_v39 = vsel %vm3360_vm9, %v3346_v47, %v10679_v7 }
 0x3d4   :  { %v13426_v13 = vpop.permute.xlu1 %10697  ;;  %v3409_v48 = vsel %vm3360_vm9, %v3344_v38, %v10674_v45  ;;  %v3410_v20 = vsel %vm3360_vm9, %v3345_v15, %v10675_v53  ;;  %v3477_v45 = vsel %vm3425_vm10, %v3412_v63, %v10690_v40 }
 0x3d5   :  { %v10683_v33 = vpop.permute.xlu0 %10682  ;;  %v10700_v21 = vunpack.i.h.bf16 %v13426_v13  ;;  %v10699_v22 = vunpack.i.l.bf16 %v13426_v13 }
 0x3d6   :  { %v10685_v29 = vunpack.i.h.bf16 %v10683_v33  ;;  %v10684_v8 = vunpack.i.l.bf16 %v10683_v33  ;;  %v10689_v33 = vunpack.i.l.bf16 %v13422_v0 }
 0x3d8   :  { %v13434_v34 = vpop.permute.xlu1 %10707  ;;  %v3474_v28 = vsel %vm3425_vm10, %v3409_v48, %v10684_v8  ;;  %v3475_v62 = vsel %vm3425_vm10, %v3410_v20, %v10685_v29  ;;  %v3476_v53 = vsel %vm3425_vm10, %v3411_v39, %v10689_v33  ;;  %v3542_v29 = vsel %vm3490_vm11, %v3477_v45, %v10700_v21 }
 0x3d9   :  { %v10693_v46 = vpop.permute.xlu0 %10692  ;;  %v10710_v37 = vunpack.i.h.bf16 %v13434_v34  ;;  %v10709_v0 = vunpack.i.l.bf16 %v13434_v34  ;;  %v3541_v51 = vsel %vm3490_vm11, %v3476_v53, %v10699_v22 }
 0x3da   :  { %v10695_v43 = vunpack.i.h.bf16 %v10693_v46  ;;  %v10694_v36 = vunpack.i.l.bf16 %v10693_v46 }
 0x3db   :  { %v3606_v52 = vsel %vm3555_vm12, %v3541_v51, %v10709_v0  ;;  %v3607_v30 = vsel %vm3555_vm12, %v3542_v29, %v10710_v37 }
 0x3dc   :  { %v13444_v56 = vpop.permute.xlu1 %10717  ;;  %v3539_v25 = vsel %vm3490_vm11, %v3474_v28, %v10694_v36  ;;  %v3540_v23 = vsel %vm3490_vm11, %v3475_v62, %v10695_v43 }
 0x3dd   :  { %v10703_v61 = vpop.permute.xlu0 %10702  ;;  %v10720_v39 = vunpack.i.h.bf16 %v13444_v56  ;;  %v10719_v63 = vunpack.i.l.bf16 %v13444_v56 }
 0x3de   :  { %v10705_v1 = vunpack.i.h.bf16 %v10703_v61  ;;  %v10704_v4 = vunpack.i.l.bf16 %v10703_v61 }
 0x3e0   :  { %v13456_v17 = vpop.permute.xlu1 %10727  ;;  %v3604_v50 = vsel %vm3555_vm12, %v3539_v25, %v10704_v4  ;;  %v3605_v44 = vsel %vm3555_vm12, %v3540_v23, %v10705_v1 }
 0x3e1   :  { %v10713_v58 = vpop.permute.xlu0 %10712 }
 0x3e2   :  { %v10715_v46 = vunpack.i.h.bf16 %v10713_v58  ;;  %v10714_v16 = vunpack.i.l.bf16 %v10713_v58 }
 0x3e4   :  { %v3669_v13 = vsel %vm3620_vm13, %v3604_v50, %v10714_v16  ;;  %v3670_v42 = vsel %vm3620_vm13, %v3605_v44, %v10715_v46  ;;  %v13472_v14 = vpop.permute.xlu1 %10737 }
 0x3e5   :  { %v3709_v55 = vpack.c.bf16 %v3670_v42, %v3669_v13  ;;  %v10723_v34 = vpop.permute.xlu0 %10722  ;;  %v10730_v13 = vunpack.i.h.bf16 %v13456_v17  ;;  %v10729_v42 = vunpack.i.l.bf16 %v13456_v17  ;;  %v10740_v53 = vunpack.i.h.bf16 %v13472_v14 }
 0x3e6   :  { %v10725_v8 = vunpack.i.h.bf16 %v10723_v34  ;;  %v10724_v47 = vunpack.i.l.bf16 %v10723_v34  ;;  %v13478_v61 = vpop.f32.mrb[24].mxu1  ;;  %v10739_v45 = vunpack.i.l.bf16 %v13472_v14 }
 0x3e7   :  { %v13482_v7 = vpop.f32.mrb[25].mxu1  ;;  %9199 = vmatprep.mubr.msk.bf16.mxu1 %vm3737_vm14, %v3709_v55  ;;  %v4219_v22 = vmul.f32 %v13478_v61, %v13478_v61  ;;  %v593_v55 = vld [vmem:[#allocation2 + $0x2a0] sm:$0xff] }
 0x3e8   :  { %v3671_v43 = vsel %vm3620_vm13, %v3606_v52, %v10724_v47  ;;  %v3672_v36 = vsel %vm3620_vm13, %v3607_v30, %v10725_v8  ;;  %v4146_v38 = vadd.f32 %v13416_v10, %v13482_v7  ;;  %v4217_v15 = vmul.f32 %v13482_v7, %v13482_v7  ;;  %v13491_v1 = vpop.f32.mrb[26].mxu1  ;;  %v10748_v4 = vpop.permute.xlu1 %10747  ;;  %v594_v8 = vld [vmem:[#allocation2 + $0x2a8] sm:$0xff]  ;;  %v595_v47 = vld [vmem:[#allocation2 + $0x2b8] sm:$0xff]  ;;  %v596_v52 = vld [vmem:[#allocation2 + $0x2c0] sm:$0xff] }
 0x3e9   :  { %v3710_v48 = vpack.c.bf16 %v3672_v36, %v3671_v43  ;;  %v10733_v20 = vpop.permute.xlu0 %10732  ;;  %v13493_v40 = vpop.f32.mrb[27].mxu1  ;;  %v10750_v34 = vunpack.i.h.bf16 %v10748_v4  ;;  %v10749_v51 = vunpack.i.l.bf16 %v10748_v4  ;;  %v3219_v56 = vsel %vm151_vm3, %v594_v8, %v10720_v39 }
 0x3ea   :  { %v4280_v33 = vadd.f32 %v13424_v24, %v4217_v15  ;;  %v4147_v28 = vadd.f32 %v4146_v38, %v13493_v40  ;;  %v4218_v62 = vmul.f32 %v13493_v40, %v13493_v40  ;;  %v4220_v24 = vmul.f32 %v13491_v1, %v13491_v1 }
 0x3eb   :  { %9200 = vmatmul.mubr.msk.bf16.gmra.mrb[52].mxu1 %vm3737_vm14, %v3710_v48  ;;  %v10735_v30 = vunpack.i.h.bf16 %v10733_v20  ;;  %v10734_v43 = vunpack.i.l.bf16 %v10733_v20  ;;  %v3218_v38 = vsel %vm151_vm3, %v593_v55, %v10719_v63  ;;  %v3221_v17 = vsel %vm151_vm3, %v596_v52, %v10730_v13 }
 0x3ec   :  { %v4148_v10 = vadd.f32 %v13478_v61, %v4147_v28  ;;  %v13501_v21 = vpop.permute.xlu1 %10757  ;;  %v4281_v58 = vadd.f32 %v4280_v33, %v4218_v62  ;;  %v3220_v15 = vsel %vm151_vm3, %v595_v47, %v10729_v42  ;;  %v3286_v4 = vsel %vm3230_vm7, %v3221_v17, %v10740_v53 }
 0x3ed   :  { %v10743_v25 = vpop.permute.xlu0 %10742  ;;  %v3285_v14 = vsel %vm3230_vm7, %v3220_v15, %v10739_v45  ;;  %v3351_v62 = vsel %vm3295_vm8, %v3286_v4, %v10750_v34  ;;  %v10760_v13 = vunpack.i.h.bf16 %v13501_v21  ;;  %v10759_v42 = vunpack.i.l.bf16 %v13501_v21 }
 0x3ee   :  { %v13506_v23 = vadd.f32 %v13491_v1, %v4148_v10  ;;  %v4282_v46 = vadd.f32 %v4281_v58, %v4219_v22  ;;  %v10745_v48 = vunpack.i.h.bf16 %v10743_v25  ;;  %v10744_v33 = vunpack.i.l.bf16 %v10743_v25 }
 0x3ef   :  { %v3350_v28 = vsel %vm3295_vm8, %v3285_v14, %v10749_v51  ;;  %v3283_v58 = vsel %vm3230_vm7, %v3218_v38, %v10734_v43 }
 0x3f0   :  { %v13510_v16 = vpop.permute.xlu1 %10767  ;;  %v13512_v0 = vadd.f32 %v4282_v46, %v4220_v24  ;;  %v3284_v24 = vsel %vm3230_vm7, %v3219_v56, %v10735_v30  ;;  %v3348_v45 = vsel %vm3295_vm8, %v3283_v58, %v10744_v33 }
 0x3f1   :  { %v10753_v37 = vpop.permute.xlu0 %10752  ;;  %v3349_v55 = vsel %vm3295_vm8, %v3284_v24, %v10745_v48  ;;  %v10770_v47 = vunpack.i.h.bf16 %v13510_v16 }
 0x3f2   :  { %v10755_v20 = vunpack.i.h.bf16 %v10753_v37  ;;  %v10754_v10 = vunpack.i.l.bf16 %v10753_v37 }
 0x3f4   :  { %v13514_v50 = vpop.permute.xlu1 %10777  ;;  %v3413_v51 = vsel %vm3360_vm9, %v3348_v45, %v10754_v10  ;;  %v3414_v8 = vsel %vm3360_vm9, %v3349_v55, %v10755_v20  ;;  %v3415_v20 = vsel %vm3360_vm9, %v3350_v28, %v10759_v42  ;;  %v3416_v10 = vsel %vm3360_vm9, %v3351_v62, %v10760_v13 }
 0x3f5   :  { %v10763_v44 = vpop.permute.xlu0 %10762  ;;  %v10780_v43 = vunpack.i.h.bf16 %v13514_v50 }
 0x3f6   :  { %v10765_v46 = vunpack.i.h.bf16 %v10763_v44  ;;  %v10764_v39 = vunpack.i.l.bf16 %v10763_v44  ;;  %v10769_v44 = vunpack.i.l.bf16 %v13510_v16 }
 0x3f8   :  { %v13522_v29 = vpop.permute.xlu1 %10787  ;;  %v3478_v21 = vsel %vm3425_vm10, %v3413_v51, %v10764_v39  ;;  %v3479_v30 = vsel %vm3425_vm10, %v3414_v8, %v10765_v46  ;;  %v3480_v46 = vsel %vm3425_vm10, %v3415_v20, %v10769_v44  ;;  %v3481_v39 = vsel %vm3425_vm10, %v3416_v10, %v10770_v47 }
 0x3f9   :  { %v10773_v36 = vpop.permute.xlu0 %10772  ;;  %v10790_v4 = vunpack.i.h.bf16 %v13522_v29  ;;  %v10789_v16 = vunpack.i.l.bf16 %v13522_v29 }
 0x3fa   :  { %v10775_v25 = vunpack.i.h.bf16 %v10773_v36  ;;  %v10774_v53 = vunpack.i.l.bf16 %v10773_v36  ;;  %v10779_v36 = vunpack.i.l.bf16 %v13514_v50 }
 0x3fc   :  { %v13532_v22 = vpop.permute.xlu1 %10797  ;;  %v3543_v38 = vsel %vm3490_vm11, %v3478_v21, %v10774_v53  ;;  %v3544_v17 = vsel %vm3490_vm11, %v3479_v30, %v10775_v25  ;;  %v3545_v25 = vsel %vm3490_vm11, %v3480_v46, %v10779_v36  ;;  %v3546_v53 = vsel %vm3490_vm11, %v3481_v39, %v10780_v43 }
 0x3fd   :  { %v10783_v63 = vpop.permute.xlu0 %10782  ;;  %v3610_v62 = vsel %vm3555_vm12, %v3545_v25, %v10789_v16  ;;  %v3611_v13 = vsel %vm3555_vm12, %v3546_v53, %v10790_v4  ;;  %v10799_v25 = vunpack.i.l.bf16 %v13532_v22 }
 0x3fe   :  { %v10785_v37 = vunpack.i.h.bf16 %v10783_v63  ;;  %v10784_v34 = vunpack.i.l.bf16 %v10783_v63 }
 0x400   :  { %v13544_v52 = vpop.permute.xlu1 %10807  ;;  %v3608_v48 = vsel %vm3555_vm12, %v3543_v38, %v10784_v34  ;;  %v3609_v33 = vsel %vm3555_vm12, %v3544_v17, %v10785_v37 }
 0x401   :  { %v10793_v56 = vpop.permute.xlu0 %10792  ;;  %v10809_v46 = vunpack.i.l.bf16 %v13544_v52 }
 0x402   :  { %v10795_v15 = vunpack.i.h.bf16 %v10793_v56  ;;  %v10794_v14 = vunpack.i.l.bf16 %v10793_v56 }
 0x404   :  { %v3673_v50 = vsel %vm3620_vm13, %v3608_v48, %v10794_v14  ;;  %v3674_v58 = vsel %vm3620_vm13, %v3609_v33, %v10795_v15  ;;  %v13560_v24 = vpop.permute.xlu1 %10817 }
 0x405   :  { %v3711_v63 = vpack.c.bf16 %v3674_v58, %v3673_v50  ;;  %v10803_v29 = vpop.permute.xlu0 %10802  ;;  %v10800_v58 = vunpack.i.h.bf16 %v13532_v22  ;;  %v10820_v53 = vunpack.i.h.bf16 %v13560_v24 }
 0x406   :  { %v10805_v45 = vunpack.i.h.bf16 %v10803_v29  ;;  %v10804_v28 = vunpack.i.l.bf16 %v10803_v29  ;;  %v13566_v42 = vpop.f32.mrb[28].mxu1  ;;  %v10819_v29 = vunpack.i.l.bf16 %v13560_v24 }
 0x407   :  { %v13570_v55 = vpop.f32.mrb[29].mxu1  ;;  %9203 = vmatprep.mubr.msk.bf16.mxu1 %vm3737_vm14, %v3711_v63  ;;  %v4223_v15 = vmul.f32 %v13566_v42, %v13566_v42  ;;  %v10810_v63 = vunpack.i.h.bf16 %v13544_v52 }
 0x408   :  { %v3675_v37 = vsel %vm3620_vm13, %v3610_v62, %v10804_v28  ;;  %v3676_v34 = vsel %vm3620_vm13, %v3611_v13, %v10805_v45  ;;  %v4150_v51 = vadd.f32 %v13506_v23, %v13570_v55  ;;  %v4221_v8 = vmul.f32 %v13570_v55, %v13570_v55  ;;  %v13579_v47 = vpop.f32.mrb[30].mxu1  ;;  %v10828_v44 = vpop.permute.xlu1 %10827  ;;  %v598_v28 = vld [vmem:[#allocation2 + $0x2d8] sm:$0xff]  ;;  %v599_v62 = vld [vmem:[#allocation2 + $0x2e8] sm:$0xff] }
 0x409   :  { %v3712_v21 = vpack.c.bf16 %v3676_v34, %v3675_v37  ;;  %v10813_v30 = vpop.permute.xlu0 %10812  ;;  %v13581_v43 = vpop.f32.mrb[31].mxu1  ;;  %v10829_v45 = vunpack.i.l.bf16 %v10828_v44  ;;  %v10830_v37 = vunpack.i.h.bf16 %v10828_v44 }
 0x40a   :  { %v4284_v36 = vadd.f32 %v13512_v0, %v4221_v8  ;;  %v4151_v56 = vadd.f32 %v4150_v51, %v13581_v43  ;;  %v4222_v38 = vmul.f32 %v13581_v43, %v13581_v43  ;;  %v4224_v0 = vmul.f32 %v13579_v47, %v13579_v47  ;;  %v600_v8 = vld [vmem:[#allocation2 + $0x2f0] sm:$0xff] }
 0x40b   :  { %9204 = vmatmul.mubr.msk.bf16.gmra.mrb[56].mxu1 %vm3737_vm14, %v3712_v21  ;;  %v10814_v13 = vunpack.i.l.bf16 %v10813_v30  ;;  %v3223_v51 = vsel %vm151_vm3, %v598_v28, %v10800_v58  ;;  %v3224_v21 = vsel %vm151_vm3, %v599_v62, %v10809_v46 }
 0x40c   :  { %v4152_v23 = vadd.f32 %v13566_v42, %v4151_v56  ;;  %v13589_v17 = vpop.permute.xlu1 %10837  ;;  %v4285_v14 = vadd.f32 %v4284_v36, %v4222_v38  ;;  %v10815_v36 = vunpack.i.h.bf16 %v10813_v30  ;;  %v597_v56 = vld [vmem:[#allocation2 + $0x2d0] sm:$0xff]  ;;  %v3225_v38 = vsel %vm151_vm3, %v600_v8, %v10810_v63 }
 0x40d   :  { %v10823_v4 = vpop.permute.xlu0 %10822  ;;  %v3289_v22 = vsel %vm3230_vm7, %v3224_v21, %v10819_v29  ;;  %v3290_v44 = vsel %vm3230_vm7, %v3225_v38, %v10820_v53  ;;  %v10840_v29 = vunpack.i.h.bf16 %v13589_v17 }
 0x40e   :  { %v13594_v16 = vadd.f32 %v13579_v47, %v4152_v23  ;;  %v4286_v48 = vadd.f32 %v4285_v14, %v4223_v15  ;;  %v10824_v24 = vunpack.i.l.bf16 %v10823_v4  ;;  %v10839_v23 = vunpack.i.l.bf16 %v13589_v17 }
 0x40f   :  { %v3222_v15 = vsel %vm151_vm3, %v597_v56, %v10799_v25  ;;  %v3354_v14 = vsel %vm3295_vm8, %v3289_v22, %v10829_v45  ;;  %v3355_v30 = vsel %vm3295_vm8, %v3290_v44, %v10830_v37  ;;  %v3288_v63 = vsel %vm3230_vm7, %v3223_v51, %v10815_v36 }
 0x410   :  { %v13598_v33 = vpop.permute.xlu1 %10847  ;;  %v13600_v10 = vadd.f32 %v4286_v48, %v4224_v0  ;;  %v10825_v0 = vunpack.i.h.bf16 %v10823_v4  ;;  %v3287_v48 = vsel %vm3230_vm7, %v3222_v15, %v10814_v13  ;;  %v3419_v45 = vsel %vm3360_vm9, %v3354_v14, %v10839_v23 }
 0x411   :  { %v10833_v20 = vpop.permute.xlu0 %10832  ;;  %v3352_v53 = vsel %vm3295_vm8, %v3287_v48, %v10824_v24  ;;  %v10850_v37 = vunpack.i.h.bf16 %v13598_v33  ;;  %v10849_v17 = vunpack.i.l.bf16 %v13598_v33  ;;  %v3420_v33 = vsel %vm3360_vm9, %v3355_v30, %v10840_v29 }
 0x412   :  { %v10835_v58 = vunpack.i.h.bf16 %v10833_v20  ;;  %v10834_v46 = vunpack.i.l.bf16 %v10833_v20  ;;  %v3353_v13 = vsel %vm3295_vm8, %v3288_v63, %v10825_v0 }
 0x414   :  { %v13602_v50 = vpop.permute.xlu1 %10857  ;;  %v3417_v38 = vsel %vm3360_vm9, %v3352_v53, %v10834_v46  ;;  %v3418_v51 = vsel %vm3360_vm9, %v3353_v13, %v10835_v58 }
 0x415   :  { %v10843_v39 = vpop.permute.xlu0 %10842  ;;  %v10859_v24 = vunpack.i.l.bf16 %v13602_v50 }
 0x416   :  { %v10845_v62 = vunpack.i.h.bf16 %v10843_v39  ;;  %v10844_v8 = vunpack.i.l.bf16 %v10843_v39  ;;  %v10860_v39 = vunpack.i.h.bf16 %v13602_v50  ;;  %v3484_v50 = vsel %vm3425_vm10, %v3419_v45, %v10849_v17 }
 0x417   :  { %v3549_v30 = vsel %vm3490_vm11, %v3484_v50, %v10859_v24 }
 0x418   :  { %v13610_v34 = vpop.permute.xlu1 %10867  ;;  %v3482_v22 = vsel %vm3425_vm10, %v3417_v38, %v10844_v8  ;;  %v3485_v8 = vsel %vm3425_vm10, %v3420_v33, %v10850_v37 }
 0x419   :  { %v10853_v52 = vpop.permute.xlu0 %10852  ;;  %v10869_v23 = vunpack.i.l.bf16 %v13610_v34  ;;  %v10870_v58 = vunpack.i.h.bf16 %v13610_v34  ;;  %v3550_v37 = vsel %vm3490_vm11, %v3485_v8, %v10860_v39 }
 0x41a   :  { %v10855_v4 = vunpack.i.h.bf16 %v10853_v52  ;;  %v10854_v21 = vunpack.i.l.bf16 %v10853_v52  ;;  %v3483_v52 = vsel %vm3425_vm10, %v3418_v51, %v10845_v62 }
 0x41c   :  { %v13622_v28 = vpop.permute.xlu1 %10877  ;;  %v3547_v44 = vsel %vm3490_vm11, %v3482_v22, %v10854_v21  ;;  %v3548_v14 = vsel %vm3490_vm11, %v3483_v52, %v10855_v4  ;;  %v3615_v22 = vsel %vm3555_vm12, %v3550_v37, %v10870_v58 }
 0x41d   :  { %v10863_v25 = vpop.permute.xlu0 %10862  ;;  %v10879_v37 = vunpack.i.l.bf16 %v13622_v28 }
 0x41e   :  { %v10865_v20 = vunpack.i.h.bf16 %v10863_v25  ;;  %v10864_v56 = vunpack.i.l.bf16 %v10863_v25 }
 0x420   :  { %v13634_v36 = vpop.permute.xlu1 %10887  ;;  %v3612_v46 = vsel %vm3555_vm12, %v3547_v44, %v10864_v56  ;;  %v3613_v63 = vsel %vm3555_vm12, %v3548_v14, %v10865_v20  ;;  %v3614_v56 = vsel %vm3555_vm12, %v3549_v30, %v10869_v23 }
 0x421   :  { %v10873_v15 = vpop.permute.xlu0 %10872 }
 0x422   :  { %v10875_v0 = vunpack.i.h.bf16 %v10873_v15  ;;  %v10874_v48 = vunpack.i.l.bf16 %v10873_v15 }
 0x423   :  { %v13646_v62 = vpop.f32.mrb[32].mxu1 }
 0x424   :  { %17677 = vst [vmem:[#allocation8_spill] sm:$0xff] %v13646_v62  ;;  %v3677_v25 = vsel %vm3620_vm13, %v3612_v46, %v10874_v48  ;;  %v3678_v53 = vsel %vm3620_vm13, %v3613_v63, %v10875_v0  ;;  %v13652_v4 = vpop.f32.mrb[33].mxu1  ;;  %v10898_v21 = vpop.permute.xlu1 %10897  ;;  %v4227_v44 = vmul.f32 %v13646_v62, %v13646_v62 }
 0x425   :  { %v3713_v34 = vpack.c.bf16 %v3678_v53, %v3677_v25  ;;  %v4154_v29 = vadd.f32 %v13594_v16, %v13652_v4  ;;  %v4225_v13 = vmul.f32 %v13652_v4, %v13652_v4  ;;  %v10883_v20 = vpop.permute.xlu0 %10882  ;;  %v13659_v45 = vpop.f32.mrb[34].mxu1  ;;  %v10890_v53 = vunpack.i.h.bf16 %v13634_v36 }
 0x426   :  { %17678 = vst [vmem:[#allocation9_spill] sm:$0xff] %v13659_v45  ;;  %v10885_v38 = vunpack.i.h.bf16 %v10883_v20  ;;  %v10884_v51 = vunpack.i.l.bf16 %v10883_v20  ;;  %v13663_v17 = vpop.f32.mrb[35].mxu1  ;;  %v4228_v33 = vmul.f32 %v13659_v45, %v13659_v45  ;;  %v10899_v20 = vunpack.i.l.bf16 %v10898_v21 }
 0x427   :  { %v4288_v52 = vadd.f32 %v13600_v10, %v4225_v13  ;;  %v4155_v16 = vadd.f32 %v4154_v29, %v13663_v17  ;;  %v4226_v24 = vmul.f32 %v13663_v17, %v13663_v17  ;;  %9207 = vmatprep.mubr.msk.bf16.mxu1 %vm3737_vm14, %v3713_v34  ;;  %v10880_v34 = vunpack.i.h.bf16 %v13622_v28 }
 0x428   :  { %v3679_v15 = vsel %vm3620_vm13, %v3614_v56, %v10884_v51  ;;  %v3680_v39 = vsel %vm3620_vm13, %v3615_v22, %v10885_v38  ;;  %v10908_v23 = vpop.permute.xlu1 %10907  ;;  %v10889_v29 = vunpack.i.l.bf16 %v13634_v36  ;;  %v10900_v13 = vunpack.i.h.bf16 %v10898_v21  ;;  %v602_v22 = vld [vmem:[#allocation2 + $0x308] sm:$0xff] }
 0x429   :  { %v3714_v14 = vpack.c.bf16 %v3680_v39, %v3679_v15  ;;  %v4156_v0 = vadd.f32 %v13646_v62, %v4155_v16  ;;  %v4289_v48 = vadd.f32 %v4288_v52, %v4226_v24  ;;  %v10893_v10 = vpop.permute.xlu0 %10892  ;;  %v10910_v56 = vunpack.i.h.bf16 %v10908_v23  ;;  %v11040_v52 = vld [vmem:[#allocation2 + $0x320] sm:$0xff] }
 0x42a   :  { %v10909_v38 = vunpack.i.l.bf16 %v10908_v23  ;;  %v3229_v16 = vsel %vm151_vm3, %v11040_v52, %v10890_v53  ;;  %v10895_v24 = vunpack.i.h.bf16 %v10893_v10  ;;  %v10894_v15 = vunpack.i.l.bf16 %v10893_v10 }
 0x42b   :  { %v4290_v58 = vadd.f32 %v4289_v48, %v4227_v44  ;;  %9208 = vmatmul.mubr.msk.bf16.gmra.mrb[60].mxu1 %vm3737_vm14, %v3714_v14  ;;  %v13680_v46 = vadd.f32 %v13659_v45, %v4156_v0  ;;  %v3227_v14 = vsel %vm151_vm3, %v602_v22, %v10880_v34  ;;  %v11041_v0 = vld [vmem:[#allocation2 + $0x318] sm:$0xff]  ;;  %v3294_v21 = vsel %vm3230_vm7, %v3229_v16, %v10900_v13  ;;  %v601_v48 = vld [vmem:[#allocation2 + $0x300] sm:$0xff] }
 0x42c   :  { %v10918_v63 = vpop.permute.xlu1 %10917  ;;  %v3228_v36 = vsel %vm151_vm3, %v11041_v0, %v10889_v29  ;;  %v3226_v45 = vsel %vm151_vm3, %v601_v48, %v10879_v37  ;;  %v3359_v10 = vsel %vm3295_vm8, %v3294_v21, %v10910_v56  ;;  %v3292_v29 = vsel %vm3230_vm7, %v3227_v14, %v10895_v24 }
 0x42d   :  { %v10903_v50 = vpop.permute.xlu0 %10902  ;;  %v13682_v8 = vadd.f32 %v4290_v58, %v4228_v33  ;;  %v10919_v39 = vunpack.i.l.bf16 %v10918_v63  ;;  %v3293_v28 = vsel %vm3230_vm7, %v3228_v36, %v10899_v20  ;;  %v10920_v58 = vunpack.i.h.bf16 %v10918_v63 }
 0x42e   :  { %v10905_v23 = vunpack.i.h.bf16 %v10903_v50  ;;  %v10904_v33 = vunpack.i.l.bf16 %v10903_v50  ;;  %v3358_v53 = vsel %vm3295_vm8, %v3293_v28, %v10909_v38  ;;  %v3291_v34 = vsel %vm3230_vm7, %v3226_v45, %v10894_v15 }
 0x42f   :  { %v3423_v13 = vsel %vm3360_vm9, %v3358_v53, %v10919_v39  ;;  %v3424_v56 = vsel %vm3360_vm9, %v3359_v10, %v10920_v58 }
 0x430   :  { %v10928_v25 = vpop.permute.xlu1 %10927  ;;  %v3356_v37 = vsel %vm3295_vm8, %v3291_v34, %v10904_v33  ;;  %v3357_v38 = vsel %vm3295_vm8, %v3292_v29, %v10905_v23 }
 0x431   :  { %v10913_v30 = vpop.permute.xlu0 %10912  ;;  %v10929_v52 = vunpack.i.l.bf16 %v10928_v25  ;;  %v10930_v22 = vunpack.i.h.bf16 %v10928_v25 }
 0x432   :  { %v10915_v20 = vunpack.i.h.bf16 %v10913_v30  ;;  %v10914_v0 = vunpack.i.l.bf16 %v10913_v30 }
 0x433   :  { %v3488_v21 = vsel %vm3425_vm10, %v3423_v13, %v10929_v52  ;;  %v3489_v25 = vsel %vm3425_vm10, %v3424_v56, %v10930_v22 }
 0x434   :  { %v10938_v51 = vpop.permute.xlu1 %10937  ;;  %v3422_v33 = vsel %vm3360_vm9, %v3357_v38, %v10915_v20 }
 0x435   :  { %v10923_v44 = vpop.permute.xlu0 %10922  ;;  %v10940_v50 = vunpack.i.h.bf16 %v10938_v51  ;;  %v10939_v63 = vunpack.i.l.bf16 %v10938_v51  ;;  %v3421_v51 = vsel %vm3360_vm9, %v3356_v37, %v10914_v0 }
 0x436   :  { %v10924_v36 = vunpack.i.l.bf16 %v10923_v44  ;;  %v10925_v45 = vunpack.i.h.bf16 %v10923_v44 }
 0x437   :  { %v3553_v23 = vsel %vm3490_vm11, %v3488_v21, %v10939_v63  ;;  %v3554_v58 = vsel %vm3490_vm11, %v3489_v25, %v10940_v50 }
 0x438   :  { %v10948_v62 = vpop.permute.xlu1 %10947  ;;  %v3486_v44 = vsel %vm3425_vm10, %v3421_v51, %v10924_v36  ;;  %v3487_v29 = vsel %vm3425_vm10, %v3422_v33, %v10925_v45 }
 0x439   :  { %v10933_v16 = vpop.permute.xlu0 %10932  ;;  %v10950_v15 = vunpack.i.h.bf16 %v10948_v62  ;;  %v10949_v24 = vunpack.i.l.bf16 %v10948_v62 }
 0x43a   :  { %v10935_v39 = vunpack.i.h.bf16 %v10933_v16  ;;  %v10934_v48 = vunpack.i.l.bf16 %v10933_v16 }
 0x43b   :  { %v3618_v13 = vsel %vm3555_vm12, %v3553_v23, %v10949_v24  ;;  %v3619_v22 = vsel %vm3555_vm12, %v3554_v58, %v10950_v15 }
 0x43c   :  { %v10958_v14 = vpop.permute.xlu1 %10957  ;;  %v3551_v0 = vsel %vm3490_vm11, %v3486_v44, %v10934_v48  ;;  %v3552_v50 = vsel %vm3490_vm11, %v3487_v29, %v10935_v39 }
 0x43d   :  { %v10943_v30 = vpop.permute.xlu0 %10942  ;;  %v10959_v28 = vunpack.i.l.bf16 %v10958_v14  ;;  %v10960_v52 = vunpack.i.h.bf16 %v10958_v14 }
 0x43e   :  { %v13708_v53 = vpop.f32.mrb[36].mxu1  ;;  %v10945_v62 = vunpack.i.h.bf16 %v10943_v30  ;;  %v10944_v10 = vunpack.i.l.bf16 %v10943_v30 }
 0x43f   :  { %v13711_v34 = vpop.f32.mrb[37].mxu1  ;;  %v3683_v63 = vsel %vm3620_vm13, %v3618_v13, %v10959_v28  ;;  %v3684_v14 = vsel %vm3620_vm13, %v3619_v22, %v10960_v52  ;;  %v4231_v28 = vmul.f32 %v13708_v53, %v13708_v53 }
 0x440   :  { %v4158_v16 = vadd.f32 %v13680_v46, %v13711_v34  ;;  %v13718_v20 = vpop.f32.mrb[38].mxu1  ;;  %v4229_v37 = vmul.f32 %v13711_v34, %v13711_v34  ;;  %v3616_v15 = vsel %vm3555_vm12, %v3551_v0, %v10944_v10  ;;  %v3617_v24 = vsel %vm3555_vm12, %v3552_v50, %v10945_v62 }
 0x441   :  { %v10953_v38 = vpop.permute.xlu0 %10952  ;;  %v13725_v56 = vpop.f32.mrb[39].mxu1  ;;  %v3716_v23 = vpack.c.bf16 %v3684_v14, %v3683_v63  ;;  %v4232_v44 = vmul.f32 %v13718_v20, %v13718_v20 }
 0x442   :  { %v10955_v36 = vunpack.i.h.bf16 %v10953_v38  ;;  %v10954_v21 = vunpack.i.l.bf16 %v10953_v38  ;;  %v4159_v45 = vadd.f32 %v4158_v16, %v13725_v56  ;;  %v4230_v46 = vmul.f32 %v13725_v56, %v13725_v56 }
 0x443   :  { %v4292_v25 = vadd.f32 %v13682_v8, %v4229_v37 }
 0x444   :  { %v3681_v39 = vsel %vm3620_vm13, %v3616_v15, %v10954_v21  ;;  %v3682_v48 = vsel %vm3620_vm13, %v3617_v24, %v10955_v36  ;;  %v4160_v30 = vadd.f32 %v13708_v53, %v4159_v45 }
 0x445   :  { %v3715_v51 = vpack.c.bf16 %v3682_v48, %v3681_v39  ;;  %v4293_v33 = vadd.f32 %v4292_v25, %v4230_v46 }
 0x446   :  { %v4161_v58 = vadd.f32 %v13718_v20, %v4160_v30 }
 0x447   :  { %v4294_v62 = vadd.f32 %v4293_v33, %v4231_v28  ;;  %9211 = vmatprep.mubr.msk.bf16.mxu1 %vm3737_vm14, %v3715_v51 }
 0x448   :  { %9212 = vmatmul.mubr.msk.bf16.gmra.mrb[64].mxu1 %vm3737_vm14, %v3716_v23 }
 0x449   :  { %v4295_v8 = vadd.f32 %v4294_v62, %v4232_v44 }
 0x45e   :  { %v13744_v10 = vpop.f32.mrb[40].mxu1 }
 0x45f   :  { %v13746_v52 = vpop.f32.mrb[41].mxu1  ;;  %v4235_v37 = vmul.f32 %v13744_v10, %v13744_v10 }
 0x460   :  { %v4162_v29 = vadd.f32 %v4161_v58, %v13746_v52  ;;  %v4233_v13 = vmul.f32 %v13746_v52, %v13746_v52  ;;  %v13751_v22 = vpop.f32.mrb[42].mxu1 }
 0x461   :  { %v13753_v16 = vpop.f32.mrb[43].mxu1  ;;  %v4236_v21 = vmul.f32 %v13751_v22, %v13751_v22 }
 0x462   :  { %v4296_v0 = vadd.f32 %v4295_v8, %v4233_v13  ;;  %v4163_v50 = vadd.f32 %v4162_v29, %v13753_v16  ;;  %v4234_v63 = vmul.f32 %v13753_v16, %v13753_v16  ;;  %v10964_v13 = vld [vmem:[%s17546_s9] sm:$0xff]  }
 0x464   :  { %v4164_v38 = vadd.f32 %v13744_v10, %v4163_v50  ;;  %v4297_v36 = vadd.f32 %v4296_v0, %v4234_v63  ;;  %v13790_v0 = vld [vmem:[%s17546_s9 + $0x80] sm:$0xff]   ;;  %v17554_v50 = vmov 0  }
 0x465   :  { %6836 = vmatprep.subr.bf16.mxu1 %v17554_v50  ;;  %7125 = vmatprep.subr.bf16.mxu0 %v17554_v50 }
 0x466   :  { %v4298_v45 = vadd.f32 %v4297_v36, %v4235_v37  ;;  %v4165_v46 = vadd.f32 %v13751_v22, %v4164_v38  ;;  %6837 = vmatpush1.bf16.msra.mxu1 %v10964_v13  ;;  %v10965_v37 = vld [vmem:[%s17546_s9 + $0x8] sm:$0xff]   ;;  %7126 = vmatpush1.bf16.msra.mxu0 %v13790_v0  ;;  %v10967_v38 = vld [vmem:[%s17546_s9 + $0x10] sm:$0xff]  }
 0x467   :  { %6838 = vmatprep.subr.bf16.mxu1 %v17554_v50  ;;  %7127 = vmatprep.subr.bf16.mxu0 %v17554_v50  ;;  %v13808_v36 = vld [vmem:[%s17546_s9 + $0x88] sm:$0xff]  }
 0x468   :  { %v4299_v15 = vadd.f32 %v4298_v45, %v4236_v21 }
 0x46a   :  { %6839 = vmatpush1.bf16.msra.mxu1 %v10965_v37  ;;  %7128 = vmatpush1.bf16.msra.mxu0 %v13808_v36 }
 0x46b   :  { %6840 = vmatprep.subr.bf16.mxu1 %v17554_v50  ;;  %7129 = vmatprep.subr.bf16.mxu0 %v17554_v50 }
 0x46e   :  { %6841 = vmatpush1.bf16.msra.mxu1 %v10967_v38 }
 0x46f   :  { %6842 = vmatprep.subr.bf16.mxu1 %v17554_v50 }
 0x47e   :  { %v13764_v24 = vpop.f32.mrb[44].mxu1 }
 0x47f   :  { %17679 = vst [vmem:[#allocation10_spill] sm:$0xff] %v13764_v24  ;;  %v13766_v14 = vpop.f32.mrb[45].mxu1  ;;  %v4239_v23 = vmul.f32 %v13764_v24, %v13764_v24 }
 0x480   :  { %v4166_v25 = vadd.f32 %v4165_v46, %v13766_v14  ;;  %v4237_v39 = vmul.f32 %v13766_v14, %v13766_v14  ;;  %v13771_v48 = vpop.f32.mrb[46].mxu1  ;;  %v10969_v46 = vld [vmem:[%s17546_s9 + $0x18] sm:$0xff]  }
 0x481   :  { %17680 = vst [vmem:[#allocation11_spill] sm:$0xff] %v13771_v48  ;;  %v13773_v30 = vpop.f32.mrb[47].mxu1  ;;  %v4240_v62 = vmul.f32 %v13771_v48, %v13771_v48  ;;  %6843 = vmatpush1.bf16.msra.mxu1 %v10969_v46 }
 0x482   :  { %v4300_v28 = vadd.f32 %v4299_v15, %v4237_v39  ;;  %v4167_v51 = vadd.f32 %v4166_v25, %v13773_v30  ;;  %v4238_v33 = vmul.f32 %v13773_v30, %v13773_v30  ;;  %6844 = vmatprep.subr.bf16.mxu1 %v17554_v50 }
 0x484   :  { %v4168_v58 = vadd.f32 %v13764_v24, %v4167_v51  ;;  %v4301_v44 = vadd.f32 %v4300_v28, %v4238_v33 }
 0x486   :  { %v4302_v8 = vadd.f32 %v4301_v44, %v4239_v23  ;;  %v4169_v29 = vadd.f32 %v13771_v48, %v4168_v58 }
 0x488   :  { %v4303_v63 = vadd.f32 %v4302_v8, %v4240_v62 }
 0x49e   :  { %v13810_v21 = vpop.f32.mrb[48].mxu1 }
 0x49f   :  { %17681 = vst [vmem:[#allocation12_spill] sm:$0xff] %v13810_v21  ;;  %v13813_v45 = vpop.f32.mrb[49].mxu1  ;;  %v4243_v58 = vmul.f32 %v13810_v21, %v13810_v21 }
 0x4a0   :  { %17682 = vst [vmem:[#allocation13_spill] sm:$0xff] %v13813_v45  ;;  %v4170_v15 = vadd.f32 %v4169_v29, %v13813_v45  ;;  %v4241_v25 = vmul.f32 %v13813_v45, %v13813_v45  ;;  %v13822_v39 = vpop.f32.mrb[50].mxu1 }
 0x4a1   :  { %17683 = vst [vmem:[#allocation14_spill] sm:$0xff] %v13822_v39  ;;  %v13824_v28 = vpop.f32.mrb[51].mxu1  ;;  %v4244_v8 = vmul.f32 %v13822_v39, %v13822_v39 }
 0x4a2   :  { %17684 = vst [vmem:[#allocation15_spill] sm:$0xff] %v13824_v28  ;;  %v4304_v51 = vadd.f32 %v4303_v63, %v4241_v25  ;;  %v4171_v33 = vadd.f32 %v4170_v15, %v13824_v28  ;;  %v4242_v23 = vmul.f32 %v13824_v28, %v13824_v28 }
 0x4a4   :  { %v4172_v44 = vadd.f32 %v13810_v21, %v4171_v33  ;;  %v4305_v62 = vadd.f32 %v4304_v51, %v4242_v23 }
 0x4a6   :  { %v4306_v29 = vadd.f32 %v4305_v62, %v4243_v58  ;;  %v4173_v13 = vadd.f32 %v13822_v39, %v4172_v44 }
 0x4a8   :  { %v4307_v63 = vadd.f32 %v4306_v29, %v4244_v8 }
 0x4be   :  { %v13836_v37 = vpop.f32.mrb[52].mxu1 }
 0x4bf   :  { %17685 = vst [vmem:[#allocation16_spill] sm:$0xff] %v13836_v37  ;;  %v13838_v38 = vpop.f32.mrb[53].mxu1  ;;  %v4247_v44 = vmul.f32 %v13836_v37, %v13836_v37 }
 0x4c0   :  { %17686 = vst [vmem:[#allocation17_spill] sm:$0xff] %v13838_v38  ;;  %v4174_v46 = vadd.f32 %v4173_v13, %v13838_v38  ;;  %v4245_v15 = vmul.f32 %v13838_v38, %v13838_v38  ;;  %v13843_v25 = vpop.f32.mrb[54].mxu1 }
 0x4c1   :  { %17687 = vst [vmem:[#allocation18_spill] sm:$0xff] %v13843_v25  ;;  %v13845_v33 = vpop.f32.mrb[55].mxu1  ;;  %v4248_v29 = vmul.f32 %v13843_v25, %v13843_v25 }
 0x4c2   :  { %17688 = vst [vmem:[#allocation19_spill] sm:$0xff] %v13845_v33  ;;  %v4308_v51 = vadd.f32 %v4307_v63, %v4245_v15  ;;  %v4175_v23 = vadd.f32 %v4174_v46, %v13845_v33  ;;  %v4246_v58 = vmul.f32 %v13845_v33, %v13845_v33 }
 0x4c4   :  { %v4176_v62 = vadd.f32 %v13836_v37, %v4175_v23  ;;  %v4309_v8 = vadd.f32 %v4308_v51, %v4246_v58 }
 0x4c6   :  { %v4310_v13 = vadd.f32 %v4309_v8, %v4247_v44  ;;  %v4177_v50 = vadd.f32 %v13843_v25, %v4176_v62 }
 0x4c8   :  { %v4311_v38 = vadd.f32 %v4310_v13, %v4248_v29 }
 0x4de   :  { %v13856_v39 = vpop.f32.mrb[56].mxu1 }
 0x4df   :  { %17689 = vst [vmem:[#allocation20_spill] sm:$0xff] %v13856_v39  ;;  %v13858_v63 = vpop.f32.mrb[57].mxu1  ;;  %v4251_v62 = vmul.f32 %v13856_v39, %v13856_v39 }
 0x4e0   :  { %17690 = vst [vmem:[#allocation21_spill] sm:$0xff] %v13858_v63  ;;  %v4178_v46 = vadd.f32 %v4177_v50, %v13858_v63  ;;  %v4249_v15 = vmul.f32 %v13858_v63, %v13858_v63  ;;  %v13863_v33 = vpop.f32.mrb[58].mxu1 }
 0x4e1   :  { %17691 = vst [vmem:[#allocation22_spill] sm:$0xff] %v13863_v33  ;;  %v13865_v23 = vpop.f32.mrb[59].mxu1  ;;  %v4252_v50 = vmul.f32 %v13863_v33, %v13863_v33 }
 0x4e2   :  { %17692 = vst [vmem:[#allocation23_spill] sm:$0xff] %v13865_v23  ;;  %v4312_v51 = vadd.f32 %v4311_v38, %v4249_v15  ;;  %v4179_v58 = vadd.f32 %v4178_v46, %v13865_v23  ;;  %v4250_v44 = vmul.f32 %v13865_v23, %v13865_v23  ;;  %v10971_v38 = vld [vmem:[%s17546_s9 + $0x20] sm:$0xff]   ;;  %v13882_v46 = vld [vmem:[%s17546_s9 + $0x90] sm:$0xff]   ;;  %v17693_v15 = vmov 0   ;;  %v13948_v23 = vld [vmem:[%s17546_s9 + $0xb8] sm:$0xff]  }
 0x4e3   :  { %6845 = vmatpush1.bf16.msra.mxu1 %v10971_v38  ;;  %7130 = vmatpush1.bf16.msra.mxu0 %v13882_v46 }
 0x4e4   :  { %v4180_v8 = vadd.f32 %v13856_v39, %v4179_v58  ;;  %v4313_v29 = vadd.f32 %v4312_v51, %v4250_v44  ;;  %6846 = vmatprep.subr.bf16.mxu1 %v17693_v15  ;;  %v10973_v51 = vld [vmem:[%s17546_s9 + $0x28] sm:$0xff]   ;;  %7131 = vmatprep.subr.bf16.mxu0 %v17693_v15  ;;  %v13893_v58 = vld [vmem:[%s17546_s9 + $0x98] sm:$0xff]   ;;  %v10975_v44 = vld [vmem:[%s17546_s9 + $0x30] sm:$0xff]  }
 0x4e6   :  { %v4314_v13 = vadd.f32 %v4313_v29, %v4251_v62  ;;  %v4181_v63 = vadd.f32 %v13863_v33, %v4180_v8  ;;  %v13904_v62 = vld [vmem:[%s17546_s9 + $0xa0] sm:$0xff]   ;;  %v10977_v8 = vld [vmem:[%s17546_s9 + $0x38] sm:$0xff]   ;;  %v13915_v29 = vld [vmem:[%s17546_s9 + $0xa8] sm:$0xff]  }
 0x4e7   :  { %6847 = vmatpush1.bf16.msra.mxu1 %v10973_v51  ;;  %7132 = vmatpush1.bf16.msra.mxu0 %v13893_v58 }
 0x4e8   :  { %v4315_v25 = vadd.f32 %v4314_v13, %v4252_v50  ;;  %6848 = vmatprep.subr.bf16.mxu1 %v17693_v15  ;;  %7133 = vmatprep.subr.bf16.mxu0 %v17693_v15  ;;  %v10979_v50 = vld [vmem:[%s17546_s9 + $0x40] sm:$0xff]   ;;  %v13926_v13 = vld [vmem:[%s17546_s9 + $0xb0] sm:$0xff]  }
 0x4eb   :  { %6849 = vmatpush1.bf16.msra.mxu1 %v10975_v44  ;;  %7134 = vmatpush1.bf16.msra.mxu0 %v13904_v62  ;;  %v10981_v44 = vld [vmem:[%s17546_s9 + $0x48] sm:$0xff]  }
 0x4ec   :  { %6850 = vmatprep.subr.bf16.mxu1 %v17693_v15  ;;  %7135 = vmatprep.subr.bf16.mxu0 %v17693_v15 }
 0x4ef   :  { %6851 = vmatpush1.bf16.msra.mxu1 %v10977_v8  ;;  %7136 = vmatpush1.bf16.msra.mxu0 %v13915_v29 }
 0x4f0   :  { %6852 = vmatprep.subr.bf16.mxu1 %v17693_v15  ;;  %7137 = vmatprep.subr.bf16.mxu0 %v17693_v15 }
 0x4f3   :  { %6853 = vmatpush1.bf16.msra.mxu1 %v10979_v50  ;;  %7138 = vmatpush1.bf16.msra.mxu0 %v13926_v13 }
 0x4f4   :  { %6854 = vmatprep.subr.bf16.mxu1 %v17693_v15  ;;  %7139 = vmatprep.subr.bf16.mxu0 %v17693_v15 }
 0x4f7   :  { %6855 = vmatpush1.bf16.msra.mxu1 %v10981_v44  ;;  %7140 = vmatpush1.bf16.msra.mxu0 %v13948_v23 }
 0x4f8   :  { %6856 = vmatprep.subr.bf16.mxu1 %v17693_v15  ;;  %7141 = vmatprep.subr.bf16.mxu0 %v17693_v15 }
 0x4fe   :  { %v13928_v38 = vpop.f32.mrb[60].mxu1 }
 0x4ff   :  { %17694 = vst [vmem:[#allocation24_spill] sm:$0xff] %v13928_v38  ;;  %v13931_v51 = vpop.f32.mrb[61].mxu1  ;;  %v4255_v28 = vmul.f32 %v13928_v38, %v13928_v38 }
 0x500   :  { %17695 = vst [vmem:[#allocation25_spill] sm:$0xff] %v13931_v51  ;;  %v4182_v8 = vadd.f32 %v4181_v63, %v13931_v51  ;;  %v4253_v33 = vmul.f32 %v13931_v51, %v13931_v51  ;;  %v13940_v39 = vpop.f32.mrb[62].mxu1  ;;  %v10983_v51 = vld [vmem:[%s17546_s9 + $0x50] sm:$0xff]  }
 0x501   :  { %17696 = vst [vmem:[#allocation26_spill] sm:$0xff] %v13940_v39  ;;  %v13943_v50 = vpop.f32.mrb[63].mxu1  ;;  %6857 = vmatpush1.bf16.msra.mxu1 %v10983_v51 }
 0x502   :  { %17697 = vst [vmem:[#allocation27_spill] sm:$0xff] %v13943_v50  ;;  %v4316_v37 = vadd.f32 %v4315_v25, %v4253_v33  ;;  %v4183_v21 = vadd.f32 %v4182_v8, %v13943_v50  ;;  %v4254_v63 = vmul.f32 %v13943_v50, %v13943_v50  ;;  %v13965_v25 = vld [vmem:[%s17546_s9 + $0xc0] sm:$0xff]   ;;  %v4256_v33 = vmul.f32 %v13940_v39, %v13940_v39 }
 0x503   :  { %6858 = vmatprep.subr.bf16.mxu1 %v17693_v15  ;;  %7142 = vmatpush1.bf16.msra.mxu0 %v13965_v25 }
 0x504   :  { %v4184_v45 = vadd.f32 %v13928_v38, %v4183_v21  ;;  %v4317_v44 = vadd.f32 %v4316_v37, %v4254_v63  ;;  %v10985_v21 = vld [vmem:[%s17546_s9 + $0x58] sm:$0xff]   ;;  %v13978_v37 = vld [vmem:[%s17546_s9 + $0xc8] sm:$0xff]   ;;  %7143 = vmatprep.subr.bf16.mxu0 %v17693_v15 }
 0x505   :  { %17698 = vst [vmem:[#allocation28_spill] sm:$0xff] %v13978_v37  ;;  %6859 = vmatpush1.bf16.msra.mxu1 %v10985_v21  ;;  %v4948_v63 = vld [vmem:[#allocation3 + $0x9] sm:$0xff] }
 0x506   :  { %v4318_v8 = vadd.f32 %v4317_v44, %v4255_v28  ;;  %v4185_v50 = vadd.f32 %v13940_v39, %v4184_v45  ;;  %v10987_v45 = vld [vmem:[%s17546_s9 + $0x60] sm:$0xff]   ;;  %6860 = vmatprep.subr.bf16.mxu1 %v17693_v15  ;;  %v13989_v39 = vld [vmem:[%s17546_s9 + $0xd0] sm:$0xff]  }
 0x507   :  { %v4947_v28 = vld [vmem:[#allocation3 + $0x1] sm:$0xff]  ;;  %7144 = vmatpush1.bf16.msra.mxu0 %v13978_v37  ;;  %17699 = vst [vmem:[#allocation29_spill] sm:$0xff] %v13989_v39  ;;  %v10991_v21 = vld [vmem:[%s17546_s9 + $0x70] sm:$0xff]  }
 0x508   :  { %v4319_v51 = vadd.f32 %v4318_v8, %v4256_v33  ;;  %v5011_v44 = vpack.c.bf16 %v4948_v63, %v4947_v28  ;;  %7145 = vmatprep.subr.bf16.mxu0 %v17693_v15  ;;  %v10989_v33 = vld [vmem:[%s17546_s9 + $0x68] sm:$0xff]   ;;  %v14000_v8 = vld [vmem:[%s17546_s9 + $0xd8] sm:$0xff]   ;;  %v4819_v63 = vld [vmem:[#allocation3] sm:$0xff] }
 0x509   :  { %6861 = vmatpush1.bf16.msra.mxu1 %v10987_v45  ;;  %17700 = vst [vmem:[#allocation30_spill] sm:$0xff] %v14000_v8  ;;  %v14011_v45 = vld [vmem:[%s17546_s9 + $0xe0] sm:$0xff]   ;;  %v10993_v28 = vld [vmem:[%s17546_s9 + $0x78] sm:$0xff]  }
 0x50a   :  { %6868 = vmatprep.mubr.bf16.mxu1 %v5011_v44  ;;  %6862 = vmatprep.subr.bf16.mxu1 %v17693_v15  ;;  %17701 = vst [vmem:[#allocation31_spill] sm:$0xff] %v14011_v45  ;;  %v14022_v44 = vld [vmem:[%s17546_s9 + $0xe8] sm:$0xff]  }
 0x50b   :  { %7146 = vmatpush1.bf16.msra.mxu0 %v13989_v39  ;;  %17702 = vst [vmem:[#allocation32_spill] sm:$0xff] %v14022_v44 }
 0x50c   :  { %7147 = vmatprep.subr.bf16.mxu0 %v17693_v15 }
 0x50d   :  { %6863 = vmatpush1.bf16.msra.mxu1 %v10989_v33  ;;  %v11042_v33 = vld [vmem:[#allocation3 + $0x8] sm:$0xff] }
 0x50e   :  { %6864 = vmatprep.subr.bf16.mxu1 %v17693_v15 }
 0x50f   :  { %7148 = vmatpush1.bf16.msra.mxu0 %v14000_v8  ;;  %v4883_v8 = vpack.c.bf16 %v11042_v33, %v4819_v63 }
 0x510   :  { %7149 = vmatprep.subr.bf16.mxu0 %v17693_v15 }
 0x511   :  { %6865 = vmatpush1.bf16.msra.mxu1 %v10991_v21 }
 0x512   :  { %6866 = vmatprep.subr.bf16.mxu1 %v17693_v15 }
 0x513   :  { %7150 = vmatpush1.bf16.msra.mxu0 %v14011_v45  ;;  %v14032_v45 = vld [vmem:[%s17546_s9 + $0xf0] sm:$0xff]  }
 0x514   :  { %7151 = vmatprep.subr.bf16.mxu0 %v17693_v15  ;;  %17703 = vst [vmem:[#allocation33_spill] sm:$0xff] %v14032_v45 }
 0x515   :  { %6867 = vmatpush1.bf16.msra.mxu1 %v10993_v28 }
 0x516   :  { %9313 = vmatprep.subr.bf16.mxu1 %v17693_v15 }
 0x517   :  { %7152 = vmatpush1.bf16.msra.mxu0 %v14022_v44 }
 0x518   :  { %7153 = vmatprep.subr.bf16.mxu0 %v17693_v15  ;;  %6869 = vmatmul.mubr.bf16.vlgmr.msra.gmra.mrb[68].mxu1 %v4883_v8 }
 0x519   :  { %9329 = vmatpush1.bf16.msra.mxu1 %v13790_v0 }
 0x51a   :  { %9314 = vmatprep.subr.bf16.mxu1 %v17693_v15 }
 0x51b   :  { %v14026_v21 = vpop.f32.mrb[64].mxu1  ;;  %7154 = vmatpush1.bf16.msra.mxu0 %v14032_v45 }
 0x51c   :  { %v14034_v39 = vpop.f32.mrb[65].mxu1  ;;  %7155 = vmatprep.subr.bf16.mxu0 %v17693_v15  ;;  %v4259_v0 = vmul.f32 %v14026_v21, %v14026_v21 }
 0x51d   :  { %17704 = vst [vmem:[#allocation34_spill] sm:$0xff] %v14034_v39  ;;  %v4186_v38 = vadd.f32 %v4185_v50, %v14034_v39  ;;  %v4257_v28 = vmul.f32 %v14034_v39, %v14034_v39  ;;  %v14040_v63 = vpop.f32.mrb[66].mxu1  ;;  %v14053_v50 = vld [vmem:[%s17546_s9 + $0xf8] sm:$0xff]   ;;  %9330 = vmatpush1.bf16.msra.mxu1 %v13808_v36 }
 0x51e   :  { %v14043_v33 = vpop.f32.mrb[67].mxu1  ;;  %17705 = vst [vmem:[#allocation35_spill] sm:$0xff] %v14053_v50  ;;  %9315 = vmatprep.subr.bf16.mxu1 %v17693_v15 }
 0x51f   :  { %v4320_v44 = vadd.f32 %v4319_v51, %v4257_v28  ;;  %v4187_v37 = vadd.f32 %v4186_v38, %v14043_v33  ;;  %v4258_v48 = vmul.f32 %v14043_v33, %v14043_v33  ;;  %v4260_v38 = vmul.f32 %v14040_v63, %v14040_v63  ;;  %7156 = vmatpush1.bf16.msra.mxu0 %v14053_v50 }
 0x520   :  { %7414 = vmatprep.subr.bf16.mxu0 %v17693_v15 }
 0x521   :  { %v4188_v8 = vadd.f32 %v14026_v21, %v4187_v37  ;;  %v4321_v51 = vadd.f32 %v4320_v44, %v4258_v48  ;;  %9331 = vmatpush1.bf16.msra.mxu1 %v13882_v46 }
 0x522   :  { %9316 = vmatprep.subr.bf16.mxu1 %v17693_v15 }
 0x523   :  { %v4189_v28 = vadd.f32 %v14040_v63, %v4188_v8  ;;  %v4322_v45 = vadd.f32 %v4321_v51, %v4259_v0 }
 0x525   :  { %v4190_v39 = vrot.slane %v4189_v28, 4  ;;  %v4323_v24 = vadd.f32 %v4322_v45, %v4260_v38  ;;  %9332 = vmatpush1.bf16.msra.mxu1 %v13893_v58  ;;  %v14072_v38 = vld [vmem:[#allocation3 + $0x2] sm:$0xff]  ;;  %v17719_v58 = vld [vmem:[#allocation18_spill] sm:$0xff] }
 0x526   :  { %9317 = vmatprep.subr.bf16.mxu1 %v17693_v15  ;;  %17706 = vst [vmem:[#allocation36_spill] sm:$0xff] %v14072_v38  ;;  %v17729_v38 = vld [vmem:[#allocation34_spill] sm:$0xff] }
 0x527   :  { %v4191_v48 = vadd.f32 %v4190_v39, %v4189_v28  ;;  %v4324_v36 = vrot.slane %v4323_v24, 4  ;;  %v14074_v39 = vld [vmem:[#allocation3 + $0xa] sm:$0xff] }
 0x528   :  { %17707 = vst [vmem:[#allocation37_spill] sm:$0xff] %v14074_v39 }
 0x529   :  { %v4192_v37 = vrot.slane %v4191_v48, 2  ;;  %v4325_v44 = vadd.f32 %v4324_v36, %v4323_v24  ;;  %9333 = vmatpush1.bf16.msra.mxu1 %v13904_v62  ;;  %v17728_v36 = vld [vmem:[#allocation26_spill] sm:$0xff] }
 0x52a   :  { %9318 = vmatprep.subr.bf16.mxu1 %v17693_v15 }
 0x52b   :  { %v4193_v8 = vadd.f32 %v4192_v37, %v4191_v48  ;;  %v4326_v0 = vrot.slane %v4325_v44, 2 }
 0x52d   :  { %v4194_v51 = vrot.slane %v4193_v8, 1  ;;  %v4327_v50 = vadd.f32 %v4326_v0, %v4325_v44  ;;  %9334 = vmatpush1.bf16.msra.mxu1 %v13915_v29  ;;  %v17715_v29 = vld [vmem:[#allocation14_spill] sm:$0xff] }
 0x52e   :  { %9319 = vmatprep.subr.bf16.mxu1 %v17693_v15 }
 0x52f   :  { %v4195_v45 = vadd.f32 %v4194_v51, %v4193_v8  ;;  %v4328_v46 = vrot.slane %v4327_v50, 1  ;;  %v17722_v51 = vld [vmem:[#allocation28_spill] sm:$0xff] }
 0x531   :  { %v14076_v28 = vmul.f32 0.001953125, %v4195_v45  ;;  %v4329_v24 = vadd.f32 %v4328_v46, %v4327_v50  ;;  %9335 = vmatpush1.bf16.msra.mxu1 %v13926_v13  ;;  %v17720_v13 = vld [vmem:[#allocation21_spill] sm:$0xff] }
 0x532   :  { %9320 = vmatprep.subr.bf16.mxu1 %v17693_v15 }
 0x533   :  { %v4330_v48 = vmul.f32 0.001953125, %v4329_v24  ;;  %v4331_v62 = vmul.f32 %v14076_v28, %v14076_v28  ;;  %v17708_v24 = vld [vmem:[#allocation8_spill] sm:$0xff]  ;;  %v17731_v44 = vsub.f32 %v12764_v59, %v14076_v28  ;;  %v17732_v46 = vsub.f32 %v12780_v19, %v14076_v28 }
 0x534   :  { %v17736_v59 = vsub.f32 %v12769_v32, %v14076_v28  ;;  %v17737_v19 = vsub.f32 %v12925_v31, %v14076_v28  ;;  %v17738_v39 = vsub.f32 %v12939_v26, %v14076_v28  ;;  %v17740_v32 = vsub.f32 %v12916_v2, %v14076_v28 }
 0x535   :  { %v4332_v0 = vsub.f32 %v4330_v48, %v4331_v62  ;;  %9336 = vmatpush1.bf16.msra.mxu1 %v13948_v23  ;;  %v17710_v62 = vld [vmem:[#allocation10_spill] sm:$0xff]  ;;  %v17741_v31 = vsub.f32 %v12933_v12, %v14076_v28  ;;  %v17742_v26 = vsub.f32 %v13076_v5, %v14076_v28  ;;  %v17743_v2 = vsub.f32 %v13091_v54, %v14076_v28 }
 0x536   :  { %9321 = vmatprep.subr.bf16.mxu1 %v17693_v15  ;;  %v17744_v12 = vsub.f32 %v13068_v11, %v14076_v28  ;;  %v17745_v5 = vsub.f32 %v13085_v41, %v14076_v28  ;;  %v17747_v11 = vsub.f32 %v13243_v18, %v14076_v28  ;;  %v17748_v41 = vsub.f32 %v13220_v6, %v14076_v28 }
 0x537   :  { %v4397_v45 = vadd.f32 1e-05, %v4332_v0  ;;  %v17709_v0 = vld [vmem:[#allocation9_spill] sm:$0xff] }
 0x539   :  { %11036 = vrsqrt.f32 %v4397_v45  ;;  %9337 = vmatpush1.bf16.msra.mxu1 %v13965_v25  ;;  %v17711_v45 = vld [vmem:[#allocation11_spill] sm:$0xff]  ;;  %v17730_v25 = vsub.f32 %v14043_v33, %v14076_v28  ;;  %v14246_v33 = vld [vmem:[%s17545_s8] ss:$0 sm:$0xff] }
 0x53a   :  { %9322 = vmatprep.subr.bf16.mxu1 %v17693_v15  ;;  %17733 = vst [vmem:[#allocation8_spill] sm:$0xff] %v14246_v33 }
 0x53d   :  { %9338 = vmatpush1.bf16.msra.mxu1 %v17722_v51  ;;  %v14215_v51 = vld [vmem:[%s17544_s7] ss:$0 sm:$0xff] }
 0x53e   :  { %9323 = vmatprep.subr.bf16.mxu1 %v17693_v15 }
 0x543   :  { %v14210_v8 = vpop.eup %11036 }
 0x544   :  { %v4460_v48 = vmul.f32 %v14210_v8, %v17730_v25  ;;  %v14235_v37 = vmul.f32 %v14210_v8, %v17731_v44  ;;  %v14241_v50 = vmul.f32 %v14210_v8, %v17732_v46  ;;  %v17734_v25 = vsub.f32 %v12755_v57, %v14076_v28 }
 0x545   :  { %v14258_v44 = vmul.f32 %v14210_v8, %v17736_v59  ;;  %v14264_v46 = vmul.f32 %v14210_v8, %v17737_v19  ;;  %v14270_v57 = vmul.f32 %v14210_v8, %v17738_v39  ;;  %v14278_v59 = vmul.f32 %v14210_v8, %v17740_v32 }
 0x546   :  { %v14252_v23 = vmul.f32 %v14210_v8, %v17734_v25  ;;  %v17739_v25 = vld [vmem:[#allocation29_spill] sm:$0xff]  ;;  %v14284_v19 = vmul.f32 %v14210_v8, %v17741_v31  ;;  %v14290_v39 = vmul.f32 %v14210_v8, %v17742_v26  ;;  %v14309_v32 = vmul.f32 %v14210_v8, %v17745_v5 }
 0x547   :  { %9339 = vmatpush1.bf16.msra.mxu1 %v17739_v25  ;;  %v14303_v25 = vmul.f32 %v14210_v8, %v17744_v12  ;;  %v17746_v31 = vsub.f32 %v13228_v3, %v14076_v28  ;;  %v14328_v12 = vmul.f32 %v14210_v8, %v17748_v41  ;;  %v17749_v3 = vsub.f32 %v13237_v49, %v14076_v28 }
 0x548   :  { %17735 = vst [vmem:[#allocation9_spill] sm:$0xff] %v14252_v23  ;;  %v4531_v23 = vmul.f32 %v14215_v51, %v4460_v48  ;;  %9324 = vmatprep.subr.bf16.mxu1 %v17693_v15  ;;  %v14297_v48 = vmul.f32 %v14210_v8, %v17743_v2  ;;  %v14322_v2 = vmul.f32 %v14210_v8, %v17747_v11 }
 0x549   :  { %v14315_v54 = vmul.f32 %v14210_v8, %v17746_v31  ;;  %v14334_v5 = vmul.f32 %v14210_v8, %v17749_v3  ;;  %v17751_v31 = vsub.f32 %v13400_v35, %v14076_v28  ;;  %v17752_v11 = vsub.f32 %v13379_v60, %v14076_v28  ;;  %v17754_v3 = vld [vmem:[#allocation30_spill] sm:$0xff] }
 0x54a   :  { %v4602_v26 = vadd.f32 %v14246_v33, %v4531_v23  ;;  %v17750_v23 = vsub.f32 %v13389_v9, %v14076_v28  ;;  %v17753_v41 = vsub.f32 %v13398_v27, %v14076_v28  ;;  %v17755_v35 = vsub.f32 %v13482_v7, %v14076_v28 }
 0x54b   :  { %v14346_v6 = vmul.f32 %v14210_v8, %v17751_v31  ;;  %v14352_v49 = vmul.f32 %v14210_v8, %v17752_v11  ;;  %9340 = vmatpush1.bf16.msra.mxu1 %v17754_v3  ;;  %v17756_v60 = vsub.f32 %v13493_v40, %v14076_v28  ;;  %v17757_v27 = vsub.f32 %v13478_v61, %v14076_v28 }
 0x54c   :  { %v14340_v18 = vmul.f32 %v14210_v8, %v17750_v23  ;;  %v14358_v9 = vmul.f32 %v14210_v8, %v17753_v41  ;;  %v4666_v23 = vmax.f32 %v4602_v26, 0.0  ;;  %v14365_v31 = vmul.f32 %v14210_v8, %v17755_v35  ;;  %9325 = vmatprep.subr.bf16.mxu1 %v17693_v15 }
 0x54d   :  { %v14371_v11 = vmul.f32 %v14210_v8, %v17756_v60  ;;  %v14377_v41 = vmul.f32 %v14210_v8, %v17757_v27  ;;  %v17758_v7 = vsub.f32 %v13491_v1, %v14076_v28  ;;  %v17759_v40 = vsub.f32 %v13570_v55, %v14076_v28 }
 0x54e   :  { %v17760_v61 = vsub.f32 %v13581_v43, %v14076_v28  ;;  %v17761_v60 = vsub.f32 %v13566_v42, %v14076_v28  ;;  %4816 = vst [vmem:[#allocation3 + $0x321] sm:$0xff] %v4666_v23  ;;  %v17762_v27 = vsub.f32 %v13579_v47, %v14076_v28  ;;  %v17765_v23 = vsub.f32 %v17708_v24, %v14076_v28 }
 0x54f   :  { %v14384_v26 = vmul.f32 %v14210_v8, %v17758_v7  ;;  %v14390_v3 = vmul.f32 %v14210_v8, %v17759_v40  ;;  %v17763_v7 = vsub.f32 %v13652_v4, %v14076_v28  ;;  %v17764_v40 = vsub.f32 %v13663_v17, %v14076_v28 }
 0x550   :  { %v14396_v35 = vmul.f32 %v14210_v8, %v17760_v61  ;;  %v14402_v1 = vmul.f32 %v14210_v8, %v17761_v60  ;;  %v14408_v55 = vmul.f32 %v14210_v8, %v17762_v27  ;;  %v14426_v47 = vmul.f32 %v14210_v8, %v17765_v23 }
 0x551   :  { %v14414_v43 = vmul.f32 %v14210_v8, %v17763_v7  ;;  %v14420_v42 = vmul.f32 %v14210_v8, %v17764_v40  ;;  %v17766_v61 = vsub.f32 %v17709_v0, %v14076_v28  ;;  %v17767_v60 = vsub.f32 %v13711_v34, %v14076_v28  ;;  %v17770_v40 = vld [vmem:[#allocation31_spill] sm:$0xff] }
 0x552   :  { %v17768_v27 = vsub.f32 %v13725_v56, %v14076_v28  ;;  %v17769_v7 = vsub.f32 %v13708_v53, %v14076_v28  ;;  %9341 = vmatpush1.bf16.msra.mxu1 %v17770_v40  ;;  %v17771_v34 = vsub.f32 %v13718_v20, %v14076_v28  ;;  %v17772_v56 = vsub.f32 %v13746_v52, %v14076_v28 }
 0x553   :  { %v14432_v4 = vmul.f32 %v14210_v8, %v17766_v61  ;;  %v14438_v17 = vmul.f32 %v14210_v8, %v17767_v60  ;;  %v17773_v53 = vsub.f32 %v13753_v16, %v14076_v28  ;;  %9326 = vmatprep.subr.bf16.mxu1 %v17693_v15  ;;  %v17775_v52 = vsub.f32 %v13751_v22, %v14076_v28 }
 0x554   :  { %v14444_v24 = vmul.f32 %v14210_v8, %v17768_v27  ;;  %v14450_v0 = vmul.f32 %v14210_v8, %v17769_v7  ;;  %v14457_v23 = vmul.f32 %v14210_v8, %v17771_v34  ;;  %v14463_v61 = vmul.f32 %v14210_v8, %v17772_v56 }
 0x555   :  { %v14469_v60 = vmul.f32 %v14210_v8, %v17773_v53  ;;  %v17774_v27 = vsub.f32 %v13744_v10, %v14076_v28  ;;  %v14482_v7 = vmul.f32 %v14210_v8, %v17775_v52  ;;  %v17776_v16 = vsub.f32 %v13766_v14, %v14076_v28 }
 0x556   :  { %v17777_v10 = vsub.f32 %v13773_v30, %v14076_v28  ;;  %v17778_v56 = vsub.f32 %v17710_v62, %v14076_v28  ;;  %v17779_v53 = vsub.f32 %v17711_v45, %v14076_v28 }
 0x557   :  { %v14475_v20 = vmul.f32 %v14210_v8, %v17774_v27  ;;  %v14488_v40 = vmul.f32 %v14210_v8, %v17776_v16  ;;  %v17780_v27 = vld [vmem:[#allocation13_spill] sm:$0xff]  ;;  %v17783_v16 = vld [vmem:[#allocation15_spill] sm:$0xff] }
 0x558   :  { %v14494_v34 = vmul.f32 %v14210_v8, %v17777_v10  ;;  %v14500_v22 = vmul.f32 %v14210_v8, %v17778_v56  ;;  %v14506_v14 = vmul.f32 %v14210_v8, %v17779_v53  ;;  %v17781_v52 = vsub.f32 %v17780_v27, %v14076_v28  ;;  %v17786_v56 = vld [vmem:[#allocation12_spill] sm:$0xff] }
 0x559   :  { %v17784_v10 = vsub.f32 %v17783_v16, %v14076_v28  ;;  %v17787_v33 = vsub.f32 %v17786_v56, %v14076_v28  ;;  %v17789_v53 = vsub.f32 %v17715_v29, %v14076_v28 }
 0x55a   :  { %v14512_v30 = vmul.f32 %v14210_v8, %v17781_v52  ;;  %v17790_v52 = vld [vmem:[#allocation17_spill] sm:$0xff] }
 0x55b   :  { %v14518_v62 = vmul.f32 %v14210_v8, %v17784_v10  ;;  %v14524_v45 = vmul.f32 %v14210_v8, %v17787_v33  ;;  %v14530_v27 = vmul.f32 %v14210_v8, %v17789_v53  ;;  %v17792_v10 = vld [vmem:[#allocation19_spill] sm:$0xff]  ;;  %v17795_v33 = vld [vmem:[#allocation16_spill] sm:$0xff] }
 0x55c   :  { %17782 = vst [vmem:[#allocation10_spill] sm:$0xff] %v14512_v30  ;;  %v17791_v30 = vsub.f32 %v17790_v52, %v14076_v28  ;;  %v17798_v53 = vld [vmem:[#allocation32_spill] sm:$0xff]  ;;  %v17799_v52 = vsub.f32 %v17719_v58, %v14076_v28 }
 0x55d   :  { %17785 = vst [vmem:[#allocation11_spill] sm:$0xff] %v14518_v62  ;;  %17788 = vst [vmem:[#allocation14_spill] sm:$0xff] %v14524_v45  ;;  %v17793_v62 = vsub.f32 %v17792_v10, %v14076_v28  ;;  %v17796_v45 = vsub.f32 %v17795_v33, %v14076_v28  ;;  %9342 = vmatpush1.bf16.msra.mxu1 %v17798_v53  ;;  %v17801_v10 = vsub.f32 %v17720_v13, %v14076_v28 }
 0x55e   :  { %v14536_v16 = vmul.f32 %v14210_v8, %v17791_v30  ;;  %v14555_v30 = vmul.f32 %v14210_v8, %v17799_v52  ;;  %9327 = vmatprep.subr.bf16.mxu1 %v17693_v15  ;;  %v17809_v52 = vld [vmem:[#allocation22_spill] sm:$0xff] }
 0x55f   :  { %v14542_v56 = vmul.f32 %v14210_v8, %v17793_v62  ;;  %v14548_v29 = vmul.f32 %v14210_v8, %v17796_v45  ;;  %v14561_v62 = vmul.f32 %v14210_v8, %v17801_v10  ;;  %v17810_v13 = vsub.f32 %v17809_v52, %v14076_v28 }
 0x560   :  { %17800 = vst [vmem:[#allocation28_spill] sm:$0xff] %v14555_v30 }
 0x561   :  { %17794 = vst [vmem:[#allocation18_spill] sm:$0xff] %v14542_v56  ;;  %17797 = vst [vmem:[#allocation21_spill] sm:$0xff] %v14548_v29  ;;  %v17803_v56 = vld [vmem:[#allocation23_spill] sm:$0xff]  ;;  %v17806_v29 = vld [vmem:[#allocation20_spill] sm:$0xff]  ;;  %v14580_v10 = vmul.f32 %v14210_v8, %v17810_v13  ;;  %v17817_v13 = vsub.f32 %v17728_v36, %v14076_v28 }
 0x562   :  { %17802 = vst [vmem:[#allocation26_spill] sm:$0xff] %v14561_v62  ;;  %v17804_v33 = vsub.f32 %v17803_v56, %v14076_v28  ;;  %v17807_v53 = vsub.f32 %v17806_v29, %v14076_v28  ;;  %v17811_v62 = vld [vmem:[#allocation25_spill] sm:$0xff] }
 0x563   :  { %v17812_v56 = vsub.f32 %v17811_v62, %v14076_v28  ;;  %v14604_v62 = vmul.f32 %v14210_v8, %v17817_v13  ;;  %v14626_v13 = vmul.f32 %v14215_v51, %v14235_v37  ;;  %v14647_v37 = vmul.f32 %v14215_v51, %v14270_v57 }
 0x564   :  { %v14567_v45 = vmul.f32 %v14210_v8, %v17804_v33  ;;  %v14573_v58 = vmul.f32 %v14210_v8, %v17807_v53  ;;  %v14668_v57 = vmul.f32 %v14215_v51, %v14303_v25  ;;  %v14688_v25 = vmul.f32 %v14215_v51, %v14334_v5 }
 0x565   :  { %v14586_v33 = vmul.f32 %v14210_v8, %v17812_v56  ;;  %v17818_v56 = vsub.f32 %v17729_v38, %v14076_v28  ;;  %v14630_v38 = vmul.f32 %v14215_v51, %v14241_v50  ;;  %v14651_v50 = vmul.f32 %v14215_v51, %v14278_v59 }
 0x566   :  { %17805 = vst [vmem:[#allocation34_spill] sm:$0xff] %v14567_v45  ;;  %17808 = vst [vmem:[#allocation29_spill] sm:$0xff] %v14573_v58  ;;  %v17813_v45 = vld [vmem:[#allocation27_spill] sm:$0xff]  ;;  %v17815_v58 = vld [vmem:[#allocation24_spill] sm:$0xff]  ;;  %v14672_v59 = vmul.f32 %v14215_v51, %v14309_v32  ;;  %v14692_v32 = vmul.f32 %v14215_v51, %v14340_v18  ;;  %v14709_v5 = vmul.f32 %v14215_v51, %v14365_v31 }
 0x567   :  { %v17814_v29 = vsub.f32 %v17813_v45, %v14076_v28  ;;  %v17816_v30 = vsub.f32 %v17815_v58, %v14076_v28  ;;  %v14610_v45 = vmul.f32 %v14210_v8, %v17818_v56  ;;  %v17821_v56 = vld [vmem:[#allocation9_spill] sm:$0xff]  ;;  %v14713_v18 = vmul.f32 %v14215_v51, %v14371_v11 }
 0x568   :  { %v14729_v31 = vmul.f32 %v14215_v51, %v14396_v35  ;;  %v14733_v11 = vmul.f32 %v14215_v51, %v14402_v1  ;;  %v14749_v35 = vmul.f32 %v14215_v51, %v14426_v47  ;;  %v14753_v1 = vmul.f32 %v14215_v51, %v14432_v4 }
 0x569   :  { %v14592_v53 = vmul.f32 %v14210_v8, %v17814_v29  ;;  %v14598_v52 = vmul.f32 %v14210_v8, %v17816_v30  ;;  %v17819_v29 = vsub.f32 %v14026_v21, %v14076_v28  ;;  %v17820_v30 = vsub.f32 %v14040_v63, %v14076_v28  ;;  %v17822_v63 = vld [vmem:[#allocation33_spill] sm:$0xff] }
 0x56a   :  { %v14634_v21 = vmul.f32 %v14215_v51, %v17821_v56  ;;  %9343 = vmatpush1.bf16.msra.mxu1 %v17822_v63  ;;  %v14643_v28 = vmul.f32 %v14215_v51, %v14264_v46  ;;  %v14664_v46 = vmul.f32 %v14215_v51, %v14297_v48  ;;  %v14684_v48 = vmul.f32 %v14215_v51, %v14328_v12  ;;  %v17824_v56 = vld [vmem:[#allocation10_spill] sm:$0xff]  ;;  %v17826_v63 = vld [vmem:[#allocation11_spill] sm:$0xff] }
 0x56b   :  { %v14616_v58 = vmul.f32 %v14210_v8, %v17819_v29  ;;  %v14622_v36 = vmul.f32 %v14210_v8, %v17820_v30  ;;  %v14638_v29 = vmul.f32 %v14215_v51, %v14258_v44  ;;  %v14655_v8 = vmul.f32 %v14215_v51, %v14284_v19  ;;  %9328 = vmatprep.subr.bf16.mxu1 %v17693_v15  ;;  %v17823_v30 = vld [vmem:[#allocation35_spill] sm:$0xff]  ;;  %v17832_v15 = vld [vmem:[#allocation18_spill] sm:$0xff] }
 0x56c   :  { %v14660_v44 = vmul.f32 %v14215_v51, %v14290_v39  ;;  %v14676_v19 = vmul.f32 %v14215_v51, %v14315_v54  ;;  %v14680_v39 = vmul.f32 %v14215_v51, %v14322_v2  ;;  %v14696_v54 = vmul.f32 %v14215_v51, %v14346_v6 }
 0x56d   :  { %v14700_v2 = vmul.f32 %v14215_v51, %v14352_v49  ;;  %v14704_v12 = vmul.f32 %v14215_v51, %v14358_v9  ;;  %v14717_v6 = vmul.f32 %v14215_v51, %v14377_v41  ;;  %v14721_v49 = vmul.f32 %v14215_v51, %v14384_v26 }
 0x56e   :  { %9344 = vmatpush1.bf16.msra.mxu1 %v17823_v30  ;;  %v14725_v9 = vmul.f32 %v14215_v51, %v14390_v3  ;;  %v14737_v41 = vmul.f32 %v14215_v51, %v14408_v55  ;;  %v14741_v26 = vmul.f32 %v14215_v51, %v14414_v43  ;;  %v14745_v3 = vmul.f32 %v14215_v51, %v14420_v42  ;;  %v17828_v30 = vld [vmem:[#allocation14_spill] sm:$0xff] }
 0x56f   :  { %v14757_v55 = vmul.f32 %v14215_v51, %v14438_v17  ;;  %v14761_v43 = vmul.f32 %v14215_v51, %v14444_v24  ;;  %v14765_v42 = vmul.f32 %v14215_v51, %v14450_v0  ;;  %v14769_v47 = vmul.f32 %v14215_v51, %v14457_v23 }
 0x570   :  { %v14773_v4 = vmul.f32 %v14215_v51, %v14463_v61  ;;  %v14777_v17 = vmul.f32 %v14215_v51, %v14469_v60  ;;  %v14781_v24 = vmul.f32 %v14215_v51, %v14475_v20  ;;  %v14785_v0 = vmul.f32 %v14215_v51, %v14482_v7 }
 0x571   :  { %v14789_v23 = vmul.f32 %v14215_v51, %v14488_v40  ;;  %v14793_v61 = vmul.f32 %v14215_v51, %v14494_v34  ;;  %v14797_v60 = vmul.f32 %v14215_v51, %v14500_v22  ;;  %v14801_v20 = vmul.f32 %v14215_v51, %v14506_v14 }
 0x572   :  { %v14805_v7 = vmul.f32 %v14215_v51, %v17824_v56  ;;  %v14809_v40 = vmul.f32 %v14215_v51, %v17826_v63  ;;  %v14813_v34 = vmul.f32 %v14215_v51, %v17828_v30  ;;  %v14817_v22 = vmul.f32 %v14215_v51, %v14530_v27 }
 0x573   :  { %v14821_v14 = vmul.f32 %v14215_v51, %v14536_v16  ;;  %v14825_v56 = vmul.f32 %v14215_v51, %v17832_v15 }
 0x574   :  { %17825 = vst [vmem:[#allocation30_spill] sm:$0xff] %v14805_v7  ;;  %17827 = vst [vmem:[#allocation31_spill] sm:$0xff] %v14809_v40  ;;  %v17833_v7 = vld [vmem:[#allocation21_spill] sm:$0xff]  ;;  %v17834_v40 = vld [vmem:[#allocation28_spill] sm:$0xff] }
 0x575   :  { %17829 = vst [vmem:[#allocation13_spill] sm:$0xff] %v14813_v34  ;;  %17830 = vst [vmem:[#allocation15_spill] sm:$0xff] %v14817_v22  ;;  %v14829_v63 = vmul.f32 %v14215_v51, %v17833_v7  ;;  %v14833_v30 = vmul.f32 %v14215_v51, %v17834_v40  ;;  %v17835_v34 = vld [vmem:[#allocation26_spill] sm:$0xff]  ;;  %v14849_v7 = vmul.f32 %v14215_v51, %v14580_v10 }
 0x576   :  { %17831 = vst [vmem:[#allocation12_spill] sm:$0xff] %v14821_v14  ;;  %v14837_v27 = vmul.f32 %v14215_v51, %v17835_v34  ;;  %v17836_v22 = vld [vmem:[#allocation34_spill] sm:$0xff]  ;;  %v17837_v14 = vld [vmem:[#allocation29_spill] sm:$0xff]  ;;  %v14853_v40 = vmul.f32 %v14215_v51, %v14586_v33  ;;  %v14857_v34 = vmul.f32 %v14215_v51, %v14592_v53  ;;  %v14869_v10 = vmul.f32 %v14215_v51, %v14610_v45 }
 0x577   :  { %v14841_v16 = vmul.f32 %v14215_v51, %v17836_v22  ;;  %v14845_v15 = vmul.f32 %v14215_v51, %v17837_v14  ;;  %v14861_v22 = vmul.f32 %v14215_v51, %v14598_v52  ;;  %v14865_v14 = vmul.f32 %v14215_v51, %v14604_v62 }
 0x578   :  { %17838 = vst [vmem:[#allocation17_spill] sm:$0xff] %v14857_v34  ;;  %v14873_v33 = vmul.f32 %v14215_v51, %v14616_v58  ;;  %v14877_v53 = vmul.f32 %v14215_v51, %v14622_v36  ;;  %v17839_v34 = vld [vmem:[#allocation8_spill] sm:$0xff] }
 0x579   :  { %v14881_v52 = vadd.f32 %v17839_v34, %v14626_v13  ;;  %v14885_v62 = vadd.f32 %v17839_v34, %v14630_v38  ;;  %v14889_v45 = vadd.f32 %v17839_v34, %v14634_v21  ;;  %v14893_v58 = vadd.f32 %v17839_v34, %v14638_v29 }
 0x57a   :  { %v14897_v51 = vadd.f32 %v17839_v34, %v14643_v28  ;;  %v14901_v36 = vadd.f32 %v17839_v34, %v14647_v37  ;;  %v14905_v13 = vadd.f32 %v17839_v34, %v14651_v50  ;;  %v14909_v38 = vadd.f32 %v17839_v34, %v14655_v8 }
 0x57b   :  { %v14913_v21 = vadd.f32 %v17839_v34, %v14660_v44  ;;  %v14917_v29 = vadd.f32 %v17839_v34, %v14664_v46  ;;  %v14921_v28 = vadd.f32 %v17839_v34, %v14668_v57  ;;  %v14925_v37 = vadd.f32 %v17839_v34, %v14672_v59 }
 0x57c   :  { %v14929_v50 = vadd.f32 %v17839_v34, %v14676_v19  ;;  %v14933_v8 = vadd.f32 %v17839_v34, %v14680_v39  ;;  %v14937_v44 = vadd.f32 %v17839_v34, %v14684_v48  ;;  %v14941_v46 = vadd.f32 %v17839_v34, %v14688_v25 }
 0x57d   :  { %v14945_v57 = vadd.f32 %v17839_v34, %v14692_v32  ;;  %v14949_v59 = vadd.f32 %v17839_v34, %v14696_v54  ;;  %v14953_v19 = vadd.f32 %v17839_v34, %v14700_v2  ;;  %v14957_v39 = vadd.f32 %v17839_v34, %v14704_v12 }
 0x57e   :  { %v14961_v48 = vadd.f32 %v17839_v34, %v14709_v5  ;;  %v14965_v25 = vadd.f32 %v17839_v34, %v14713_v18  ;;  %v14969_v32 = vadd.f32 %v17839_v34, %v14717_v6  ;;  %v14973_v54 = vadd.f32 %v17839_v34, %v14721_v49 }
 0x57f   :  { %v14977_v2 = vadd.f32 %v17839_v34, %v14725_v9  ;;  %v14981_v12 = vadd.f32 %v17839_v34, %v14729_v31  ;;  %v14985_v5 = vadd.f32 %v17839_v34, %v14733_v11  ;;  %v14989_v18 = vadd.f32 %v17839_v34, %v14737_v41 }
 0x580   :  { %v14993_v6 = vadd.f32 %v17839_v34, %v14741_v26  ;;  %v14997_v49 = vadd.f32 %v17839_v34, %v14745_v3  ;;  %v15001_v9 = vadd.f32 %v17839_v34, %v14749_v35  ;;  %v15005_v31 = vadd.f32 %v17839_v34, %v14753_v1 }
 0x581   :  { %v15009_v11 = vadd.f32 %v17839_v34, %v14757_v55  ;;  %v15013_v41 = vadd.f32 %v17839_v34, %v14761_v43  ;;  %v15017_v26 = vadd.f32 %v17839_v34, %v14765_v42  ;;  %v15021_v3 = vadd.f32 %v17839_v34, %v14769_v47 }
 0x582   :  { %17840 = vst [vmem:[#allocation19_spill] sm:$0xff] %v14993_v6  ;;  %v15025_v35 = vadd.f32 %v17839_v34, %v14773_v4  ;;  %v15029_v1 = vadd.f32 %v17839_v34, %v14777_v17  ;;  %v15033_v55 = vadd.f32 %v17839_v34, %v14781_v24  ;;  %v15037_v43 = vadd.f32 %v17839_v34, %v14785_v0  ;;  %v17845_v24 = vld [vmem:[#allocation30_spill] sm:$0xff] }
 0x583   :  { %v15041_v42 = vadd.f32 %v17839_v34, %v14789_v23  ;;  %v15045_v47 = vadd.f32 %v17839_v34, %v14793_v61  ;;  %v15049_v4 = vadd.f32 %v17839_v34, %v14797_v60  ;;  %v15053_v17 = vadd.f32 %v17839_v34, %v14801_v20 }
 0x584   :  { %17841 = vst [vmem:[#allocation16_spill] sm:$0xff] %v15037_v43  ;;  %v15057_v0 = vadd.f32 %v17839_v34, %v17845_v24  ;;  %v17846_v43 = vld [vmem:[#allocation31_spill] sm:$0xff]  ;;  %v15077_v24 = vadd.f32 %v17839_v34, %v14825_v56  ;;  %v15097_v56 = vadd.f32 %v17839_v34, %v14845_v15  ;;  %v15117_v15 = vadd.f32 %v17839_v34, %v14865_v14 }
 0x585   :  { %17842 = vst [vmem:[#allocation32_spill] sm:$0xff] %v15041_v42  ;;  %17843 = vst [vmem:[#allocation23_spill] sm:$0xff] %v15045_v47  ;;  %v15061_v23 = vadd.f32 %v17839_v34, %v17846_v43  ;;  %v17847_v42 = vld [vmem:[#allocation13_spill] sm:$0xff]  ;;  %v17848_v47 = vld [vmem:[#allocation15_spill] sm:$0xff]  ;;  %v15081_v43 = vadd.f32 %v17839_v34, %v14829_v63  ;;  %v15101_v63 = vadd.f32 %v17839_v34, %v14849_v7  ;;  %v17608_v14 = vmax.f32 %v14893_v58, 0.0 }
 0x586   :  { %17844 = vst [vmem:[#allocation20_spill] sm:$0xff] %v15049_v4  ;;  %v15065_v61 = vadd.f32 %v17839_v34, %v17847_v42  ;;  %v15069_v60 = vadd.f32 %v17839_v34, %v17848_v47  ;;  %v17849_v4 = vld [vmem:[#allocation12_spill] sm:$0xff]  ;;  %v15085_v42 = vadd.f32 %v17839_v34, %v14833_v30  ;;  %v15089_v47 = vadd.f32 %v17839_v34, %v14837_v27 }
 0x587   :  { %v15073_v20 = vadd.f32 %v17839_v34, %v17849_v4  ;;  %v15093_v4 = vadd.f32 %v17839_v34, %v14841_v16  ;;  %v15105_v30 = vadd.f32 %v17839_v34, %v14853_v40  ;;  %v15113_v16 = vadd.f32 %v17839_v34, %v14861_v22  ;;  %17854 = vst [vmem:[#allocation24_spill] sm:$0xff] %v15117_v15 }
 0x588   :  { %17850 = vst [vmem:[#allocation22_spill] sm:$0xff] %v15085_v42  ;;  %v17851_v42 = vld [vmem:[#allocation17_spill] sm:$0xff]  ;;  %v15121_v7 = vadd.f32 %v17839_v34, %v14869_v10  ;;  %v15125_v40 = vadd.f32 %v17839_v34, %v14873_v33  ;;  %v17607_v22 = vmax.f32 %v14885_v62, 0.0  ;;  %v17610_v33 = vmax.f32 %v14909_v38, 0.0  ;;  %4758 = vst [vmem:[#allocation3 + $0x39] sm:$0xff] %v17608_v14 }
 0x589   :  { %v15109_v27 = vadd.f32 %v17839_v34, %v17851_v42  ;;  %17853 = vst [vmem:[#allocation27_spill] sm:$0xff] %v15113_v16  ;;  %v15129_v42 = vadd.f32 %v17839_v34, %v14877_v53  ;;  %v17609_v16 = vmax.f32 %v14889_v45, 0.0  ;;  %v17857_v34 = vmax.f32 %v14897_v51, 0.0 }
 0x58a   :  { %17855 = vst [vmem:[#allocation9_spill] sm:$0xff] %v15121_v7  ;;  %17856 = vst [vmem:[#allocation33_spill] sm:$0xff] %v15125_v40  ;;  %v17611_v40 = vmax.f32 %v14913_v21, 0.0  ;;  %v17613_v15 = vmax.f32 %v14941_v46, 0.0  ;;  %v17859_v53 = vmax.f32 %v14905_v13, 0.0  ;;  %v17861_v10 = vmax.f32 %v14921_v28, 0.0 }
 0x58b   :  { %17852 = vst [vmem:[#allocation25_spill] sm:$0xff] %v15109_v27  ;;  %v17606_v27 = vmax.f32 %v14881_v52, 0.0  ;;  %4756 = vst [vmem:[#allocation3 + $0x21] sm:$0xff] %v17607_v22  ;;  %v17612_v22 = vmax.f32 %v14937_v44, 0.0  ;;  %v17614_v14 = vmax.f32 %v14973_v54, 0.0  ;;  %v4638_v7 = vmax.f32 %v15013_v41, 0.0 }
 0x58c   :  { %4757 = vst [vmem:[#allocation3 + $0x31] sm:$0xff] %v17609_v16  ;;  %4759 = vst [vmem:[#allocation3 + $0x49] sm:$0xff] %v17857_v34  ;;  %v17860_v34 = vmax.f32 %v14917_v29, 0.0  ;;  %v4637_v16 = vmax.f32 %v15009_v11, 0.0  ;;  %v4641_v11 = vmax.f32 %v15025_v35, 0.0  ;;  %v4642_v41 = vmax.f32 %v15029_v1, 0.0 }
 0x58d   :  { %4755 = vst [vmem:[#allocation3 + $0x19] sm:$0xff] %v17606_v27  ;;  %v17858_v27 = vmax.f32 %v14901_v36, 0.0  ;;  %4761 = vst [vmem:[#allocation3 + $0x61] sm:$0xff] %v17859_v53  ;;  %v17862_v53 = vmax.f32 %v14925_v37, 0.0 }
 0x58e   :  { %4762 = vst [vmem:[#allocation3 + $0x69] sm:$0xff] %v17610_v33  ;;  %4763 = vst [vmem:[#allocation3 + $0x79] sm:$0xff] %v17611_v40  ;;  %v17863_v33 = vmax.f32 %v14929_v50, 0.0  ;;  %v17864_v40 = vmax.f32 %v14933_v8, 0.0 }
 0x58f   :  { %4760 = vst [vmem:[#allocation3 + $0x51] sm:$0xff] %v17858_v27  ;;  %4764 = vst [vmem:[#allocation3 + $0x81] sm:$0xff] %v17860_v34  ;;  %v17616_v27 = vmax.f32 %v14953_v19, 0.0  ;;  %v17615_v34 = vmax.f32 %v14969_v32, 0.0 }
 0x590   :  { %4765 = vst [vmem:[#allocation3 + $0x91] sm:$0xff] %v17861_v10  ;;  %4766 = vst [vmem:[#allocation3 + $0x99] sm:$0xff] %v17862_v53  ;;  %v17865_v10 = vmax.f32 %v14945_v57, 0.0  ;;  %v4636_v53 = vmax.f32 %v15005_v31, 0.0  ;;  %v4640_v31 = vmax.f32 %v15021_v3, 0.0 }
 0x591   :  { %4767 = vst [vmem:[#allocation3 + $0xa9] sm:$0xff] %v17863_v33  ;;  %4768 = vst [vmem:[#allocation3 + $0xb1] sm:$0xff] %v17864_v40  ;;  %v17866_v33 = vmax.f32 %v14949_v59, 0.0  ;;  %v17617_v40 = vmax.f32 %v14985_v5, 0.0 }
 0x592   :  { %4769 = vst [vmem:[#allocation3 + $0xc1] sm:$0xff] %v17612_v22  ;;  %4770 = vst [vmem:[#allocation3 + $0xc9] sm:$0xff] %v17613_v15  ;;  %v17867_v22 = vmax.f32 %v14957_v39, 0.0  ;;  %v17868_v15 = vmax.f32 %v14961_v48, 0.0 }
 0x593   :  { %4771 = vst [vmem:[#allocation3 + $0xd9] sm:$0xff] %v17865_v10  ;;  %4772 = vst [vmem:[#allocation3 + $0xe1] sm:$0xff] %v17866_v33  ;;  %v17869_v10 = vmax.f32 %v14965_v25, 0.0  ;;  %v4635_v33 = vmax.f32 %v15001_v9, 0.0  ;;  %v4639_v9 = vmax.f32 %v15017_v26, 0.0  ;;  %v4643_v26 = vmax.f32 %v15033_v55, 0.0 }
 0x594   :  { %4773 = vst [vmem:[#allocation3 + $0xf1] sm:$0xff] %v17616_v27  ;;  %4774 = vst [vmem:[#allocation3 + $0xf9] sm:$0xff] %v17867_v22  ;;  %v17870_v22 = vmax.f32 %v14977_v2, 0.0  ;;  %v17877_v27 = vld [vmem:[#allocation23_spill] sm:$0xff]  ;;  %v4651_v55 = vmax.f32 %v15065_v61, 0.0 }
 0x595   :  { %4775 = vst [vmem:[#allocation3 + $0x109] sm:$0xff] %v17868_v15  ;;  %4776 = vst [vmem:[#allocation3 + $0x111] sm:$0xff] %v17869_v10  ;;  %v17871_v15 = vmax.f32 %v14981_v12, 0.0  ;;  %v17872_v10 = vmax.f32 %v14989_v18, 0.0  ;;  %v4646_v1 = vmax.f32 %v17877_v27, 0.0  ;;  %v4652_v27 = vmax.f32 %v15069_v60, 0.0 }
 0x596   :  { %4777 = vst [vmem:[#allocation3 + $0x121] sm:$0xff] %v17615_v34  ;;  %4778 = vst [vmem:[#allocation3 + $0x129] sm:$0xff] %v17614_v14  ;;  %v17873_v14 = vmax.f32 %v14993_v6, 0.0  ;;  %v17876_v34 = vld [vmem:[#allocation32_spill] sm:$0xff]  ;;  %v4648_v6 = vmax.f32 %v15053_v17, 0.0  ;;  %v4655_v17 = vmax.f32 %v15081_v43, 0.0 }
 0x597   :  { %4779 = vst [vmem:[#allocation3 + $0x139] sm:$0xff] %v17870_v22  ;;  %4780 = vst [vmem:[#allocation3 + $0x141] sm:$0xff] %v17871_v15  ;;  %v17874_v22 = vmax.f32 %v14997_v49, 0.0  ;;  %v17875_v15 = vld [vmem:[#allocation16_spill] sm:$0xff]  ;;  %v4645_v35 = vmax.f32 %v17876_v34, 0.0  ;;  %v4653_v34 = vmax.f32 %v15073_v20, 0.0 }
 0x598   :  { %4781 = vst [vmem:[#allocation3 + $0x151] sm:$0xff] %v17617_v40  ;;  %4782 = vst [vmem:[#allocation3 + $0x159] sm:$0xff] %v17872_v10  ;;  %v4644_v3 = vmax.f32 %v17875_v15, 0.0  ;;  %v17878_v40 = vld [vmem:[#allocation20_spill] sm:$0xff]  ;;  %v5203_v61 = vld [vmem:[#allocation3 + $0x18] sm:$0xff]  ;;  %v4659_v20 = vmax.f32 %v15097_v56, 0.0 }
 0x599   :  { %4783 = vst [vmem:[#allocation3 + $0x169] sm:$0xff] %v17873_v14  ;;  %4784 = vst [vmem:[#allocation3 + $0x171] sm:$0xff] %v17874_v22  ;;  %v4647_v10 = vmax.f32 %v17878_v40, 0.0  ;;  %v4649_v14 = vmax.f32 %v15057_v0, 0.0  ;;  %v4650_v22 = vmax.f32 %v15061_v23, 0.0  ;;  %v17879_v0 = vld [vmem:[#allocation22_spill] sm:$0xff] }
 0x59a   :  { %4785 = vst [vmem:[#allocation3 + $0x181] sm:$0xff] %v4635_v33  ;;  %4786 = vst [vmem:[#allocation3 + $0x189] sm:$0xff] %v4636_v53  ;;  %v4656_v23 = vmax.f32 %v17879_v0, 0.0  ;;  %v4658_v40 = vmax.f32 %v15093_v4, 0.0  ;;  %v5204_v60 = vld [vmem:[#allocation3 + $0x20] sm:$0xff]  ;;  %v4661_v53 = vmax.f32 %v15105_v30, 0.0 }
 0x59b   :  { %4787 = vst [vmem:[#allocation3 + $0x1c9] sm:$0xff] %v4637_v16  ;;  %4788 = vst [vmem:[#allocation3 + $0x1d1] sm:$0xff] %v4638_v7  ;;  %v4654_v16 = vmax.f32 %v15077_v24, 0.0  ;;  %v4657_v7 = vmax.f32 %v15089_v47, 0.0  ;;  %v4660_v24 = vmax.f32 %v15101_v63, 0.0  ;;  %v17880_v33 = vld [vmem:[#allocation25_spill] sm:$0xff] }
 0x59c   :  { %4789 = vst [vmem:[#allocation3 + $0x1e1] sm:$0xff] %v4639_v9  ;;  %4790 = vst [vmem:[#allocation3 + $0x1e9] sm:$0xff] %v4640_v31  ;;  %v4662_v43 = vmax.f32 %v17880_v33, 0.0  ;;  %v17881_v47 = vld [vmem:[#allocation27_spill] sm:$0xff]  ;;  %v17882_v9 = vld [vmem:[#allocation24_spill] sm:$0xff]  ;;  %v4668_v56 = vmax.f32 %v15129_v42, 0.0 }
 0x59d   :  { %4791 = vst [vmem:[#allocation3 + $0x1f9] sm:$0xff] %v4641_v11  ;;  %4792 = vst [vmem:[#allocation3 + $0x201] sm:$0xff] %v4642_v41  ;;  %v4663_v4 = vmax.f32 %v17881_v47, 0.0  ;;  %v17883_v31 = vld [vmem:[#allocation9_spill] sm:$0xff]  ;;  %v17885_v63 = vmax.f32 %v14881_v52, 0.0  ;;  %v17886_v30 = vmax.f32 %v14885_v62, 0.0 }
 0x59e   :  { %4793 = vst [vmem:[#allocation3 + $0x211] sm:$0xff] %v4643_v26  ;;  %4794 = vst [vmem:[#allocation3 + $0x219] sm:$0xff] %v4644_v3  ;;  %v4665_v11 = vmax.f32 %v17883_v31, 0.0  ;;  %v17884_v41 = vld [vmem:[#allocation33_spill] sm:$0xff]  ;;  %v5267_v3 = vpack.c.bf16 %v5204_v60, %v5203_v61  ;;  %v17889_v52 = vmax.f32 %v14897_v51, 0.0  ;;  %v17890_v62 = vmax.f32 %v14901_v36, 0.0 }
 0x59f   :  { %4795 = vst [vmem:[#allocation3 + $0x229] sm:$0xff] %v4645_v35  ;;  %4796 = vst [vmem:[#allocation3 + $0x231] sm:$0xff] %v4646_v1  ;;  %v4667_v26 = vmax.f32 %v17884_v41, 0.0  ;;  %v15258_v15 = vpack.c.bf16 %v17886_v30, %v17885_v63  ;;  %v10996_v35 = vld [vmem:[%s17546_s9 + $0x100] sm:$0xff]   ;;  %v17887_v1 = vmax.f32 %v14889_v45, 0.0  ;;  %v17891_v45 = vmax.f32 %v14905_v13, 0.0 }
 0x5a0   :  { %4797 = vst [vmem:[#allocation3 + $0x241] sm:$0xff] %v4647_v10  ;;  %4798 = vst [vmem:[#allocation3 + $0x249] sm:$0xff] %v4648_v6  ;;  %v4664_v6 = vmax.f32 %v17882_v9, 0.0  ;;  %v17888_v10 = vmax.f32 %v14893_v58, 0.0  ;;  %7157 = vmatprep.mubr.bf16.mxu0 %v5267_v3  ;;  %v17892_v58 = vmax.f32 %v14909_v38, 0.0  ;;  %v17896_v51 = vmax.f32 %v14913_v21, 0.0 }
 0x5a1   :  { %4799 = vst [vmem:[#allocation3 + $0x259] sm:$0xff] %v4649_v14  ;;  %4800 = vst [vmem:[#allocation3 + $0x261] sm:$0xff] %v4650_v22  ;;  %v5205_v14 = vld [vmem:[#allocation3 + $0x30] sm:$0xff]  ;;  %v5206_v22 = vld [vmem:[#allocation3 + $0x38] sm:$0xff]  ;;  %6876 = vmatprep.mubr.bf16.mxu1 %v15258_v15  ;;  %v17897_v36 = vmax.f32 %v14917_v29, 0.0  ;;  %v17898_v38 = vmax.f32 %v14921_v28, 0.0 }
 0x5a2   :  { %4801 = vst [vmem:[#allocation3 + $0x271] sm:$0xff] %v4651_v55  ;;  %4802 = vst [vmem:[#allocation3 + $0x279] sm:$0xff] %v4652_v27  ;;  %v15267_v42 = vpack.c.bf16 %v17888_v10, %v17887_v1  ;;  %v5014_v55 = vpack.c.bf16 %v17890_v62, %v17889_v52  ;;  %v5015_v27 = vpack.c.bf16 %v17892_v58, %v17891_v45  ;;  %6877 = vmatmul.mubr.bf16.gmra.mrb[72].mxu1 %v5267_v3  ;;  %v10997_v13 = vld [vmem:[%s17546_s9 + $0x108] sm:$0xff]   ;;  %v17900_v61 = vmov 0   ;;  %v11000_v10 = vld [vmem:[%s17546_s9 + $0x120] sm:$0xff]  }
 0x5a3   :  { %4803 = vst [vmem:[#allocation3 + $0x289] sm:$0xff] %v4653_v34  ;;  %4804 = vst [vmem:[#allocation3 + $0x291] sm:$0xff] %v4654_v16  ;;  %v17893_v34 = vld [vmem:[#allocation37_spill] sm:$0xff]  ;;  %v17894_v16 = vld [vmem:[#allocation36_spill] sm:$0xff]  ;;  %v5268_v0 = vpack.c.bf16 %v5206_v22, %v5205_v14  ;;  %v17901_v21 = vmax.f32 %v14929_v50, 0.0  ;;  %v17902_v29 = vmax.f32 %v14933_v8, 0.0 }
 0x5a4   :  { %4805 = vst [vmem:[#allocation3 + $0x2a1] sm:$0xff] %v4655_v17  ;;  %4806 = vst [vmem:[#allocation3 + $0x2a9] sm:$0xff] %v4656_v23  ;;  %v17895_v17 = vpack.c.bf16 %v17893_v34, %v17894_v16  ;;  %v5016_v23 = vpack.c.bf16 %v17897_v36, %v17896_v51  ;;  %6884 = vmatprep.mubr.bf16.mxu1 %v15267_v42  ;;  %v17904_v33 = vmax.f32 %v14941_v46, 0.0  ;;  %v17905_v47 = vmax.f32 %v14945_v57, 0.0  ;;  %v5210_v1 = vld [vmem:[#allocation3 + $0x68] sm:$0xff]  ;;  %v5082_v62 = vld [vmem:[#allocation3 + $0x52] sm:$0xff] }
 0x5a5   :  { %4807 = vst [vmem:[#allocation3 + $0x2b9] sm:$0xff] %v4657_v7  ;;  %4808 = vst [vmem:[#allocation3 + $0x2c1] sm:$0xff] %v4658_v40  ;;  %v17899_v7 = vmax.f32 %v14925_v37, 0.0  ;;  %v15300_v60 = vpack.c.bf16 %v17902_v29, %v17901_v21  ;;  %v5207_v37 = vld [vmem:[#allocation3 + $0x48] sm:$0xff]  ;;  %v17907_v50 = vmax.f32 %v14953_v19, 0.0  ;;  %v17908_v8 = vmax.f32 %v14957_v39, 0.0 }
 0x5a6   :  { %4809 = vst [vmem:[#allocation3 + $0x2d1] sm:$0xff] %v4659_v20  ;;  %4810 = vst [vmem:[#allocation3 + $0x2d9] sm:$0xff] %v4660_v24  ;;  %7158 = vmatmul.mubr.bf16.vlgmr.msra.gmra.mrb[4].mxu0 %v17895_v17  ;;  %v5077_v20 = vld [vmem:[#allocation3 + $0x1a] sm:$0xff]  ;;  %v5078_v24 = vld [vmem:[#allocation3 + $0x22] sm:$0xff]  ;;  %v17910_v46 = vmax.f32 %v14965_v25, 0.0  ;;  %v17912_v57 = vmax.f32 %v14973_v54, 0.0 }
 0x5a7   :  { %4811 = vst [vmem:[#allocation3 + $0x2e9] sm:$0xff] %v4661_v53  ;;  %4812 = vst [vmem:[#allocation3 + $0x2f1] sm:$0xff] %v4662_v43  ;;  %7415 = vmatpush1.bf16.msra.mxu0 %v10996_v35  ;;  %v15293_v40 = vpack.c.bf16 %v17899_v7, %v17898_v38  ;;  %7165 = vmatprep.mubr.bf16.mxu0 %v5268_v0  ;;  %v17903_v53 = vmax.f32 %v14937_v44, 0.0  ;;  %v5208_v43 = vld [vmem:[#allocation3 + $0x50] sm:$0xff]  ;;  %v17909_v44 = vmax.f32 %v14961_v48, 0.0  ;;  %v17913_v39 = vmax.f32 %v14977_v2, 0.0 }
 0x5a8   :  { %4813 = vst [vmem:[#allocation3 + $0x301] sm:$0xff] %v4663_v4  ;;  %4814 = vst [vmem:[#allocation3 + $0x309] sm:$0xff] %v4664_v6  ;;  %7416 = vmatprep.subr.bf16.mxu0 %v17900_v61  ;;  %v17906_v4 = vmax.f32 %v14949_v59, 0.0  ;;  %v15318_v6 = vpack.c.bf16 %v17908_v8, %v17907_v50  ;;  %v15332_v41 = vpack.c.bf16 %v5078_v24, %v5077_v20  ;;  %v10998_v19 = vld [vmem:[%s17546_s9 + $0x110] sm:$0xff]   ;;  %v17914_v48 = vmax.f32 %v14981_v12, 0.0  ;;  %v10999_v2 = vld [vmem:[%s17546_s9 + $0x118] sm:$0xff]  }
 0x5a9   :  { %4815 = vst [vmem:[#allocation3 + $0x319] sm:$0xff] %v4665_v11  ;;  %4817 = vst [vmem:[#allocation3 + $0x331] sm:$0xff] %v4667_v26  ;;  %v15306_v28 = vpack.c.bf16 %v17904_v33, %v17903_v53  ;;  %v15324_v31 = vpack.c.bf16 %v17910_v46, %v17909_v44  ;;  %v17911_v11 = vmax.f32 %v14969_v32, 0.0  ;;  %v17915_v32 = vmax.f32 %v14985_v5, 0.0  ;;  %v5079_v12 = vld [vmem:[#allocation3 + $0x32] sm:$0xff]  ;;  %v5080_v5 = vld [vmem:[#allocation3 + $0x3a] sm:$0xff] }
 0x5aa   :  { %4818 = vst [vmem:[#allocation3 + $0x339] sm:$0xff] %v4668_v56  ;;  %v15312_v9 = vpack.c.bf16 %v17906_v4, %v17905_v47  ;;  %v15342_v25 = vpack.c.bf16 %v17914_v48, %v17913_v39  ;;  %v17916_v54 = vmax.f32 %v14989_v18, 0.0  ;;  %v17917_v56 = vld [vmem:[#allocation19_spill] sm:$0xff]  ;;  %v17919_v30 = vmax.f32 %v14997_v49, 0.0  ;;  %6885 = vmatmul.mubr.bf16.gmra.mrb[76].mxu1 %v5268_v0  ;;  %v5209_v18 = vld [vmem:[#allocation3 + $0x60] sm:$0xff]  ;;  %v11001_v22 = vld [vmem:[%s17546_s9 + $0x128] sm:$0xff]  }
 0x5ab   :  { %7417 = vmatpush1.bf16.msra.mxu0 %v10997_v13  ;;  %v15330_v59 = vpack.c.bf16 %v17912_v57, %v17911_v11  ;;  %v17918_v63 = vmax.f32 %v17917_v56, 0.0  ;;  %v5269_v35 = vpack.c.bf16 %v5208_v43, %v5207_v37  ;;  %6892 = vmatprep.mubr.bf16.mxu1 %v5014_v55  ;;  %v15361_v49 = vpack.c.bf16 %v5080_v5, %v5079_v12  ;;  %v5081_v52 = vld [vmem:[#allocation3 + $0x4a] sm:$0xff]  ;;  %v5211_v55 = vld [vmem:[#allocation3 + $0x78] sm:$0xff]  ;;  %v5212_v45 = vld [vmem:[#allocation3 + $0x80] sm:$0xff] }
 0x5ac   :  { %7418 = vmatprep.subr.bf16.mxu0 %v17900_v61  ;;  %v15348_v26 = vpack.c.bf16 %v17916_v54, %v17915_v32  ;;  %v5270_v14 = vpack.c.bf16 %v5210_v1, %v5209_v18  ;;  %v15372_v58 = vpack.c.bf16 %v5082_v62, %v5081_v52  ;;  %v11002_v34 = vld [vmem:[%s17546_s9 + $0x130] sm:$0xff]   ;;  %v11003_v16 = vld [vmem:[%s17546_s9 + $0x138] sm:$0xff]   ;;  %v5083_v17 = vld [vmem:[#allocation3 + $0x62] sm:$0xff] }
 0x5ad   :  { %v15354_v3 = vpack.c.bf16 %v17919_v30, %v17918_v63  ;;  %v5084_v0 = vld [vmem:[#allocation3 + $0x6a] sm:$0xff]  ;;  %v5214_v36 = vld [vmem:[#allocation3 + $0x98] sm:$0xff]  ;;  %v11004_v38 = vld [vmem:[%s17546_s9 + $0x140] sm:$0xff]  }
 0x5ae   :  { %7166 = vmatmul.mubr.bf16.gmra.mrb[8].mxu0 %v15332_v41  ;;  %v5213_v51 = vld [vmem:[#allocation3 + $0x90] sm:$0xff]  ;;  %v15383_v13 = vpack.c.bf16 %v5084_v0, %v5083_v17  ;;  %v11005_v7 = vld [vmem:[%s17546_s9 + $0x148] sm:$0xff]   ;;  %v5085_v21 = vld [vmem:[#allocation3 + $0x7a] sm:$0xff] }
 0x5af   :  { %7173 = vmatprep.mubr.bf16.mxu0 %v5269_v35  ;;  %7419 = vmatpush1.bf16.msra.mxu0 %v10998_v19  ;;  %v5086_v29 = vld [vmem:[#allocation3 + $0x82] sm:$0xff]  ;;  %v5216_v24 = vld [vmem:[#allocation3 + $0xb0] sm:$0xff]  ;;  %v11007_v37 = vld [vmem:[%s17546_s9 + $0x158] sm:$0xff]  }
 0x5b0   :  { %7420 = vmatprep.subr.bf16.mxu0 %v17900_v61  ;;  %v5215_v20 = vld [vmem:[#allocation3 + $0xa8] sm:$0xff]  ;;  %v15395_v53 = vpack.c.bf16 %v5086_v29, %v5085_v21  ;;  %v11006_v33 = vld [vmem:[%s17546_s9 + $0x150] sm:$0xff]   ;;  %v5088_v47 = vld [vmem:[#allocation3 + $0x9a] sm:$0xff] }
 0x5b1   :  { %v5087_v43 = vld [vmem:[#allocation3 + $0x92] sm:$0xff]  ;;  %v5217_v4 = vld [vmem:[#allocation3 + $0xc0] sm:$0xff]  ;;  %v5218_v50 = vld [vmem:[#allocation3 + $0xc8] sm:$0xff] }
 0x5b2   :  { %6893 = vmatmul.mubr.bf16.gmra.mrb[80].mxu1 %v5269_v35  ;;  %v15407_v8 = vpack.c.bf16 %v5088_v47, %v5087_v43  ;;  %v11008_v44 = vld [vmem:[%s17546_s9 + $0x160] sm:$0xff]   ;;  %v11009_v46 = vld [vmem:[%s17546_s9 + $0x168] sm:$0xff]   ;;  %v5090_v57 = vld [vmem:[#allocation3 + $0xb2] sm:$0xff] }
 0x5b3   :  { %7421 = vmatpush1.bf16.msra.mxu0 %v10999_v2  ;;  %6900 = vmatprep.mubr.bf16.mxu1 %v5015_v27  ;;  %v5271_v27 = vpack.c.bf16 %v5212_v45, %v5211_v55  ;;  %v5089_v11 = vld [vmem:[#allocation3 + $0xaa] sm:$0xff]  ;;  %v5219_v19 = vld [vmem:[#allocation3 + $0xd8] sm:$0xff]  ;;  %v5220_v39 = vld [vmem:[#allocation3 + $0xe0] sm:$0xff] }
 0x5b4   :  { %7422 = vmatprep.subr.bf16.mxu0 %v17900_v61  ;;  %v15419_v48 = vpack.c.bf16 %v5090_v57, %v5089_v11  ;;  %v11010_v32 = vld [vmem:[%s17546_s9 + $0x170] sm:$0xff]   ;;  %v11011_v54 = vld [vmem:[%s17546_s9 + $0x178] sm:$0xff]   ;;  %v5091_v56 = vld [vmem:[#allocation3 + $0xc2] sm:$0xff] }
 0x5b5   :  { %v5092_v63 = vld [vmem:[#allocation3 + $0xca] sm:$0xff]  ;;  %v5222_v35 = vld [vmem:[#allocation3 + $0xf8] sm:$0xff]  ;;  %v5094_v5 = vld [vmem:[#allocation3 + $0xe2] sm:$0xff] }
 0x5b6   :  { %7174 = vmatmul.mubr.bf16.gmra.mrb[12].mxu0 %v15361_v49  ;;  %v5221_v30 = vld [vmem:[#allocation3 + $0xf0] sm:$0xff]  ;;  %v15431_v2 = vpack.c.bf16 %v5092_v63, %v5091_v56  ;;  %v5223_v18 = vld [vmem:[#allocation3 + $0x108] sm:$0xff]  ;;  %v5096_v52 = vld [vmem:[#allocation3 + $0xfa] sm:$0xff] }
 0x5b7   :  { %7181 = vmatprep.mubr.bf16.mxu0 %v5270_v14  ;;  %7423 = vmatpush1.bf16.msra.mxu0 %v11000_v10  ;;  %v5276_v12 = vpack.c.bf16 %v5222_v35, %v5221_v30  ;;  %v5224_v1 = vld [vmem:[#allocation3 + $0x110] sm:$0xff]  ;;  %v5225_v62 = vld [vmem:[#allocation3 + $0x120] sm:$0xff]  ;;  %v5226_v55 = vld [vmem:[#allocation3 + $0x128] sm:$0xff] }
 0x5b8   :  { %7424 = vmatprep.subr.bf16.mxu0 %v17900_v61  ;;  %v4846_v17 = vld [vmem:[#allocation3 + $0x140] sm:$0xff]  ;;  %v11015_v21 = vld [vmem:[%s17546_s9 + $0x198] sm:$0xff]   ;;  %v4851_v43 = vld [vmem:[#allocation3 + $0x1b0] sm:$0xff] }
 0x5b9   :  { %v11012_v0 = vld [vmem:[%s17546_s9 + $0x180] sm:$0xff]   ;;  %v11017_v47 = vld [vmem:[%s17546_s9 + $0x1a8] sm:$0xff]   ;;  %v4982_v11 = vld [vmem:[#allocation3 + $0x1d1] sm:$0xff] }
 0x5ba   :  { %6901 = vmatmul.mubr.bf16.gmra.mrb[84].mxu1 %v5270_v14  ;;  %v5277_v14 = vpack.c.bf16 %v5224_v1, %v5223_v18  ;;  %v5340_v56 = vld [vmem:[#allocation3 + $0x81] sm:$0xff]  ;;  %v4984_v30 = vld [vmem:[#allocation3 + $0x1e9] sm:$0xff] }
 0x5bb   :  { %7425 = vmatpush1.bf16.msra.mxu0 %v11001_v22  ;;  %6908 = vmatprep.mubr.bf16.mxu1 %v5016_v23  ;;  %v5272_v23 = vpack.c.bf16 %v5214_v36, %v5213_v51  ;;  %v5095_v22 = vld [vmem:[#allocation3 + $0xf2] sm:$0xff]  ;;  %v4983_v63 = vld [vmem:[#allocation3 + $0x1e1] sm:$0xff] }
 0x5bc   :  { %7426 = vmatprep.subr.bf16.mxu0 %v17900_v61  ;;  %v15440_v45 = vpack.c.bf16 %v5096_v52, %v5095_v22  ;;  %v11021_v18 = vld [vmem:[%s17546_s9 + $0x1c8] sm:$0xff]   ;;  %v5342_v22 = vld [vmem:[#allocation3 + $0x99] sm:$0xff] }
 0x5bd   :  { %v4856_v1 = vld [vmem:[#allocation3 + $0x1e8] sm:$0xff]  ;;  %v4985_v52 = vld [vmem:[#allocation3 + $0x1f9] sm:$0xff] }
 0x5be   :  { %7182 = vmatmul.mubr.bf16.gmra.mrb[16].mxu0 %v15372_v58 }
 0x5bf   :  { %7189 = vmatprep.mubr.bf16.mxu0 %v5271_v27  ;;  %7427 = vmatpush1.bf16.msra.mxu0 %v11002_v34  ;;  %v5097_v34 = vld [vmem:[#allocation3 + $0x10a] sm:$0xff] }
 0x5c0   :  { %7428 = vmatprep.subr.bf16.mxu0 %v17900_v61 }
 0x5c2   :  { %6909 = vmatmul.mubr.bf16.gmra.mrb[88].mxu1 %v5271_v27  ;;  %v5098_v27 = vld [vmem:[#allocation3 + $0x112] sm:$0xff] }
 0x5c3   :  { %7429 = vmatpush1.bf16.msra.mxu0 %v11003_v16  ;;  %6916 = vmatprep.mubr.bf16.mxu1 %v15293_v40  ;;  %v5273_v40 = vpack.c.bf16 %v5216_v24, %v5215_v20  ;;  %v15444_v16 = vpack.c.bf16 %v5098_v27, %v5097_v34  ;;  %v4850_v20 = vld [vmem:[#allocation3 + $0x170] sm:$0xff]  ;;  %v4857_v27 = vld [vmem:[#allocation3 + $0x1f8] sm:$0xff] }
 0x5c4   :  { %7430 = vmatprep.subr.bf16.mxu0 %v17900_v61  ;;  %v5335_v24 = vld [vmem:[#allocation3 + $0x49] sm:$0xff] }
 0x5c6   :  { %7190 = vmatmul.mubr.bf16.gmra.mrb[20].mxu0 %v15383_v13 }
 0x5c7   :  { %7197 = vmatprep.mubr.bf16.mxu0 %v5272_v23  ;;  %7431 = vmatpush1.bf16.msra.mxu0 %v11004_v38 }
 0x5c8   :  { %7432 = vmatprep.subr.bf16.mxu0 %v17900_v61 }
 0x5ca   :  { %6917 = vmatmul.mubr.bf16.gmra.mrb[92].mxu1 %v5272_v23  ;;  %v4849_v23 = vld [vmem:[#allocation3 + $0x168] sm:$0xff] }
 0x5cb   :  { %7433 = vmatpush1.bf16.msra.mxu0 %v11005_v7  ;;  %6924 = vmatprep.mubr.bf16.mxu1 %v15300_v60  ;;  %v5274_v60 = vpack.c.bf16 %v5218_v50, %v5217_v4  ;;  %v4980_v7 = vld [vmem:[#allocation3 + $0x1b9] sm:$0xff]  ;;  %v5337_v4 = vld [vmem:[#allocation3 + $0x61] sm:$0xff]  ;;  %v5338_v50 = vld [vmem:[#allocation3 + $0x69] sm:$0xff] }
 0x5cc   :  { %7434 = vmatprep.subr.bf16.mxu0 %v17900_v61  ;;  %v5398_v57 = vpack.c.bf16 %v5338_v50, %v5337_v4  ;;  %v4992_v4 = vld [vmem:[#allocation3 + $0x249] sm:$0xff] }
 0x5ce   :  { %7198 = vmatmul.mubr.bf16.gmra.mrb[24].mxu0 %v15395_v53 }
 0x5cf   :  { %7205 = vmatprep.mubr.bf16.mxu0 %v5273_v40  ;;  %7435 = vmatpush1.bf16.msra.mxu0 %v11006_v33 }
 0x5d0   :  { %7436 = vmatprep.subr.bf16.mxu0 %v17900_v61 }
 0x5d2   :  { %6925 = vmatmul.mubr.bf16.gmra.mrb[96].mxu1 %v5273_v40  ;;  %v15480_v40 = vpack.c.bf16 %v4850_v20, %v4849_v23  ;;  %v4860_v23 = vld [vmem:[#allocation3 + $0x218] sm:$0xff]  ;;  %v4989_v20 = vld [vmem:[#allocation3 + $0x229] sm:$0xff] }
 0x5d3   :  { %7437 = vmatpush1.bf16.msra.mxu0 %v11007_v37  ;;  %6932 = vmatprep.mubr.bf16.mxu1 %v15306_v28  ;;  %v5275_v28 = vpack.c.bf16 %v5220_v39, %v5219_v19  ;;  %v11016_v37 = vld [vmem:[%s17546_s9 + $0x1a0] sm:$0xff]   ;;  %v4853_v39 = vld [vmem:[#allocation3 + $0x1c8] sm:$0xff] }
 0x5d4   :  { %7438 = vmatprep.subr.bf16.mxu0 %v17900_v61 }
 0x5d6   :  { %7206 = vmatmul.mubr.bf16.gmra.mrb[28].mxu0 %v15407_v8 }
 0x5d7   :  { %7213 = vmatprep.mubr.bf16.mxu0 %v5274_v60  ;;  %7439 = vmatpush1.bf16.msra.mxu0 %v11008_v44  ;;  %v11043_v44 = vld [vmem:[#allocation3 + $0x8] sm:$0xff] }
 0x5d8   :  { %7440 = vmatprep.subr.bf16.mxu0 %v17900_v61 }
 0x5da   :  { %6933 = vmatmul.mubr.bf16.gmra.mrb[100].mxu1 %v5274_v60  ;;  %v4899_v60 = vpack.c.bf16 %v11043_v44, %v4851_v43  ;;  %v5348_v43 = vld [vmem:[#allocation3 + $0xe1] sm:$0xff] }
 0x5db   :  { %7441 = vmatpush1.bf16.msra.mxu0 %v11009_v46  ;;  %6940 = vmatprep.mubr.bf16.mxu1 %v15312_v9  ;;  %v5093_v9 = vld [vmem:[#allocation3 + $0xda] sm:$0xff]  ;;  %v4981_v46 = vld [vmem:[#allocation3 + $0x1c9] sm:$0xff] }
 0x5dc   :  { %7442 = vmatprep.subr.bf16.mxu0 %v17900_v61  ;;  %v15436_v10 = vpack.c.bf16 %v5094_v5, %v5093_v9  ;;  %v15495_v19 = vpack.c.bf16 %v4982_v11, %v4981_v46  ;;  %v15509_v9 = vpack.c.bf16 %v4984_v30, %v4983_v63  ;;  %v4855_v5 = vld [vmem:[#allocation3 + $0x1e0] sm:$0xff]  ;;  %v4864_v11 = vld [vmem:[#allocation3 + $0x248] sm:$0xff] }
 0x5dd   :  { %v11024_v46 = vld [vmem:[%s17546_s9 + $0x1e0] sm:$0xff]   ;;  %v5351_v30 = vld [vmem:[#allocation3 + $0x109] sm:$0xff] }
 0x5de   :  { %7214 = vmatmul.mubr.bf16.gmra.mrb[32].mxu0 %v15419_v48  ;;  %v4866_v63 = vld [vmem:[#allocation3 + $0x260] sm:$0xff] }
 0x5df   :  { %7221 = vmatprep.mubr.bf16.mxu0 %v5275_v28  ;;  %7443 = vmatpush1.bf16.msra.mxu0 %v11010_v32  ;;  %v11019_v32 = vld [vmem:[%s17546_s9 + $0x1b8] sm:$0xff]  }
 0x5e0   :  { %7444 = vmatprep.subr.bf16.mxu0 %v17900_v61 }
 0x5e2   :  { %6941 = vmatmul.mubr.bf16.gmra.mrb[104].mxu1 %v5275_v28  ;;  %v4854_v28 = vld [vmem:[#allocation3 + $0x1d0] sm:$0xff] }
 0x5e3   :  { %7445 = vmatpush1.bf16.msra.mxu0 %v11011_v54  ;;  %6948 = vmatprep.mubr.bf16.mxu1 %v15318_v6  ;;  %v5278_v6 = vpack.c.bf16 %v5226_v55, %v5225_v62  ;;  %v5339_v54 = vld [vmem:[#allocation3 + $0x79] sm:$0xff]  ;;  %v15504_v35 = vpack.c.bf16 %v4854_v28, %v4853_v39  ;;  %v4986_v62 = vld [vmem:[#allocation3 + $0x201] sm:$0xff]  ;;  %v15519_v55 = vpack.c.bf16 %v4856_v1, %v4855_v5  ;;  %v5482_v1 = vld [vmem:[#allocation3 + $0x12a] sm:$0xff] }
 0x5e4   :  { %7703 = vmatprep.subr.bf16.mxu0 %v17900_v61  ;;  %v15524_v34 = vpack.c.bf16 %v4986_v62, %v4985_v52  ;;  %v4993_v39 = vld [vmem:[#allocation3 + $0x259] sm:$0xff] }
 0x5e5   :  { %v4996_v5 = vld [vmem:[#allocation3 + $0x279] sm:$0xff] }
 0x5e6   :  { %7222 = vmatmul.mubr.bf16.gmra.mrb[36].mxu0 %v15431_v2 }
 0x5e7   :  { %7229 = vmatprep.mubr.bf16.mxu0 %v5276_v12 }
 0x5ea   :  { %6949 = vmatmul.mubr.bf16.gmra.mrb[108].mxu1 %v5276_v12  ;;  %v5399_v12 = vpack.c.bf16 %v5340_v56, %v5339_v54 }
 0x5eb   :  { %6956 = vmatprep.mubr.bf16.mxu1 %v15324_v31  ;;  %v4845_v31 = vld [vmem:[#allocation3 + $0x138] sm:$0xff] }
 0x5ec   :  { %v15452_v51 = vpack.c.bf16 %v4846_v17, %v4845_v31  ;;  %v4858_v31 = vld [vmem:[#allocation3 + $0x200] sm:$0xff]  ;;  %v5343_v17 = vld [vmem:[#allocation3 + $0xa9] sm:$0xff] }
 0x5ee   :  { %7230 = vmatmul.mubr.bf16.gmra.mrb[40].mxu0 %v15436_v10 }
 0x5ef   :  { %7237 = vmatprep.mubr.bf16.mxu0 %v5277_v14 }
 0x5f2   :  { %6957 = vmatmul.mubr.bf16.gmra.mrb[112].mxu1 %v5277_v14  ;;  %v5341_v14 = vld [vmem:[#allocation3 + $0x91] sm:$0xff] }
 0x5f3   :  { %6964 = vmatprep.mubr.bf16.mxu1 %v15330_v59  ;;  %v11013_v59 = vld [vmem:[%s17546_s9 + $0x188] sm:$0xff]  }
 0x5f6   :  { %7238 = vmatmul.mubr.bf16.gmra.mrb[44].mxu0 %v15440_v45 }
 0x5f7   :  { %7245 = vmatprep.mubr.bf16.mxu0 %v5278_v6 }
 0x5fa   :  { %6965 = vmatmul.mubr.bf16.gmra.mrb[116].mxu1 %v5278_v6  ;;  %v5400_v6 = vpack.c.bf16 %v5342_v22, %v5341_v14 }
 0x5fb   :  { %6972 = vmatprep.mubr.bf16.mxu1 %v15342_v25  ;;  %v4848_v25 = vld [vmem:[#allocation3 + $0x158] sm:$0xff] }
 0x5fe   :  { %7246 = vmatmul.mubr.bf16.gmra.mrb[48].mxu0 %v15444_v16 }
 0x5ff   :  { %7446 = vmatprep.mubr.bf16.mxu0 %v15332_v41  ;;  %v4847_v41 = vld [vmem:[#allocation3 + $0x150] sm:$0xff] }
 0x600   :  { %v15462_v36 = vpack.c.bf16 %v4848_v25, %v4847_v41  ;;  %v4988_v41 = vld [vmem:[#allocation3 + $0x219] sm:$0xff]  ;;  %v15531_v25 = vpack.c.bf16 %v4858_v31, %v4857_v27  ;;  %v5353_v27 = vld [vmem:[#allocation3 + $0x121] sm:$0xff]  ;;  %v5354_v31 = vld [vmem:[#allocation3 + $0x129] sm:$0xff] }
 0x602   :  { %6973 = vmatmul.mubr.bf16.gmra.mrb[120].mxu1 %v15452_v51 }
 0x603   :  { %6980 = vmatprep.mubr.bf16.mxu1 %v15348_v26  ;;  %v15470_v26 = vpop.f32.mrb[68].mxu1 }
 0x604   :  { %v6872_v38 = vpop.f32.mrb[69].mxu1 }
 0x605   :  { %v15477_v29 = vpop.f32.mrb[70].mxu1  ;;  %v4859_v38 = vld [vmem:[#allocation3 + $0x210] sm:$0xff] }
 0x606   :  { %7447 = vmatmul.mubr.bf16.vlgmr.msra.gmra.mrb[4].mxu0 %v15258_v15  ;;  %v11014_v15 = vld [vmem:[%s17546_s9 + $0x190] sm:$0xff]   ;;  %v6875_v33 = vpop.f32.mrb[71].mxu1 }
 0x607   :  { %7704 = vmatpush1.bf16.msra.mxu0 %v11012_v0  ;;  %7454 = vmatprep.mubr.bf16.mxu0 %v15361_v49  ;;  %v4979_v49 = vld [vmem:[#allocation3 + $0x1b1] sm:$0xff] }
 0x608   :  { %7705 = vmatprep.subr.bf16.mxu0 %v17900_v61  ;;  %v5344_v0 = vld [vmem:[#allocation3 + $0xb1] sm:$0xff] }
 0x60a   :  { %6981 = vmatmul.mubr.bf16.gmra.mrb[124].mxu1 %v15462_v36 }
 0x60b   :  { %7706 = vmatpush1.bf16.msra.mxu0 %v11013_v59  ;;  %6988 = vmatprep.mubr.bf16.mxu1 %v15354_v3  ;;  %v5027_v3 = vpack.c.bf16 %v4980_v7, %v4979_v49  ;;  %v4987_v59 = vld [vmem:[#allocation3 + $0x211] sm:$0xff]  ;;  %v5345_v7 = vld [vmem:[#allocation3 + $0xc1] sm:$0xff] }
 0x60c   :  { %7707 = vmatprep.subr.bf16.mxu0 %v17900_v61  ;;  %v15533_v49 = vpack.c.bf16 %v4988_v41, %v4987_v59  ;;  %v5483_v59 = vld [vmem:[#allocation3 + $0x13a] sm:$0xff]  ;;  %v5484_v41 = vld [vmem:[#allocation3 + $0x142] sm:$0xff] }
 0x60e   :  { %7455 = vmatmul.mubr.bf16.gmra.mrb[8].mxu0 %v15267_v42  ;;  %v5336_v42 = vld [vmem:[#allocation3 + $0x51] sm:$0xff] }
 0x60f   :  { %7462 = vmatprep.mubr.bf16.mxu0 %v15372_v58  ;;  %7708 = vmatpush1.bf16.msra.mxu0 %v11014_v15  ;;  %v5397_v58 = vpack.c.bf16 %v5336_v42, %v5335_v24  ;;  %v5401_v15 = vpack.c.bf16 %v5344_v0, %v5343_v17  ;;  %v4990_v24 = vld [vmem:[#allocation3 + $0x231] sm:$0xff]  ;;  %v15542_v42 = vpack.c.bf16 %v4860_v23, %v4859_v38  ;;  %v4997_v17 = vld [vmem:[#allocation3 + $0x289] sm:$0xff] }
 0x610   :  { %7709 = vmatprep.subr.bf16.mxu0 %v17900_v61  ;;  %v4998_v0 = vld [vmem:[#allocation3 + $0x291] sm:$0xff]  ;;  %v15584_v23 = vpack.c.bf16 %v5484_v41, %v5483_v59 }
 0x611   :  { %v15582_v38 = vpack.c.bf16 %v4998_v0, %v4997_v17  ;;  %v11028_v41 = vld [vmem:[%s17546_s9 + $0x1f8] sm:$0xff]  }
 0x612   :  { %6989 = vmatmul.mubr.bf16.gmra.mrb[128].mxu1 %v15480_v40 }
 0x613   :  { %7710 = vmatpush1.bf16.msra.mxu0 %v11015_v21  ;;  %6996 = vmatprep.mubr.bf16.mxu1 %v5027_v3  ;;  %v5346_v21 = vld [vmem:[#allocation3 + $0xc9] sm:$0xff]  ;;  %v15544_v3 = vpack.c.bf16 %v4990_v24, %v4989_v20  ;;  %v5355_v24 = vld [vmem:[#allocation3 + $0x139] sm:$0xff] }
 0x614   :  { %7711 = vmatprep.subr.bf16.mxu0 %v17900_v61  ;;  %v5402_v33 = vpack.c.bf16 %v5346_v21, %v5345_v7  ;;  %v15592_v7 = vld [vmem:[%s17546_s9 + $0x200] sm:$0xff]   ;;  %v4869_v21 = vld [vmem:[#allocation3 + $0x288] sm:$0xff]  ;;  %v4870_v20 = vld [vmem:[#allocation3 + $0x290] sm:$0xff] }
 0x615   :  { %9215 = vmatprep.subr.bf16.mxu1 %v15592_v7 }
 0x616   :  { %7463 = vmatmul.mubr.bf16.gmra.mrb[12].mxu0 %v5397_v58  ;;  %v4862_v58 = vld [vmem:[#allocation3 + $0x230] sm:$0xff] }
 0x617   :  { %7470 = vmatprep.mubr.bf16.mxu0 %v15383_v13  ;;  %7712 = vmatpush1.bf16.msra.mxu0 %v11016_v37  ;;  %v11018_v13 = vld [vmem:[%s17546_s9 + $0x1b0] sm:$0xff]   ;;  %v5347_v37 = vld [vmem:[#allocation3 + $0xd9] sm:$0xff] }
 0x618   :  { %7713 = vmatprep.subr.bf16.mxu0 %v17900_v61  ;;  %v5403_v44 = vpack.c.bf16 %v5348_v43, %v5347_v37  ;;  %v5485_v37 = vld [vmem:[#allocation3 + $0x152] sm:$0xff]  ;;  %v5486_v43 = vld [vmem:[#allocation3 + $0x15a] sm:$0xff] }
 0x61a   :  { %6997 = vmatmul.mubr.bf16.gmra.mrb[132].mxu1 %v4899_v60 }
 0x61b   :  { %7714 = vmatpush1.bf16.msra.mxu0 %v11017_v47  ;;  %7004 = vmatprep.mubr.bf16.mxu1 %v15495_v19  ;;  %v4991_v47 = vld [vmem:[#allocation3 + $0x241] sm:$0xff] }
 0x61c   :  { %7715 = vmatprep.subr.bf16.mxu0 %v17900_v61  ;;  %v15551_v60 = vpack.c.bf16 %v4992_v4, %v4991_v47  ;;  %v15595_v47 = vpack.c.bf16 %v4870_v20, %v4869_v21  ;;  %v4876_v21 = vld [vmem:[#allocation3 + $0x2d8] sm:$0xff] }
 0x61e   :  { %7471 = vmatmul.mubr.bf16.gmra.mrb[16].mxu0 %v5398_v57  ;;  %v5349_v57 = vld [vmem:[#allocation3 + $0xf1] sm:$0xff] }
 0x61f   :  { %7478 = vmatprep.mubr.bf16.mxu0 %v15395_v53  ;;  %7716 = vmatpush1.bf16.msra.mxu0 %v11018_v13  ;;  %v11020_v53 = vld [vmem:[%s17546_s9 + $0x1c0] sm:$0xff]  }
 0x620   :  { %7717 = vmatprep.subr.bf16.mxu0 %v17900_v61  ;;  %v5350_v13 = vld [vmem:[#allocation3 + $0xf9] sm:$0xff] }
 0x621   :  { %v5404_v54 = vpack.c.bf16 %v5350_v13, %v5349_v57  ;;  %v4872_v57 = vld [vmem:[#allocation3 + $0x2a8] sm:$0xff]  ;;  %v5357_v13 = vld [vmem:[#allocation3 + $0x151] sm:$0xff] }
 0x622   :  { %7005 = vmatmul.mubr.bf16.gmra.mrb[136].mxu1 %v15504_v35 }
 0x623   :  { %7718 = vmatpush1.bf16.msra.mxu0 %v11019_v32  ;;  %7012 = vmatprep.mubr.bf16.mxu1 %v15509_v9  ;;  %v4994_v32 = vld [vmem:[#allocation3 + $0x261] sm:$0xff] }
 0x624   :  { %7719 = vmatprep.subr.bf16.mxu0 %v17900_v61  ;;  %v15562_v56 = vpack.c.bf16 %v4994_v32, %v4993_v39  ;;  %v5358_v39 = vld [vmem:[#allocation3 + $0x159] sm:$0xff] }
 0x625   :  { %v5001_v32 = vld [vmem:[#allocation3 + $0x2b9] sm:$0xff] }
 0x626   :  { %7479 = vmatmul.mubr.bf16.gmra.mrb[20].mxu0 %v5399_v12  ;;  %v5352_v12 = vld [vmem:[#allocation3 + $0x111] sm:$0xff] }
 0x627   :  { %7486 = vmatprep.mubr.bf16.mxu0 %v15407_v8  ;;  %7720 = vmatpush1.bf16.msra.mxu0 %v11020_v53  ;;  %v11022_v8 = vld [vmem:[%s17546_s9 + $0x1d0] sm:$0xff]   ;;  %v5405_v22 = vpack.c.bf16 %v5352_v12, %v5351_v30  ;;  %v5408_v12 = vpack.c.bf16 %v5358_v39, %v5357_v13 }
 0x628   :  { %7721 = vmatprep.subr.bf16.mxu0 %v17900_v61  ;;  %v4995_v53 = vld [vmem:[#allocation3 + $0x271] sm:$0xff] }
 0x629   :  { %v15569_v52 = vpack.c.bf16 %v4996_v5, %v4995_v53 }
 0x62a   :  { %7013 = vmatmul.mubr.bf16.gmra.mrb[140].mxu1 %v15519_v55 }
 0x62b   :  { %7722 = vmatpush1.bf16.msra.mxu0 %v11021_v18  ;;  %7020 = vmatprep.mubr.bf16.mxu1 %v15524_v34  ;;  %v5481_v18 = vld [vmem:[#allocation3 + $0x122] sm:$0xff] }
 0x62c   :  { %7723 = vmatprep.subr.bf16.mxu0 %v17900_v61  ;;  %v15571_v62 = vpack.c.bf16 %v5482_v1, %v5481_v18  ;;  %v4873_v18 = vld [vmem:[#allocation3 + $0x2b8] sm:$0xff]  ;;  %v4874_v1 = vld [vmem:[#allocation3 + $0x2c0] sm:$0xff] }
 0x62e   :  { %7487 = vmatmul.mubr.bf16.gmra.mrb[24].mxu0 %v5400_v6  ;;  %v4867_v6 = vld [vmem:[#allocation3 + $0x270] sm:$0xff] }
 0x62f   :  { %7494 = vmatprep.mubr.bf16.mxu0 %v15419_v48  ;;  %7724 = vmatpush1.bf16.msra.mxu0 %v11022_v8  ;;  %v11023_v48 = vld [vmem:[%s17546_s9 + $0x1d8] sm:$0xff]  }
 0x630   :  { %7725 = vmatprep.subr.bf16.mxu0 %v17900_v61  ;;  %v4868_v8 = vld [vmem:[#allocation3 + $0x278] sm:$0xff] }
 0x632   :  { %7021 = vmatmul.mubr.bf16.gmra.mrb[144].mxu1 %v15531_v25 }
 0x633   :  { %7028 = vmatprep.mubr.bf16.mxu1 %v15533_v49  ;;  %7726 = vmatpush1.bf16.msra.mxu0 %v11023_v48  ;;  %v5406_v48 = vpack.c.bf16 %v5354_v31, %v5353_v27  ;;  %v5490_v27 = vld [vmem:[#allocation3 + $0x18a] sm:$0xff]  ;;  %v15617_v31 = vpack.c.bf16 %v4874_v1, %v4873_v18 }
 0x634   :  { %7727 = vmatprep.subr.bf16.mxu0 %v17900_v61  ;;  %v5008_v1 = vld [vmem:[#allocation3 + $0x309] sm:$0xff] }
 0x636   :  { %7495 = vmatmul.mubr.bf16.gmra.mrb[28].mxu0 %v5401_v15  ;;  %v15580_v15 = vpack.c.bf16 %v4868_v8, %v4867_v6  ;;  %v5004_v6 = vld [vmem:[#allocation3 + $0x2d9] sm:$0xff]  ;;  %v5489_v8 = vld [vmem:[#allocation3 + $0x182] sm:$0xff] }
 0x637   :  { %7502 = vmatprep.mubr.bf16.mxu0 %v15431_v2  ;;  %v4861_v2 = vld [vmem:[#allocation3 + $0x228] sm:$0xff]  ;;  %7728 = vmatpush1.bf16.msra.mxu0 %v11024_v46  ;;  %v15599_v46 = vpack.c.bf16 %v5486_v43, %v5485_v37  ;;  %v5538_v59 = vpack.c.bf16 %v5490_v27, %v5489_v8  ;;  %v5006_v37 = vld [vmem:[#allocation3 + $0x2f1] sm:$0xff] }
 0x638   :  { %v15549_v50 = vpack.c.bf16 %v4862_v58, %v4861_v2  ;;  %7729 = vmatprep.subr.bf16.mxu0 %v17900_v61  ;;  %v4999_v2 = vld [vmem:[#allocation3 + $0x2a1] sm:$0xff]  ;;  %v5000_v58 = vld [vmem:[#allocation3 + $0x2a9] sm:$0xff] }
 0x639   :  { %v5491_v43 = vld [vmem:[#allocation3 + $0x1ca] sm:$0xff] }
 0x63a   :  { %7029 = vmatmul.mubr.bf16.gmra.mrb[148].mxu1 %v15542_v42 }
 0x63b   :  { %7036 = vmatprep.mubr.bf16.mxu1 %v15544_v3 }
 0x63e   :  { %7503 = vmatmul.mubr.bf16.gmra.mrb[32].mxu0 %v5402_v33  ;;  %v5356_v33 = vld [vmem:[#allocation3 + $0x141] sm:$0xff] }
 0x63f   :  { %7510 = vmatprep.mubr.bf16.mxu0 %v15436_v10  ;;  %v4863_v10 = vld [vmem:[#allocation3 + $0x240] sm:$0xff]  ;;  %v5407_v4 = vpack.c.bf16 %v5356_v33, %v5355_v24  ;;  %v5362_v33 = vld [vmem:[#allocation3 + $0x189] sm:$0xff] }
 0x640   :  { %v15560_v28 = vpack.c.bf16 %v4864_v11, %v4863_v10  ;;  %v11027_v10 = vld [vmem:[%s17546_s9 + $0x1f0] sm:$0xff]   ;;  %v4871_v11 = vld [vmem:[#allocation3 + $0x2a0] sm:$0xff] }
 0x641   :  { %v15608_v30 = vpack.c.bf16 %v4872_v57, %v4871_v11  ;;  %v5361_v24 = vld [vmem:[#allocation3 + $0x181] sm:$0xff] }
 0x642   :  { %7037 = vmatmul.mubr.bf16.gmra.mrb[152].mxu1 %v15549_v50  ;;  %v5410_v13 = vpack.c.bf16 %v5362_v33, %v5361_v24  ;;  %v5009_v33 = vld [vmem:[#allocation3 + $0x319] sm:$0xff] }
 0x643   :  { %7044 = vmatprep.mubr.bf16.mxu1 %v15551_v60 }
 0x646   :  { %7511 = vmatmul.mubr.bf16.gmra.mrb[36].mxu0 %v5403_v44  ;;  %v15597_v44 = vpack.c.bf16 %v5000_v58, %v4999_v2  ;;  %v5005_v2 = vld [vmem:[#allocation3 + $0x2e9] sm:$0xff] }
 0x647   :  { %7518 = vmatprep.mubr.bf16.mxu0 %v15440_v45  ;;  %v4865_v45 = vld [vmem:[#allocation3 + $0x258] sm:$0xff]  ;;  %v15632_v39 = vpack.c.bf16 %v5006_v37, %v5005_v2 }
 0x648   :  { %v15567_v14 = vpack.c.bf16 %v4866_v63, %v4865_v45  ;;  %v5487_v45 = vld [vmem:[#allocation3 + $0x16a] sm:$0xff]  ;;  %v5488_v63 = vld [vmem:[#allocation3 + $0x172] sm:$0xff]  ;;  %v5495_v2 = vld [vmem:[#allocation3 + $0x1fa] sm:$0xff] }
 0x649   :  { %v15612_v5 = vpack.c.bf16 %v5488_v63, %v5487_v45  ;;  %v4877_v45 = vld [vmem:[#allocation3 + $0x2e8] sm:$0xff]  ;;  %v4878_v63 = vld [vmem:[#allocation3 + $0x2f0] sm:$0xff] }
 0x64a   :  { %7045 = vmatmul.mubr.bf16.gmra.mrb[156].mxu1 %v15560_v28  ;;  %v15643_v8 = vpack.c.bf16 %v4878_v63, %v4877_v45  ;;  %v4881_v45 = vld [vmem:[#allocation3 + $0x318] sm:$0xff]  ;;  %v4882_v63 = vld [vmem:[#allocation3 + $0x320] sm:$0xff] }
 0x64b   :  { %7052 = vmatprep.mubr.bf16.mxu1 %v15562_v56 }
 0x64e   :  { %7519 = vmatmul.mubr.bf16.gmra.mrb[40].mxu0 %v5404_v54  ;;  %v5002_v54 = vld [vmem:[#allocation3 + $0x2c1] sm:$0xff] }
 0x64f   :  { %7526 = vmatprep.mubr.bf16.mxu0 %v15444_v16  ;;  %v11025_v16 = vld [vmem:[%s17546_s9 + $0x1e8] sm:$0xff]   ;;  %v15610_v53 = vpack.c.bf16 %v5002_v54, %v5001_v32 }
 0x650   :  { %7730 = vmatpush1.bf16.msra.mxu0 %v11025_v16  ;;  %v5003_v16 = vld [vmem:[#allocation3 + $0x2d1] sm:$0xff] }
 0x651   :  { %7731 = vmatprep.subr.bf16.mxu0 %v17900_v61  ;;  %v15619_v0 = vpack.c.bf16 %v5004_v6, %v5003_v16 }
 0x652   :  { %7053 = vmatmul.mubr.bf16.gmra.mrb[160].mxu1 %v15567_v14 }
 0x653   :  { %7060 = vmatprep.mubr.bf16.mxu1 %v15569_v52 }
 0x654   :  { %7732 = vmatpush1.bf16.msra.mxu0 %v11027_v10 }
 0x655   :  { %7733 = vmatprep.subr.bf16.mxu0 %v17900_v61  ;;  %v5359_v61 = vld [vmem:[#allocation3 + $0x169] sm:$0xff] }
 0x656   :  { %7527 = vmatmul.mubr.bf16.gmra.mrb[44].mxu0 %v5405_v22  ;;  %v5360_v22 = vld [vmem:[#allocation3 + $0x171] sm:$0xff] }
 0x657   :  { %7534 = vmatprep.mubr.bf16.mxu0 %v15571_v62  ;;  %v5409_v17 = vpack.c.bf16 %v5360_v22, %v5359_v61  ;;  %v5493_v61 = vld [vmem:[#allocation3 + $0x1e2] sm:$0xff]  ;;  %v5494_v22 = vld [vmem:[#allocation3 + $0x1ea] sm:$0xff] }
 0x658   :  { %7734 = vmatpush1.bf16.msra.mxu0 %v11028_v41  ;;  %v4879_v41 = vld [vmem:[#allocation3 + $0x300] sm:$0xff] }
 0x65a   :  { %7061 = vmatmul.mubr.bf16.gmra.mrb[164].mxu1 %v15580_v15 }
 0x65b   :  { %7068 = vmatprep.mubr.bf16.mxu1 %v15582_v38 }
 0x65e   :  { %7535 = vmatmul.mubr.bf16.gmra.mrb[48].mxu0 %v5406_v48  ;;  %v4875_v48 = vld [vmem:[#allocation3 + $0x2d0] sm:$0xff] }
 0x65f   :  { %7542 = vmatprep.mubr.bf16.mxu0 %v15584_v23  ;;  %v15630_v57 = vpack.c.bf16 %v4876_v21, %v4875_v48  ;;  %v4880_v48 = vld [vmem:[#allocation3 + $0x308] sm:$0xff] }
 0x660   :  { %v5010_v21 = vld [vmem:[#allocation3 + $0x321] sm:$0xff] }
 0x662   :  { %7069 = vmatmul.mubr.bf16.gmra.mrb[168].mxu1 %v15595_v47 }
 0x663   :  { %7076 = vmatprep.mubr.bf16.mxu1 %v15597_v44 }
 0x666   :  { %7543 = vmatmul.mubr.bf16.gmra.mrb[52].mxu0 %v5407_v4  ;;  %v5492_v4 = vld [vmem:[#allocation3 + $0x1d2] sm:$0xff] }
 0x667   :  { %7550 = vmatprep.mubr.bf16.mxu0 %v15599_v46  ;;  %v15634_v32 = vpack.c.bf16 %v5492_v4, %v5491_v43  ;;  %v15657_v4 = vpack.c.bf16 %v4880_v48, %v4879_v41 }
 0x66a   :  { %7077 = vmatmul.mubr.bf16.gmra.mrb[172].mxu1 %v15608_v30 }
 0x66b   :  { %7084 = vmatprep.mubr.bf16.mxu1 %v15610_v53 }
 0x66e   :  { %7551 = vmatmul.mubr.bf16.gmra.mrb[56].mxu0 %v5408_v12  ;;  %v5007_v12 = vld [vmem:[#allocation3 + $0x301] sm:$0xff] }
 0x66f   :  { %7558 = vmatprep.mubr.bf16.mxu0 %v15612_v5  ;;  %v15645_v27 = vpack.c.bf16 %v5008_v1, %v5007_v12  ;;  %v5498_v1 = vld [vmem:[#allocation3 + $0x21a] sm:$0xff] }
 0x672   :  { %7085 = vmatmul.mubr.bf16.gmra.mrb[176].mxu1 %v15617_v31 }
 0x673   :  { %7092 = vmatprep.mubr.bf16.mxu1 %v15619_v0 }
 0x675   :  { %v15626_v20 = vpop.f32.mrb[72].mxu1 }
 0x676   :  { %7559 = vmatmul.mubr.bf16.gmra.mrb[60].mxu0 %v5409_v17  ;;  %v6880_v58 = vpop.f32.mrb[73].mxu1  ;;  %v15647_v17 = vpack.c.bf16 %v5494_v22, %v5493_v61 }
 0x677   :  { %7566 = vmatprep.mubr.bf16.mxu0 %v5538_v59  ;;  %v15628_v10 = vpop.f32.mrb[74].mxu1  ;;  %v5496_v58 = vld [vmem:[#allocation3 + $0x202] sm:$0xff] }
 0x678   :  { %v6883_v11 = vpop.f32.mrb[75].mxu1 }
 0x679   :  { %v15659_v11 = vpack.c.bf16 %v5010_v21, %v5009_v33  ;;  %v5499_v21 = vld [vmem:[#allocation3 + $0x22a] sm:$0xff] }
 0x67a   :  { %7093 = vmatmul.mubr.bf16.gmra.mrb[180].mxu1 %v15630_v57 }
 0x67b   :  { %7100 = vmatprep.mubr.bf16.mxu1 %v15632_v39 }
 0x67d   :  { %v15639_v54 = vpop.f32.mrb[76].mxu1 }
 0x67e   :  { %7567 = vmatmul.mubr.bf16.gmra.mrb[64].mxu0 %v5410_v13  ;;  %v6888_v18 = vpop.f32.mrb[77].mxu1 }
 0x67f   :  { %7574 = vmatprep.mubr.bf16.mxu0 %v15634_v32  ;;  %v15641_v16 = vpop.f32.mrb[78].mxu1  ;;  %v5497_v18 = vld [vmem:[#allocation3 + $0x212] sm:$0xff] }
 0x680   :  { %v6891_v6 = vpop.f32.mrb[79].mxu1  ;;  %v15673_v41 = vpack.c.bf16 %v5498_v1, %v5497_v18  ;;  %v5233_v1 = vld [vmem:[#allocation3 + $0x180] sm:$0xff] }
 0x681   :  { %v15671_v6 = vpack.c.bf16 %v4882_v63, %v4881_v45  ;;  %v5501_v63 = vld [vmem:[#allocation3 + $0x242] sm:$0xff] }
 0x682   :  { %7101 = vmatmul.mubr.bf16.gmra.mrb[184].mxu1 %v15643_v8 }
 0x683   :  { %7108 = vmatprep.mubr.bf16.mxu1 %v15645_v27 }
 0x685   :  { %v15653_v59 = vpop.f32.mrb[80].mxu1 }
 0x686   :  { %7575 = vmatmul.mubr.bf16.gmra.mrb[68].mxu0 %v15495_v19  ;;  %v6896_v24 = vpop.f32.mrb[81].mxu1  ;;  %v15661_v19 = vpack.c.bf16 %v5496_v58, %v5495_v2 }
 0x687   :  { %7582 = vmatprep.mubr.bf16.mxu0 %v15647_v17  ;;  %v15655_v37 = vpop.f32.mrb[82].mxu1  ;;  %v5500_v24 = vld [vmem:[#allocation3 + $0x232] sm:$0xff] }
 0x688   :  { %v6899_v43 = vpop.f32.mrb[83].mxu1  ;;  %v15683_v58 = vpack.c.bf16 %v5500_v24, %v5499_v21  ;;  %v5503_v21 = vld [vmem:[#allocation3 + $0x25a] sm:$0xff]  ;;  %v5504_v24 = vld [vmem:[#allocation3 + $0x262] sm:$0xff] }
 0x689   :  { %v11029_v43 = vld [vmem:[%s17546_s9 + $0x208] sm:$0xff]  }
 0x68a   :  { %7109 = vmatmul.mubr.bf16.gmra.mrb[188].mxu1 %v15657_v4 }
 0x68b   :  { %7116 = vmatprep.mubr.bf16.mxu1 %v15659_v11 }
 0x68d   :  { %v15667_v13 = vpop.f32.mrb[84].mxu1 }
 0x68e   :  { %7583 = vmatmul.mubr.bf16.gmra.mrb[72].mxu0 %v15509_v9  ;;  %v6904_v12 = vpop.f32.mrb[85].mxu1 }
 0x68f   :  { %7590 = vmatprep.mubr.bf16.mxu0 %v15661_v19  ;;  %v15669_v61 = vpop.f32.mrb[86].mxu1  ;;  %v5502_v12 = vld [vmem:[#allocation3 + $0x24a] sm:$0xff] }
 0x690   :  { %v6907_v22 = vpop.f32.mrb[87].mxu1 }
 0x692   :  { %7117 = vmatmul.mubr.bf16.gmra.mrb[192].mxu1 %v15671_v6 }
 0x693   :  { %7253 = vmatprep.mubr.bf16.mxu1 %v15452_v51 }
 0x695   :  { %v15679_v9 = vpop.f32.mrb[88].mxu1 }
 0x696   :  { %7591 = vmatmul.mubr.bf16.gmra.mrb[76].mxu0 %v15524_v34  ;;  %v6912_v48 = vpop.f32.mrb[89].mxu1  ;;  %v11030_v34 = vld [vmem:[%s17546_s9 + $0x210] sm:$0xff]  }
 0x697   :  { %7598 = vmatprep.mubr.bf16.mxu0 %v15673_v41  ;;  %v15681_v33 = vpop.f32.mrb[90].mxu1  ;;  %v5234_v48 = vld [vmem:[#allocation3 + $0x188] sm:$0xff] }
 0x698   :  { %v6915_v2 = vpop.f32.mrb[91].mxu1 }
 0x69a   :  { %7254 = vmatmul.mubr.bf16.vlgmr.msra.gmra.mrb[116].mxu1 %v15571_v62 }
 0x69b   :  { %7261 = vmatprep.mubr.bf16.mxu1 %v15462_v36  ;;  %9216 = vmatpush3.bf16.msra.mxu1 %v15592_v7  ;;  %v11031_v36 = vld [vmem:[%s17546_s9 + $0x218] sm:$0xff]  }
 0x69c   :  { %9217 = vmatprep.subr.bf16.mxu1 %v11029_v43 }
 0x69d   :  { %v15693_v51 = vpop.f32.mrb[92].mxu1 }
 0x69e   :  { %7599 = vmatmul.mubr.bf16.gmra.mrb[80].mxu0 %v15533_v49  ;;  %v6920_v45 = vpop.f32.mrb[93].mxu1  ;;  %v15700_v49 = vpack.c.bf16 %v5502_v12, %v5501_v63  ;;  %v5506_v12 = vld [vmem:[#allocation3 + $0x27a] sm:$0xff] }
 0x69f   :  { %7606 = vmatprep.mubr.bf16.mxu0 %v15683_v58  ;;  %v15698_v18 = vpop.f32.mrb[94].mxu1  ;;  %9218 = vmatpush3.bf16.msra.mxu1 %v11029_v43 }
 0x6a0   :  { %v6923_v62 = vpop.f32.mrb[95].mxu1  ;;  %9219 = vmatprep.subr.bf16.mxu1 %v11030_v34 }
 0x6a2   :  { %7262 = vmatmul.mubr.bf16.gmra.mrb[120].mxu1 %v15584_v23  ;;  %v15713_v23 = vpack.c.bf16 %v5234_v48, %v5233_v1  ;;  %v11034_v1 = vld [vmem:[%s17546_s9 + $0x230] sm:$0xff]   ;;  %v5108_v48 = vld [vmem:[#allocation3 + $0x1ba] sm:$0xff] }
 0x6a3   :  { %7269 = vmatprep.mubr.bf16.mxu1 %v15480_v40  ;;  %9220 = vmatpush3.bf16.msra.mxu1 %v11030_v34  ;;  %v11032_v40 = vld [vmem:[%s17546_s9 + $0x220] sm:$0xff]   ;;  %v11033_v34 = vld [vmem:[%s17546_s9 + $0x228] sm:$0xff]  }
 0x6a4   :  { %9221 = vmatprep.subr.bf16.mxu1 %v11031_v36 }
 0x6a5   :  { %v15709_v7 = vpop.f32.mrb[96].mxu1 }
 0x6a6   :  { %7607 = vmatmul.mubr.bf16.gmra.mrb[84].mxu0 %v15544_v3  ;;  %v6928_v22 = vpop.f32.mrb[97].mxu1  ;;  %v15715_v3 = vpack.c.bf16 %v5504_v24, %v5503_v21  ;;  %v11035_v21 = vld [vmem:[%s17546_s9 + $0x238] sm:$0xff]  }
 0x6a7   :  { %7614 = vmatprep.mubr.bf16.mxu0 %v15700_v49  ;;  %v15711_v2 = vpop.f32.mrb[98].mxu1  ;;  %9222 = vmatpush3.bf16.msra.mxu1 %v11031_v36  ;;  %v5107_v22 = vld [vmem:[#allocation3 + $0x1b2] sm:$0xff] }
 0x6a8   :  { %v6931_v43 = vpop.f32.mrb[99].mxu1  ;;  %9223 = vmatprep.subr.bf16.mxu1 %v11032_v40 }
 0x6a9   :  { %v5507_v43 = vld [vmem:[#allocation3 + $0x28a] sm:$0xff] }
 0x6aa   :  { %7270 = vmatmul.mubr.bf16.gmra.mrb[124].mxu1 %v15599_v46  ;;  %v5505_v46 = vld [vmem:[#allocation3 + $0x272] sm:$0xff] }
 0x6ab   :  { %7277 = vmatprep.mubr.bf16.mxu1 %v15713_v23  ;;  %9224 = vmatpush3.bf16.msra.mxu1 %v11032_v40  ;;  %v15731_v36 = vpack.c.bf16 %v5506_v12, %v5505_v46  ;;  %v5508_v40 = vld [vmem:[#allocation3 + $0x292] sm:$0xff] }
 0x6ac   :  { %9225 = vmatprep.subr.bf16.mxu1 %v11033_v34 }
 0x6ad   :  { %v15727_v45 = vpop.f32.mrb[100].mxu1 }
 0x6ae   :  { %7615 = vmatmul.mubr.bf16.gmra.mrb[88].mxu0 %v15551_v60  ;;  %v6936_v63 = vpop.f32.mrb[101].mxu1 }
 0x6af   :  { %7622 = vmatprep.mubr.bf16.mxu0 %v15715_v3  ;;  %v15729_v60 = vpop.f32.mrb[102].mxu1  ;;  %9226 = vmatpush3.bf16.msra.mxu1 %v11033_v34  ;;  %v15747_v63 = vpack.c.bf16 %v5508_v40, %v5507_v43 }
 0x6b0   :  { %v6939_v62 = vpop.f32.mrb[103].mxu1  ;;  %9227 = vmatprep.subr.bf16.mxu1 %v11034_v1 }
 0x6b1   :  { %v5509_v62 = vld [vmem:[#allocation3 + $0x2a2] sm:$0xff] }
 0x6b2   :  { %7278 = vmatmul.mubr.bf16.gmra.mrb[128].mxu1 %v15612_v5 }
 0x6b3   :  { %7285 = vmatprep.mubr.bf16.mxu1 %v15504_v35  ;;  %9228 = vmatpush3.bf16.msra.mxu1 %v11034_v1  ;;  %v5510_v1 = vld [vmem:[#allocation3 + $0x2aa] sm:$0xff] }
 0x6b4   :  { %9229 = vmatprep.subr.bf16.mxu1 %v11035_v21 }
 0x6b5   :  { %v15743_v24 = vpop.f32.mrb[104].mxu1 }
 0x6b6   :  { %7623 = vmatmul.mubr.bf16.gmra.mrb[92].mxu0 %v15562_v56  ;;  %v6944_v5 = vpop.f32.mrb[105].mxu1  ;;  %v5155_v56 = vpack.c.bf16 %v5108_v48, %v5107_v22 }
 0x6b7   :  { %7630 = vmatprep.mubr.bf16.mxu0 %v15731_v36  ;;  %v15745_v34 = vpop.f32.mrb[106].mxu1  ;;  %9230 = vmatpush3.bf16.msra.mxu1 %v11035_v21  ;;  %v15756_v5 = vpack.c.bf16 %v5510_v1, %v5509_v62  ;;  %v5511_v21 = vld [vmem:[#allocation3 + $0x2ba] sm:$0xff] }
 0x6b8   :  { %v6947_v35 = vpop.f32.mrb[107].mxu1 }
 0x6ba   :  { %7286 = vmatmul.mubr.bf16.gmra.mrb[132].mxu1 %v5155_v56  ;;  %v5512_v56 = vld [vmem:[#allocation3 + $0x2c2] sm:$0xff] }
 0x6bb   :  { %7293 = vmatprep.mubr.bf16.mxu1 %v15519_v55  ;;  %v15766_v35 = vpack.c.bf16 %v5512_v56, %v5511_v21  ;;  %v5590_v56 = vld [vmem:[#allocation3 + $0x48] sm:$0xff] }
 0x6bd   :  { %v15752_v46 = vpop.f32.mrb[108].mxu1 }
 0x6be   :  { %7631 = vmatmul.mubr.bf16.gmra.mrb[96].mxu0 %v15569_v52  ;;  %v6952_v12 = vpop.f32.mrb[109].mxu1 }
 0x6bf   :  { %7638 = vmatprep.mubr.bf16.mxu0 %v15747_v63  ;;  %v15754_v22 = vpop.f32.mrb[110].mxu1  ;;  %v5515_v12 = vld [vmem:[#allocation3 + $0x2ea] sm:$0xff] }
 0x6c0   :  { %v6955_v48 = vpop.f32.mrb[111].mxu1 }
 0x6c1   :  { %v5588_v48 = vld [vmem:[#allocation3 + $0x30] sm:$0xff] }
 0x6c2   :  { %7294 = vmatmul.mubr.bf16.gmra.mrb[136].mxu1 %v15634_v32 }
 0x6c3   :  { %7301 = vmatprep.mubr.bf16.mxu1 %v15531_v25  ;;  %v5513_v25 = vld [vmem:[#allocation3 + $0x2d2] sm:$0xff] }
 0x6c5   :  { %v15762_v55 = vpop.f32.mrb[112].mxu1 }
 0x6c6   :  { %7639 = vmatmul.mubr.bf16.gmra.mrb[100].mxu0 %v15582_v38  ;;  %v6960_v52 = vpop.f32.mrb[113].mxu1  ;;  %v5514_v38 = vld [vmem:[#allocation3 + $0x2da] sm:$0xff] }
 0x6c7   :  { %7646 = vmatprep.mubr.bf16.mxu0 %v15756_v5  ;;  %v15764_v43 = vpop.f32.mrb[114].mxu1  ;;  %v15772_v32 = vpack.c.bf16 %v5514_v38, %v5513_v25  ;;  %v5718_v52 = vld [vmem:[#allocation3 + $0x49] sm:$0xff]  ;;  %v5720_v25 = vld [vmem:[#allocation3 + $0x61] sm:$0xff] }
 0x6c8   :  { %v6963_v40 = vpop.f32.mrb[115].mxu1 }
 0x6c9   :  { %v5591_v40 = vld [vmem:[#allocation3 + $0x50] sm:$0xff] }
 0x6ca   :  { %7302 = vmatmul.mubr.bf16.gmra.mrb[140].mxu1 %v15647_v17  ;;  %v5516_v17 = vld [vmem:[#allocation3 + $0x2f2] sm:$0xff]  ;;  %v5653_v38 = vpack.c.bf16 %v5591_v40, %v5590_v56  ;;  %v5729_v56 = vld [vmem:[#allocation3 + $0xc9] sm:$0xff] }
 0x6cb   :  { %7309 = vmatprep.mubr.bf16.mxu1 %v15542_v42  ;;  %v15778_v62 = vpack.c.bf16 %v5516_v17, %v5515_v12  ;;  %v5517_v42 = vld [vmem:[#allocation3 + $0x302] sm:$0xff] }
 0x6cc   :  { %v5593_v17 = vld [vmem:[#allocation3 + $0x68] sm:$0xff] }
 0x6ce   :  { %7647 = vmatmul.mubr.bf16.gmra.mrb[104].mxu0 %v15597_v44  ;;  %v5518_v44 = vld [vmem:[#allocation3 + $0x30a] sm:$0xff] }
 0x6cf   :  { %7654 = vmatprep.mubr.bf16.mxu0 %v15766_v35 }
 0x6d2   :  { %7310 = vmatmul.mubr.bf16.gmra.mrb[144].mxu1 %v15661_v19  ;;  %v15784_v19 = vpack.c.bf16 %v5518_v44, %v5517_v42  ;;  %v5722_v42 = vld [vmem:[#allocation3 + $0x79] sm:$0xff]  ;;  %v5723_v44 = vld [vmem:[#allocation3 + $0x81] sm:$0xff] }
 0x6d3   :  { %7317 = vmatprep.mubr.bf16.mxu1 %v15549_v50  ;;  %v5519_v50 = vld [vmem:[#allocation3 + $0x31a] sm:$0xff] }
 0x6d6   :  { %7655 = vmatmul.mubr.bf16.gmra.mrb[108].mxu0 %v15610_v53  ;;  %v5520_v53 = vld [vmem:[#allocation3 + $0x322] sm:$0xff] }
 0x6d7   :  { %7662 = vmatprep.mubr.bf16.mxu0 %v15772_v32 }
 0x6da   :  { %7318 = vmatmul.mubr.bf16.gmra.mrb[148].mxu1 %v15673_v41  ;;  %v15790_v41 = vpack.c.bf16 %v5520_v53, %v5519_v50  ;;  %v5783_v53 = vpack.c.bf16 %v5723_v44, %v5722_v42 }
 0x6db   :  { %7325 = vmatprep.mubr.bf16.mxu1 %v15560_v28  ;;  %v5521_v28 = vld [vmem:[#allocation3 + $0x332] sm:$0xff] }
 0x6de   :  { %7663 = vmatmul.mubr.bf16.gmra.mrb[112].mxu0 %v15619_v0  ;;  %v5522_v0 = vld [vmem:[#allocation3 + $0x33a] sm:$0xff] }
 0x6df   :  { %7670 = vmatprep.mubr.bf16.mxu0 %v15778_v62 }
 0x6e2   :  { %7326 = vmatmul.mubr.bf16.gmra.mrb[152].mxu1 %v15683_v58  ;;  %v15796_v58 = vpack.c.bf16 %v5522_v0, %v5521_v28  ;;  %v5595_v28 = vld [vmem:[#allocation3 + $0x80] sm:$0xff]  ;;  %v5724_v0 = vld [vmem:[#allocation3 + $0x91] sm:$0xff] }
 0x6e3   :  { %7333 = vmatprep.mubr.bf16.mxu1 %v15567_v14  ;;  %v5393_v14 = vld [vmem:[#allocation3 + $0x331] sm:$0xff] }
 0x6e6   :  { %7671 = vmatmul.mubr.bf16.gmra.mrb[116].mxu0 %v15632_v39  ;;  %v5394_v39 = vld [vmem:[#allocation3 + $0x339] sm:$0xff] }
 0x6e7   :  { %7678 = vmatprep.mubr.bf16.mxu0 %v15784_v19  ;;  %v5426_v1 = vpack.c.bf16 %v5394_v39, %v5393_v14  ;;  %v5725_v14 = vld [vmem:[#allocation3 + $0x99] sm:$0xff] }
 0x6ea   :  { %7334 = vmatmul.mubr.bf16.gmra.mrb[156].mxu1 %v15700_v49  ;;  %v5716_v49 = vld [vmem:[#allocation3 + $0x31] sm:$0xff] }
 0x6eb   :  { %7341 = vmatprep.mubr.bf16.mxu1 %v15580_v15 }
 0x6ee   :  { %7679 = vmatmul.mubr.bf16.gmra.mrb[120].mxu0 %v15645_v27  ;;  %v5717_v27 = vld [vmem:[#allocation3 + $0x39] sm:$0xff] }
 0x6ef   :  { %7686 = vmatprep.mubr.bf16.mxu0 %v15790_v41  ;;  %v5780_v15 = vpack.c.bf16 %v5717_v27, %v5716_v49  ;;  %v5784_v49 = vpack.c.bf16 %v5725_v14, %v5724_v0  ;;  %v5597_v27 = vld [vmem:[#allocation3 + $0x98] sm:$0xff] }
 0x6f0   :  { %v5847_v0 = vld [vmem:[#allocation3 + $0x52] sm:$0xff] }
 0x6f1   :  { %v5732_v14 = vld [vmem:[#allocation3 + $0xf1] sm:$0xff] }
 0x6f2   :  { %7342 = vmatmul.mubr.bf16.gmra.mrb[160].mxu1 %v15715_v3  ;;  %v5589_v3 = vld [vmem:[#allocation3 + $0x38] sm:$0xff] }
 0x6f3   :  { %7349 = vmatprep.mubr.bf16.mxu1 %v15595_v47  ;;  %v5652_v21 = vpack.c.bf16 %v5589_v3, %v5588_v48 }
 0x6f6   :  { %7687 = vmatmul.mubr.bf16.gmra.mrb[124].mxu0 %v15659_v11  ;;  %v5719_v11 = vld [vmem:[#allocation3 + $0x51] sm:$0xff] }
 0x6f7   :  { %7694 = vmatprep.mubr.bf16.mxu0 %v15796_v58  ;;  %v5781_v47 = vpack.c.bf16 %v5719_v11, %v5718_v52  ;;  %v5599_v52 = vld [vmem:[#allocation3 + $0xb0] sm:$0xff] }
 0x6f8   :  { %v5265_v11 = vld [vmem:[#allocation3 + $0x330] sm:$0xff] }
 0x6fa   :  { %7350 = vmatmul.mubr.bf16.gmra.mrb[164].mxu1 %v15731_v36  ;;  %v5721_v36 = vld [vmem:[#allocation3 + $0x69] sm:$0xff] }
 0x6fb   :  { %7357 = vmatprep.mubr.bf16.mxu1 %v15608_v30  ;;  %v5782_v12 = vpack.c.bf16 %v5721_v36, %v5720_v25  ;;  %v5592_v30 = vld [vmem:[#allocation3 + $0x60] sm:$0xff] }
 0x6fc   :  { %v5654_v50 = vpack.c.bf16 %v5593_v17, %v5592_v30  ;;  %v5600_v36 = vld [vmem:[#allocation3 + $0xc0] sm:$0xff]  ;;  %v5844_v30 = vld [vmem:[#allocation3 + $0x32] sm:$0xff] }
 0x6fd   :  { %v5845_v17 = vld [vmem:[#allocation3 + $0x3a] sm:$0xff] }
 0x6fe   :  { %7695 = vmatmul.mubr.bf16.gmra.mrb[128].mxu0 %v5426_v1  ;;  %v5726_v1 = vld [vmem:[#allocation3 + $0xa9] sm:$0xff] }
 0x6ff   :  { %7735 = vmatprep.mubr.bf16.mxu0 %v5780_v15  ;;  %v5727_v15 = vld [vmem:[#allocation3 + $0xb1] sm:$0xff] }
 0x700   :  { %v5785_v3 = vpack.c.bf16 %v5727_v15, %v5726_v1 }
 0x702   :  { %7358 = vmatmul.mubr.bf16.gmra.mrb[168].mxu1 %v15747_v63 }
 0x703   :  { %7365 = vmatprep.mubr.bf16.mxu1 %v15617_v31  ;;  %v5594_v31 = vld [vmem:[#allocation3 + $0x78] sm:$0xff] }
 0x704   :  { %v5655_v39 = vpack.c.bf16 %v5595_v28, %v5594_v31  ;;  %v5603_v31 = vld [vmem:[#allocation3 + $0xe0] sm:$0xff]  ;;  %v5846_v28 = vld [vmem:[#allocation3 + $0x4a] sm:$0xff] }
 0x705   :  { %v5909_v1 = vpack.c.bf16 %v5847_v0, %v5846_v28 }
 0x706   :  { %7736 = vmatmul.mubr.bf16.vlgmr.msra.gmra.mrb[4].mxu0 %v5652_v21  ;;  %v5266_v21 = vld [vmem:[#allocation3 + $0x338] sm:$0xff] }
 0x707   :  { %7743 = vmatprep.mubr.bf16.mxu0 %v5781_v47  ;;  %v5728_v47 = vld [vmem:[#allocation3 + $0xc1] sm:$0xff]  ;;  %v15814_v40 = vpack.c.bf16 %v5266_v21, %v5265_v11  ;;  %v5734_v21 = vld [vmem:[#allocation3 + $0x109] sm:$0xff] }
 0x708   :  { %v5786_v25 = vpack.c.bf16 %v5729_v56, %v5728_v47  ;;  %v5851_v11 = vld [vmem:[#allocation3 + $0x82] sm:$0xff]  ;;  %v5735_v47 = vld [vmem:[#allocation3 + $0x111] sm:$0xff] }
 0x709   :  { %v5852_v56 = vld [vmem:[#allocation3 + $0x92] sm:$0xff] }
 0x70a   :  { %7366 = vmatmul.mubr.bf16.gmra.mrb[172].mxu1 %v15756_v5 }
 0x70b   :  { %7373 = vmatprep.mubr.bf16.mxu1 %v15630_v57  ;;  %v5596_v57 = vld [vmem:[#allocation3 + $0x90] sm:$0xff] }
 0x70c   :  { %v5656_v48 = vpack.c.bf16 %v5597_v27, %v5596_v57  ;;  %v5849_v57 = vld [vmem:[#allocation3 + $0x6a] sm:$0xff] }
 0x70e   :  { %7744 = vmatmul.mubr.bf16.gmra.mrb[8].mxu0 %v5653_v38  ;;  %v5601_v38 = vld [vmem:[#allocation3 + $0xc8] sm:$0xff] }
 0x70f   :  { %7751 = vmatprep.mubr.bf16.mxu0 %v5782_v12  ;;  %v5731_v12 = vld [vmem:[#allocation3 + $0xe1] sm:$0xff]  ;;  %v5658_v42 = vpack.c.bf16 %v5601_v38, %v5600_v36  ;;  %v5789_v38 = vpack.c.bf16 %v5735_v47, %v5734_v21 }
 0x712   :  { %7374 = vmatmul.mubr.bf16.gmra.mrb[176].mxu1 %v15766_v35 }
 0x713   :  { %7381 = vmatprep.mubr.bf16.mxu1 %v15643_v8  ;;  %v5598_v8 = vld [vmem:[#allocation3 + $0xa8] sm:$0xff] }
 0x716   :  { %7752 = vmatmul.mubr.bf16.gmra.mrb[12].mxu0 %v5654_v50  ;;  %v5908_v50 = vpack.c.bf16 %v5845_v17, %v5844_v30  ;;  %v5607_v30 = vld [vmem:[#allocation3 + $0x110] sm:$0xff] }
 0x717   :  { %7759 = vmatprep.mubr.bf16.mxu0 %v5783_v53  ;;  %v5602_v53 = vld [vmem:[#allocation3 + $0xd8] sm:$0xff]  ;;  %v5854_v17 = vld [vmem:[#allocation3 + $0xaa] sm:$0xff] }
 0x718   :  { %v5659_v27 = vpack.c.bf16 %v5603_v31, %v5602_v53  ;;  %v5856_v53 = vld [vmem:[#allocation3 + $0xc2] sm:$0xff]  ;;  %v5857_v31 = vld [vmem:[#allocation3 + $0xca] sm:$0xff] }
 0x71a   :  { %7382 = vmatmul.mubr.bf16.gmra.mrb[180].mxu1 %v15772_v32 }
 0x71b   :  { %7389 = vmatprep.mubr.bf16.mxu1 %v15657_v4  ;;  %v5657_v4 = vpack.c.bf16 %v5599_v52, %v5598_v8  ;;  %v5605_v8 = vld [vmem:[#allocation3 + $0xf8] sm:$0xff] }
 0x71c   :  { %v5850_v52 = vld [vmem:[#allocation3 + $0x7a] sm:$0xff] }
 0x71d   :  { %v5911_v36 = vpack.c.bf16 %v5851_v11, %v5850_v52 }
 0x71e   :  { %7760 = vmatmul.mubr.bf16.gmra.mrb[16].mxu0 %v5655_v39  ;;  %v5733_v39 = vld [vmem:[#allocation3 + $0xf9] sm:$0xff] }
 0x71f   :  { %7767 = vmatprep.mubr.bf16.mxu0 %v5784_v49  ;;  %v5848_v49 = vld [vmem:[#allocation3 + $0x62] sm:$0xff]  ;;  %v5788_v15 = vpack.c.bf16 %v5733_v39, %v5732_v14  ;;  %v5914_v39 = vpack.c.bf16 %v5857_v31, %v5856_v53  ;;  %v5612_v53 = vld [vmem:[#allocation3 + $0x150] sm:$0xff]  ;;  %v5613_v31 = vld [vmem:[#allocation3 + $0x158] sm:$0xff] }
 0x722   :  { %7390 = vmatmul.mubr.bf16.gmra.mrb[184].mxu1 %v15778_v62 }
 0x723   :  { %7397 = vmatprep.mubr.bf16.mxu1 %v15671_v6  ;;  %v5730_v6 = vld [vmem:[#allocation3 + $0xd9] sm:$0xff] }
 0x724   :  { %v5787_v44 = vpack.c.bf16 %v5731_v12, %v5730_v6  ;;  %v5606_v12 = vld [vmem:[#allocation3 + $0x108] sm:$0xff] }
 0x725   :  { %v5661_v28 = vpack.c.bf16 %v5607_v30, %v5606_v12  ;;  %v5864_v12 = vld [vmem:[#allocation3 + $0x122] sm:$0xff]  ;;  %v5865_v30 = vld [vmem:[#allocation3 + $0x12a] sm:$0xff] }
 0x726   :  { %7768 = vmatmul.mubr.bf16.gmra.mrb[20].mxu0 %v5656_v48  ;;  %v5910_v48 = vpack.c.bf16 %v5849_v57, %v5848_v49  ;;  %v5608_v49 = vld [vmem:[#allocation3 + $0x120] sm:$0xff]  ;;  %v5609_v57 = vld [vmem:[#allocation3 + $0x128] sm:$0xff] }
 0x727   :  { %7775 = vmatprep.mubr.bf16.mxu0 %v5785_v3  ;;  %v5604_v3 = vld [vmem:[#allocation3 + $0xf0] sm:$0xff]  ;;  %v5662_v52 = vpack.c.bf16 %v5609_v57, %v5608_v49  ;;  %v5869_v57 = vld [vmem:[#allocation3 + $0x15a] sm:$0xff] }
 0x728   :  { %v5868_v49 = vld [vmem:[#allocation3 + $0x152] sm:$0xff] }
 0x72a   :  { %7398 = vmatmul.mubr.bf16.gmra.mrb[188].mxu1 %v15784_v19 }
 0x72b   :  { %7405 = vmatprep.mubr.bf16.mxu1 %v15814_v40 }
 0x72e   :  { %7776 = vmatmul.mubr.bf16.gmra.mrb[24].mxu0 %v5657_v4  ;;  %v5853_v4 = vld [vmem:[#allocation3 + $0x9a] sm:$0xff] }
 0x72f   :  { %7783 = vmatprep.mubr.bf16.mxu0 %v5786_v25  ;;  %v5660_v25 = vpack.c.bf16 %v5605_v8, %v5604_v3  ;;  %v5912_v6 = vpack.c.bf16 %v5853_v4, %v5852_v56  ;;  %v5860_v3 = vld [vmem:[#allocation3 + $0xf2] sm:$0xff]  ;;  %v5861_v8 = vld [vmem:[#allocation3 + $0xfa] sm:$0xff] }
 0x730   :  { %v5916_v47 = vpack.c.bf16 %v5861_v8, %v5860_v3  ;;  %v5610_v56 = vld [vmem:[#allocation3 + $0x138] sm:$0xff]  ;;  %v5611_v4 = vld [vmem:[#allocation3 + $0x140] sm:$0xff]  ;;  %v5614_v3 = vld [vmem:[#allocation3 + $0x168] sm:$0xff] }
 0x731   :  { %v5615_v8 = vld [vmem:[#allocation3 + $0x170] sm:$0xff] }
 0x732   :  { %7406 = vmatmul.mubr.bf16.gmra.mrb[192].mxu1 %v15790_v41 }
 0x733   :  { %9231 = vmatprep.mubr.bf16.mxu1 %v5908_v50  ;;  %v5737_v50 = vld [vmem:[#allocation3 + $0x129] sm:$0xff] }
 0x736   :  { %7784 = vmatmul.mubr.bf16.gmra.mrb[28].mxu0 %v5658_v42  ;;  %v5855_v42 = vld [vmem:[#allocation3 + $0xb2] sm:$0xff] }
 0x737   :  { %7791 = vmatprep.mubr.bf16.mxu0 %v5787_v44  ;;  %v5736_v44 = vld [vmem:[#allocation3 + $0x121] sm:$0xff]  ;;  %v5913_v0 = vpack.c.bf16 %v5855_v42, %v5854_v17  ;;  %v5663_v17 = vpack.c.bf16 %v5611_v4, %v5610_v56  ;;  %v5873_v4 = vld [vmem:[#allocation3 + $0x18a] sm:$0xff] }
 0x738   :  { %v5790_v14 = vpack.c.bf16 %v5737_v50, %v5736_v44  ;;  %v5918_v50 = vpack.c.bf16 %v5865_v30, %v5864_v12  ;;  %v5872_v56 = vld [vmem:[#allocation3 + $0x182] sm:$0xff]  ;;  %v5874_v12 = vld [vmem:[#allocation3 + $0x19a] sm:$0xff] }
 0x739   :  { %v5875_v30 = vld [vmem:[#allocation3 + $0x1a2] sm:$0xff] }
 0x73a   :  { %9232 = vmatmul.mubr.bf16.vlgmr.msra.gmra.mrb[196].mxu1 %v5909_v1  ;;  %v5859_v1 = vld [vmem:[#allocation3 + $0xe2] sm:$0xff] }
 0x73b   :  { %9235 = vmatprep.mubr.bf16.mxu1 %v5910_v48  ;;  %v5739_v48 = vld [vmem:[#allocation3 + $0x141] sm:$0xff] }
 0x73e   :  { %7792 = vmatmul.mubr.bf16.gmra.mrb[32].mxu0 %v5659_v27  ;;  %v5858_v27 = vld [vmem:[#allocation3 + $0xda] sm:$0xff] }
 0x73f   :  { %7799 = vmatprep.mubr.bf16.mxu0 %v5788_v15  ;;  %v5738_v15 = vld [vmem:[#allocation3 + $0x139] sm:$0xff]  ;;  %v5915_v11 = vpack.c.bf16 %v5859_v1, %v5858_v27  ;;  %v5664_v27 = vpack.c.bf16 %v5613_v31, %v5612_v53  ;;  %v5923_v53 = vpack.c.bf16 %v5875_v30, %v5874_v12  ;;  %v5876_v31 = vld [vmem:[#allocation3 + $0x1e2] sm:$0xff]  ;;  %v5882_v30 = vld [vmem:[#allocation3 + $0x22a] sm:$0xff] }
 0x740   :  { %v5791_v21 = vpack.c.bf16 %v5739_v48, %v5738_v15  ;;  %v5920_v48 = vpack.c.bf16 %v5869_v57, %v5868_v49  ;;  %v5618_v57 = vld [vmem:[#allocation3 + $0x198] sm:$0xff] }
 0x742   :  { %9236 = vmatmul.mubr.bf16.gmra.mrb[200].mxu1 %v5911_v36  ;;  %v5863_v36 = vld [vmem:[#allocation3 + $0x112] sm:$0xff] }
 0x743   :  { %9239 = vmatprep.mubr.bf16.mxu1 %v5912_v6  ;;  %v5741_v6 = vld [vmem:[#allocation3 + $0x159] sm:$0xff] }
 0x746   :  { %7800 = vmatmul.mubr.bf16.gmra.mrb[36].mxu0 %v5660_v25  ;;  %v5862_v25 = vld [vmem:[#allocation3 + $0x10a] sm:$0xff] }
 0x747   :  { %7807 = vmatprep.mubr.bf16.mxu0 %v5789_v38  ;;  %v5740_v38 = vld [vmem:[#allocation3 + $0x151] sm:$0xff]  ;;  %v5917_v42 = vpack.c.bf16 %v5863_v36, %v5862_v25  ;;  %v5665_v25 = vpack.c.bf16 %v5615_v8, %v5614_v3  ;;  %v15826_v8 = vld [vmem:[#allocation3 + $0x8] sm:$0xff] }
 0x748   :  { %v5792_v44 = vpack.c.bf16 %v5741_v6, %v5740_v38  ;;  %v5922_v6 = vpack.c.bf16 %v5873_v4, %v5872_v56 }
 0x74a   :  { %9240 = vmatmul.mubr.bf16.gmra.mrb[204].mxu1 %v5913_v0  ;;  %v5867_v0 = vld [vmem:[#allocation3 + $0x142] sm:$0xff] }
 0x74b   :  { %9243 = vmatprep.mubr.bf16.mxu1 %v5914_v39  ;;  %v5743_v39 = vld [vmem:[#allocation3 + $0x171] sm:$0xff] }
 0x74e   :  { %7808 = vmatmul.mubr.bf16.gmra.mrb[40].mxu0 %v5661_v28  ;;  %v5866_v28 = vld [vmem:[#allocation3 + $0x13a] sm:$0xff] }
 0x74f   :  { %7815 = vmatprep.mubr.bf16.mxu0 %v5790_v14  ;;  %v5742_v14 = vld [vmem:[#allocation3 + $0x169] sm:$0xff]  ;;  %v5919_v1 = vpack.c.bf16 %v5867_v0, %v5866_v28 }
 0x750   :  { %v5793_v15 = vpack.c.bf16 %v5743_v39, %v5742_v14  ;;  %v5877_v28 = vld [vmem:[#allocation3 + $0x1ea] sm:$0xff] }
 0x751   :  { %v5924_v49 = vpack.c.bf16 %v5877_v28, %v5876_v31  ;;  %v5884_v31 = vld [vmem:[#allocation3 + $0x242] sm:$0xff]  ;;  %v5885_v28 = vld [vmem:[#allocation3 + $0x24a] sm:$0xff] }
 0x752   :  { %9244 = vmatmul.mubr.bf16.gmra.mrb[208].mxu1 %v5915_v11  ;;  %v5871_v11 = vld [vmem:[#allocation3 + $0x172] sm:$0xff] }
 0x753   :  { %9247 = vmatprep.mubr.bf16.mxu1 %v5916_v47  ;;  %v5745_v47 = vld [vmem:[#allocation3 + $0x189] sm:$0xff] }
 0x756   :  { %7816 = vmatmul.mubr.bf16.gmra.mrb[44].mxu0 %v5662_v52  ;;  %v5870_v52 = vld [vmem:[#allocation3 + $0x16a] sm:$0xff] }
 0x757   :  { %7823 = vmatprep.mubr.bf16.mxu0 %v5791_v21  ;;  %v5744_v21 = vld [vmem:[#allocation3 + $0x181] sm:$0xff]  ;;  %v5921_v36 = vpack.c.bf16 %v5871_v11, %v5870_v52  ;;  %v5667_v52 = vpack.c.bf16 %v15826_v8, %v5618_v57  ;;  %v5749_v11 = vld [vmem:[#allocation3 + $0x1e9] sm:$0xff] }
 0x758   :  { %v5794_v38 = vpack.c.bf16 %v5745_v47, %v5744_v21  ;;  %v5880_v21 = vld [vmem:[#allocation3 + $0x212] sm:$0xff]  ;;  %v5881_v47 = vld [vmem:[#allocation3 + $0x21a] sm:$0xff] }
 0x75a   :  { %9248 = vmatmul.mubr.bf16.gmra.mrb[212].mxu1 %v5917_v42  ;;  %v5747_v42 = vld [vmem:[#allocation3 + $0x1a1] sm:$0xff] }
 0x75b   :  { %9251 = vmatprep.mubr.bf16.mxu1 %v5918_v50 }
 0x75e   :  { %7824 = vmatmul.mubr.bf16.gmra.mrb[48].mxu0 %v5663_v17  ;;  %v5746_v17 = vld [vmem:[#allocation3 + $0x199] sm:$0xff] }
 0x75f   :  { %7831 = vmatprep.mubr.bf16.mxu0 %v5792_v44  ;;  %v5795_v14 = vpack.c.bf16 %v5747_v42, %v5746_v17  ;;  %v5883_v17 = vld [vmem:[#allocation3 + $0x232] sm:$0xff] }
 0x760   :  { %v5750_v42 = vld [vmem:[#allocation3 + $0x1f9] sm:$0xff]  ;;  %v5927_v57 = vpack.c.bf16 %v5883_v17, %v5882_v30 }
 0x762   :  { %9252 = vmatmul.mubr.bf16.gmra.mrb[216].mxu1 %v5919_v1  ;;  %v5878_v1 = vld [vmem:[#allocation3 + $0x1fa] sm:$0xff] }
 0x763   :  { %9255 = vmatprep.mubr.bf16.mxu1 %v5920_v48  ;;  %v5748_v48 = vld [vmem:[#allocation3 + $0x1e1] sm:$0xff] }
 0x766   :  { %7832 = vmatmul.mubr.bf16.gmra.mrb[52].mxu0 %v5664_v27 }
 0x767   :  { %7839 = vmatprep.mubr.bf16.mxu0 %v5793_v15  ;;  %v5879_v15 = vld [vmem:[#allocation3 + $0x202] sm:$0xff] }
 0x768   :  { %v5925_v4 = vpack.c.bf16 %v5879_v15, %v5878_v1  ;;  %v5928_v15 = vpack.c.bf16 %v5885_v28, %v5884_v31  ;;  %v5624_v31 = vld [vmem:[#allocation3 + $0x210] sm:$0xff]  ;;  %v5625_v28 = vld [vmem:[#allocation3 + $0x218] sm:$0xff] }
 0x76a   :  { %9256 = vmatmul.mubr.bf16.gmra.mrb[220].mxu1 %v5921_v36  ;;  %v5926_v36 = vpack.c.bf16 %v5881_v47, %v5880_v21  ;;  %v5887_v21 = vld [vmem:[#allocation3 + $0x262] sm:$0xff]  ;;  %v5752_v47 = vld [vmem:[#allocation3 + $0x211] sm:$0xff] }
 0x76b   :  { %9259 = vmatprep.mubr.bf16.mxu1 %v5922_v6  ;;  %v5621_v6 = vld [vmem:[#allocation3 + $0x1e8] sm:$0xff] }
 0x76d   :  { %v15819_v44 = vpop.f32.mrb[116].mxu1 }
 0x76e   :  { %7840 = vmatmul.mubr.bf16.gmra.mrb[56].mxu0 %v5665_v25  ;;  %v7257_v50 = vpop.f32.mrb[117].mxu1  ;;  %v5796_v25 = vpack.c.bf16 %v5749_v11, %v5748_v48  ;;  %v5622_v48 = vld [vmem:[#allocation3 + $0x1f8] sm:$0xff] }
 0x76f   :  { %7847 = vmatprep.mubr.bf16.mxu0 %v5794_v38  ;;  %v15821_v0 = vpop.f32.mrb[118].mxu1  ;;  %v5620_v38 = vld [vmem:[#allocation3 + $0x1e0] sm:$0xff] }
 0x770   :  { %v7260_v39 = vpop.f32.mrb[119].mxu1  ;;  %v5886_v11 = vld [vmem:[#allocation3 + $0x25a] sm:$0xff] }
 0x771   :  { %v5929_v30 = vpack.c.bf16 %v5887_v21, %v5886_v11  ;;  %v5627_v11 = vld [vmem:[#allocation3 + $0x230] sm:$0xff] }
 0x772   :  { %9260 = vmatmul.mubr.bf16.gmra.mrb[224].mxu1 %v5923_v53  ;;  %v5751_v53 = vld [vmem:[#allocation3 + $0x201] sm:$0xff] }
 0x773   :  { %9263 = vmatprep.mubr.bf16.mxu1 %v5924_v49  ;;  %v5668_v49 = vpack.c.bf16 %v5621_v6, %v5620_v38  ;;  %v5797_v1 = vpack.c.bf16 %v5751_v53, %v5750_v42 }
 0x775   :  { %v15824_v27 = vpop.f32.mrb[120].mxu1 }
 0x776   :  { %7848 = vmatmul.mubr.bf16.gmra.mrb[60].mxu0 %v15713_v23  ;;  %v7265_v3 = vpop.f32.mrb[121].mxu1 }
 0x777   :  { %7855 = vmatprep.mubr.bf16.mxu0 %v5795_v14  ;;  %v15829_v56 = vpop.f32.mrb[122].mxu1  ;;  %v5623_v3 = vld [vmem:[#allocation3 + $0x200] sm:$0xff] }
 0x778   :  { %v7268_v23 = vpop.f32.mrb[123].mxu1  ;;  %v5669_v6 = vpack.c.bf16 %v5623_v3, %v5622_v48  ;;  %v5626_v3 = vld [vmem:[#allocation3 + $0x228] sm:$0xff] }
 0x77a   :  { %9264 = vmatmul.mubr.bf16.gmra.mrb[228].mxu1 %v5925_v4  ;;  %v5753_v4 = vld [vmem:[#allocation3 + $0x219] sm:$0xff] }
 0x77b   :  { %9267 = vmatprep.mubr.bf16.mxu1 %v5926_v36  ;;  %v5889_v36 = vld [vmem:[#allocation3 + $0x27a] sm:$0xff]  ;;  %v5798_v17 = vpack.c.bf16 %v5753_v4, %v5752_v47  ;;  %v5757_v4 = vld [vmem:[#allocation3 + $0x249] sm:$0xff] }
 0x77c   :  { %v5756_v47 = vld [vmem:[#allocation3 + $0x241] sm:$0xff] }
 0x77d   :  { %v15831_v12 = vpop.f32.mrb[124].mxu1 }
 0x77e   :  { %7856 = vmatmul.mubr.bf16.gmra.mrb[64].mxu0 %v5667_v52  ;;  %v7273_v50 = vpop.f32.mrb[125].mxu1 }
 0x77f   :  { %7863 = vmatprep.mubr.bf16.mxu0 %v5796_v25  ;;  %v15833_v14 = vpop.f32.mrb[126].mxu1  ;;  %v5888_v25 = vld [vmem:[#allocation3 + $0x272] sm:$0xff] }
 0x780   :  { %v7276_v39 = vpop.f32.mrb[127].mxu1  ;;  %v5930_v42 = vpack.c.bf16 %v5889_v36, %v5888_v25 }
 0x782   :  { %9268 = vmatmul.mubr.bf16.gmra.mrb[232].mxu1 %v5927_v57  ;;  %v5755_v57 = vld [vmem:[#allocation3 + $0x231] sm:$0xff] }
 0x783   :  { %9271 = vmatprep.mubr.bf16.mxu1 %v5928_v15 }
 0x785   :  { %v15835_v52 = vpop.f32.mrb[128].mxu1 }
 0x786   :  { %7864 = vmatmul.mubr.bf16.gmra.mrb[68].mxu0 %v5668_v49  ;;  %v7281_v23 = vpop.f32.mrb[129].mxu1  ;;  %v5754_v49 = vld [vmem:[#allocation3 + $0x229] sm:$0xff] }
 0x787   :  { %7871 = vmatprep.mubr.bf16.mxu0 %v5797_v1  ;;  %v15837_v50 = vpop.f32.mrb[130].mxu1  ;;  %v5670_v23 = vpack.c.bf16 %v5625_v28, %v5624_v31  ;;  %v5758_v31 = vld [vmem:[#allocation3 + $0x259] sm:$0xff]  ;;  %v5759_v28 = vld [vmem:[#allocation3 + $0x261] sm:$0xff] }
 0x788   :  { %v7284_v38 = vpop.f32.mrb[131].mxu1 }
 0x789   :  { %v5799_v38 = vpack.c.bf16 %v5755_v57, %v5754_v49 }
 0x78a   :  { %9272 = vmatmul.mubr.bf16.gmra.mrb[236].mxu1 %v5929_v30  ;;  %v5800_v30 = vpack.c.bf16 %v5757_v4, %v5756_v47 }
 0x78b   :  { %9275 = vmatprep.mubr.bf16.mxu1 %v5930_v42 }
 0x78d   :  { %v15839_v53 = vpop.f32.mrb[132].mxu1 }
 0x78e   :  { %7872 = vmatmul.mubr.bf16.gmra.mrb[72].mxu0 %v5669_v6  ;;  %v7289_v39 = vpop.f32.mrb[133].mxu1  ;;  %v5671_v6 = vpack.c.bf16 %v5627_v11, %v5626_v3  ;;  %v5760_v3 = vld [vmem:[#allocation3 + $0x271] sm:$0xff]  ;;  %v5761_v11 = vld [vmem:[#allocation3 + $0x279] sm:$0xff] }
 0x78f   :  { %7879 = vmatprep.mubr.bf16.mxu0 %v5798_v17  ;;  %v15841_v1 = vpop.f32.mrb[134].mxu1  ;;  %v5629_v17 = vld [vmem:[#allocation3 + $0x248] sm:$0xff] }
 0x790   :  { %v7292_v15 = vpop.f32.mrb[135].mxu1 }
 0x791   :  { %v5801_v15 = vpack.c.bf16 %v5759_v28, %v5758_v31  ;;  %v5763_v31 = vld [vmem:[#allocation3 + $0x291] sm:$0xff] }
 0x792   :  { %9276 = vmatmul.mubr.bf16.gmra.mrb[240].mxu1 %v15747_v63 }
 0x793   :  { %9279 = vmatprep.mubr.bf16.mxu1 %v15756_v5  ;;  %v5628_v5 = vld [vmem:[#allocation3 + $0x240] sm:$0xff] }
 0x794   :  { %v5672_v57 = vpack.c.bf16 %v5629_v17, %v5628_v5  ;;  %v5633_v5 = vld [vmem:[#allocation3 + $0x278] sm:$0xff] }
 0x795   :  { %v15845_v48 = vpop.f32.mrb[136].mxu1 }
 0x796   :  { %7880 = vmatmul.mubr.bf16.gmra.mrb[76].mxu0 %v5670_v23  ;;  %v7297_v21 = vpop.f32.mrb[137].mxu1  ;;  %v5631_v23 = vld [vmem:[#allocation3 + $0x260] sm:$0xff] }
 0x797   :  { %7887 = vmatprep.mubr.bf16.mxu0 %v5799_v38  ;;  %v15847_v25 = vpop.f32.mrb[138].mxu1 }
 0x798   :  { %v7300_v36 = vpop.f32.mrb[139].mxu1 }
 0x799   :  { %v5802_v36 = vpack.c.bf16 %v5761_v11, %v5760_v3  ;;  %v5764_v3 = vld [vmem:[#allocation3 + $0x2a1] sm:$0xff]  ;;  %v5765_v11 = vld [vmem:[#allocation3 + $0x2a9] sm:$0xff] }
 0x79a   :  { %9280 = vmatmul.mubr.bf16.gmra.mrb[244].mxu1 %v15766_v35 }
 0x79b   :  { %9283 = vmatprep.mubr.bf16.mxu1 %v15772_v32  ;;  %v5630_v32 = vld [vmem:[#allocation3 + $0x258] sm:$0xff] }
 0x79c   :  { %v5673_v4 = vpack.c.bf16 %v5631_v23, %v5630_v32  ;;  %v5635_v23 = vld [vmem:[#allocation3 + $0x290] sm:$0xff] }
 0x79d   :  { %v15851_v63 = vpop.f32.mrb[140].mxu1 }
 0x79e   :  { %7888 = vmatmul.mubr.bf16.gmra.mrb[80].mxu0 %v5671_v6  ;;  %v7305_v42 = vpop.f32.mrb[141].mxu1 }
 0x79f   :  { %7895 = vmatprep.mubr.bf16.mxu0 %v5800_v30  ;;  %v15853_v39 = vpop.f32.mrb[142].mxu1  ;;  %v5632_v30 = vld [vmem:[#allocation3 + $0x270] sm:$0xff] }
 0x7a0   :  { %v7308_v49 = vpop.f32.mrb[143].mxu1  ;;  %v5762_v42 = vld [vmem:[#allocation3 + $0x289] sm:$0xff] }
 0x7a1   :  { %v5803_v32 = vpack.c.bf16 %v5763_v31, %v5762_v42  ;;  %v5766_v42 = vld [vmem:[#allocation3 + $0x2b9] sm:$0xff]  ;;  %v5767_v31 = vld [vmem:[#allocation3 + $0x2c1] sm:$0xff] }
 0x7a2   :  { %9284 = vmatmul.mubr.bf16.gmra.mrb[248].mxu1 %v15778_v62  ;;  %v5906_v62 = vld [vmem:[#allocation3 + $0x34a] sm:$0xff] }
 0x7a3   :  { %9287 = vmatprep.mubr.bf16.mxu1 %v15784_v19  ;;  %v5907_v19 = vld [vmem:[#allocation3 + $0x352] sm:$0xff] }
 0x7a4   :  { %v5939_v28 = vpack.c.bf16 %v5907_v19, %v5906_v62  ;;  %v5804_v62 = vpack.c.bf16 %v5765_v11, %v5764_v3  ;;  %v5768_v11 = vld [vmem:[#allocation3 + $0x2d1] sm:$0xff] }
 0x7a5   :  { %v15857_v35 = vpop.f32.mrb[144].mxu1 }
 0x7a6   :  { %7896 = vmatmul.mubr.bf16.gmra.mrb[84].mxu0 %v5672_v57  ;;  %v7313_v38 = vpop.f32.mrb[145].mxu1 }
 0x7a7   :  { %7903 = vmatprep.mubr.bf16.mxu0 %v5801_v15  ;;  %v15859_v21 = vpop.f32.mrb[146].mxu1  ;;  %v5674_v15 = vpack.c.bf16 %v5633_v5, %v5632_v30  ;;  %v5636_v30 = vld [vmem:[#allocation3 + $0x2a0] sm:$0xff]  ;;  %v5637_v5 = vld [vmem:[#allocation3 + $0x2a8] sm:$0xff] }
 0x7a8   :  { %v7316_v47 = vpop.f32.mrb[147].mxu1 }
 0x7aa   :  { %9288 = vmatmul.mubr.bf16.gmra.mrb[252].mxu1 %v15790_v41 }
 0x7ab   :  { %9291 = vmatprep.mubr.bf16.mxu1 %v15796_v58  ;;  %v5634_v58 = vld [vmem:[#allocation3 + $0x288] sm:$0xff] }
 0x7ad   :  { %v15863_v6 = vpop.f32.mrb[148].mxu1 }
 0x7ae   :  { %7904 = vmatmul.mubr.bf16.gmra.mrb[88].mxu0 %v5673_v4  ;;  %v7321_v17 = vpop.f32.mrb[149].mxu1 }
 0x7af   :  { %7911 = vmatprep.mubr.bf16.mxu0 %v5802_v36  ;;  %v15865_v49 = vpop.f32.mrb[150].mxu1  ;;  %v5675_v36 = vpack.c.bf16 %v5635_v23, %v5634_v58  ;;  %v5638_v58 = vld [vmem:[#allocation3 + $0x2b8] sm:$0xff]  ;;  %v5639_v23 = vld [vmem:[#allocation3 + $0x2c0] sm:$0xff] }
 0x7b0   :  { %v7324_v57 = vpop.f32.mrb[151].mxu1 }
 0x7b2   :  { %9292 = vmatmul.mubr.bf16.gmra.mrb[0].mxu1 %v5939_v28 }
 0x7b5   :  { %v15867_v41 = vpop.f32.mrb[152].mxu1 }
 0x7b6   :  { %7912 = vmatmul.mubr.bf16.gmra.mrb[92].mxu0 %v5674_v15  ;;  %v7329_v38 = vpop.f32.mrb[153].mxu1  ;;  %v5676_v15 = vpack.c.bf16 %v5637_v5, %v5636_v30  ;;  %v5640_v30 = vld [vmem:[#allocation3 + $0x2d0] sm:$0xff]  ;;  %v5641_v5 = vld [vmem:[#allocation3 + $0x2d8] sm:$0xff] }
 0x7b7   :  { %7919 = vmatprep.mubr.bf16.mxu0 %v5803_v32  ;;  %v15869_v47 = vpop.f32.mrb[154].mxu1  ;;  %v5805_v32 = vpack.c.bf16 %v5767_v31, %v5766_v42  ;;  %v5770_v31 = vld [vmem:[#allocation3 + $0x2e9] sm:$0xff] }
 0x7b8   :  { %17920 = vst [vmem:[#allocation35_spill] sm:$0xff] %v15869_v47  ;;  %v7332_v4 = vpop.f32.mrb[155].mxu1  ;;  %v5775_v47 = vld [vmem:[#allocation3 + $0x321] sm:$0xff] }
 0x7b9   :  { %v5769_v4 = vld [vmem:[#allocation3 + $0x2d9] sm:$0xff] }
 0x7bd   :  { %v15871_v19 = vpop.f32.mrb[156].mxu1 }
 0x7be   :  { %7920 = vmatmul.mubr.bf16.gmra.mrb[96].mxu0 %v5675_v36  ;;  %17921 = vst [vmem:[#allocation10_spill] sm:$0xff] %v15871_v19  ;;  %v7337_v17 = vpop.f32.mrb[157].mxu1  ;;  %v5806_v19 = vpack.c.bf16 %v5769_v4, %v5768_v11  ;;  %v5643_v11 = vld [vmem:[#allocation3 + $0x2f0] sm:$0xff] }
 0x7bf   :  { %7927 = vmatprep.mubr.bf16.mxu0 %v5804_v62  ;;  %v15873_v28 = vpop.f32.mrb[158].mxu1  ;;  %v5677_v17 = vpack.c.bf16 %v5639_v23, %v5638_v58  ;;  %v5642_v23 = vld [vmem:[#allocation3 + $0x2e8] sm:$0xff] }
 0x7c0   :  { %17922 = vst [vmem:[#allocation11_spill] sm:$0xff] %v15873_v28  ;;  %v7340_v57 = vpop.f32.mrb[159].mxu1 }
 0x7c1   :  { %v5771_v57 = vld [vmem:[#allocation3 + $0x2f1] sm:$0xff] }
 0x7c5   :  { %v15875_v38 = vpop.f32.mrb[160].mxu1 }
 0x7c6   :  { %7928 = vmatmul.mubr.bf16.gmra.mrb[100].mxu0 %v5676_v15  ;;  %17923 = vst [vmem:[#allocation14_spill] sm:$0xff] %v15875_v38  ;;  %v7345_v3 = vpop.f32.mrb[161].mxu1  ;;  %v5807_v38 = vpack.c.bf16 %v5771_v57, %v5770_v31  ;;  %v5679_v31 = vpack.c.bf16 %v5643_v11, %v5642_v23 }
 0x7c7   :  { %7935 = vmatprep.mubr.bf16.mxu0 %v5805_v32  ;;  %v15877_v36 = vpop.f32.mrb[162].mxu1  ;;  %v5678_v3 = vpack.c.bf16 %v5641_v5, %v5640_v30 }
 0x7c8   :  { %17924 = vst [vmem:[#allocation18_spill] sm:$0xff] %v15877_v36  ;;  %v7348_v62 = vpop.f32.mrb[163].mxu1 }
 0x7cd   :  { %v15879_v28 = vpop.f32.mrb[164].mxu1 }
 0x7ce   :  { %7936 = vmatmul.mubr.bf16.gmra.mrb[104].mxu0 %v5677_v17  ;;  %17925 = vst [vmem:[#allocation21_spill] sm:$0xff] %v15879_v28  ;;  %v7353_v42 = vpop.f32.mrb[165].mxu1  ;;  %v5772_v17 = vld [vmem:[#allocation3 + $0x301] sm:$0xff] }
 0x7cf   :  { %7943 = vmatprep.mubr.bf16.mxu0 %v5806_v19  ;;  %v15881_v15 = vpop.f32.mrb[166].mxu1  ;;  %v5773_v42 = vld [vmem:[#allocation3 + $0x309] sm:$0xff] }
 0x7d0   :  { %17926 = vst [vmem:[#allocation28_spill] sm:$0xff] %v15881_v15  ;;  %v7356_v32 = vpop.f32.mrb[167].mxu1  ;;  %v5808_v57 = vpack.c.bf16 %v5773_v42, %v5772_v17 }
 0x7d5   :  { %v15883_v36 = vpop.f32.mrb[168].mxu1 }
 0x7d6   :  { %7944 = vmatmul.mubr.bf16.gmra.mrb[108].mxu0 %v5678_v3  ;;  %17927 = vst [vmem:[#allocation26_spill] sm:$0xff] %v15883_v36  ;;  %v7361_v4 = vpop.f32.mrb[169].mxu1  ;;  %v5644_v3 = vld [vmem:[#allocation3 + $0x300] sm:$0xff] }
 0x7d7   :  { %7951 = vmatprep.mubr.bf16.mxu0 %v5807_v38  ;;  %v15888_v28 = vpop.f32.mrb[170].mxu1  ;;  %v5774_v36 = vld [vmem:[#allocation3 + $0x319] sm:$0xff] }
 0x7d8   :  { %17928 = vst [vmem:[#allocation34_spill] sm:$0xff] %v15888_v28  ;;  %v7364_v5 = vpop.f32.mrb[171].mxu1 }
 0x7d9   :  { %v7737_v58 = vpop.f32.mrb[4].mxu0  ;;  %v5809_v5 = vpack.c.bf16 %v5775_v47, %v5774_v36 }
 0x7da   :  { %v15886_v19 = vadd.f32 %v7737_v58, %v15470_v26  ;;  %v7739_v62 = vpop.f32.mrb[5].mxu0  ;;  %v5645_v58 = vld [vmem:[#allocation3 + $0x308] sm:$0xff] }
 0x7db   :  { %v7740_v15 = vpop.f32.mrb[6].mxu0  ;;  %v5680_v42 = vpack.c.bf16 %v5645_v58, %v5644_v3 }
 0x7dc   :  { %v15891_v30 = vadd.f32 %v7740_v15, %v15477_v29  ;;  %v7742_v38 = vpop.f32.mrb[7].mxu0 }
 0x7dd   :  { %v15893_v32 = vpop.f32.mrb[172].mxu1 }
 0x7de   :  { %7952 = vmatmul.mubr.bf16.gmra.mrb[112].mxu0 %v5679_v31  ;;  %17929 = vst [vmem:[#allocation29_spill] sm:$0xff] %v15893_v32  ;;  %v7369_v62 = vpop.f32.mrb[173].mxu1  ;;  %v5646_v31 = vld [vmem:[#allocation3 + $0x318] sm:$0xff] }
 0x7df   :  { %7959 = vmatprep.mubr.bf16.mxu0 %v5808_v57  ;;  %v15898_v29 = vpop.f32.mrb[174].mxu1  ;;  %v5647_v57 = vld [vmem:[#allocation3 + $0x320] sm:$0xff] }
 0x7e0   :  { %17930 = vst [vmem:[#allocation8_spill] sm:$0xff] %v15898_v29  ;;  %v7372_v11 = vpop.f32.mrb[175].mxu1  ;;  %v5776_v29 = vld [vmem:[#allocation3 + $0x331] sm:$0xff]  ;;  %v5777_v32 = vld [vmem:[#allocation3 + $0x339] sm:$0xff]  ;;  %v5681_v58 = vpack.c.bf16 %v5647_v57, %v5646_v31  ;;  %v5650_v31 = vld [vmem:[#allocation3 + $0x348] sm:$0xff] }
 0x7e1   :  { %v7745_v26 = vpop.f32.mrb[8].mxu0  ;;  %v5810_v11 = vpack.c.bf16 %v5777_v32, %v5776_v29 }
 0x7e2   :  { %v15896_v4 = vadd.f32 %v7745_v26, %v15626_v20  ;;  %v7747_v28 = vpop.f32.mrb[9].mxu0 }
 0x7e3   :  { %v7748_v15 = vpop.f32.mrb[10].mxu0 }
 0x7e4   :  { %v15901_v23 = vadd.f32 %v7748_v15, %v15628_v10  ;;  %v7750_v17 = vpop.f32.mrb[11].mxu0 }
 0x7e5   :  { %v15903_v38 = vpop.f32.mrb[176].mxu1  ;;  %v5778_v17 = vld [vmem:[#allocation3 + $0x349] sm:$0xff] }
 0x7e6   :  { %7960 = vmatmul.mubr.bf16.gmra.mrb[116].mxu0 %v5680_v42  ;;  %v7377_v26 = vpop.f32.mrb[177].mxu1  ;;  %v5779_v42 = vld [vmem:[#allocation3 + $0x351] sm:$0xff] }
 0x7e7   :  { %7967 = vmatprep.mubr.bf16.mxu0 %v5809_v5  ;;  %v15908_v10 = vpop.f32.mrb[178].mxu1 }
 0x7e8   :  { %17931 = vst [vmem:[#allocation30_spill] sm:$0xff] %v15908_v10  ;;  %v7380_v47 = vpop.f32.mrb[179].mxu1 }
 0x7e9   :  { %v7753_v20 = vpop.f32.mrb[12].mxu0 }
 0x7ea   :  { %v15906_v28 = vadd.f32 %v7753_v20, %v15639_v54  ;;  %v7755_v62 = vpop.f32.mrb[13].mxu0 }
 0x7eb   :  { %v7756_v15 = vpop.f32.mrb[14].mxu0 }
 0x7ec   :  { %v15911_v3 = vadd.f32 %v7756_v15, %v15641_v16  ;;  %v7758_v36 = vpop.f32.mrb[15].mxu0  ;;  %v5811_v15 = vpack.c.bf16 %v5779_v42, %v5778_v17 }
 0x7ed   :  { %v15913_v54 = vpop.f32.mrb[180].mxu1 }
 0x7ee   :  { %7968 = vmatmul.mubr.bf16.gmra.mrb[120].mxu0 %v5681_v58  ;;  %v7385_v26 = vpop.f32.mrb[181].mxu1 }
 0x7ef   :  { %7975 = vmatprep.mubr.bf16.mxu0 %v5810_v11  ;;  %v15918_v10 = vpop.f32.mrb[182].mxu1 }
 0x7f0   :  { %v7388_v32 = vpop.f32.mrb[183].mxu1 }
 0x7f1   :  { %v7761_v5 = vpop.f32.mrb[16].mxu0 }
 0x7f2   :  { %v15916_v20 = vadd.f32 %v7761_v5, %v15653_v59  ;;  %v7763_v62 = vpop.f32.mrb[17].mxu0  ;;  %v5683_v5 = vpack.c.bf16 %v15826_v8, %v5650_v31 }
 0x7f3   :  { %v7764_v16 = vpop.f32.mrb[18].mxu0 }
 0x7f4   :  { %v15921_v47 = vadd.f32 %v7764_v16, %v15655_v37  ;;  %v7766_v29 = vpop.f32.mrb[19].mxu0 }
 0x7f5   :  { %v15924_v57 = vpop.f32.mrb[184].mxu1 }
 0x7f6   :  { %7976 = vmatmul.mubr.bf16.gmra.mrb[124].mxu0 %v15814_v40  ;;  %v7393_v58 = vpop.f32.mrb[185].mxu1 }
 0x7f7   :  { %7983 = vmatprep.mubr.bf16.mxu0 %v5811_v15  ;;  %v15930_v17 = vpop.f32.mrb[186].mxu1 }
 0x7f8   :  { %v7396_v26 = vpop.f32.mrb[187].mxu1 }
 0x7f9   :  { %v7769_v36 = vpop.f32.mrb[20].mxu0 }
 0x7fa   :  { %v15927_v59 = vadd.f32 %v7769_v36, %v15667_v13  ;;  %v7771_v11 = vpop.f32.mrb[21].mxu0 }
 0x7fb   :  { %v7772_v37 = vpop.f32.mrb[22].mxu0 }
 0x7fc   :  { %v15933_v42 = vadd.f32 %v7772_v37, %v15669_v61  ;;  %v7774_v40 = vpop.f32.mrb[23].mxu0 }
 0x7fd   :  { %v15935_v62 = vpop.f32.mrb[188].mxu1 }
 0x7fe   :  { %7984 = vmatmul.mubr.bf16.gmra.mrb[128].mxu0 %v5683_v5  ;;  %v7401_v13 = vpop.f32.mrb[189].mxu1 }
 0x7ff   :  { %v15940_v29 = vpop.f32.mrb[190].mxu1 }
 0x800   :  { %v7404_v36 = vpop.f32.mrb[191].mxu1 }
 0x801   :  { %v7777_v16 = vpop.f32.mrb[24].mxu0 }
 0x802   :  { %v15938_v15 = vadd.f32 %v7777_v16, %v15679_v9  ;;  %v7779_v32 = vpop.f32.mrb[25].mxu0 }
 0x803   :  { %v7780_v8 = vpop.f32.mrb[26].mxu0 }
 0x804   :  { %v15943_v31 = vadd.f32 %v7780_v8, %v15681_v33  ;;  %v7782_v61 = vpop.f32.mrb[27].mxu0 }
 0x805   :  { %v15945_v58 = vpop.f32.mrb[192].mxu1 }
 0x806   :  { %v7409_v37 = vpop.f32.mrb[193].mxu1 }
 0x807   :  { %v15950_v9 = vpop.f32.mrb[194].mxu1 }
 0x808   :  { %17932 = vst [vmem:[#allocation31_spill] sm:$0xff] %v15950_v9  ;;  %v7412_v13 = vpop.f32.mrb[195].mxu1 }
 0x809   :  { %v7785_v11 = vpop.f32.mrb[28].mxu0 }
 0x80a   :  { %v15948_v5 = vadd.f32 %v7785_v11, %v15693_v51  ;;  %v7787_v26 = vpop.f32.mrb[29].mxu0 }
 0x80b   :  { %v7788_v40 = vpop.f32.mrb[30].mxu0 }
 0x80c   :  { %v15953_v16 = vadd.f32 %v7788_v40, %v15698_v18  ;;  %v7790_v32 = vpop.f32.mrb[31].mxu0 }
 0x80d   :  { %v9233_v8 = vpop.f32.mrb[196].mxu1 }
 0x80e   :  { %v15959_v61 = vadd.f32 %v15896_v4, %v9233_v8  ;;  %v8026_v11 = vpop.f32.mrb[197].mxu1 }
 0x80f   :  { %v15962_v37 = vadd.f32 %v15886_v19, %v8026_v11  ;;  %v9234_v9 = vpop.f32.mrb[198].mxu1 }
 0x810   :  { %17933 = vst [vmem:[#allocation13_spill] sm:$0xff] %v15959_v61  ;;  %v15968_v40 = vadd.f32 %v15901_v23, %v9234_v9  ;;  %v8029_v32 = vpop.f32.mrb[199].mxu1 }
 0x811   :  { %v7793_v33 = vpop.f32.mrb[32].mxu0  ;;  %17934 = vst [vmem:[#allocation15_spill] sm:$0xff] %v15962_v37  ;;  %v8351_v4 = vmul.f32 %v15962_v37, %v15962_v37 }
 0x812   :  { %v15956_v36 = vadd.f32 %v7793_v33, %v15709_v7  ;;  %v7795_v51 = vpop.f32.mrb[33].mxu0  ;;  %v15971_v7 = vadd.f32 %v15891_v30, %v8029_v32  ;;  %v8354_v32 = vmul.f32 %v15968_v40, %v15968_v40 }
 0x813   :  { %v7796_v26 = vpop.f32.mrb[34].mxu0 }
 0x814   :  { %v15965_v18 = vadd.f32 %v7796_v26, %v15711_v2  ;;  %v7798_v13 = vpop.f32.mrb[35].mxu0  ;;  %17935 = vst [vmem:[#allocation12_spill] sm:$0xff] %v15971_v7  ;;  %v8281_v19 = vadd.f32 %v15971_v7, %v15962_v37  ;;  %v8352_v33 = vmul.f32 %v15971_v7, %v15971_v7  ;;  %v8353_v2 = vmul.f32 %v15959_v61, %v15959_v61 }
 0x815   :  { %v9237_v51 = vpop.f32.mrb[200].mxu1 }
 0x816   :  { %v8282_v23 = vadd.f32 %v8281_v19, %v15959_v61  ;;  %v8415_v9 = vadd.f32 %v8352_v33, %v8351_v4  ;;  %v15986_v11 = vadd.f32 %v15916_v20, %v9237_v51  ;;  %v8042_v13 = vpop.f32.mrb[201].mxu1 }
 0x817   :  { %v15991_v37 = vadd.f32 %v15906_v28, %v8042_v13  ;;  %v9238_v33 = vpop.f32.mrb[202].mxu1 }
 0x818   :  { %v8416_v7 = vadd.f32 %v8415_v9, %v8353_v2  ;;  %v8283_v19 = vadd.f32 %v8282_v23, %v15968_v40 }
 0x819   :  { %v7801_v8 = vpop.f32.mrb[36].mxu0  ;;  %v8355_v2 = vmul.f32 %v15991_v37, %v15991_v37 }
 0x81a   :  { %v15983_v30 = vadd.f32 %v7801_v8, %v15727_v45  ;;  %v7803_v26 = vpop.f32.mrb[37].mxu0  ;;  %v15998_v45 = vadd.f32 %v15921_v47, %v9238_v33  ;;  %v8045_v8 = vpop.f32.mrb[203].mxu1  ;;  %v8284_v51 = vadd.f32 %v8283_v19, %v15991_v37  ;;  %v8417_v9 = vadd.f32 %v8416_v7, %v8354_v32 }
 0x81b   :  { %v7804_v4 = vpop.f32.mrb[38].mxu0  ;;  %v16004_v28 = vadd.f32 %v15911_v3, %v8045_v8  ;;  %v8357_v47 = vmul.f32 %v15986_v11, %v15986_v11 }
 0x81c   :  { %v15995_v61 = vadd.f32 %v7804_v4, %v15729_v60  ;;  %v7806_v20 = vpop.f32.mrb[39].mxu0  ;;  %v8418_v23 = vadd.f32 %v8417_v9, %v8355_v2  ;;  %v8358_v8 = vmul.f32 %v15998_v45, %v15998_v45 }
 0x81d   :  { %v8285_v26 = vadd.f32 %v8284_v51, %v16004_v28  ;;  %v8356_v60 = vmul.f32 %v16004_v28, %v16004_v28  ;;  %v9241_v33 = vpop.f32.mrb[204].mxu1 }
 0x81e   :  { %v16014_v7 = vadd.f32 %v15938_v15, %v9241_v33  ;;  %v8058_v32 = vpop.f32.mrb[205].mxu1 }
 0x81f   :  { %v8286_v13 = vadd.f32 %v8285_v26, %v15986_v11  ;;  %v8419_v4 = vadd.f32 %v8418_v23, %v8356_v60  ;;  %v16019_v2 = vadd.f32 %v15927_v59, %v8058_v32  ;;  %v9242_v23 = vpop.f32.mrb[206].mxu1 }
 0x821   :  { %v7809_v19 = vpop.f32.mrb[40].mxu0  ;;  %v8420_v51 = vadd.f32 %v8419_v4, %v8357_v47  ;;  %v8287_v9 = vadd.f32 %v8286_v13, %v15998_v45 }
 0x822   :  { %v9363_v20 = vadd.f32 %v7809_v19, %v15743_v24  ;;  %v7811_v3 = vpop.f32.mrb[41].mxu0  ;;  %v16024_v24 = vadd.f32 %v15943_v31, %v9242_v23  ;;  %v8061_v19 = vpop.f32.mrb[207].mxu1  ;;  %v8361_v31 = vmul.f32 %v16014_v7, %v16014_v7 }
 0x823   :  { %v7812_v26 = vpop.f32.mrb[42].mxu0  ;;  %v8288_v33 = vadd.f32 %v8287_v9, %v16019_v2  ;;  %v8359_v3 = vmul.f32 %v16019_v2, %v16019_v2  ;;  %v8421_v47 = vadd.f32 %v8420_v51, %v8358_v8  ;;  %v16030_v59 = vadd.f32 %v15933_v42, %v8061_v19 }
 0x824   :  { %v9364_v60 = vadd.f32 %v7812_v26, %v15745_v34  ;;  %17936 = vst [vmem:[#allocation17_spill] sm:$0xff] %v16024_v24  ;;  %v7814_v15 = vpop.f32.mrb[43].mxu0  ;;  %v8362_v19 = vmul.f32 %v16024_v24, %v16024_v24 }
 0x825   :  { %v8422_v4 = vadd.f32 %v8421_v47, %v8359_v3  ;;  %v8289_v13 = vadd.f32 %v8288_v33, %v16030_v59  ;;  %v8360_v34 = vmul.f32 %v16030_v59, %v16030_v59  ;;  %v9245_v23 = vpop.f32.mrb[208].mxu1 }
 0x826   :  { %v16040_v8 = vadd.f32 %v15956_v36, %v9245_v23  ;;  %v8074_v51 = vpop.f32.mrb[209].mxu1 }
 0x827   :  { %v8290_v32 = vadd.f32 %v8289_v13, %v16014_v7  ;;  %v8423_v26 = vadd.f32 %v8422_v4, %v8360_v34  ;;  %v16045_v3 = vadd.f32 %v15948_v5, %v8074_v51  ;;  %v9246_v4 = vpop.f32.mrb[210].mxu1 }
 0x828   :  { %17937 = vst [vmem:[#allocation16_spill] sm:$0xff] %v16040_v8 }
 0x829   :  { %v7817_v9 = vpop.f32.mrb[44].mxu0  ;;  %v8424_v33 = vadd.f32 %v8423_v26, %v8361_v31  ;;  %v8291_v47 = vadd.f32 %v8290_v32, %v16024_v24 }
 0x82a   :  { %v9365_v15 = vadd.f32 %v7817_v9, %v15752_v46  ;;  %v7819_v42 = vpop.f32.mrb[45].mxu0  ;;  %v16050_v46 = vadd.f32 %v15965_v18, %v9246_v4  ;;  %v8077_v9 = vpop.f32.mrb[211].mxu1 }
 0x82b   :  { %v7820_v13 = vpop.f32.mrb[46].mxu0  ;;  %v8292_v23 = vadd.f32 %v8291_v47, %v16045_v3  ;;  %v8363_v42 = vmul.f32 %v16045_v3, %v16045_v3  ;;  %v8425_v31 = vadd.f32 %v8424_v33, %v8362_v19  ;;  %v16056_v5 = vadd.f32 %v15953_v16, %v8077_v9 }
 0x82c   :  { %v9366_v34 = vadd.f32 %v7820_v13, %v15754_v22  ;;  %17938 = vst [vmem:[#allocation32_spill] sm:$0xff] %v16050_v46  ;;  %v7822_v36 = vpop.f32.mrb[47].mxu0  ;;  %v8365_v9 = vmul.f32 %v16040_v8, %v16040_v8 }
 0x82d   :  { %17939 = vst [vmem:[#allocation23_spill] sm:$0xff] %v16056_v5  ;;  %v8426_v26 = vadd.f32 %v8425_v31, %v8363_v42  ;;  %v8364_v32 = vmul.f32 %v16056_v5, %v16056_v5  ;;  %v8293_v22 = vadd.f32 %v8292_v23, %v16056_v5  ;;  %v9249_v18 = vpop.f32.mrb[212].mxu1 }
 0x82e   :  { %v16062_v36 = vadd.f32 %v9363_v20, %v9249_v18  ;;  %v8090_v24 = vpop.f32.mrb[213].mxu1 }
 0x82f   :  { %v8427_v13 = vadd.f32 %v8426_v26, %v8364_v32  ;;  %v16065_v19 = vadd.f32 %v15983_v30, %v8090_v24  ;;  %v9250_v33 = vpop.f32.mrb[214].mxu1  ;;  %v8294_v42 = vadd.f32 %v8293_v22, %v16040_v8  ;;  %v8366_v30 = vmul.f32 %v16050_v46, %v16050_v46 }
 0x830   :  { %v16071_v31 = vadd.f32 %v9364_v60, %v9250_v33 }
 0x831   :  { %v7825_v51 = vpop.f32.mrb[48].mxu0  ;;  %v8428_v32 = vadd.f32 %v8427_v13, %v8365_v9  ;;  %v8295_v24 = vadd.f32 %v8294_v42, %v16050_v46  ;;  %v8367_v22 = vmul.f32 %v16065_v19, %v16065_v19 }
 0x832   :  { %v9367_v4 = vadd.f32 %v7825_v51, %v15762_v55  ;;  %v7827_v47 = vpop.f32.mrb[49].mxu0  ;;  %v8093_v55 = vpop.f32.mrb[215].mxu1 }
 0x833   :  { %v7828_v16 = vpop.f32.mrb[50].mxu0  ;;  %v16074_v20 = vadd.f32 %v15995_v61, %v8093_v55  ;;  %v8429_v47 = vadd.f32 %v8428_v32, %v8366_v30 }
 0x834   :  { %v9368_v23 = vadd.f32 %v7828_v16, %v15764_v43  ;;  %v7830_v26 = vpop.f32.mrb[51].mxu0 }
 0x835   :  { %v9253_v18 = vpop.f32.mrb[216].mxu1  ;;  %v8296_v26 = vadd.f32 %v8295_v24, %v16065_v19  ;;  %v8430_v32 = vadd.f32 %v8429_v47, %v8367_v22 }
 0x836   :  { %v16082_v60 = vadd.f32 %v9367_v4, %v9253_v18  ;;  %v8106_v33 = vpop.f32.mrb[217].mxu1 }
 0x837   :  { %v16084_v61 = vadd.f32 %v9365_v15, %v8106_v33  ;;  %v9254_v9 = vpop.f32.mrb[218].mxu1  ;;  %v8297_v4 = vadd.f32 %v8296_v26, %v16074_v20 }
 0x838   :  { %17940 = vst [vmem:[#allocation20_spill] sm:$0xff] %v16082_v60  ;;  %v16088_v55 = vadd.f32 %v9368_v23, %v9254_v9  ;;  %v8109_v8 = vpop.f32.mrb[219].mxu1 }
 0x839   :  { %v7833_v51 = vpop.f32.mrb[52].mxu0  ;;  %17941 = vst [vmem:[#allocation22_spill] sm:$0xff] %v16084_v61  ;;  %v16090_v5 = vadd.f32 %v9366_v34, %v8109_v8  ;;  %v8369_v8 = vmul.f32 %v16062_v36, %v16062_v36  ;;  %v8298_v34 = vadd.f32 %v8297_v4, %v16062_v36  ;;  %v8371_v4 = vmul.f32 %v16084_v61, %v16084_v61 }
 0x83a   :  { %v9369_v43 = vadd.f32 %v7833_v51, %v15819_v44  ;;  %v7835_v16 = vpop.f32.mrb[53].mxu0  ;;  %17942 = vst [vmem:[#allocation25_spill] sm:$0xff] %v16088_v55  ;;  %v8368_v44 = vmul.f32 %v16074_v20, %v16074_v20 }
 0x83b   :  { %v7836_v13 = vpop.f32.mrb[54].mxu0 }
 0x83c   :  { %v9370_v42 = vadd.f32 %v7836_v13, %v15821_v0  ;;  %v7838_v46 = vpop.f32.mrb[55].mxu0  ;;  %v8431_v51 = vadd.f32 %v8430_v32, %v8368_v44  ;;  %v8299_v32 = vadd.f32 %v8298_v34, %v16071_v31 }
 0x83d   :  { %v9257_v30 = vpop.f32.mrb[220].mxu1 }
 0x83e   :  { %v8122_v16 = vpop.f32.mrb[221].mxu1 }
 0x83f   :  { %v16096_v0 = vadd.f32 %v9369_v43, %v8122_v16  ;;  %v9258_v46 = vpop.f32.mrb[222].mxu1  ;;  %v8370_v43 = vmul.f32 %v16071_v31, %v16071_v31 }
 0x840   :  { %v8125_v13 = vpop.f32.mrb[223].mxu1 }
 0x841   :  { %v7841_v15 = vpop.f32.mrb[56].mxu0  ;;  %17943 = vst [vmem:[#allocation27_spill] sm:$0xff] %v16096_v0  ;;  %v16104_v9 = vadd.f32 %v9370_v42, %v8125_v13 }
 0x842   :  { %v9371_v18 = vadd.f32 %v7841_v15, %v15824_v27  ;;  %v7843_v24 = vpop.f32.mrb[57].mxu0  ;;  %v8432_v27 = vadd.f32 %v8431_v51, %v8369_v8  ;;  %v8300_v51 = vadd.f32 %v8299_v32, %v16084_v61 }
 0x843   :  { %v7844_v23 = vpop.f32.mrb[58].mxu0  ;;  %17945 = vst [vmem:[#allocation9_spill] sm:$0xff] %v16104_v9 }
 0x844   :  { %v16101_v22 = vadd.f32 %v9371_v18, %v9257_v30  ;;  %v9372_v47 = vadd.f32 %v7844_v23, %v15829_v56  ;;  %v7846_v33 = vpop.f32.mrb[59].mxu0  ;;  %v8433_v30 = vadd.f32 %v8432_v27, %v8370_v43 }
 0x845   :  { %v9261_v15 = vpop.f32.mrb[224].mxu1  ;;  %v8372_v33 = vmul.f32 %v16090_v5, %v16090_v5 }
 0x846   :  { %17944 = vst [vmem:[#allocation24_spill] sm:$0xff] %v16101_v22  ;;  %v16106_v26 = vadd.f32 %v9372_v47, %v9258_v46  ;;  %v8138_v24 = vpop.f32.mrb[225].mxu1  ;;  %v8434_v47 = vadd.f32 %v8433_v30, %v8371_v4 }
 0x847   :  { %v9262_v16 = vpop.f32.mrb[226].mxu1 }
 0x848   :  { %17946 = vst [vmem:[#allocation33_spill] sm:$0xff] %v16106_v26  ;;  %v8141_v34 = vpop.f32.mrb[227].mxu1 }
 0x849   :  { %v7849_v44 = vpop.f32.mrb[60].mxu0 }
 0x84a   :  { %v9373_v56 = vadd.f32 %v7849_v44, %v15831_v12  ;;  %v7851_v18 = vpop.f32.mrb[61].mxu0  ;;  %v8301_v12 = vadd.f32 %v8300_v51, %v16090_v5  ;;  %v8435_v44 = vadd.f32 %v8434_v47, %v8372_v33 }
 0x84b   :  { %v7852_v42 = vpop.f32.mrb[62].mxu0 }
 0x84c   :  { %v9374_v23 = vadd.f32 %v7852_v42, %v15833_v14  ;;  %v16116_v46 = vadd.f32 %v9373_v56, %v8138_v24  ;;  %v7854_v8 = vpop.f32.mrb[63].mxu0  ;;  %v8373_v24 = vmul.f32 %v16082_v60, %v16082_v60  ;;  %v8302_v4 = vadd.f32 %v8301_v12, %v16082_v60 }
 0x84d   :  { %v9265_v43 = vpop.f32.mrb[228].mxu1  ;;  %v8375_v12 = vmul.f32 %v16096_v0, %v16096_v0  ;;  %v8376_v60 = vmul.f32 %v16104_v9, %v16104_v9 }
 0x84e   :  { %17947 = vst [vmem:[#allocation37_spill] sm:$0xff] %v16116_v46  ;;  %v16120_v13 = vadd.f32 %v9374_v23, %v8141_v34  ;;  %v8154_v61 = vpop.f32.mrb[229].mxu1  ;;  %v8436_v8 = vadd.f32 %v8435_v44, %v8373_v24  ;;  %v8303_v47 = vadd.f32 %v8302_v4, %v16088_v55 }
 0x84f   :  { %v9266_v56 = vpop.f32.mrb[230].mxu1 }
 0x850   :  { %17948 = vst [vmem:[#allocation36_spill] sm:$0xff] %v16120_v13  ;;  %v8157_v51 = vpop.f32.mrb[231].mxu1 }
 0x851   :  { %v7857_v27 = vpop.f32.mrb[64].mxu0 }
 0x852   :  { %v9375_v18 = vadd.f32 %v7857_v27, %v15835_v52  ;;  %v7859_v32 = vpop.f32.mrb[65].mxu0  ;;  %v8374_v52 = vmul.f32 %v16088_v55, %v16088_v55 }
 0x853   :  { %v7860_v14 = vpop.f32.mrb[66].mxu0 }
 0x854   :  { %v16127_v30 = vadd.f32 %v9375_v18, %v9261_v15  ;;  %v9376_v42 = vadd.f32 %v7860_v14, %v15837_v50  ;;  %v7862_v23 = vpop.f32.mrb[67].mxu0  ;;  %v8437_v15 = vadd.f32 %v8436_v8, %v8374_v52 }
 0x855   :  { %v16135_v27 = vpop.f32.mrb[232].mxu1 }
 0x856   :  { %17949 = vst [vmem:[#allocation19_spill] sm:$0xff] %v16127_v30  ;;  %v16130_v34 = vadd.f32 %v9376_v42, %v9262_v16  ;;  %v8170_v32 = vpop.f32.mrb[233].mxu1  ;;  %v8304_v16 = vadd.f32 %v8303_v47, %v16096_v0  ;;  %v8438_v55 = vadd.f32 %v8437_v15, %v8375_v12  ;;  %v8377_v12 = vmul.f32 %v16101_v22, %v16101_v22 }
 0x857   :  { %v16140_v44 = vpop.f32.mrb[234].mxu1 }
 0x858   :  { %17950 = vst [vmem:[#allocation38_spill] sm:$0xff] %v16130_v34  ;;  %v8173_v23 = vpop.f32.mrb[235].mxu1 }
 0x859   :  { %v7865_v33 = vpop.f32.mrb[68].mxu0 }
 0x85a   :  { %v9377_v18 = vadd.f32 %v7865_v33, %v15839_v53  ;;  %v7867_v50 = vpop.f32.mrb[69].mxu0  ;;  %v8305_v53 = vadd.f32 %v8304_v16, %v16104_v9 }
 0x85b   :  { %v7868_v14 = vpop.f32.mrb[70].mxu0  ;;  %v8439_v50 = vadd.f32 %v8438_v55, %v8376_v60  ;;  %v8378_v55 = vmul.f32 %v16106_v26, %v16106_v26 }
 0x85c   :  { %v16143_v24 = vadd.f32 %v9377_v18, %v8154_v61  ;;  %v9378_v4 = vadd.f32 %v7868_v14, %v15841_v1  ;;  %v7870_v42 = vpop.f32.mrb[71].mxu0 }
 0x85d   :  { %v16151_v33 = vpop.f32.mrb[236].mxu1  ;;  %v8440_v60 = vadd.f32 %v8439_v50, %v8377_v12 }
 0x85e   :  { %17951 = vst [vmem:[#allocation39_spill] sm:$0xff] %v16143_v24  ;;  %v16148_v8 = vadd.f32 %v9378_v4, %v8157_v51  ;;  %v16154_v18 = vpop.f32.mrb[237].mxu1  ;;  %v8306_v51 = vadd.f32 %v8305_v53, %v16101_v22 }
 0x85f   :  { %v16156_v14 = vpop.f32.mrb[238].mxu1 }
 0x860   :  { %17952 = vst [vmem:[#allocation40_spill] sm:$0xff] %v16148_v8  ;;  %v16164_v42 = vpop.f32.mrb[239].mxu1 }
 0x861   :  { %v7873_v52 = vpop.f32.mrb[72].mxu0 }
 0x862   :  { %v9379_v47 = vadd.f32 %v7873_v52, %v15845_v48  ;;  %v7875_v61 = vpop.f32.mrb[73].mxu0  ;;  %v8307_v52 = vadd.f32 %v8306_v51, %v16106_v26  ;;  %v8380_v51 = vmul.f32 %v16120_v13, %v16120_v13 }
 0x863   :  { %v7876_v1 = vpop.f32.mrb[74].mxu0  ;;  %v8379_v61 = vmul.f32 %v16116_v46, %v16116_v46 }
 0x864   :  { %v16161_v15 = vadd.f32 %v9379_v47, %v9265_v43  ;;  %v9380_v16 = vadd.f32 %v7876_v1, %v15847_v25  ;;  %v7878_v4 = vpop.f32.mrb[75].mxu0  ;;  %v8308_v43 = vadd.f32 %v8307_v52, %v16116_v46  ;;  %v8441_v25 = vadd.f32 %v8440_v60, %v8378_v55 }
 0x865   :  { %v16173_v53 = vpop.f32.mrb[240].mxu1 }
 0x866   :  { %17953 = vst [vmem:[#allocation41_spill] sm:$0xff] %v16161_v15  ;;  %v16166_v48 = vadd.f32 %v9380_v16, %v9266_v56  ;;  %v16177_v50 = vpop.f32.mrb[241].mxu1  ;;  %v8442_v16 = vadd.f32 %v8441_v25, %v8379_v61  ;;  %v8309_v60 = vadd.f32 %v8308_v43, %v16120_v13 }
 0x867   :  { %v16179_v12 = vpop.f32.mrb[242].mxu1 }
 0x868   :  { %17954 = vst [vmem:[#allocation42_spill] sm:$0xff] %v16166_v48  ;;  %v16186_v0 = vpop.f32.mrb[243].mxu1  ;;  %v8443_v55 = vadd.f32 %v8442_v16, %v8380_v51  ;;  %v8310_v52 = vadd.f32 %v8309_v60, %v16127_v30 }
 0x869   :  { %v7881_v9 = vpop.f32.mrb[76].mxu0 }
 0x86a   :  { %v9381_v47 = vadd.f32 %v7881_v9, %v15851_v63  ;;  %v7883_v1 = vpop.f32.mrb[77].mxu0  ;;  %v8381_v63 = vmul.f32 %v16127_v30, %v16127_v30 }
 0x86b   :  { %v7884_v56 = vpop.f32.mrb[78].mxu0 }
 0x86c   :  { %v16183_v4 = vadd.f32 %v9381_v47, %v8170_v32  ;;  %v9382_v26 = vadd.f32 %v7884_v56, %v15853_v39  ;;  %v7886_v22 = vpop.f32.mrb[79].mxu0  ;;  %v8444_v32 = vadd.f32 %v8443_v55, %v8381_v63  ;;  %v8382_v39 = vmul.f32 %v16130_v34, %v16130_v34 }
 0x86d   :  { %v16194_v25 = vpop.f32.mrb[244].mxu1 }
 0x86e   :  { %17955 = vst [vmem:[#allocation43_spill] sm:$0xff] %v16183_v4  ;;  %v16191_v9 = vadd.f32 %v9382_v26, %v8173_v23  ;;  %v16199_v1 = vpop.f32.mrb[245].mxu1  ;;  %v8311_v26 = vadd.f32 %v8310_v52, %v16130_v34  ;;  %v8383_v23 = vmul.f32 %v16143_v24, %v16143_v24  ;;  %v8384_v52 = vmul.f32 %v16148_v8, %v16148_v8 }
 0x86f   :  { %v16201_v56 = vpop.f32.mrb[246].mxu1 }
 0x870   :  { %17956 = vst [vmem:[#allocation44_spill] sm:$0xff] %v16191_v9  ;;  %v16210_v63 = vpop.f32.mrb[247].mxu1  ;;  %v8312_v55 = vadd.f32 %v8311_v26, %v16143_v24 }
 0x871   :  { %v7889_v61 = vpop.f32.mrb[80].mxu0 }
 0x872   :  { %v9383_v22 = vadd.f32 %v7889_v61, %v15857_v35  ;;  %v7891_v47 = vpop.f32.mrb[81].mxu0  ;;  %v8445_v35 = vadd.f32 %v8444_v32, %v8382_v39 }
 0x873   :  { %v7892_v43 = vpop.f32.mrb[82].mxu0 }
 0x874   :  { %v16207_v16 = vadd.f32 %v9383_v22, %v16135_v27  ;;  %v9384_v51 = vadd.f32 %v7892_v43, %v15859_v21  ;;  %v7894_v60 = vpop.f32.mrb[83].mxu0  ;;  %v8446_v47 = vadd.f32 %v8445_v35, %v8383_v23  ;;  %v8313_v27 = vadd.f32 %v8312_v55, %v16148_v8 }
 0x875   :  { %v16218_v30 = vpop.f32.mrb[248].mxu1  ;;  %v8385_v21 = vmul.f32 %v16161_v15, %v16161_v15 }
 0x876   :  { %17957 = vst [vmem:[#allocation45_spill] sm:$0xff] %v16207_v16  ;;  %v16214_v61 = vadd.f32 %v9384_v51, %v16140_v44  ;;  %v16224_v39 = vpop.f32.mrb[249].mxu1  ;;  %v8447_v26 = vadd.f32 %v8446_v47, %v8384_v52  ;;  %v8314_v23 = vadd.f32 %v8313_v27, %v16161_v15  ;;  %v8387_v47 = vmul.f32 %v16183_v4, %v16183_v4 }
 0x877   :  { %v16226_v44 = vpop.f32.mrb[250].mxu1 }
 0x878   :  { %17958 = vst [vmem:[#allocation46_spill] sm:$0xff] %v16214_v61  ;;  %v16233_v55 = vpop.f32.mrb[251].mxu1  ;;  %v8448_v8 = vadd.f32 %v8447_v26, %v8385_v21 }
 0x879   :  { %v7897_v34 = vpop.f32.mrb[84].mxu0 }
 0x87a   :  { %v9385_v22 = vadd.f32 %v7897_v34, %v15863_v6  ;;  %v7899_v32 = vpop.f32.mrb[85].mxu0  ;;  %v8386_v6 = vmul.f32 %v16166_v48, %v16166_v48 }
 0x87b   :  { %v7900_v43 = vpop.f32.mrb[86].mxu0  ;;  %v8315_v32 = vadd.f32 %v8314_v23, %v16166_v48  ;;  %v8388_v23 = vmul.f32 %v16191_v9, %v16191_v9  ;;  %v17960_v48 = vld [vmem:[#allocation35_spill] sm:$0xff] }
 0x87c   :  { %v16230_v51 = vadd.f32 %v9385_v22, %v16154_v18  ;;  %v9386_v60 = vadd.f32 %v7900_v43, %v15865_v49  ;;  %v7902_v35 = vpop.f32.mrb[87].mxu0  ;;  %v8449_v27 = vadd.f32 %v8448_v8, %v8386_v6 }
 0x87d   :  { %v16243_v18 = vpop.f32.mrb[252].mxu1  ;;  %v8316_v49 = vadd.f32 %v8315_v32, %v16183_v4  ;;  %v8389_v32 = vmul.f32 %v16207_v16, %v16207_v16 }
 0x87e   :  { %v16238_v34 = vadd.f32 %v9386_v60, %v16164_v42  ;;  %v16247_v43 = vpop.f32.mrb[253].mxu1  ;;  %v8450_v42 = vadd.f32 %v8449_v27, %v8387_v47 }
 0x87f   :  { %v16249_v35 = vpop.f32.mrb[254].mxu1 }
 0x880   :  { %17959 = vst [vmem:[#allocation47_spill] sm:$0xff] %v16238_v34  ;;  %v16257_v6 = vpop.f32.mrb[255].mxu1  ;;  %v8451_v47 = vadd.f32 %v8450_v42, %v8388_v23  ;;  %v17962_v23 = vld [vmem:[#allocation11_spill] sm:$0xff] }
 0x881   :  { %v7905_v52 = vpop.f32.mrb[88].mxu0 }
 0x882   :  { %v9387_v22 = vadd.f32 %v7905_v52, %v15867_v41  ;;  %v7907_v21 = vpop.f32.mrb[89].mxu0  ;;  %v8317_v41 = vadd.f32 %v8316_v49, %v16191_v9 }
 0x883   :  { %v7908_v26 = vpop.f32.mrb[90].mxu0 }
 0x884   :  { %v16254_v60 = vadd.f32 %v9387_v22, %v16151_v33  ;;  %v9388_v15 = vadd.f32 %v7908_v26, %v17960_v48  ;;  %v7910_v8 = vpop.f32.mrb[91].mxu0  ;;  %v8318_v27 = vadd.f32 %v8317_v41, %v16207_v16  ;;  %v8452_v33 = vadd.f32 %v8451_v47, %v8389_v32  ;;  %v17961_v22 = vld [vmem:[#allocation10_spill] sm:$0xff] }
 0x885   :  { %v16266_v4 = vpop.f32.mrb[0].mxu1  ;;  %v8390_v48 = vmul.f32 %v16214_v61, %v16214_v61 }
 0x886   :  { %v16263_v52 = vadd.f32 %v9388_v15, %v16156_v14  ;;  %v16271_v49 = vpop.f32.mrb[1].mxu1  ;;  %v8319_v14 = vadd.f32 %v8318_v27, %v16214_v61  ;;  %v8391_v15 = vmul.f32 %v16230_v51, %v16230_v51  ;;  %v8392_v27 = vmul.f32 %v16238_v34, %v16238_v34 }
 0x887   :  { %v16273_v24 = vpop.f32.mrb[2].mxu1 }
 0x888   :  { %v16282_v47 = vpop.f32.mrb[3].mxu1 }
 0x889   :  { %v7913_v21 = vpop.f32.mrb[92].mxu0 }
 0x88a   :  { %v9389_v26 = vadd.f32 %v7913_v21, %v17961_v22  ;;  %v7915_v8 = vpop.f32.mrb[93].mxu0  ;;  %v8453_v21 = vadd.f32 %v8452_v33, %v8390_v48  ;;  %v8320_v22 = vadd.f32 %v8319_v14, %v16230_v51  ;;  %v17964_v14 = vld [vmem:[#allocation18_spill] sm:$0xff] }
 0x88b   :  { %v7916_v9 = vpop.f32.mrb[94].mxu0 }
 0x88c   :  { %v16279_v42 = vadd.f32 %v9389_v26, %v16177_v50  ;;  %v9390_v41 = vadd.f32 %v7916_v9, %v17962_v23  ;;  %v7918_v32 = vpop.f32.mrb[95].mxu0  ;;  %v8454_v16 = vadd.f32 %v8453_v21, %v8391_v15  ;;  %v8321_v13 = vadd.f32 %v8320_v22, %v16238_v34  ;;  %v17963_v9 = vld [vmem:[#allocation14_spill] sm:$0xff] }
 0x88d   :  { %v8393_v50 = vmul.f32 %v16254_v60, %v16254_v60  ;;  %v8394_v22 = vmul.f32 %v16263_v52, %v16263_v52 }
 0x88e   :  { %v16286_v8 = vadd.f32 %v9390_v41, %v16186_v0  ;;  %v8455_v33 = vadd.f32 %v8454_v16, %v8392_v27  ;;  %v8322_v48 = vadd.f32 %v8321_v13, %v16254_v60  ;;  %v8395_v16 = vmul.f32 %v16279_v42, %v16279_v42 }
 0x890   :  { %v8456_v21 = vadd.f32 %v8455_v33, %v8393_v50  ;;  %v8396_v33 = vmul.f32 %v16286_v8, %v16286_v8 }
 0x891   :  { %v7921_v61 = vpop.f32.mrb[96].mxu0 }
 0x892   :  { %v9391_v26 = vadd.f32 %v7921_v61, %v17963_v9  ;;  %v7923_v23 = vpop.f32.mrb[97].mxu0  ;;  %v8323_v61 = vadd.f32 %v8322_v48, %v16263_v52  ;;  %v8457_v13 = vadd.f32 %v8456_v21, %v8394_v22  ;;  %v17965_v9 = vld [vmem:[#allocation21_spill] sm:$0xff] }
 0x893   :  { %v7924_v32 = vpop.f32.mrb[98].mxu0 }
 0x894   :  { %v16296_v0 = vadd.f32 %v9391_v26, %v16173_v53  ;;  %v9392_v15 = vadd.f32 %v7924_v32, %v17964_v14  ;;  %v7926_v41 = vpop.f32.mrb[99].mxu0  ;;  %v8324_v53 = vadd.f32 %v8323_v61, %v16279_v42  ;;  %v8458_v50 = vadd.f32 %v8457_v13, %v8395_v16  ;;  %v17966_v14 = vld [vmem:[#allocation28_spill] sm:$0xff] }
 0x896   :  { %v16302_v34 = vadd.f32 %v9392_v15, %v16179_v12  ;;  %v8325_v41 = vadd.f32 %v8324_v53, %v16286_v8  ;;  %v8397_v21 = vmul.f32 %v16296_v0, %v16296_v0  ;;  %v8459_v61 = vadd.f32 %v8458_v50, %v8396_v33  ;;  %v17969_v50 = vld [vmem:[#allocation34_spill] sm:$0xff] }
 0x898   :  { %v8326_v16 = vadd.f32 %v8325_v41, %v16296_v0  ;;  %v8460_v13 = vadd.f32 %v8459_v61, %v8397_v21 }
 0x899   :  { %v7929_v27 = vpop.f32.mrb[100].mxu0 }
 0x89a   :  { %v9393_v26 = vadd.f32 %v7929_v27, %v17965_v9  ;;  %v7931_v23 = vpop.f32.mrb[101].mxu0  ;;  %v17967_v9 = vld [vmem:[#allocation26_spill] sm:$0xff]  ;;  %v8327_v53 = vadd.f32 %v8326_v16, %v16302_v34 }
 0x89b   :  { %v7932_v32 = vpop.f32.mrb[102].mxu0 }
 0x89c   :  { %v16312_v12 = vadd.f32 %v9393_v26, %v16199_v1  ;;  %v9394_v48 = vadd.f32 %v7932_v32, %v17966_v14  ;;  %v7934_v15 = vpop.f32.mrb[103].mxu0  ;;  %v8398_v1 = vmul.f32 %v16302_v34, %v16302_v34 }
 0x89e   :  { %v16319_v22 = vadd.f32 %v9394_v48, %v16210_v63  ;;  %v8399_v14 = vmul.f32 %v16312_v12, %v16312_v12  ;;  %v8461_v15 = vadd.f32 %v8460_v13, %v8398_v1  ;;  %v8328_v41 = vadd.f32 %v8327_v53, %v16312_v12  ;;  %v17971_v53 = vld [vmem:[#allocation8_spill] sm:$0xff] }
 0x8a0   :  { %v8462_v61 = vadd.f32 %v8461_v15, %v8399_v14 }
 0x8a1   :  { %v7937_v27 = vpop.f32.mrb[104].mxu0 }
 0x8a2   :  { %v9395_v26 = vadd.f32 %v7937_v27, %v17967_v9  ;;  %v7939_v23 = vpop.f32.mrb[105].mxu0  ;;  %v8400_v27 = vmul.f32 %v16319_v22, %v16319_v22  ;;  %v8329_v9 = vadd.f32 %v8328_v41, %v16319_v22 }
 0x8a3   :  { %v7940_v32 = vpop.f32.mrb[106].mxu0 }
 0x8a4   :  { %v16329_v63 = vadd.f32 %v9395_v26, %v16194_v25  ;;  %v9396_v33 = vadd.f32 %v7940_v32, %v17969_v50  ;;  %v7942_v48 = vpop.f32.mrb[107].mxu0  ;;  %v17970_v26 = vld [vmem:[#allocation29_spill] sm:$0xff]  ;;  %v8463_v13 = vadd.f32 %v8462_v61, %v8400_v27 }
 0x8a6   :  { %17968 = vst [vmem:[#allocation35_spill] sm:$0xff] %v16329_v63  ;;  %v16334_v21 = vadd.f32 %v9396_v33, %v16201_v56  ;;  %v8401_v25 = vmul.f32 %v16329_v63, %v16329_v63  ;;  %v8330_v1 = vadd.f32 %v8329_v9, %v16329_v63 }
 0x8a8   :  { %v8464_v48 = vadd.f32 %v8463_v13, %v8401_v25  ;;  %v8402_v15 = vmul.f32 %v16334_v21, %v16334_v21  ;;  %v17972_v13 = vld [vmem:[#allocation30_spill] sm:$0xff] }
 0x8a9   :  { %v7945_v16 = vpop.f32.mrb[108].mxu0 }
 0x8aa   :  { %v9397_v23 = vadd.f32 %v7945_v16, %v17970_v26  ;;  %v7947_v32 = vpop.f32.mrb[109].mxu0  ;;  %v8331_v16 = vadd.f32 %v8330_v1, %v16334_v21  ;;  %v8465_v9 = vadd.f32 %v8464_v48, %v8402_v15 }
 0x8ab   :  { %v7948_v50 = vpop.f32.mrb[110].mxu0 }
 0x8ac   :  { %v16344_v56 = vadd.f32 %v9397_v23, %v16224_v39  ;;  %v9398_v14 = vadd.f32 %v7948_v50, %v17971_v53  ;;  %v7950_v33 = vpop.f32.mrb[111].mxu0 }
 0x8ae   :  { %v16350_v41 = vadd.f32 %v9398_v14, %v16233_v55  ;;  %v8403_v61 = vmul.f32 %v16344_v56, %v16344_v56  ;;  %v8332_v39 = vadd.f32 %v8331_v16, %v16344_v56 }
 0x8b0   :  { %v8466_v25 = vadd.f32 %v8465_v9, %v8403_v61  ;;  %v8404_v50 = vmul.f32 %v16350_v41, %v16350_v41  ;;  %v8333_v14 = vadd.f32 %v8332_v39, %v16350_v41 }
 0x8b1   :  { %v7953_v27 = vpop.f32.mrb[112].mxu0 }
 0x8b2   :  { %v9399_v26 = vadd.f32 %v7953_v27, %v15903_v38  ;;  %v7955_v23 = vpop.f32.mrb[113].mxu0  ;;  %v8467_v38 = vadd.f32 %v8466_v25, %v8404_v50 }
 0x8b3   :  { %v7956_v32 = vpop.f32.mrb[114].mxu0 }
 0x8b4   :  { %v16360_v55 = vadd.f32 %v9399_v26, %v16218_v30  ;;  %v9400_v1 = vadd.f32 %v7956_v32, %v17972_v13  ;;  %v7958_v53 = vpop.f32.mrb[115].mxu0 }
 0x8b6   :  { %v8405_v33 = vmul.f32 %v16360_v55, %v16360_v55  ;;  %v16367_v48 = vadd.f32 %v9400_v1, %v16226_v44  ;;  %v8334_v15 = vadd.f32 %v8333_v14, %v16360_v55 }
 0x8b8   :  { %v8468_v61 = vadd.f32 %v8467_v38, %v8405_v33  ;;  %v8406_v30 = vmul.f32 %v16367_v48, %v16367_v48  ;;  %v8335_v39 = vadd.f32 %v8334_v15, %v16367_v48 }
 0x8b9   :  { %v7961_v16 = vpop.f32.mrb[116].mxu0 }
 0x8ba   :  { %v9401_v27 = vadd.f32 %v7961_v16, %v15913_v54  ;;  %v7963_v9 = vpop.f32.mrb[117].mxu0  ;;  %v8469_v25 = vadd.f32 %v8468_v61, %v8406_v30 }
 0x8bb   :  { %v7964_v26 = vpop.f32.mrb[118].mxu0 }
 0x8bc   :  { %v16375_v23 = vadd.f32 %v9401_v27, %v16247_v43  ;;  %v9402_v44 = vadd.f32 %v7964_v26, %v15918_v10  ;;  %v7966_v32 = vpop.f32.mrb[119].mxu0 }
 0x8be   :  { %v8336_v50 = vadd.f32 %v8335_v39, %v16375_v23  ;;  %v8407_v13 = vmul.f32 %v16375_v23, %v16375_v23  ;;  %v16382_v1 = vadd.f32 %v9402_v44, %v16257_v6 }
 0x8c0   :  { %17973 = vst [vmem:[#allocation10_spill] sm:$0xff] %v16382_v1  ;;  %v8470_v54 = vadd.f32 %v8469_v25, %v8407_v13  ;;  %v8337_v53 = vadd.f32 %v8336_v50, %v16382_v1  ;;  %v8408_v14 = vmul.f32 %v16382_v1, %v16382_v1 }
 0x8c1   :  { %v7969_v43 = vpop.f32.mrb[120].mxu0 }
 0x8c2   :  { %v8471_v33 = vadd.f32 %v8470_v54, %v8408_v14  ;;  %v9403_v10 = vadd.f32 %v7969_v43, %v15924_v57  ;;  %v7971_v38 = vpop.f32.mrb[121].mxu0 }
 0x8c3   :  { %v7972_v15 = vpop.f32.mrb[122].mxu0 }
 0x8c4   :  { %v16389_v16 = vadd.f32 %v9403_v10, %v16243_v18  ;;  %v9404_v61 = vadd.f32 %v7972_v15, %v15930_v17  ;;  %v7974_v30 = vpop.f32.mrb[123].mxu0 }
 0x8c5   :  { %v17975_v30 = vld [vmem:[#allocation31_spill] sm:$0xff] }
 0x8c6   :  { %17974 = vst [vmem:[#allocation11_spill] sm:$0xff] %v16389_v16  ;;  %v8338_v6 = vadd.f32 %v8337_v53, %v16389_v16  ;;  %v8409_v27 = vmul.f32 %v16389_v16, %v16389_v16  ;;  %v16396_v9 = vadd.f32 %v9404_v61, %v16249_v35 }
 0x8c8   :  { %v8472_v26 = vadd.f32 %v8471_v33, %v8409_v27  ;;  %v8410_v57 = vmul.f32 %v16396_v9, %v16396_v9  ;;  %v8339_v39 = vadd.f32 %v8338_v6, %v16396_v9 }
 0x8c9   :  { %v7977_v44 = vpop.f32.mrb[124].mxu0 }
 0x8ca   :  { %v9405_v18 = vadd.f32 %v7977_v44, %v15935_v62  ;;  %v7979_v32 = vpop.f32.mrb[125].mxu0  ;;  %v8473_v17 = vadd.f32 %v8472_v26, %v8410_v57 }
 0x8cb   :  { %v7980_v25 = vpop.f32.mrb[126].mxu0 }
 0x8cc   :  { %v9406_v50 = vadd.f32 %v7980_v25, %v15940_v29  ;;  %v16404_v13 = vadd.f32 %v9405_v18, %v16271_v49  ;;  %v7982_v54 = vpop.f32.mrb[127].mxu0 }
 0x8ce   :  { %v8340_v35 = vadd.f32 %v8339_v39, %v16404_v13  ;;  %v8411_v53 = vmul.f32 %v16404_v13, %v16404_v13  ;;  %v16410_v14 = vadd.f32 %v9406_v50, %v16282_v47 }
 0x8d0   :  { %v8474_v43 = vadd.f32 %v8473_v17, %v8411_v53  ;;  %v8341_v62 = vadd.f32 %v8340_v35, %v16410_v14  ;;  %v8412_v33 = vmul.f32 %v16410_v14, %v16410_v14 }
 0x8d1   :  { %v7985_v10 = vpop.f32.mrb[128].mxu0 }
 0x8d2   :  { %v8475_v29 = vadd.f32 %v8474_v43, %v8412_v33  ;;  %v9407_v49 = vadd.f32 %v7985_v10, %v15945_v58  ;;  %v7987_v38 = vpop.f32.mrb[129].mxu0 }
 0x8d3   :  { %v7988_v15 = vpop.f32.mrb[130].mxu0  ;;  %v18000_v38 = vld [vmem:[#allocation46_spill] sm:$0xff] }
 0x8d4   :  { %v16417_v61 = vadd.f32 %v9407_v49, %v16266_v4  ;;  %v9408_v6 = vadd.f32 %v7988_v15, %v17975_v30  ;;  %v7990_v27 = vpop.f32.mrb[131].mxu0  ;;  %v17976_v15 = vld [vmem:[#allocation15_spill] sm:$0xff]  ;;  %v17999_v30 = vld [vmem:[#allocation45_spill] sm:$0xff] }
 0x8d5   :  { %v17998_v27 = vld [vmem:[#allocation44_spill] sm:$0xff] }
 0x8d6   :  { %v8342_v47 = vadd.f32 %v8341_v62, %v16417_v61  ;;  %v8413_v26 = vmul.f32 %v16417_v61, %v16417_v61  ;;  %v16424_v57 = vadd.f32 %v9408_v6, %v16273_v24  ;;  %v17977_v6 = vld [vmem:[#allocation12_spill] sm:$0xff] }
 0x8d8   :  { %v8476_v39 = vadd.f32 %v8475_v29, %v8413_v26  ;;  %v8343_v44 = vadd.f32 %v8342_v47, %v16424_v57  ;;  %v8414_v58 = vmul.f32 %v16424_v57, %v16424_v57  ;;  %v17978_v47 = vld [vmem:[#allocation13_spill] sm:$0xff]  ;;  %v17997_v26 = vld [vmem:[#allocation43_spill] sm:$0xff] }
 0x8da   :  { %v8344_v18 = vrot.slane %v8343_v44, 4  ;;  %v8477_v4 = vadd.f32 %v8476_v39, %v8414_v58 }
 0x8dc   :  { %v8345_v32 = vadd.f32 %v8344_v18, %v8343_v44  ;;  %v8478_v17 = vrot.slane %v8477_v4, 4  ;;  %v17994_v44 = vld [vmem:[#allocation40_spill] sm:$0xff] }
 0x8dd   :  { %v16556_v18 = vld [vmem:[%s17547_s10] ss:$0 sm:$0xff] }
 0x8de   :  { %v8346_v25 = vrot.slane %v8345_v32, 2  ;;  %v8479_v50 = vadd.f32 %v8478_v17, %v8477_v4  ;;  %v17984_v17 = vld [vmem:[#allocation20_spill] sm:$0xff] }
 0x8e0   :  { %v8347_v54 = vadd.f32 %v8346_v25, %v8345_v32  ;;  %v8480_v35 = vrot.slane %v8479_v50, 2  ;;  %v17985_v25 = vld [vmem:[#allocation25_spill] sm:$0xff] }
 0x8e2   :  { %v8348_v53 = vrot.slane %v8347_v54, 1  ;;  %v8481_v43 = vadd.f32 %v8480_v35, %v8479_v50  ;;  %v17986_v50 = vld [vmem:[#allocation27_spill] sm:$0xff] }
 0x8e3   :  { %v18001_v35 = vld [vmem:[#allocation47_spill] sm:$0xff] }
 0x8e4   :  { %v8349_v62 = vadd.f32 %v8348_v53, %v8347_v54  ;;  %v8482_v33 = vrot.slane %v8481_v43, 1  ;;  %v17979_v54 = vld [vmem:[#allocation17_spill] sm:$0xff] }
 0x8e6   :  { %v16429_v24 = vmul.f32 0.001953125, %v8349_v62  ;;  %v8483_v10 = vadd.f32 %v8482_v33, %v8481_v43  ;;  %v17980_v62 = vld [vmem:[#allocation23_spill] sm:$0xff]  ;;  %v17983_v33 = vld [vmem:[#allocation22_spill] sm:$0xff] }
 0x8e8   :  { %v8484_v29 = vmul.f32 0.001953125, %v8483_v10  ;;  %v8485_v49 = vmul.f32 %v16429_v24, %v16429_v24  ;;  %v17981_v10 = vld [vmem:[#allocation16_spill] sm:$0xff]  ;;  %v18002_v32 = vsub.f32 %v16424_v57, %v16429_v24  ;;  %v18004_v39 = vsub.f32 %v17977_v6, %v16429_v24 }
 0x8e9   :  { %v16587_v57 = vld [vmem:[%s17548_s11] ss:$0 sm:$0xff]  ;;  %v18008_v6 = vsub.f32 %v15991_v37, %v16429_v24  ;;  %v18009_v46 = vsub.f32 %v16004_v28, %v16429_v24  ;;  %v18011_v37 = vsub.f32 %v15998_v45, %v16429_v24  ;;  %v18012_v28 = vsub.f32 %v16019_v2, %v16429_v24  ;;  %s11082_s11 = smov [#allocation5]  }
 0x8ea   :  { %v8486_v58 = vsub.f32 %v8484_v29, %v8485_v49  ;;  %v17982_v49 = vld [vmem:[#allocation32_spill] sm:$0xff]  ;;  %v17996_v29 = vld [vmem:[#allocation42_spill] sm:$0xff]  ;;  %18005 = vst [vmem:[#allocation14_spill] sm:$0xff] %v16587_v57  ;;  %s8892_s28 = sshll.u32 %s11082_s11, 4  ;;  %s8893_s28 = int_to_ptr.vmem [resolvable:$true] %s8892_s28 }
 0x8eb   :  { %s11045_s29 = scalar_lea.vmem %s8893_s28, 8192  ;;  %p11050_p1 = scmp.lt.s32.totalorder %s8893_s28, %s8893_s28 }
 0x8ec   :  { %v8551_v53 = vadd.f32 1e-05, %v8486_v58  ;;  %v18003_v58 = vsub.f32 %v17976_v15, %v16429_v24  ;;  %v18007_v15 = vsub.f32 %v15968_v40, %v16429_v24  ;;  %v18010_v40 = vsub.f32 %v15986_v11, %v16429_v24  ;;  %p11046_p0 = scmp.ne.s32.totalorder %s8893_s28, %s11045_s29  ;;  %p11051_p2 = scmp.lt.s32.totalorder %s11045_s29, %s11045_s29 }
 0x8ee   :  { %11038 = vrsqrt.f32 %v8551_v53  ;;  %v17987_v53 = vld [vmem:[#allocation9_spill] sm:$0xff]  ;;  %p11052_p3 = por %p11051_p2, %p11050_p1 }
 0x8f0   :  { %p11053_p4 = pnand %p11052_p3, %p11046_p0 }
 0x8f8   :  { %v16551_v63 = vpop.eup %11038 }
 0x8f9   :  { %v8616_v4 = vmul.f32 %v16551_v63, %v18002_v32  ;;  %v16576_v16 = vmul.f32 %v16551_v63, %v18003_v58  ;;  %v16582_v43 = vmul.f32 %v16551_v63, %v18004_v39  ;;  %v18006_v32 = vsub.f32 %v17978_v47, %v16429_v24 }
 0x8fa   :  { %v16599_v58 = vmul.f32 %v16551_v63, %v18007_v15  ;;  %v16605_v39 = vmul.f32 %v16551_v63, %v18008_v6  ;;  %v16611_v47 = vmul.f32 %v16551_v63, %v18009_v46  ;;  %v16618_v15 = vmul.f32 %v16551_v63, %v18010_v40 }
 0x8fb   :  { %v16593_v1 = vmul.f32 %v16551_v63, %v18006_v32  ;;  %v8687_v32 = vmul.f32 %v16556_v18, %v8616_v4  ;;  %v16624_v6 = vmul.f32 %v16551_v63, %v18011_v37  ;;  %v16630_v46 = vmul.f32 %v16551_v63, %v18012_v28 }
 0x8fc   :  { %v18013_v4 = vsub.f32 %v16030_v59, %v16429_v24  ;;  %v18014_v40 = vsub.f32 %v16014_v7, %v16429_v24  ;;  %v18015_v37 = vsub.f32 %v17979_v54, %v16429_v24  ;;  %v18016_v28 = vsub.f32 %v16045_v3, %v16429_v24 }
 0x8fd   :  { %v18017_v7 = vsub.f32 %v17980_v62, %v16429_v24  ;;  %v18018_v54 = vsub.f32 %v17981_v10, %v16429_v24  ;;  %v18019_v3 = vsub.f32 %v17982_v49, %v16429_v24 }
 0x8fe   :  { %v16636_v11 = vmul.f32 %v16551_v63, %v18013_v4  ;;  %v16642_v45 = vmul.f32 %v16551_v63, %v18014_v40  ;;  %v16648_v2 = vmul.f32 %v16551_v63, %v18015_v37  ;;  %v16654_v59 = vmul.f32 %v16551_v63, %v18016_v28 }
 0x8ff   :  { %v8758_v4 = vadd.f32 %v16587_v57, %v8687_v32  ;;  %v16661_v40 = vmul.f32 %v16551_v63, %v18017_v7  ;;  %v16667_v37 = vmul.f32 %v16551_v63, %v18018_v54  ;;  %v16673_v28 = vmul.f32 %v16551_v63, %v18019_v3 }
 0x900   :  { %v18020_v32 = vsub.f32 %v16065_v19, %v16429_v24  ;;  %v18021_v7 = vsub.f32 %v16074_v20, %v16429_v24  ;;  %v18022_v54 = vsub.f32 %v16062_v36, %v16429_v24  ;;  %v18023_v3 = vsub.f32 %v16071_v31, %v16429_v24 }
 0x901   :  { %v18024_v57 = vsub.f32 %v17983_v33, %v16429_v24 }
 0x902   :  { %v16679_v62 = vmul.f32 %v16551_v63, %v18020_v32  ;;  %v16685_v10 = vmul.f32 %v16551_v63, %v18021_v7  ;;  %v16691_v49 = vmul.f32 %v16551_v63, %v18022_v54  ;;  %v16697_v19 = vmul.f32 %v16551_v63, %v18023_v3 }
 0x903   :  { %v8822_v32 = vmax.f32 %v8758_v4, 0.0  ;;  %v16703_v20 = vmul.f32 %v16551_v63, %v18024_v57  ;;  %v18025_v7 = vsub.f32 %v16090_v5, %v16429_v24  ;;  %v18026_v54 = vsub.f32 %v17984_v17, %v16429_v24 }
 0x904   :  { %v18027_v4 = vsub.f32 %v17985_v25, %v16429_v24  ;;  %v18029_v57 = vsub.f32 %v17986_v50, %v16429_v24  ;;  %v18031_v3 = vsub.f32 %v17987_v53, %v16429_v24 }
 0x905   :  { %v16709_v36 = vmul.f32 %v16551_v63, %v18025_v7  ;;  %v16715_v31 = vmul.f32 %v16551_v63, %v18026_v54  ;;  %v18033_v7 = vld [vmem:[#allocation24_spill] sm:$0xff]  ;;  %8886 = vst [vmem:[#allocation5 + $0x1f8] sm:$0xff] %v8822_v32 }
 0x906   :  { %v16721_v33 = vmul.f32 %v16551_v63, %v18027_v4  ;;  %v16727_v5 = vmul.f32 %v16551_v63, %v18029_v57  ;;  %v16733_v17 = vmul.f32 %v16551_v63, %v18031_v3  ;;  %v18034_v54 = vsub.f32 %v18033_v7, %v16429_v24  ;;  %v18035_v4 = vld [vmem:[#allocation33_spill] sm:$0xff]  ;;  %v18041_v3 = vld [vmem:[#allocation36_spill] sm:$0xff] }
 0x907   :  { %v18038_v57 = vld [vmem:[#allocation37_spill] sm:$0xff] }
 0x908   :  { %18028 = vst [vmem:[#allocation18_spill] sm:$0xff] %v16721_v33  ;;  %18030 = vst [vmem:[#allocation21_spill] sm:$0xff] %v16727_v5  ;;  %v16739_v25 = vmul.f32 %v16551_v63, %v18034_v54  ;;  %v18036_v33 = vsub.f32 %v18035_v4, %v16429_v24  ;;  %v18039_v5 = vsub.f32 %v18038_v57, %v16429_v24  ;;  %v18043_v54 = vld [vmem:[#allocation19_spill] sm:$0xff] }
 0x909   :  { %18032 = vst [vmem:[#allocation28_spill] sm:$0xff] %v16733_v17  ;;  %v18042_v17 = vsub.f32 %v18041_v3, %v16429_v24  ;;  %v18044_v32 = vsub.f32 %v18043_v54, %v16429_v24 }
 0x90a   :  { %v16745_v50 = vmul.f32 %v16551_v63, %v18036_v33  ;;  %v16751_v53 = vmul.f32 %v16551_v63, %v18039_v5  ;;  %v18046_v33 = vld [vmem:[#allocation38_spill] sm:$0xff]  ;;  %v18048_v5 = vld [vmem:[#allocation39_spill] sm:$0xff] }
 0x90b   :  { %v16757_v7 = vmul.f32 %v16551_v63, %v18042_v17  ;;  %v16763_v4 = vmul.f32 %v16551_v63, %v18044_v32  ;;  %v18050_v17 = vsub.f32 %v17994_v44, %v16429_v24  ;;  %v18051_v32 = vld [vmem:[#allocation41_spill] sm:$0xff] }
 0x90c   :  { %18037 = vst [vmem:[#allocation26_spill] sm:$0xff] %v16745_v50  ;;  %18040 = vst [vmem:[#allocation34_spill] sm:$0xff] %v16751_v53  ;;  %v18047_v50 = vsub.f32 %v18046_v33, %v16429_v24  ;;  %v18049_v53 = vsub.f32 %v18048_v5, %v16429_v24 }
 0x90d   :  { %18045 = vst [vmem:[#allocation29_spill] sm:$0xff] %v16763_v4  ;;  %v16781_v54 = vmul.f32 %v16551_v63, %v18050_v17  ;;  %v18052_v4 = vsub.f32 %v18051_v32, %v16429_v24  ;;  %v18055_v17 = vsub.f32 %v17998_v27, %v16429_v24 }
 0x90e   :  { %v16769_v57 = vmul.f32 %v16551_v63, %v18047_v50  ;;  %v16775_v3 = vmul.f32 %v16551_v63, %v18049_v53  ;;  %v18053_v50 = vsub.f32 %v17996_v29, %v16429_v24  ;;  %v18054_v53 = vsub.f32 %v17997_v26, %v16429_v24 }
 0x90f   :  { %v16787_v33 = vmul.f32 %v16551_v63, %v18052_v4  ;;  %v16805_v32 = vmul.f32 %v16551_v63, %v18055_v17  ;;  %v18056_v4 = vsub.f32 %v17999_v30, %v16429_v24  ;;  %v18059_v17 = vsub.f32 %v18001_v35, %v16429_v24 }
 0x910   :  { %v16793_v5 = vmul.f32 %v16551_v63, %v18053_v50  ;;  %v16799_v44 = vmul.f32 %v16551_v63, %v18054_v53  ;;  %v18057_v50 = vsub.f32 %v18000_v38, %v16429_v24  ;;  %v18058_v53 = vsub.f32 %v16230_v51, %v16429_v24 }
 0x911   :  { %v16811_v29 = vmul.f32 %v16551_v63, %v18056_v4  ;;  %v16829_v30 = vmul.f32 %v16551_v63, %v18059_v17  ;;  %v18060_v4 = vsub.f32 %v16254_v60, %v16429_v24  ;;  %v18063_v17 = vsub.f32 %v16286_v8, %v16429_v24 }
 0x912   :  { %v16817_v26 = vmul.f32 %v16551_v63, %v18057_v50  ;;  %v16823_v27 = vmul.f32 %v16551_v63, %v18058_v53  ;;  %v18061_v50 = vsub.f32 %v16263_v52, %v16429_v24  ;;  %v18062_v53 = vsub.f32 %v16279_v42, %v16429_v24 }
 0x913   :  { %v16835_v38 = vmul.f32 %v16551_v63, %v18060_v4  ;;  %v16853_v60 = vmul.f32 %v16551_v63, %v18063_v17  ;;  %v18064_v4 = vsub.f32 %v16296_v0, %v16429_v24  ;;  %v18068_v17 = vsub.f32 %v16319_v22, %v16429_v24 }
 0x914   :  { %v16841_v51 = vmul.f32 %v16551_v63, %v18061_v50  ;;  %v16847_v35 = vmul.f32 %v16551_v63, %v18062_v53  ;;  %v18066_v50 = vsub.f32 %v16302_v34, %v16429_v24  ;;  %v18067_v53 = vsub.f32 %v16312_v12, %v16429_v24 }
 0x915   :  { %v16859_v52 = vmul.f32 %v16551_v63, %v18064_v4  ;;  %v16877_v0 = vmul.f32 %v16551_v63, %v18068_v17  ;;  %v18069_v4 = vld [vmem:[#allocation35_spill] sm:$0xff]  ;;  %v18073_v17 = vsub.f32 %v16350_v41, %v16429_v24 }
 0x916   :  { %v16865_v42 = vmul.f32 %v16551_v63, %v18066_v50  ;;  %v16871_v8 = vmul.f32 %v16551_v63, %v18067_v53  ;;  %v18071_v50 = vsub.f32 %v16334_v21, %v16429_v24  ;;  %v18072_v53 = vsub.f32 %v16344_v56, %v16429_v24 }
 0x917   :  { %18065 = vst [vmem:[#allocation8_spill] sm:$0xff] %v16859_v52  ;;  %v18070_v52 = vsub.f32 %v18069_v4, %v16429_v24  ;;  %v16901_v4 = vmul.f32 %v16551_v63, %v18073_v17  ;;  %v18079_v17 = vld [vmem:[#allocation10_spill] sm:$0xff] }
 0x918   :  { %v16889_v12 = vmul.f32 %v16551_v63, %v18071_v50  ;;  %v16895_v22 = vmul.f32 %v16551_v63, %v18072_v53  ;;  %v18077_v50 = vsub.f32 %v16367_v48, %v16429_v24  ;;  %v18078_v53 = vsub.f32 %v16375_v23, %v16429_v24 }
 0x919   :  { %v16883_v34 = vmul.f32 %v16551_v63, %v18070_v52  ;;  %18074 = vst [vmem:[#allocation30_spill] sm:$0xff] %v16901_v4  ;;  %v18075_v52 = vsub.f32 %v16360_v55, %v16429_v24  ;;  %v18080_v4 = vsub.f32 %v18079_v17, %v16429_v24 }
 0x91a   :  { %v16913_v56 = vmul.f32 %v16551_v63, %v18077_v50  ;;  %v16919_v41 = vmul.f32 %v16551_v63, %v18078_v53  ;;  %v18083_v50 = vsub.f32 %v16396_v9, %v16429_v24  ;;  %v18084_v53 = vsub.f32 %v16404_v13, %v16429_v24 }
 0x91b   :  { %v16907_v21 = vmul.f32 %v16551_v63, %v18075_v52  ;;  %v16925_v55 = vmul.f32 %v16551_v63, %v18080_v4  ;;  %v18081_v52 = vld [vmem:[#allocation11_spill] sm:$0xff]  ;;  %v18085_v4 = vsub.f32 %v16410_v14, %v16429_v24  ;;  %v16963_v13 = vmul.f32 %v16556_v18, %v16582_v43 }
 0x91c   :  { %v16937_v23 = vmul.f32 %v16551_v63, %v18083_v50  ;;  %v16943_v17 = vmul.f32 %v16551_v63, %v18084_v53  ;;  %v16959_v50 = vmul.f32 %v16556_v18, %v16576_v16  ;;  %v16967_v14 = vmul.f32 %v16556_v18, %v16593_v1 }
 0x91d   :  { %18076 = vst [vmem:[#allocation31_spill] sm:$0xff] %v16907_v21  ;;  %v18082_v21 = vsub.f32 %v18081_v52, %v16429_v24  ;;  %v16949_v52 = vmul.f32 %v16551_v63, %v18085_v4  ;;  %v16971_v53 = vmul.f32 %v16556_v18, %v16599_v58  ;;  %v16979_v16 = vmul.f32 %v16556_v18, %v16611_v47  ;;  %v18091_v4 = vld [vmem:[#allocation28_spill] sm:$0xff] }
 0x91e   :  { %v16987_v1 = vmul.f32 %v16556_v18, %v16624_v6  ;;  %v16995_v43 = vmul.f32 %v16556_v18, %v16636_v11  ;;  %v16999_v58 = vmul.f32 %v16556_v18, %v16642_v45  ;;  %v17007_v47 = vmul.f32 %v16556_v18, %v16654_v59 }
 0x91f   :  { %v16931_v48 = vmul.f32 %v16551_v63, %v18082_v21  ;;  %v18086_v21 = vsub.f32 %v16417_v61, %v16429_v24  ;;  %v16983_v61 = vmul.f32 %v16556_v18, %v16618_v15  ;;  %v16991_v24 = vmul.f32 %v16556_v18, %v16630_v46 }
 0x920   :  { %v17011_v15 = vmul.f32 %v16556_v18, %v16661_v40  ;;  %v17015_v6 = vmul.f32 %v16556_v18, %v16667_v37  ;;  %v17019_v46 = vmul.f32 %v16556_v18, %v16673_v28  ;;  %v17023_v11 = vmul.f32 %v16556_v18, %v16679_v62  ;;  %v18088_v62 = vld [vmem:[#allocation18_spill] sm:$0xff] }
 0x921   :  { %v16955_v9 = vmul.f32 %v16551_v63, %v18086_v21  ;;  %v16975_v63 = vmul.f32 %v16556_v18, %v16605_v39  ;;  %v17003_v39 = vmul.f32 %v16556_v18, %v16648_v2  ;;  %v17027_v45 = vmul.f32 %v16556_v18, %v16685_v10  ;;  %v18092_v21 = vld [vmem:[#allocation26_spill] sm:$0xff] }
 0x922   :  { %v17031_v2 = vmul.f32 %v16556_v18, %v16691_v49  ;;  %v17035_v59 = vmul.f32 %v16556_v18, %v16697_v19  ;;  %v17039_v40 = vmul.f32 %v16556_v18, %v16703_v20  ;;  %v17043_v37 = vmul.f32 %v16556_v18, %v16709_v36  ;;  %v18089_v49 = vld [vmem:[#allocation21_spill] sm:$0xff] }
 0x923   :  { %v17047_v28 = vmul.f32 %v16556_v18, %v16715_v31  ;;  %v17051_v10 = vmul.f32 %v16556_v18, %v18088_v62  ;;  %v17055_v19 = vmul.f32 %v16556_v18, %v18089_v49  ;;  %v17059_v20 = vmul.f32 %v16556_v18, %v18091_v4 }
 0x924   :  { %v17063_v36 = vmul.f32 %v16556_v18, %v16739_v25  ;;  %v17067_v31 = vmul.f32 %v16556_v18, %v18092_v21  ;;  %v17075_v49 = vmul.f32 %v16556_v18, %v16757_v7  ;;  %v17083_v25 = vmul.f32 %v16556_v18, %v16769_v57 }
 0x925   :  { %18087 = vst [vmem:[#allocation15_spill] sm:$0xff] %v17047_v28  ;;  %18090 = vst [vmem:[#allocation12_spill] sm:$0xff] %v17055_v19  ;;  %v18093_v28 = vld [vmem:[#allocation34_spill] sm:$0xff]  ;;  %v18094_v19 = vld [vmem:[#allocation29_spill] sm:$0xff]  ;;  %v17087_v21 = vmul.f32 %v16556_v18, %v16775_v3  ;;  %v17095_v7 = vmul.f32 %v16556_v18, %v16787_v33  ;;  %v17103_v57 = vmul.f32 %v16556_v18, %v16799_v44 }
 0x926   :  { %v17071_v62 = vmul.f32 %v16556_v18, %v18093_v28  ;;  %v17079_v4 = vmul.f32 %v16556_v18, %v18094_v19  ;;  %v17091_v28 = vmul.f32 %v16556_v18, %v16781_v54  ;;  %v17099_v19 = vmul.f32 %v16556_v18, %v16793_v5 }
 0x927   :  { %v17107_v3 = vmul.f32 %v16556_v18, %v16805_v32  ;;  %v17111_v54 = vmul.f32 %v16556_v18, %v16811_v29  ;;  %v17115_v33 = vmul.f32 %v16556_v18, %v16817_v26  ;;  %v17119_v5 = vmul.f32 %v16556_v18, %v16823_v27 }
 0x928   :  { %v17123_v44 = vmul.f32 %v16556_v18, %v16829_v30  ;;  %v17127_v32 = vmul.f32 %v16556_v18, %v16835_v38  ;;  %v17131_v29 = vmul.f32 %v16556_v18, %v16841_v51  ;;  %v17135_v26 = vmul.f32 %v16556_v18, %v16847_v35 }
 0x929   :  { %18095 = vst [vmem:[#allocation13_spill] sm:$0xff] %v17119_v5  ;;  %v17139_v27 = vmul.f32 %v16556_v18, %v16853_v60  ;;  %v18096_v5 = vld [vmem:[#allocation8_spill] sm:$0xff]  ;;  %v17147_v38 = vmul.f32 %v16556_v18, %v16865_v42  ;;  %v17151_v51 = vmul.f32 %v16556_v18, %v16871_v8  ;;  %v17155_v35 = vmul.f32 %v16556_v18, %v16877_v0 }
 0x92a   :  { %v17143_v30 = vmul.f32 %v16556_v18, %v18096_v5  ;;  %v17159_v60 = vmul.f32 %v16556_v18, %v16883_v34  ;;  %v17163_v5 = vmul.f32 %v16556_v18, %v16889_v12  ;;  %v17167_v42 = vmul.f32 %v16556_v18, %v16895_v22 }
 0x92b   :  { %18097 = vst [vmem:[#allocation17_spill] sm:$0xff] %v17147_v38  ;;  %18098 = vst [vmem:[#allocation23_spill] sm:$0xff] %v17151_v51  ;;  %v18099_v38 = vld [vmem:[#allocation30_spill] sm:$0xff]  ;;  %v18100_v51 = vld [vmem:[#allocation31_spill] sm:$0xff]  ;;  %v17179_v34 = vmul.f32 %v16556_v18, %v16913_v56  ;;  %v17183_v12 = vmul.f32 %v16556_v18, %v16919_v41  ;;  %v17187_v22 = vmul.f32 %v16556_v18, %v16925_v55 }
 0x92c   :  { %v17171_v8 = vmul.f32 %v16556_v18, %v18099_v38  ;;  %v17175_v0 = vmul.f32 %v16556_v18, %v18100_v51  ;;  %v17191_v38 = vmul.f32 %v16556_v18, %v16931_v48  ;;  %v17195_v51 = vmul.f32 %v16556_v18, %v16937_v23 }
 0x92d   :  { %18101 = vst [vmem:[#allocation16_spill] sm:$0xff] %v17187_v22  ;;  %v17199_v56 = vmul.f32 %v16556_v18, %v16943_v17  ;;  %v17203_v41 = vmul.f32 %v16556_v18, %v16949_v52  ;;  %v17207_v55 = vmul.f32 %v16556_v18, %v16955_v9  ;;  %v18102_v22 = vld [vmem:[#allocation14_spill] sm:$0xff] }
 0x92e   :  { %v17211_v48 = vadd.f32 %v18102_v22, %v16959_v50  ;;  %v17215_v23 = vadd.f32 %v18102_v22, %v16963_v13  ;;  %v17219_v17 = vadd.f32 %v18102_v22, %v16967_v14  ;;  %v17223_v52 = vadd.f32 %v18102_v22, %v16971_v53 }
 0x92f   :  { %v17227_v18 = vadd.f32 %v18102_v22, %v16975_v63  ;;  %v17231_v9 = vadd.f32 %v18102_v22, %v16979_v16  ;;  %v17235_v50 = vadd.f32 %v18102_v22, %v16983_v61  ;;  %v17239_v13 = vadd.f32 %v18102_v22, %v16987_v1 }
 0x930   :  { %v17243_v14 = vadd.f32 %v18102_v22, %v16991_v24  ;;  %v17247_v53 = vadd.f32 %v18102_v22, %v16995_v43  ;;  %v17251_v63 = vadd.f32 %v18102_v22, %v16999_v58  ;;  %v17255_v16 = vadd.f32 %v18102_v22, %v17003_v39 }
 0x931   :  { %v17259_v61 = vadd.f32 %v18102_v22, %v17007_v47  ;;  %v17263_v1 = vadd.f32 %v18102_v22, %v17011_v15  ;;  %v17267_v24 = vadd.f32 %v18102_v22, %v17015_v6  ;;  %v17271_v43 = vadd.f32 %v18102_v22, %v17019_v46 }
 0x932   :  { %v17275_v58 = vadd.f32 %v18102_v22, %v17023_v11  ;;  %v17279_v39 = vadd.f32 %v18102_v22, %v17027_v45  ;;  %v17283_v47 = vadd.f32 %v18102_v22, %v17031_v2  ;;  %v17287_v15 = vadd.f32 %v18102_v22, %v17035_v59  ;;  %v18104_v11 = vld [vmem:[#allocation15_spill] sm:$0xff] }
 0x933   :  { %v17291_v6 = vadd.f32 %v18102_v22, %v17039_v40  ;;  %v17295_v46 = vadd.f32 %v18102_v22, %v17043_v37  ;;  %v17299_v45 = vadd.f32 %v18102_v22, %v18104_v11  ;;  %v17303_v2 = vadd.f32 %v18102_v22, %v17051_v10 }
 0x934   :  { %18103 = vst [vmem:[#allocation32_spill] sm:$0xff] %v17283_v47  ;;  %v18105_v47 = vld [vmem:[#allocation12_spill] sm:$0xff]  ;;  %v17311_v40 = vadd.f32 %v18102_v22, %v17059_v20  ;;  %v17315_v37 = vadd.f32 %v18102_v22, %v17063_v36  ;;  %v17319_v11 = vadd.f32 %v18102_v22, %v17067_v31  ;;  %v17323_v10 = vadd.f32 %v18102_v22, %v17071_v62 }
 0x935   :  { %v17307_v59 = vadd.f32 %v18102_v22, %v18105_v47  ;;  %v17327_v47 = vadd.f32 %v18102_v22, %v17075_v49  ;;  %v17331_v20 = vadd.f32 %v18102_v22, %v17079_v4  ;;  %v17335_v36 = vadd.f32 %v18102_v22, %v17083_v25 }
 0x936   :  { %v17339_v31 = vadd.f32 %v18102_v22, %v17087_v21  ;;  %v17343_v62 = vadd.f32 %v18102_v22, %v17091_v28  ;;  %v17347_v49 = vadd.f32 %v18102_v22, %v17095_v7  ;;  %v17351_v4 = vadd.f32 %v18102_v22, %v17099_v19 }
 0x937   :  { %v17355_v25 = vadd.f32 %v18102_v22, %v17103_v57  ;;  %v17359_v21 = vadd.f32 %v18102_v22, %v17107_v3  ;;  %v17363_v28 = vadd.f32 %v18102_v22, %v17111_v54  ;;  %v17367_v7 = vadd.f32 %v18102_v22, %v17115_v33 }
 0x938   :  { %18106 = vst [vmem:[#allocation22_spill] sm:$0xff] %v17347_v49  ;;  %v18107_v49 = vld [vmem:[#allocation13_spill] sm:$0xff]  ;;  %v17375_v57 = vadd.f32 %v18102_v22, %v17123_v44  ;;  %v17379_v3 = vadd.f32 %v18102_v22, %v17127_v32  ;;  %v17383_v54 = vadd.f32 %v18102_v22, %v17131_v29  ;;  %v17387_v33 = vadd.f32 %v18102_v22, %v17135_v26 }
 0x939   :  { %v17371_v19 = vadd.f32 %v18102_v22, %v18107_v49  ;;  %v17391_v49 = vadd.f32 %v18102_v22, %v17139_v27  ;;  %v17395_v44 = vadd.f32 %v18102_v22, %v17143_v30  ;;  %v17407_v26 = vadd.f32 %v18102_v22, %v17155_v35 }
 0x93a   :  { %18108 = vst [vmem:[#allocation20_spill] sm:$0xff] %v17375_v57  ;;  %18109 = vst [vmem:[#allocation25_spill] sm:$0xff] %v17379_v3  ;;  %v18110_v57 = vld [vmem:[#allocation17_spill] sm:$0xff]  ;;  %v18111_v3 = vld [vmem:[#allocation23_spill] sm:$0xff]  ;;  %v17411_v27 = vadd.f32 %v18102_v22, %v17159_v60  ;;  %v17415_v30 = vadd.f32 %v18102_v22, %v17163_v5  ;;  %v17427_v35 = vadd.f32 %v18102_v22, %v17175_v0 }
 0x93b   :  { %v17399_v32 = vadd.f32 %v18102_v22, %v18110_v57  ;;  %v17403_v29 = vadd.f32 %v18102_v22, %v18111_v3  ;;  %v17419_v57 = vadd.f32 %v18102_v22, %v17167_v42  ;;  %v17423_v3 = vadd.f32 %v18102_v22, %v17171_v8 }
 0x93c   :  { %18112 = vst [vmem:[#allocation27_spill] sm:$0xff] %v17415_v30  ;;  %v17431_v60 = vadd.f32 %v18102_v22, %v17179_v34  ;;  %v17435_v5 = vadd.f32 %v18102_v22, %v17183_v12  ;;  %v18113_v30 = vld [vmem:[#allocation16_spill] sm:$0xff]  ;;  %v17443_v8 = vadd.f32 %v18102_v22, %v17191_v38  ;;  %v17447_v0 = vadd.f32 %v18102_v22, %v17195_v51 }
 0x93d   :  { %v17439_v42 = vadd.f32 %v18102_v22, %v18113_v30  ;;  %v17451_v34 = vadd.f32 %v18102_v22, %v17199_v56  ;;  %v17455_v12 = vadd.f32 %v18102_v22, %v17203_v41  ;;  %v17459_v30 = vadd.f32 %v18102_v22, %v17207_v55 }
 0x93e   :  { %18115 = vst [vmem:[#allocation40_spill] sm:$0xff] %v17443_v8  ;;  %18116 = vst [vmem:[#allocation42_spill] sm:$0xff] %v17447_v0  ;;  %v8760_v38 = vmax.f32 %v17215_v23, 0.0  ;;  %v8761_v8 = vmax.f32 %v17219_v17, 0.0  ;;  %v8762_v51 = vmax.f32 %v17223_v52, 0.0  ;;  %v8763_v0 = vmax.f32 %v17227_v18, 0.0 }
 0x93f   :  { %18114 = vst [vmem:[#allocation9_spill] sm:$0xff] %v17439_v42  ;;  %18117 = vst [vmem:[#allocation43_spill] sm:$0xff] %v17451_v34  ;;  %v8759_v42 = vmax.f32 %v17211_v48, 0.0  ;;  %v8764_v56 = vmax.f32 %v17231_v9, 0.0  ;;  %v8765_v34 = vmax.f32 %v17235_v50, 0.0  ;;  %v8766_v41 = vmax.f32 %v17239_v13, 0.0 }
 0x940   :  { %18118 = vst [vmem:[#allocation44_spill] sm:$0xff] %v17455_v12  ;;  %v8767_v12 = vmax.f32 %v17243_v14, 0.0  ;;  %v8768_v22 = vmax.f32 %v17247_v53, 0.0  ;;  %8824 = vst [vmem:[#allocation5 + $0x8] sm:$0xff] %v8760_v38  ;;  %v8769_v55 = vmax.f32 %v17251_v63, 0.0  ;;  %v8770_v48 = vmax.f32 %v17255_v16, 0.0 }
 0x941   :  { %8823 = vst [vmem:[#allocation5] sm:$0xff] %v8759_v42  ;;  %v8771_v23 = vmax.f32 %v17259_v61, 0.0  ;;  %v8772_v17 = vmax.f32 %v17263_v1, 0.0  ;;  %8825 = vst [vmem:[#allocation5 + $0x10] sm:$0xff] %v8761_v8  ;;  %v8773_v52 = vmax.f32 %v17267_v24, 0.0  ;;  %v8774_v18 = vmax.f32 %v17271_v43, 0.0 }
 0x942   :  { %8826 = vst [vmem:[#allocation5 + $0x18] sm:$0xff] %v8762_v51  ;;  %8827 = vst [vmem:[#allocation5 + $0x20] sm:$0xff] %v8763_v0  ;;  %v8775_v9 = vmax.f32 %v17275_v58, 0.0  ;;  %v8776_v50 = vmax.f32 %v17279_v39, 0.0  ;;  %v18119_v13 = vld [vmem:[#allocation32_spill] sm:$0xff]  ;;  %v8778_v53 = vmax.f32 %v17287_v15, 0.0 }
 0x943   :  { %8828 = vst [vmem:[#allocation5 + $0x28] sm:$0xff] %v8764_v56  ;;  %8829 = vst [vmem:[#allocation5 + $0x30] sm:$0xff] %v8765_v34  ;;  %v8777_v14 = vmax.f32 %v18119_v13, 0.0  ;;  %v8779_v63 = vmax.f32 %v17291_v6, 0.0  ;;  %v8780_v16 = vmax.f32 %v17295_v46, 0.0  ;;  %v8781_v61 = vmax.f32 %v17299_v45, 0.0 }
 0x944   :  { %8830 = vst [vmem:[#allocation5 + $0x38] sm:$0xff] %v8766_v41  ;;  %8831 = vst [vmem:[#allocation5 + $0x40] sm:$0xff] %v8767_v12  ;;  %v8782_v1 = vmax.f32 %v17303_v2, 0.0  ;;  %v8783_v24 = vmax.f32 %v17307_v59, 0.0  ;;  %v8784_v43 = vmax.f32 %v17311_v40, 0.0  ;;  %v8785_v58 = vmax.f32 %v17315_v37, 0.0 }
 0x945   :  { %8832 = vst [vmem:[#allocation5 + $0x48] sm:$0xff] %v8768_v22  ;;  %8833 = vst [vmem:[#allocation5 + $0x50] sm:$0xff] %v8769_v55  ;;  %v8786_v39 = vmax.f32 %v17319_v11, 0.0  ;;  %v8787_v15 = vmax.f32 %v17323_v10, 0.0  ;;  %v8788_v6 = vmax.f32 %v17327_v47, 0.0  ;;  %v8789_v46 = vmax.f32 %v17331_v20, 0.0 }
 0x946   :  { %8834 = vst [vmem:[#allocation5 + $0x58] sm:$0xff] %v8770_v48  ;;  %8835 = vst [vmem:[#allocation5 + $0x60] sm:$0xff] %v8771_v23  ;;  %v8790_v45 = vmax.f32 %v17335_v36, 0.0  ;;  %v8791_v2 = vmax.f32 %v17339_v31, 0.0  ;;  %v8792_v59 = vmax.f32 %v17343_v62, 0.0  ;;  %v18120_v40 = vld [vmem:[#allocation22_spill] sm:$0xff] }
 0x947   :  { %8836 = vst [vmem:[#allocation5 + $0x68] sm:$0xff] %v8772_v17  ;;  %8837 = vst [vmem:[#allocation5 + $0x70] sm:$0xff] %v8773_v52  ;;  %v8793_v37 = vmax.f32 %v18120_v40, 0.0  ;;  %v8794_v11 = vmax.f32 %v17351_v4, 0.0  ;;  %v8795_v10 = vmax.f32 %v17355_v25, 0.0  ;;  %v8796_v47 = vmax.f32 %v17359_v21, 0.0 }
 0x948   :  { %8838 = vst [vmem:[#allocation5 + $0x78] sm:$0xff] %v8774_v18  ;;  %8839 = vst [vmem:[#allocation5 + $0x80] sm:$0xff] %v8775_v9  ;;  %v8797_v20 = vmax.f32 %v17363_v28, 0.0  ;;  %v8798_v36 = vmax.f32 %v17367_v7, 0.0  ;;  %v8799_v31 = vmax.f32 %v17371_v19, 0.0  ;;  %v18121_v62 = vld [vmem:[#allocation20_spill] sm:$0xff] }
 0x949   :  { %8840 = vst [vmem:[#allocation5 + $0x88] sm:$0xff] %v8776_v50  ;;  %8841 = vst [vmem:[#allocation5 + $0x90] sm:$0xff] %v8777_v14  ;;  %v8800_v42 = vmax.f32 %v18121_v62, 0.0  ;;  %v18122_v4 = vld [vmem:[#allocation25_spill] sm:$0xff]  ;;  %v8802_v21 = vmax.f32 %v17383_v54, 0.0  ;;  %v8803_v8 = vmax.f32 %v17387_v33, 0.0 }
 0x94a   :  { %8842 = vst [vmem:[#allocation5 + $0x98] sm:$0xff] %v8778_v53  ;;  %8843 = vst [vmem:[#allocation5 + $0xa0] sm:$0xff] %v8779_v63  ;;  %v8801_v25 = vmax.f32 %v18122_v4, 0.0  ;;  %v8804_v0 = vmax.f32 %v17391_v49, 0.0  ;;  %v8805_v28 = vmax.f32 %v17395_v44, 0.0  ;;  %v8806_v7 = vmax.f32 %v17399_v32, 0.0 }
 0x94b   :  { %8844 = vst [vmem:[#allocation5 + $0xa8] sm:$0xff] %v8780_v16  ;;  %8845 = vst [vmem:[#allocation5 + $0xb0] sm:$0xff] %v8781_v61  ;;  %v8807_v19 = vmax.f32 %v17403_v29, 0.0  ;;  %v8808_v34 = vmax.f32 %v17407_v26, 0.0  ;;  %v8809_v54 = vmax.f32 %v17411_v27, 0.0  ;;  %v18123_v33 = vld [vmem:[#allocation27_spill] sm:$0xff] }
 0x94c   :  { %8846 = vst [vmem:[#allocation5 + $0xb8] sm:$0xff] %v8782_v1  ;;  %8847 = vst [vmem:[#allocation5 + $0xc0] sm:$0xff] %v8783_v24  ;;  %v8810_v49 = vmax.f32 %v18123_v33, 0.0  ;;  %v8811_v12 = vmax.f32 %v17419_v57, 0.0  ;;  %v8812_v38 = vmax.f32 %v17423_v3, 0.0  ;;  %v8813_v44 = vmax.f32 %v17427_v35, 0.0 }
 0x94d   :  { %8848 = vst [vmem:[#allocation5 + $0xc8] sm:$0xff] %v8784_v43  ;;  %8849 = vst [vmem:[#allocation5 + $0xd0] sm:$0xff] %v8785_v58  ;;  %v8814_v32 = vmax.f32 %v17431_v60, 0.0  ;;  %v8815_v29 = vmax.f32 %v17435_v5, 0.0  ;;  %v18124_v26 = vld [vmem:[#allocation9_spill] sm:$0xff]  ;;  %v18125_v57 = vld [vmem:[#allocation40_spill] sm:$0xff] }
 0x94e   :  { %8850 = vst [vmem:[#allocation5 + $0xd8] sm:$0xff] %v8786_v39  ;;  %8851 = vst [vmem:[#allocation5 + $0xe0] sm:$0xff] %v8787_v15  ;;  %v8816_v27 = vmax.f32 %v18124_v26, 0.0  ;;  %v8817_v3 = vmax.f32 %v18125_v57, 0.0  ;;  %v18126_v51 = vld [vmem:[#allocation42_spill] sm:$0xff]  ;;  %v18127_v41 = vld [vmem:[#allocation43_spill] sm:$0xff] }
 0x94f   :  { %8852 = vst [vmem:[#allocation5 + $0xe8] sm:$0xff] %v8788_v6  ;;  %8853 = vst [vmem:[#allocation5 + $0xf0] sm:$0xff] %v8789_v46  ;;  %v8818_v56 = vmax.f32 %v18126_v51, 0.0  ;;  %v8819_v22 = vmax.f32 %v18127_v41, 0.0  ;;  %v18128_v55 = vld [vmem:[#allocation44_spill] sm:$0xff]  ;;  %v8821_v35 = vmax.f32 %v17459_v30, 0.0 }
 0x950   :  { %8854 = vst [vmem:[#allocation5 + $0xf8] sm:$0xff] %v8790_v45  ;;  %8855 = vst [vmem:[#allocation5 + $0x100] sm:$0xff] %v8791_v2  ;;  %v8820_v48 = vmax.f32 %v18128_v55, 0.0 }
 0x951   :  { %8856 = vst [vmem:[#allocation5 + $0x108] sm:$0xff] %v8792_v59  ;;  %8857 = vst [vmem:[#allocation5 + $0x110] sm:$0xff] %v8793_v37 }
 0x952   :  { %8858 = vst [vmem:[#allocation5 + $0x118] sm:$0xff] %v8794_v11  ;;  %8859 = vst [vmem:[#allocation5 + $0x120] sm:$0xff] %v8795_v10 }
 0x953   :  { %8860 = vst [vmem:[#allocation5 + $0x128] sm:$0xff] %v8796_v47  ;;  %8861 = vst [vmem:[#allocation5 + $0x130] sm:$0xff] %v8797_v20 }
 0x954   :  { %8862 = vst [vmem:[#allocation5 + $0x138] sm:$0xff] %v8798_v36  ;;  %8863 = vst [vmem:[#allocation5 + $0x140] sm:$0xff] %v8799_v31 }
 0x955   :  { %8864 = vst [vmem:[#allocation5 + $0x148] sm:$0xff] %v8800_v42  ;;  %8865 = vst [vmem:[#allocation5 + $0x150] sm:$0xff] %v8801_v25 }
 0x956   :  { %8866 = vst [vmem:[#allocation5 + $0x158] sm:$0xff] %v8802_v21  ;;  %8867 = vst [vmem:[#allocation5 + $0x160] sm:$0xff] %v8803_v8 }
 0x957   :  { %8868 = vst [vmem:[#allocation5 + $0x168] sm:$0xff] %v8804_v0  ;;  %8869 = vst [vmem:[#allocation5 + $0x170] sm:$0xff] %v8805_v28 }
 0x958   :  { %8870 = vst [vmem:[#allocation5 + $0x178] sm:$0xff] %v8806_v7  ;;  %8871 = vst [vmem:[#allocation5 + $0x180] sm:$0xff] %v8807_v19 }
 0x959   :  { %8872 = vst [vmem:[#allocation5 + $0x188] sm:$0xff] %v8808_v34  ;;  %8873 = vst [vmem:[#allocation5 + $0x190] sm:$0xff] %v8809_v54 }
 0x95a   :  { %8874 = vst [vmem:[#allocation5 + $0x198] sm:$0xff] %v8810_v49  ;;  %8875 = vst [vmem:[#allocation5 + $0x1a0] sm:$0xff] %v8811_v12 }
 0x95b   :  { %8876 = vst [vmem:[#allocation5 + $0x1a8] sm:$0xff] %v8812_v38  ;;  %8877 = vst [vmem:[#allocation5 + $0x1b0] sm:$0xff] %v8813_v44 }
 0x95c   :  { %8878 = vst [vmem:[#allocation5 + $0x1b8] sm:$0xff] %v8814_v32  ;;  %8879 = vst [vmem:[#allocation5 + $0x1c0] sm:$0xff] %v8815_v29 }
 0x95d   :  { %8880 = vst [vmem:[#allocation5 + $0x1c8] sm:$0xff] %v8816_v27  ;;  %8881 = vst [vmem:[#allocation5 + $0x1d0] sm:$0xff] %v8817_v3 }
 0x95e   :  { %8882 = vst [vmem:[#allocation5 + $0x1d8] sm:$0xff] %v8818_v56  ;;  %8883 = vst [vmem:[#allocation5 + $0x1e0] sm:$0xff] %v8819_v22 }
 0x95f   :  { %8884 = vst [vmem:[#allocation5 + $0x1e8] sm:$0xff] %v8820_v48  ;;  %8885 = vst [vmem:[#allocation5 + $0x1f0] sm:$0xff] %v8821_v35 }
 0x960   :  { %11056 = shalt.err (!%p11053_p4)
}
 0x961   :  { %s11057_s15 = scalar_lea.hbm %s17549_s12, 8192 }
 0x962   :  { %p11058_p5 = scmp.ne.s32.totalorder %s17549_s12, %s11057_s15  ;;  %p11061_p6 = scmp.lt.u32.totalorder %s11057_s15, %s17549_s12 }
 0x964   :  { %p11063_p7 = pnand %p11061_p6, %p11058_p5 }
 0x966   :  { %11066 = shalt.err (!%p11063_p7)
}
 0x967   :  { %s11083_s13 = smov 128  }
 0x968   :  { %8898 = dma.vmem_to_hbm [thread:$0]  %s8893_s28, 8192, %s17549_s12, [#allocation6], %s11083_s13, %s11083_s13, %s11073_s4  }
 0x969   :  { %11067 = dma.done.wait [#allocation6], 8192  }
 0x96a   :  { %11068 = vsyncadd [#allocation6], 4294959104 }
 0x96b   :  { %8902 = vsyncpa [#allocation6], 1 }

</bundles_post_ra>
